<compile_context>
chip_gen: v6e
topology: v6e:2x2x1
jax: 0.10.0
libtpu: 0.0.40
codegen_flags: <defaults>
</compile_context>

<pallas_src>
import functools

import jax
import jax.numpy as jnp
import numpy as np
from jax.experimental import pallas as pl
from jax.experimental.pallas import tpu as pltpu


def _round_up(x, m):
    return (x + m - 1) // m * m


def _pick_batch_block(n, bytes_per_image, target_bytes=1 << 20):
    """Largest divisor of n that keeps >=2 grid steps (megacore) and <= target bytes/step."""
    best = 1
    min_steps = 2 if n >= 2 else 1
    for nb in range(1, n + 1):
        if n % nb != 0:
            continue
        if n // nb < min_steps:
            continue
        if nb * bytes_per_image <= target_bytes:
            best = nb
    return best


def _residual_block_kernel(x_ref, w1_ref, b1_ref, w2_ref, b2_ref, out_ref, q_ref,
                           *, H, W, Wp_pad, L, Nb, compute_dtype):
    n_out = H * Wp_pad                    # extended flat output rows (incl. masked wrap cols)
    base_out = L + Wp_pad + 1             # interior offset; multiple of 8 by construction
    FLAT, Cp = q_ref.shape
    shifts = [L + ky * Wp_pad + kx for ky in range(3) for kx in range(3)]  # static tap offsets

    # In-kernel validity mask: columns >= W of each extended row are wrap garbage.
    col = jax.lax.broadcasted_iota(jnp.int32, (n_out, Cp), 0) % Wp_pad
    valid = col < W

    w1 = w1_ref[...]                      # (9*Cp, Cp) compute_dtype
    w2 = w2_ref[...]
    b1 = b1_ref[...]                      # (1, Cp) f32
    b2 = b2_ref[...]

    # Zero ONLY the halo of the scratch (interior rows are fully overwritten per image).
    # Done every step -> correct even when the grid is sharded across TensorCores.
    q_ref[0:base_out, :] = jnp.zeros((base_out, Cp), compute_dtype)
    q_ref[base_out + n_out:FLAT, :] = jnp.zeros((FLAT - base_out - n_out, Cp), compute_dtype)

    for i in range(Nb):                   # Nb is small & static
        p = x_ref[i]                      # (FLAT, Cp) f32, zero-padded flat layout
        residual = p[base_out:base_out + n_out, :]

        # ---- relu + conv1: im2col slab -> single MXU matmul ----
        a = jnp.maximum(p, 0.0).astype(compute_dtype)      # relu in f32, cast only for MXU
        slab1 = jnp.concatenate([a[s:s + n_out, :] for s in shifts], axis=1)   # (n_out, 9*Cp)
        acc1 = jnp.dot(slab1, w1, preferred_element_type=jnp.float32)
        h1 = jnp.maximum(acc1 + b1, 0.0)
        h1 = jnp.where(valid, h1, 0.0)    # wrap columns land in padding slots of q: must be 0

        # scatter relu(conv1) into the zero-padded flat scratch (aligned interior store)
        q_ref[base_out:base_out + n_out, :] = h1.astype(compute_dtype)

        # ---- conv2: im2col slab from scratch -> single MXU matmul, + residual ----
        slab2 = jnp.concatenate([q_ref[s:s + n_out, :] for s in shifts], axis=1)
        acc2 = jnp.dot(slab2, w2, preferred_element_type=jnp.float32)
        y = acc2 + b2 + residual
        out_ref[i] = y.astype(out_ref.dtype)


def residual_block(x_nchw, w1, b1, w2, b2, *,
                   compute_dtype=jnp.bfloat16, batch_block=None):
    """x_nchw: (N, C, H, W); w: (C, C, 3, 3) torch OIHW; b: (C,).  Returns (N, C, H, W) f32."""
    N, C, H, W = x_nchw.shape
    Hp = H + 2
    Wp_pad = _round_up(W + 2, 8)                      # aligned row pitch
    L = (-(Wp_pad + 1)) % 8                           # leading slack -> interior offset % 8 == 0
    n_out = H * Wp_pad
    FLAT = _round_up(L + Hp * Wp_pad + 2, 8)          # +2 slack so all shifted slices fit
    Cp = max(_round_up(C, 128), 128)                  # lane-dense channel width

    # NCHW -> NHWC f32, pad spatially (conv halo + alignment) and channels, flatten spatial.
    x = jnp.transpose(x_nchw, (0, 2, 3, 1)).astype(jnp.float32)          # (N, H, W, C)
    x = jnp.pad(x, ((0, 0), (1, 1), (1, Wp_pad - W - 1), (0, Cp - C)))   # (N, Hp, Wp_pad, Cp)
    xflat = x.reshape(N, Hp * Wp_pad, Cp)
    xflat = jnp.pad(xflat, ((0, 0), (L, FLAT - L - Hp * Wp_pad), (0, 0)))  # (N, FLAT, Cp)

    # torch conv weights (Cout, Cin, 3, 3) -> im2col weight (9*Cp, Cp); padded channels are 0.
    def prep_w(w):
        wk = jnp.transpose(w, (2, 3, 1, 0)).astype(jnp.float32).reshape(9, C, C)
        wk = jnp.pad(wk, ((0, 0), (0, Cp - C), (0, Cp - C)))
        return wk.reshape(9 * Cp, Cp).astype(compute_dtype)

    w1k, w2k = prep_w(w1), prep_w(w2)
    b1k = jnp.pad(b1.astype(jnp.float32), (0, Cp - C)).reshape(1, Cp)
    b2k = jnp.pad(b2.astype(jnp.float32), (0, Cp - C)).reshape(1, Cp)

    # Batch several images per grid step, keeping >= 2 steps for megacore when possible.
    per_img_bytes = (FLAT + n_out) * Cp * 4
    Nb = batch_block or _pick_batch_block(N, per_img_bytes)
    assert N % Nb == 0
    grid = (N // Nb,)

    kernel = functools.partial(_residual_block_kernel, H=H, W=W, Wp_pad=Wp_pad, L=L,
                               Nb=Nb, compute_dtype=compute_dtype)
    out_flat = pl.pallas_call(
        kernel,
        out_shape=jax.ShapeDtypeStruct((N, n_out, Cp), jnp.float32),
        grid_spec=pltpu.PrefetchScalarGridSpec(
            num_scalar_prefetch=0,
            grid=grid,
            in_specs=[
                pl.BlockSpec((Nb, FLAT, Cp), lambda n: (n, 0, 0)),   # padded flat input (f32)
                pl.BlockSpec((9 * Cp, Cp), lambda n: (0, 0)),        # im2col W1
                pl.BlockSpec((1, Cp), lambda n: (0, 0)),             # b1
                pl.BlockSpec((9 * Cp, Cp), lambda n: (0, 0)),        # im2col W2
                pl.BlockSpec((1, Cp), lambda n: (0, 0)),             # b2
            ],
            out_specs=pl.BlockSpec((Nb, n_out, Cp), lambda n: (n, 0, 0)),
            scratch_shapes=[pltpu.VMEM((FLAT, Cp), compute_dtype)],  # padded relu(conv1) layout
        ),
        compiler_params=pltpu.CompilerParams(dimension_semantics=("parallel",)),
    )(xflat, w1k, b1k, w2k, b2k)

    # drop wrap columns / alignment columns / padded channels, back to NCHW
    out = out_flat.reshape(N, H, Wp_pad, Cp)[:, :, :W, :C]
    return jnp.transpose(out, (0, 3, 1, 2))


# ---------------- pure-JAX reference (for verification) ----------------
def _ref_conv(x, w, b):
    y = jax.lax.conv_general_dilated(
        x, w, window_strides=(1, 1), padding=((1, 1), (1, 1)),
        dimension_numbers=('NCHW', 'OIHW', 'NCHW'))
    return y + b[None, :, None, None]


def ref_residual_block(x, w1, b1, w2, b2):
    r = x
    y = jnp.maximum(x, 0.0)
    y = _ref_conv(y, w1, b1)
    y = jnp.maximum(y, 0.0)
    y = _ref_conv(y, w2, b2)
    return y + r


if __name__ == "__main__":
    C, N, H, W = 4, 2, 16, 16
    key = jax.random.PRNGKey(0)
    k1, k2, k3, k4, k5 = jax.random.split(key, 5)
    w1 = jax.random.normal(k1, (C, C, 3, 3), jnp.float32) * 0.1
    b1 = jax.random.normal(k2, (C,), jnp.float32) * 0.1
    w2 = jax.random.normal(k3, (C, C, 3, 3), jnp.float32) * 0.1
    b2 = jax.random.normal(k4, (C,), jnp.float32) * 0.1
    x = jax.random.normal(k5, (N, C, H, W), jnp.float32)

    ref = ref_residual_block(x, w1, b1, w2, b2)

    # exact-math path (f32 matmuls): tight tolerance validates the kernel logic
    out_f32 = jax.block_until_ready(
        residual_block(x, w1, b1, w2, b2, compute_dtype=jnp.float32))
    np.testing.assert_allclose(np.asarray(out_f32), np.asarray(ref), rtol=1e-4, atol=1e-4)

    # default path: bf16 MXU inputs, f32 accumulation/elementwise (bf16-appropriate tolerance)
    out_bf16 = jax.block_until_ready(residual_block(x, w1, b1, w2, b2))
    np.testing.assert_allclose(np.asarray(out_bf16), np.asarray(ref), rtol=5e-2, atol=5e-2)

    print("KERNEL_OK")
</pallas_src>

<mosaic_0001>
module attributes {stable_mosaic.version = 11 : i64} {
  func.func @_residual_block_kernel(%arg0: i32, %arg1: memref<1x448x128xf32, #tpu.memory_space<vmem>>, %arg2: memref<1152x128xf32, #tpu.memory_space<vmem>>, %arg3: memref<1x128xf32, #tpu.memory_space<vmem>>, %arg4: memref<1152x128xf32, #tpu.memory_space<vmem>>, %arg5: memref<1x128xf32, #tpu.memory_space<vmem>>, %arg6: memref<1x384x128xf32, #tpu.memory_space<vmem>>, %arg7: memref<448x128xf32, #tpu.memory_space<vmem>>) attributes {dimension_semantics = [#tpu.dimension_semantics<parallel>], iteration_bounds = array<i64: 2>, scalar_prefetch = 0 : i64, scratch_operands = 1 : i64, tpu.core_type = #tpu.core_type<tc>, window_params = [{transform_indices = @transform_0, window_bounds = array<i64: 1, 448, 128>}, {pipeline_mode = #tpu.pipeline_mode<synchronous>, transform_indices = @transform_1, window_bounds = array<i64: 1152, 128>}, {pipeline_mode = #tpu.pipeline_mode<synchronous>, transform_indices = @transform_2, window_bounds = array<i64: 1, 128>}, {pipeline_mode = #tpu.pipeline_mode<synchronous>, transform_indices = @transform_3, window_bounds = array<i64: 1152, 128>}, {pipeline_mode = #tpu.pipeline_mode<synchronous>, transform_indices = @transform_4, window_bounds = array<i64: 1, 128>}, {transform_indices = @transform_5, window_bounds = array<i64: 1, 384, 128>}]} {
    %0 = tpu.iota {dimensions = array<i32: 0>} : vector<384x128xi32>
    %c24_i32 = arith.constant 24 : i32
    %c0_i32 = arith.constant 0 : i32
    %1 = arith.cmpi eq, %c24_i32, %c0_i32 : i32
    %c1_i32 = arith.constant 1 : i32
    %2 = arith.select %1, %c1_i32, %c24_i32 : i32
    %3 = vector.broadcast %2 : i32 to vector<384x128xi32>
    %4 = arith.remsi %0, %3 : vector<384x128xi32>
    %c0_i32_0 = arith.constant 0 : i32
    %5 = vector.broadcast %c0_i32_0 : i32 to vector<384x128xi32>
    %6 = arith.cmpi ne, %4, %5 : vector<384x128xi32>
    %c0_i32_1 = arith.constant 0 : i32
    %7 = vector.broadcast %c0_i32_1 : i32 to vector<384x128xi32>
    %8 = arith.cmpi slt, %4, %7 : vector<384x128xi32>
    %c0_i32_2 = arith.constant 0 : i32
    %9 = arith.cmpi slt, %2, %c0_i32_2 : i32
    %10 = vector.broadcast %9 : i1 to vector<384x128xi1>
    %11 = vector.broadcast %10 : vector<384x128xi1> to vector<384x128xi1>
    %12 = arith.xori %8, %11 : vector<384x128xi1>
    %13 = arith.andi %12, %6 : vector<384x128xi1>
    %14 = vector.broadcast %2 : i32 to vector<384x128xi32>
    %15 = arith.addi %4, %14 : vector<384x128xi32>
    %16 = arith.select %13, %15, %4 : vector<384x128xi1>, vector<384x128xi32>
    %c16_i32 = arith.constant 16 : i32
    %17 = vector.broadcast %c16_i32 : i32 to vector<384x128xi32>
    %18 = arith.cmpi slt, %16, %17 : vector<384x128xi32>
    %c0 = arith.constant 0 : index
    %c0_3 = arith.constant 0 : index
    %19 = vector.load %arg2[%c0, %c0_3] : memref<1152x128xf32, #tpu.memory_space<vmem>>, vector<1152x128xf32>
    %c0_4 = arith.constant 0 : index
    %c0_5 = arith.constant 0 : index
    %20 = vector.load %arg4[%c0_4, %c0_5] : memref<1152x128xf32, #tpu.memory_space<vmem>>, vector<1152x128xf32>
    %c0_6 = arith.constant 0 : index
    %c0_7 = arith.constant 0 : index
    %21 = vector.load %arg3[%c0_6, %c0_7] : memref<1x128xf32, #tpu.memory_space<vmem>>, vector<1x128xf32>
    %c0_8 = arith.constant 0 : index
    %c0_9 = arith.constant 0 : index
    %22 = vector.load %arg5[%c0_8, %c0_9] : memref<1x128xf32, #tpu.memory_space<vmem>>, vector<1x128xf32>
    %cst = arith.constant 0.000000e+00 : f32
    %23 = vector.broadcast %cst : f32 to vector<32x128xf32>
    %c0_10 = arith.constant 0 : index
    %c0_11 = arith.constant 0 : index
    %24 = vector.load %arg7[%c0_10, %c0_11] : memref<448x128xf32, #tpu.memory_space<vmem>>, vector<32x128xf32>
    tpu.vector_store %arg7[%c0_10, %c0_11], %23 {strides = array<i32>} : memref<448x128xf32, #tpu.memory_space<vmem>>, vector<32x128xf32>,
    %cst_12 = arith.constant 0.000000e+00 : f32
    %25 = vector.broadcast %cst_12 : f32 to vector<32x128xf32>
    %c416 = arith.constant 416 : index
    %c0_13 = arith.constant 0 : index
    %26 = vector.load %arg7[%c416, %c0_13] : memref<448x128xf32, #tpu.memory_space<vmem>>, vector<32x128xf32>
    tpu.vector_store %arg7[%c416, %c0_13], %25 {strides = array<i32>} : memref<448x128xf32, #tpu.memory_space<vmem>>, vector<32x128xf32>,
    %c0_14 = arith.constant 0 : index
    %c0_15 = arith.constant 0 : index
    %c0_16 = arith.constant 0 : index
    %27 = vector.load %arg1[%c0_14, %c0_15, %c0_16] : memref<1x448x128xf32, #tpu.memory_space<vmem>>, vector<1x448x128xf32>
    %28 = vector.shape_cast %27 : vector<1x448x128xf32> to vector<448x128xf32>
    %29 = vector.extract_strided_slice %28 {offsets = [32, 0], sizes = [384, 128], strides = [1, 1]} : vector<448x128xf32> to vector<384x128xf32>
    %cst_17 = arith.constant 0.000000e+00 : f32
    %30 = vector.broadcast %cst_17 : f32 to vector<448x128xf32>
    %31 = arith.maximumf %28, %30 : vector<448x128xf32>
    %32 = vector.extract_strided_slice %31 {offsets = [7, 0], sizes = [384, 128], strides = [1, 1]} : vector<448x128xf32> to vector<384x128xf32>
    %33 = vector.extract_strided_slice %31 {offsets = [8, 0], sizes = [384, 128], strides = [1, 1]} : vector<448x128xf32> to vector<384x128xf32>
    %34 = vector.extract_strided_slice %31 {offsets = [9, 0], sizes = [384, 128], strides = [1, 1]} : vector<448x128xf32> to vector<384x128xf32>
    %35 = vector.extract_strided_slice %31 {offsets = [31, 0], sizes = [384, 128], strides = [1, 1]} : vector<448x128xf32> to vector<384x128xf32>
    %36 = vector.extract_strided_slice %31 {offsets = [32, 0], sizes = [384, 128], strides = [1, 1]} : vector<448x128xf32> to vector<384x128xf32>
    %37 = vector.extract_strided_slice %31 {offsets = [33, 0], sizes = [384, 128], strides = [1, 1]} : vector<448x128xf32> to vector<384x128xf32>
    %38 = vector.extract_strided_slice %31 {offsets = [55, 0], sizes = [384, 128], strides = [1, 1]} : vector<448x128xf32> to vector<384x128xf32>
    %39 = vector.extract_strided_slice %31 {offsets = [56, 0], sizes = [384, 128], strides = [1, 1]} : vector<448x128xf32> to vector<384x128xf32>
    %40 = vector.extract_strided_slice %31 {offsets = [57, 0], sizes = [384, 128], strides = [1, 1]} : vector<448x128xf32> to vector<384x128xf32>
    %41 = tpu.concatenate %32, %33, %34, %35, %36, %37, %38, %39, %40 in 1 : vector<384x128xf32>, vector<384x128xf32>, vector<384x128xf32>, vector<384x128xf32>, vector<384x128xf32>, vector<384x128xf32>, vector<384x128xf32>, vector<384x128xf32>, vector<384x128xf32> -> vector<384x1152xf32>
    %cst_18 = arith.constant dense<0.000000e+00> : vector<384x128xf32>
    %42 = tpu.matmul %41, %19, %cst_18 {dimension_numbers = #tpu.dot_dimension_numbers<[1], [0], [0], [1], [0, 0, 1, 1], [], []>} : vector<384x1152xf32>, vector<1152x128xf32>, vector<384x128xf32> -> vector<384x128xf32>
    %43 = vector.broadcast %21 : vector<1x128xf32> to vector<384x128xf32>
    %44 = arith.addf %42, %43 : vector<384x128xf32>
    %cst_19 = arith.constant 0.000000e+00 : f32
    %45 = vector.broadcast %cst_19 : f32 to vector<384x128xf32>
    %46 = arith.maximumf %44, %45 : vector<384x128xf32>
    %cst_20 = arith.constant 0.000000e+00 : f32
    %47 = vector.broadcast %cst_20 : f32 to vector<384x128xf32>
    %48 = arith.select %18, %46, %47 : vector<384x128xi1>, vector<384x128xf32>
    %c32 = arith.constant 32 : index
    %c0_21 = arith.constant 0 : index
    %49 = vector.load %arg7[%c32, %c0_21] : memref<448x128xf32, #tpu.memory_space<vmem>>, vector<384x128xf32>
    tpu.vector_store %arg7[%c32, %c0_21], %48 {strides = array<i32>} : memref<448x128xf32, #tpu.memory_space<vmem>>, vector<384x128xf32>,
    %c7 = arith.constant 7 : index
    %c0_22 = arith.constant 0 : index
    %50 = vector.load %arg7[%c7, %c0_22] : memref<448x128xf32, #tpu.memory_space<vmem>>, vector<384x128xf32>
    %c8 = arith.constant 8 : index
    %c0_23 = arith.constant 0 : index
    %51 = vector.load %arg7[%c8, %c0_23] : memref<448x128xf32, #tpu.memory_space<vmem>>, vector<384x128xf32>
    %c9 = arith.constant 9 : index
    %c0_24 = arith.constant 0 : index
    %52 = vector.load %arg7[%c9, %c0_24] : memref<448x128xf32, #tpu.memory_space<vmem>>, vector<384x128xf32>
    %c31 = arith.constant 31 : index
    %c0_25 = arith.constant 0 : index
    %53 = vector.load %arg7[%c31, %c0_25] : memref<448x128xf32, #tpu.memory_space<vmem>>, vector<384x128xf32>
    %c32_26 = arith.constant 32 : index
    %c0_27 = arith.constant 0 : index
    %54 = vector.load %arg7[%c32_26, %c0_27] : memref<448x128xf32, #tpu.memory_space<vmem>>, vector<384x128xf32>
    %c33 = arith.constant 33 : index
    %c0_28 = arith.constant 0 : index
    %55 = vector.load %arg7[%c33, %c0_28] : memref<448x128xf32, #tpu.memory_space<vmem>>, vector<384x128xf32>
    %c55 = arith.constant 55 : index
    %c0_29 = arith.constant 0 : index
    %56 = vector.load %arg7[%c55, %c0_29] : memref<448x128xf32, #tpu.memory_space<vmem>>, vector<384x128xf32>
    %c56 = arith.constant 56 : index
    %c0_30 = arith.constant 0 : index
    %57 = vector.load %arg7[%c56, %c0_30] : memref<448x128xf32, #tpu.memory_space<vmem>>, vector<384x128xf32>
    %c57 = arith.constant 57 : index
    %c0_31 = arith.constant 0 : index
    %58 = vector.load %arg7[%c57, %c0_31] : memref<448x128xf32, #tpu.memory_space<vmem>>, vector<384x128xf32>
    %59 = tpu.concatenate %50, %51, %52, %53, %54, %55, %56, %57, %58 in 1 : vector<384x128xf32>, vector<384x128xf32>, vector<384x128xf32>, vector<384x128xf32>, vector<384x128xf32>, vector<384x128xf32>, vector<384x128xf32>, vector<384x128xf32>, vector<384x128xf32> -> vector<384x1152xf32>
    %cst_32 = arith.constant dense<0.000000e+00> : vector<384x128xf32>
    %60 = tpu.matmul %59, %20, %cst_32 {dimension_numbers = #tpu.dot_dimension_numbers<[1], [0], [0], [1], [0, 0, 1, 1], [], []>} : vector<384x1152xf32>, vector<1152x128xf32>, vector<384x128xf32> -> vector<384x128xf32>
    %61 = vector.broadcast %22 : vector<1x128xf32> to vector<384x128xf32>
    %62 = arith.addf %60, %61 : vector<384x128xf32>
    %63 = arith.addf %62, %29 : vector<384x128xf32>
    %c0_33 = arith.constant 0 : index
    %c0_34 = arith.constant 0 : index
    %c0_35 = arith.constant 0 : index
    %64 = vector.load %arg6[%c0_33, %c0_34, %c0_35] : memref<1x384x128xf32, #tpu.memory_space<vmem>>, vector<1x384x128xf32>
    %65 = vector.shape_cast %64 : vector<1x384x128xf32> to vector<384x128xf32>
    %66 = vector.shape_cast %63 : vector<384x128xf32> to vector<1x384x128xf32>
    tpu.vector_store %arg6[%c0_33, %c0_34, %c0_35], %66 {strides = array<i32>} : memref<1x384x128xf32, #tpu.memory_space<vmem>>, vector<1x384x128xf32>,
    return
  }
  func.func @transform_0(%arg0: i32) -> (i32, i32, i32) {
    %c0_i32 = arith.constant 0 : i32
    %c0_i32_0 = arith.constant 0 : i32
    %c0_i32_1 = arith.constant 0 : i32
    return %arg0, %c0_i32, %c0_i32_0 : i32, i32, i32
  }
  func.func @transform_1(%arg0: i32) -> (i32, i32) {
    %c0_i32 = arith.constant 0 : i32
    %c0_i32_0 = arith.constant 0 : i32
    %c0_i32_1 = arith.constant 0 : i32
    return %c0_i32, %c0_i32_0 : i32, i32
  }
  func.func @transform_2(%arg0: i32) -> (i32, i32) {
    %c0_i32 = arith.constant 0 : i32
    %c0_i32_0 = arith.constant 0 : i32
    %c0_i32_1 = arith.constant 0 : i32
    return %c0_i32, %c0_i32_0 : i32, i32
  }
  func.func @transform_3(%arg0: i32) -> (i32, i32) {
    %c0_i32 = arith.constant 0 : i32
    %c0_i32_0 = arith.constant 0 : i32
    %c0_i32_1 = arith.constant 0 : i32
    return %c0_i32, %c0_i32_0 : i32, i32
  }
  func.func @transform_4(%arg0: i32) -> (i32, i32) {
    %c0_i32 = arith.constant 0 : i32
    %c0_i32_0 = arith.constant 0 : i32
    %c0_i32_1 = arith.constant 0 : i32
    return %c0_i32, %c0_i32_0 : i32, i32
  }
  func.func @transform_5(%arg0: i32) -> (i32, i32, i32) {
    %c0_i32 = arith.constant 0 : i32
    %c0_i32_0 = arith.constant 0 : i32
    %c0_i32_1 = arith.constant 0 : i32
    return %arg0, %c0_i32, %c0_i32_0 : i32, i32, i32
  }
}

</mosaic_0001>

<bundles_post_ra>
// kernel: tpu_custom_call.1
= control target key start
LH: loop header
LB: loop body
LE: loop exit
PB: predicated region body
PF: predicated region fallthrough
CT: control target
= control target key end

     0   :  { %10 = vsyncpa [#allocation4], 0  ;;  %s11993_s0 = inlined_call_operand.hbm [shape: f32[2,448,128], index: 0, kind: input, shape index: {}]   ;;  %s11994_s1 = inlined_call_operand.hbm [shape: f32[1152,128], index: 1, kind: input, shape index: {}]   ;;  %s11995_s2 = inlined_call_operand.vmem [shape: f32[1,128], index: 2, kind: input, shape index: {}]   ;;  %s11996_s3 = inlined_call_operand.hbm [shape: f32[1152,128], index: 3, kind: input, shape index: {}]   ;;  %s11997_s4 = inlined_call_operand.vmem [shape: f32[1,128], index: 4, kind: input, shape index: {}]   ;;  %s11998_s5 = inlined_call_operand.hbm [shape: f32[2,384,128], index: 5, kind: output, shape index: {}]  }
   0x1   :  { %12 = vsyncpa [#allocation4 + $0x1], 0 }
   0x2   :  { %13 = vsyncpa [#allocation7], 0 }
   0x3   :  { %14 = vsyncpa [#allocation5], 0 }
   0x4   :  { %16 = vsyncpa [#allocation5 + $0x1], 0  ;;  %s6796_s18 = smov 0   ;;  %s6798_s19 = smov 0  }
   0x5   :  { %s6800_s20 = smov 0   ;;  %s6802_s21 = smov 0  }
   0x6 LB: > { %s6817_s22 = sadd.s32 4294967295, %s6755_s21   ;;  %s5899_s23 = sadd.s32 4294967294, %s6755_s21   ;;  %s6755_s21 = sphi %s6802_s21, %s13309_s21   ;;  %s6751_s20 = sphi %s6800_s20, %s13308_s20   ;;  %s6747_s19 = sphi %s6798_s19, %s13307_s19   ;;  %s6743_s18 = sphi %s6796_s18, %s13306_s18  }
   0x7   : > { %p42_p0 = scmp.ne.s32.totalorder %s6747_s19, %s6743_s18  ;;  %p12000_p1 = scmp.eq.s32.totalorder %s6817_s22, 0 }
   0x8   : > { %p150_p2 = scmp.eq.s32.totalorder %s6817_s22, 1  ;;  %p156_p3 = scmp.eq.s32.totalorder %s5899_s23, 1 }
   0x9   : > { %p6826_p4 = por %p12000_p1, %p42_p0  ;;  %p5900_p5 = scmp.ge.s32.totalorder %s6755_s21, 1 }
   0xa   : > { %p6831_p6 = por %p156_p3, %p42_p0  ;;  %p163_p7 = scmp.lt.s32.totalorder %s6755_s21, 3 }
   0xb   : > { %s12330_s24 = scalar_select %p6826_p4, 1, 0 }
   0xc   : > { %s12331_s25 = scalar_select %p6831_p6, 1, 0 }
   0xd   : > { %p6836_p8 = pnand %p5900_p5, %p163_p7  ;;  %s6757_s27 = smov [#allocation6]  }
   0xe   : > { %s175_s28 = sshll.u32 %s6757_s27, 4  ;;  %s6758_s30 = smov [#allocation8]   ;;  %s176_s28 = int_to_ptr.vmem [resolvable:$true] %s175_s28 }
   0xf   : > { %s12332_s26 = scalar_select %p6836_p8, 1, 0 }
  0x10   : > { %p6362_p9 = pneg %p6836_p8  ;;  %s191_s6 = sshll.u32 %s6758_s30, 4  ;;  %s192_s6 = int_to_ptr.vmem [resolvable:$true] %s191_s6 }
  0x11   : > { %s6618_s7 = scalar_lea.vmem %s176_s28, 18432  ;;  %p6626_p5 = scmp.lt.s32.totalorder %s176_s28, %s176_s28 }
  0x12   : > { %p6845_p11 = pnand %p6362_p9, %p12000_p1  ;;  %p6619_p13 = scmp.ne.s32.totalorder %s176_s28, %s6618_s7 }
  0x13   : > { %p6627_p7 = scmp.lt.s32.totalorder %s6618_s7, %s6618_s7 }
  0x14   : > { %p6609_p12 = pneg %p6845_p11 }
  0x15   : > { %p6628_p10 = por %p6627_p7, %p6626_p5 }
  0x16   : > { %p6621_p0 = pnand %p6619_p13, %p6609_p12 }
  0x18   : > { %p6622_p3 = pneg %p6621_p0 }
  0x1a   : > { %p6629_p9 = pnand %p6628_p10, %p6622_p3 }
  0x1c   : > { %6632 = shalt.err (!%p6629_p9)
}
  0x1d   : > { %s11999_s8 = smov 128   ;;  %s6760_s9 = smov 8  }
  0x1e   : > { %6365 = dma.hbm_to_vmem [thread:$0]  (!%p6845_p11), %s11994_s1, 18432, %s176_s28, [#allocation7], %s11999_s8, %s11999_s8, %s6760_s9  }
  0x1f   : > { %s6644_s12 = scalar_lea.vmem %s192_s6, 18432  ;;  %p6652_p10 = scmp.lt.s32.totalorder %s192_s6, %s192_s6 }
  0x20   : > { %p6645_p13 = scmp.ne.s32.totalorder %s192_s6, %s6644_s12  ;;  %p6653_p3 = scmp.lt.s32.totalorder %s6644_s12, %s6644_s12 }
  0x22   : > { %p6647_p0 = pnand %p6645_p13, %p6609_p12  ;;  %p6654_p7 = por %p6653_p3, %p6652_p10 }
  0x24   : > { %p6648_p5 = pneg %p6647_p0 }
  0x26   : > { %p6655_p9 = pnand %p6654_p7, %p6648_p5 }
  0x28   : > { %6658 = shalt.err (!%p6655_p9)
}
  0x29   : > { %6368 = dma.hbm_to_vmem [thread:$0]  (!%p6845_p11), %s11996_s3, 18432, %s192_s6, [#allocation7], %s11999_s8, %s11999_s8, %s6760_s9  }
  0x2a   : > { %s6874_s15 = sadd.s32 1, %s6755_s21   ;;  %s29_s16 = sadd.s32 1, %s6751_s20 }
  0x2b   : > { %s26_s17 = ssub.s32 %s6755_s21, %s6874_s15  ;;  %p36_p12 = scmp.ne.s32.totalorder %s6751_s20, %s6747_s19 }
  0x2c   : > { %p27_p13 = scmp.eq.s32.totalorder %s26_s17, 0  ;;  %p37_p0 = scmp.eq.s32.totalorder %s6755_s21, 0 }
  0x2d   : > { %p6884_p5 = por %p150_p2, %p36_p12  ;;  %p6379_p10 = scmp.lt.s32.totalorder %s6755_s21, 2 }
  0x2e   : > { %s6890_s27 = scalar_select %p27_p13, %s6751_s20, %s29_s16  }
  0x2f   : > { %s12334_s23 = scalar_select %p6884_p5, 1, 0 }
  0x30   : > { %p38_p3 = por %p37_p0, %p36_p12  ;;  %s208_s28 = sand.u32 1, %s6751_s20  }
  0x31   : > { %s6249_s29 = smul.u32 448, %s208_s28  ;;  %s6905_s14 = scalar_lea.sflag [#allocation4], %s208_s28 }
  0x32   : > { %s6250_s30 = smul.u32 7168, %s6755_s21  ;;  %p6894_p11 = pnand %p6379_p10, %p38_p3 }
  0x33   : > { %s212_s12 = scalar_lea.vmem [#allocation3], %s6249_s29 }
  0x34   : > { %s6901_s11 = scalar_lea.hbm %s11993_s0, %s6250_s30  ;;  %s219_s13 = sshll.u32 %s212_s12, 4  ;;  %s6903_s13 = int_to_ptr.vmem [resolvable:$true] %s219_s13 }
  0x35   : > { %s6659_s16 = scalar_lea.hbm %s6901_s11, 7168  ;;  %p6661_p7 = pneg %p6894_p11 }
  0x36   : > { %p6660_p2 = scmp.ne.s32.totalorder %s6901_s11, %s6659_s16  ;;  %s6664_s30 = scalar_lea.hbm %s11993_s0, 14336 }
  0x37   : > { %p6665_p13 = scmp.lt.s32.totalorder %s6901_s11, %s11993_s0  ;;  %p6666_p0 = scmp.lt.s32.totalorder %s6664_s30, %s6659_s16 }
  0x38   : > { %p6662_p9 = pnand %p6661_p7, %p6660_p2 }
  0x39   : > { %p6667_p10 = por %p6666_p0, %p6665_p13 }
  0x3a   : > { %p6663_p12 = pneg %p6662_p9 }
  0x3c   : > { %p6668_p3 = pnand %p6667_p10, %p6663_p12 }
  0x3e   : > { %6671 = shalt.err (!%p6668_p3)
}
  0x3f   : > { %s6672_s28 = scalar_lea.vmem %s6903_s13, 7168  ;;  %s6761_s29 = smov [#allocation3]  }
  0x40   : > { %p6673_p1 = scmp.ne.s32.totalorder %s6903_s13, %s6672_s28  ;;  %s6677_s12 = sshll.u32 %s6761_s29, 4  ;;  %s6678_s12 = int_to_ptr.vmem [resolvable:$false] %s6677_s12 }
  0x41   : > { %s6679_s17 = scalar_lea.vmem %s6678_s12, 14336  ;;  %p6680_p9 = scmp.lt.s32.totalorder %s6903_s13, %s6678_s12 }
  0x42   : > { %p6675_p6 = pnand %p6673_p1, %p6661_p7  ;;  %p6681_p5 = scmp.lt.s32.totalorder %s6679_s17, %s6672_s28 }
  0x44   : > { %p6676_p2 = pneg %p6675_p6  ;;  %p6682_p4 = por %p6681_p5, %p6680_p9 }
  0x46   : > { %p6683_p8 = pnand %p6682_p4, %p6676_p2 }
  0x48   : > { %6686 = shalt.err (!%p6683_p8)
}
  0x49   : > { %s12336_s8 = smov 128   ;;  %p12337_p1 = scmp.ne.s32.totalorder %s12332_s26, 0 }
  0x4a   : > { %6372 = dma.hbm_to_vmem [thread:$0]  (!%p6894_p11), %s6901_s11, 7168, %s6903_s13, %s6905_s14, %s12336_s8, %s12336_s8, %s6760_s9  }
  0x4b   : > { %231 = sbr.rel (%p12337_p1) target bundleno = 1461 (0x5b5), region = 40 }
  0x50   : > { %s6932_s16 = sand.u32 1, %s6747_s19   ;;  %p12338_p4 = scmp.ne.s32.totalorder %s12330_s24, 0 }
  0x51   : > { %s6251_s7 = smul.u32 448, %s6932_s16  ;;  %s234_s30 = scalar_lea.sflag [#allocation4], %s6932_s16 }
  0x53   : > { %s6936_s10 = scalar_lea.vmem [#allocation3], %s6251_s7 }
  0x54   : > { %6730 = dma.done.wait (%p12338_p4), %s234_s30, 7168  }
  0x55   : > { %6732 = vsyncadd (%p12338_p4), %s234_s30, 4294960128  ;;  %p12339_p6 = scmp.eq.s32.totalorder %s6817_s22, 0 }
  0x57   : > { %6734 = dma.done.wait (%p12339_p6), [#allocation7], 36864   ;;  %p12340_p8 = pmov %p12339_p6 }
  0x58   : > { %v6762_v0 = vmov 0.0   ;;  %v1152_v1 = vld [vmem:[#allocation6 + $0x78] sm:$0xff]  ;;  %v1151_v2 = vld [vmem:[#allocation6 + $0x70] sm:$0xff]  ;;  %v1150_v5 = vld [vmem:[#allocation6 + $0x68] sm:$0xff]  ;;  %vm1595_vm0 = vcmask 1046528   ;;  %vm1692_vm1 = vcmask 1045504  }
  0x59   : > { %6736 = vsyncadd (%p12340_p8), [#allocation7], 4294930432  ;;  %2335 = vmatprep.subr.mxu0 %v6762_v0  ;;  %1427 = vst [vmem:[#allocation2] sm:$0xff] %v6762_v0  ;;  %2640 = vmatprep.subr.mxu1 %v6762_v0  ;;  %v1184_v3 = vld [vmem:[#allocation6 + $0x178] sm:$0xff]  ;;  %v1183_v4 = vld [vmem:[#allocation6 + $0x170] sm:$0xff]  ;;  %vm1827_vm2 = vcmask 1040384  }
  0x5a   : > { %1428 = vst [vmem:[#allocation2 + $0x8] sm:$0xff] %v6762_v0  ;;  %1429 = vst [vmem:[#allocation2 + $0x10] sm:$0xff] %v6762_v0  ;;  %2336 = vmatpush1.msra.mxu0 %v1152_v1  ;;  %2641 = vmatpush1.msra.mxu1 %v1184_v3  ;;  %v1182_v6 = vld [vmem:[#allocation6 + $0x168] sm:$0xff]  ;;  %v1149_v7 = vld [vmem:[#allocation6 + $0x60] sm:$0xff]  ;;  %s6252_s29 = smul.u32 384, %s6932_s16  ;;  %p13303_p11 = scmp.ne.s32.totalorder %s12334_s23, 0 }
  0x5b   : > { %1430 = vst [vmem:[#allocation2 + $0x18] sm:$0xff] %v6762_v0  ;;  %1431 = vst [vmem:[#allocation2 + $0x1a0] sm:$0xff] %v6762_v0  ;;  %2337 = vmatprep.subr.mxu0 %v6762_v0  ;;  %2642 = vmatprep.subr.mxu1 %v6762_v0  ;;  %v1181_v8 = vld [vmem:[#allocation6 + $0x160] sm:$0xff]  ;;  %v1148_v9 = vld [vmem:[#allocation6 + $0x58] sm:$0xff]  ;;  %s6349_s17 = smul.u32 6144, %s6817_s22  ;;  %s5794_s22 = scalar_lea.sflag [#allocation5], %s6932_s16 }
  0x5c   : > { %1432 = vst [vmem:[#allocation2 + $0x1a8] sm:$0xff] %v6762_v0  ;;  %1433 = vst [vmem:[#allocation2 + $0x1b0] sm:$0xff] %v6762_v0  ;;  %2338 = vmatpush1.msra.mxu0 %v1151_v2  ;;  %2643 = vmatpush1.msra.mxu1 %v1183_v4  ;;  %v1180_v10 = vld [vmem:[#allocation6 + $0x158] sm:$0xff]  ;;  %v1147_v11 = vld [vmem:[#allocation6 + $0x50] sm:$0xff]  ;;  %s11796_s12 = scalar_lea.vmem [#allocation9], %s6252_s29  ;;  %s6763_s9 = smov [#allocation9]  }
  0x5d   : > { %1434 = vst [vmem:[#allocation2 + $0x1b8] sm:$0xff] %v6762_v0  ;;  %2339 = vmatprep.subr.mxu0 %v6762_v0  ;;  %2644 = vmatprep.subr.mxu1 %v6762_v0  ;;  %v1179_v12 = vld [vmem:[#allocation6 + $0x150] sm:$0xff]  ;;  %v1146_v13 = vld [vmem:[#allocation6 + $0x48] sm:$0xff]  ;;  %v1145_v15 = vld [vmem:[#allocation6 + $0x40] sm:$0xff]  ;;  %s5807_s8 = sshll.u32 %s11796_s12, 4  ;;  %s11945_s24 = scalar_lea.hbm %s11998_s5, %s6349_s17  ;;  %s11947_s8 = int_to_ptr.vmem [resolvable:$true] %s5807_s8 }
  0x5e   : > { %2340 = vmatpush1.msra.mxu0 %v1150_v5  ;;  %2645 = vmatpush1.msra.mxu1 %v1182_v6  ;;  %v1178_v14 = vld [vmem:[#allocation6 + $0x148] sm:$0xff]  ;;  %v1177_v16 = vld [vmem:[#allocation6 + $0x140] sm:$0xff]  ;;  %v1144_v17 = vld [vmem:[#allocation6 + $0x38] sm:$0xff]  ;;  %s6687_s26 = scalar_lea.vmem %s11947_s8, 6144  ;;  %s6691_s6 = sshll.u32 %s6763_s9, 4  ;;  %s6692_s6 = int_to_ptr.vmem [resolvable:$false] %s6691_s6 }
  0x5f   : > { %2341 = vmatprep.subr.mxu0 %v6762_v0  ;;  %2646 = vmatprep.subr.mxu1 %v6762_v0  ;;  %v1176_v18 = vld [vmem:[#allocation6 + $0x138] sm:$0xff]  ;;  %v1143_v19 = vld [vmem:[#allocation6 + $0x30] sm:$0xff]  ;;  %v1142_v21 = vld [vmem:[#allocation6 + $0x28] sm:$0xff]  ;;  %p6688_p5 = scmp.ne.s32.totalorder %s11947_s8, %s6687_s26  ;;  %s6693_s11 = scalar_lea.vmem %s6692_s6, 12288 }
  0x60   : > { %2342 = vmatpush1.msra.mxu0 %v1149_v7  ;;  %2647 = vmatpush1.msra.mxu1 %v1181_v8  ;;  %v1175_v20 = vld [vmem:[#allocation6 + $0x130] sm:$0xff]  ;;  %v1174_v22 = vld [vmem:[#allocation6 + $0x128] sm:$0xff]  ;;  %v1141_v23 = vld [vmem:[#allocation6 + $0x20] sm:$0xff]  ;;  %p6694_p13 = scmp.lt.s32.totalorder %s11947_s8, %s6692_s6  ;;  %p6695_p0 = scmp.lt.s32.totalorder %s6693_s11, %s6687_s26 }
  0x61   : > { %2343 = vmatprep.subr.mxu0 %v6762_v0  ;;  %2648 = vmatprep.subr.mxu1 %v6762_v0  ;;  %v1173_v24 = vld [vmem:[#allocation6 + $0x120] sm:$0xff]  ;;  %v1140_v25 = vld [vmem:[#allocation6 + $0x18] sm:$0xff]  ;;  %v1139_v27 = vld [vmem:[#allocation6 + $0x10] sm:$0xff]  ;;  %p6689_p7 = pnand %p6688_p5, %p13303_p11 }
  0x62   : > { %2344 = vmatpush1.msra.mxu0 %v1148_v9  ;;  %2649 = vmatpush1.msra.mxu1 %v1180_v10  ;;  %v1172_v26 = vld [vmem:[#allocation6 + $0x118] sm:$0xff]  ;;  %v1171_v28 = vld [vmem:[#allocation6 + $0x110] sm:$0xff]  ;;  %v1138_v29 = vld [vmem:[#allocation6 + $0x8] sm:$0xff]  ;;  %p6696_p10 = por %p6695_p0, %p6694_p13 }
  0x63   : > { %2345 = vmatprep.subr.mxu0 %v6762_v0  ;;  %2650 = vmatprep.subr.mxu1 %v6762_v0  ;;  %v1170_v30 = vld [vmem:[#allocation6 + $0x108] sm:$0xff]  ;;  %v1137_v31 = vld [vmem:[#allocation6] sm:$0xff]  ;;  %v1168_v33 = vld [vmem:[#allocation6 + $0xf8] sm:$0xff]  ;;  %p6690_p12 = pneg %p6689_p7 }
  0x64   : > { %2346 = vmatpush1.msra.mxu0 %v1147_v11  ;;  %2651 = vmatpush1.msra.mxu1 %v1179_v12  ;;  %v1169_v32 = vld [vmem:[#allocation6 + $0x100] sm:$0xff]  ;;  %v1200_v34 = vld [vmem:[#allocation6 + $0x1f8] sm:$0xff]  ;;  %v1167_v35 = vld [vmem:[#allocation6 + $0xf0] sm:$0xff] }
  0x65   : > { %2347 = vmatprep.subr.mxu0 %v6762_v0  ;;  %2652 = vmatprep.subr.mxu1 %v6762_v0  ;;  %v1199_v36 = vld [vmem:[#allocation6 + $0x1f0] sm:$0xff]  ;;  %v1166_v37 = vld [vmem:[#allocation6 + $0xe8] sm:$0xff]  ;;  %v1165_v39 = vld [vmem:[#allocation6 + $0xe0] sm:$0xff]  ;;  %p6697_p3 = pnand %p6696_p10, %p6690_p12 }
  0x66   : > { %2348 = vmatpush1.msra.mxu0 %v1146_v13  ;;  %2653 = vmatpush1.msra.mxu1 %v1178_v14  ;;  %v1198_v38 = vld [vmem:[#allocation6 + $0x1e8] sm:$0xff]  ;;  %v1197_v40 = vld [vmem:[#allocation6 + $0x1e0] sm:$0xff]  ;;  %v1164_v41 = vld [vmem:[#allocation6 + $0xd8] sm:$0xff] }
  0x67   : > { %2349 = vmatprep.subr.mxu0 %v6762_v0  ;;  %2654 = vmatprep.subr.mxu1 %v6762_v0  ;;  %v1196_v42 = vld [vmem:[#allocation6 + $0x1d8] sm:$0xff]  ;;  %v1163_v43 = vld [vmem:[#allocation6 + $0xd0] sm:$0xff]  ;;  %v1436_v45 = vld [vmem:[%s6936_s10 + $0x8] sm:$0xff] }
  0x68   : > { %2350 = vmatpush1.msra.mxu0 %v1145_v15  ;;  %2655 = vmatpush1.msra.mxu1 %v1177_v16  ;;  %v1195_v44 = vld [vmem:[#allocation6 + $0x1d0] sm:$0xff]  ;;  %v1162_v47 = vld [vmem:[#allocation6 + $0xc8] sm:$0xff]  ;;  %v7000_v49 = vmax.f32 %v1436_v45, 0.0  ;;  %v1161_v51 = vld [vmem:[#allocation6 + $0xc0] sm:$0xff] }
  0x69   : > { %2351 = vmatprep.subr.mxu0 %v6762_v0  ;;  %2656 = vmatprep.subr.mxu1 %v6762_v0  ;;  %v1437_v46 = vld [vmem:[%s6936_s10 + $0x10] sm:$0xff]  ;;  %v1194_v48 = vld [vmem:[#allocation6 + $0x1c8] sm:$0xff]  ;;  %v1193_v52 = vld [vmem:[#allocation6 + $0x1c0] sm:$0xff] }
  0x6a   : > { %2352 = vmatpush1.msra.mxu0 %v1144_v17  ;;  %2657 = vmatpush1.msra.mxu1 %v1176_v18  ;;  %v7002_v50 = vmax.f32 %v1437_v46, 0.0  ;;  %v1438_v53 = vld [vmem:[%s6936_s10 + $0x18] sm:$0xff]  ;;  %v1596_v56 = vrot.slane %v7000_v49, 1  ;;  %v1159_v58 = vld [vmem:[#allocation6 + $0xb0] sm:$0xff]  ;;  %v1158_v61 = vld [vmem:[#allocation6 + $0xa8] sm:$0xff]  ;;  %v1693_v3 = vrot.slane %v7000_v49, 2 }
  0x6b   : > { %2353 = vmatprep.subr.mxu0 %v6762_v0  ;;  %2658 = vmatprep.subr.mxu1 %v6762_v0  ;;  %v1160_v54 = vld [vmem:[#allocation6 + $0xb8] sm:$0xff]  ;;  %v1191_v59 = vld [vmem:[#allocation6 + $0x1b0] sm:$0xff]  ;;  %v7013_v60 = vmax.f32 %v1438_v53, 0.0  ;;  %v1190_v62 = vld [vmem:[#allocation6 + $0x1a8] sm:$0xff] }
  0x6c   : > { %2354 = vmatpush1.msra.mxu0 %v1143_v19  ;;  %2659 = vmatpush1.msra.mxu1 %v1175_v20  ;;  %v1192_v55 = vld [vmem:[#allocation6 + $0x1b8] sm:$0xff]  ;;  %v1597_v57 = vrot.slane %v7002_v50, 1  ;;  %v1435_v63 = vld [vmem:[%s6936_s10] sm:$0xff]  ;;  %v1694_v4 = vrot.slane %v7002_v50, 2  ;;  %v1440_v10 = vld [vmem:[%s6936_s10 + $0x28] sm:$0xff]  ;;  %v1831_v13 = vrot.slane %v1596_v56, 7 }
  0x6d   : > { %2355 = vmatprep.subr.mxu0 %v6762_v0  ;;  %2660 = vmatprep.subr.mxu1 %v6762_v0  ;;  %v1439_v1 = vld [vmem:[%s6936_s10 + $0x20] sm:$0xff]  ;;  %v1599_v7 = vrot.slane %v7013_v60, 1  ;;  %v1491_v8 = vmax.f32 %v1435_v63, 0.0  ;;  %v1156_v11 = vld [vmem:[#allocation6 + $0x98] sm:$0xff]  ;;  %v1696_v16 = vrot.slane %v7013_v60, 2  ;;  %v1155_v18 = vld [vmem:[#allocation6 + $0x90] sm:$0xff] }
  0x6e   : > { %2356 = vmatpush1.msra.mxu0 %v1142_v21  ;;  %2661 = vmatpush1.msra.mxu1 %v1174_v22  ;;  %v7020_v2 = vsel %vm1595_vm0, %v1596_v56, %v1597_v57  ;;  %v1157_v5 = vld [vmem:[#allocation6 + $0xa0] sm:$0xff]  ;;  %v7027_v9 = vmax.f32 %v1439_v1, 0.0  ;;  %v1188_v12 = vld [vmem:[#allocation6 + $0x198] sm:$0xff]  ;;  %v7034_v15 = vsel %vm1692_vm1, %v1693_v3, %v1694_v4  ;;  %v1187_v19 = vld [vmem:[#allocation6 + $0x190] sm:$0xff]  ;;  %v7043_v21 = vmax.f32 %v1440_v10, 0.0 }
  0x6f   : > { %2357 = vmatprep.subr.mxu0 %v6762_v0  ;;  %2662 = vmatprep.subr.mxu1 %v6762_v0  ;;  %v1189_v6 = vld [vmem:[#allocation6 + $0x1a0] sm:$0xff]  ;;  %v1832_v14 = vrot.slane %v7020_v2, 7  ;;  %v1600_v20 = vsel %vm1595_vm0, %v1597_v57, %v1599_v7  ;;  %v1828_v22 = vrot.slane %v1491_v8, 7 }
  0x70   : > { %2358 = vmatpush1.msra.mxu0 %v1141_v23  ;;  %2663 = vmatpush1.msra.mxu1 %v1173_v24  ;;  %v7038_v17 = vrot.slane %v7027_v9, 1  ;;  %v1829_v23 = vrot.slane %v7000_v49, 7  ;;  %v1837_v24 = vrot.slane %v7013_v60, 7 }
  0x71   : > { %2359 = vmatprep.subr.mxu0 %v6762_v0  ;;  %2664 = vmatprep.subr.mxu1 %v6762_v0 }
  0x72   : > { %2360 = vmatpush1.msra.mxu0 %v1140_v25  ;;  %2665 = vmatpush1.msra.mxu1 %v1172_v26  ;;  %v1441_v25 = vld [vmem:[%s6936_s10 + $0x30] sm:$0xff]  ;;  %v1154_v26 = vld [vmem:[#allocation6 + $0x88] sm:$0xff] }
  0x73   : > { %2361 = vmatprep.subr.mxu0 %v6762_v0  ;;  %2666 = vmatprep.subr.mxu1 %v6762_v0 }
  0x74   : > { %2362 = vmatpush1.msra.mxu0 %v1139_v27  ;;  %2667 = vmatpush1.msra.mxu1 %v1171_v28  ;;  %v1833_v27 = vsel %vm1827_vm2, %v1831_v13, %v1832_v14  ;;  %v1838_v28 = vrot.slane %v7027_v9, 7 }
  0x75   : > { %2363 = vmatprep.subr.mxu0 %v6762_v0  ;;  %2668 = vmatprep.subr.mxu1 %v6762_v0 }
  0x76   : > { %2364 = vmatpush1.msra.mxu0 %v1138_v29  ;;  %2669 = vmatpush1.msra.mxu1 %v1170_v30  ;;  %v1834_v29 = vrot.slane %v1693_v3, 7  ;;  %v1835_v30 = vrot.slane %v7034_v15, 7  ;;  %v1213_v15 = vld [vmem:[#allocation6 + $0x260] sm:$0xff] }
  0x77   : > { %2365 = vmatprep.subr.mxu0 %v6762_v0  ;;  %2670 = vmatprep.subr.mxu1 %v6762_v0 }
  0x78   : > { %2366 = vmatpush1.msra.mxu0 %v1137_v31  ;;  %2671 = vmatpush1.msra.mxu1 %v1169_v32  ;;  %v1186_v31 = vld [vmem:[#allocation6 + $0x188] sm:$0xff]  ;;  %v1857_v32 = vrot.slane %v1600_v20, 7  ;;  %v1836_v45 = vsel %vm1827_vm2, %v1834_v29, %v1835_v30  ;;  %v1211_v29 = vld [vmem:[#allocation6 + $0x250] sm:$0xff] }
  0x79   : > { %2367 = vmatprep.subr.mxu0 %v6762_v0  ;;  %2672 = vmatprep.subr.mxu1 %v6762_v0 }
  0x7a   : > { %2368 = vmatpush2.msra.mxu0 %v1168_v33  ;;  %2673 = vmatpush2.msra.mxu1 %v1200_v34  ;;  %v7054_v33 = vsel %vm1692_vm1, %v1694_v4, %v1696_v16  ;;  %v7058_v34 = vsel %vm1595_vm0, %v1599_v7, %v7038_v17  ;;  %v1858_v49 = vsel %vm1827_vm2, %v1832_v14, %v1857_v32  ;;  %v1214_v7 = vld [vmem:[#allocation6 + $0x268] sm:$0xff] }
  0x7b   : > { %2369 = vmatprep.subr.mxu0 %v6762_v0  ;;  %2674 = vmatprep.subr.mxu1 %v6762_v0  ;;  %v1859_v46 = vrot.slane %v7054_v33, 7 }
  0x7c   : > { %2370 = vmatpush2.msra.mxu0 %v1167_v35  ;;  %2675 = vmatpush2.msra.mxu1 %v1199_v36  ;;  %v1603_v35 = vrot.slane %v7043_v21, 1  ;;  %v1153_v36 = vld [vmem:[#allocation6 + $0x80] sm:$0xff] }
  0x7d   : > { %2371 = vmatprep.subr.mxu0 %v6762_v0  ;;  %2676 = vmatprep.subr.mxu1 %v6762_v0 }
  0x7e   : > { %2372 = vmatpush2.msra.mxu0 %v1166_v37  ;;  %2677 = vmatpush2.msra.mxu1 %v1198_v38  ;;  %v1861_v37 = vrot.slane %v7043_v21, 7  ;;  %v7064_v38 = vmax.f32 %v1441_v25, 0.0  ;;  %v1445_v25 = vld [vmem:[%s6936_s10 + $0x50] sm:$0xff] }
  0x7f   : > { %2373 = vmatprep.subr.mxu0 %v6762_v0  ;;  %2678 = vmatprep.subr.mxu1 %v6762_v0 }
  0x80   : > { %2374 = vmatpush2.msra.mxu0 %v1165_v39  ;;  %2679 = vmatpush2.msra.mxu1 %v1197_v40  ;;  %v7067_v39 = vrot.slane %v7027_v9, 2  ;;  %v1830_v40 = vsel %vm1827_vm2, %v1828_v22, %v1829_v23  ;;  %v7089_v53 = vsel %vm1827_vm2, %v1838_v28, %v1861_v37  ;;  %v1702_v9 = vrot.slane %v7064_v38, 2 }
  0x81   : > { %2375 = vmatprep.subr.mxu0 %v6762_v0  ;;  %2680 = vmatprep.subr.mxu1 %v6762_v0 }
  0x82   : > { %2376 = vmatpush2.msra.mxu0 %v1164_v41  ;;  %2681 = vmatpush2.msra.mxu1 %v1196_v42  ;;  %v1855_v41 = vrot.slane %v7002_v50, 7  ;;  %v1442_v42 = vld [vmem:[%s6936_s10 + $0x38] sm:$0xff]  ;;  %v1604_v50 = vsel %vm1595_vm0, %v7038_v17, %v1603_v35 }
  0x83   : > { %2377 = vmatprep.subr.mxu0 %v6762_v0  ;;  %2682 = vmatprep.subr.mxu1 %v6762_v0  ;;  %v7094_v56 = vmax.f32 %v1442_v42, 0.0  ;;  %v7101_v63 = vrot.slane %v1604_v50, 7 }
  0x84   : > { %2378 = vmatpush2.msra.mxu0 %v1163_v43  ;;  %2683 = vmatpush2.msra.mxu1 %v1195_v44  ;;  %v1185_v43 = vld [vmem:[#allocation6 + $0x180] sm:$0xff]  ;;  %v7076_v44 = vsel %vm1827_vm2, %v1837_v24, %v1838_v28  ;;  %v1856_v57 = vsel %vm1827_vm2, %v1829_v23, %v1855_v41  ;;  %v1873_v10 = vsel %vm1827_vm2, %v1855_v41, %v1837_v24  ;;  %v1212_v24 = vld [vmem:[#allocation6 + $0x258] sm:$0xff] }
  0x85   : > { %2379 = vmatprep.subr.mxu0 %v6762_v0  ;;  %2684 = vmatprep.subr.mxu1 %v6762_v0  ;;  %v7108_v4 = vrot.slane %v7094_v56, 1 }
  0x86   : > { %2380 = vmatpush2.msra.mxu0 %v1162_v47  ;;  %2685 = vmatpush2.msra.mxu1 %v1194_v48  ;;  %v1874_v47 = vrot.slane %v7058_v34, 7  ;;  %v1216_v48 = vld [vmem:[#allocation6 + $0x278] sm:$0xff] }
  0x87   : > { %2381 = vmatprep.subr.mxu0 %v6762_v0  ;;  %2686 = vmatprep.subr.mxu1 %v6762_v0 }
  0x88   : > { %2382 = vmatpush2.msra.mxu0 %v1161_v51  ;;  %2687 = vmatpush2.msra.mxu1 %v1193_v52  ;;  %v1700_v51 = vrot.slane %v7043_v21, 2  ;;  %v1605_v52 = vrot.slane %v7064_v38, 1 }
  0x89   : > { %2383 = vmatprep.subr.mxu0 %v6762_v0  ;;  %2688 = vmatprep.subr.mxu1 %v6762_v0 }
  0x8a   : > { %2384 = vmatpush2.msra.mxu0 %v1160_v54  ;;  %2689 = vmatpush2.msra.mxu1 %v1192_v55  ;;  %v1846_v54 = vrot.slane %v7064_v38, 7  ;;  %v1699_v55 = vsel %vm1692_vm1, %v1696_v16, %v7067_v39  ;;  %v1701_v2 = vsel %vm1692_vm1, %v7067_v39, %v1700_v51  ;;  %v1606_v3 = vsel %vm1595_vm0, %v1603_v35, %v1605_v52  ;;  %v1210_v38 = vld [vmem:[#allocation6 + $0x248] sm:$0xff] }
  0x8b   : > { %2385 = vmatprep.subr.mxu0 %v6762_v0  ;;  %2690 = vmatprep.subr.mxu1 %v6762_v0  ;;  %v1876_v1 = vrot.slane %v1699_v55, 7  ;;  %v7125_v13 = vrot.slane %v1701_v2, 7  ;;  %v1863_v14 = vrot.slane %v1606_v3, 7  ;;  %v1608_v60 = vsel %vm1595_vm0, %v1605_v52, %v7108_v4  ;;  %v1447_v55 = vld [vmem:[%s6936_s10 + $0x60] sm:$0xff] }
  0x8c   : > { %2386 = vmatpush2.msra.mxu0 %v1159_v58  ;;  %2691 = vmatpush2.msra.mxu1 %v1191_v59  ;;  %v1443_v58 = vld [vmem:[%s6936_s10 + $0x40] sm:$0xff]  ;;  %v1860_v59 = vsel %vm1827_vm2, %v1835_v30, %v1859_v46  ;;  %v1703_v22 = vsel %vm1692_vm1, %v1700_v51, %v1702_v9  ;;  %v1879_v28 = vrot.slane %v1608_v60, 7 }
  0x8d   : > { %2387 = vmatprep.subr.mxu0 %v6762_v0  ;;  %2692 = vmatprep.subr.mxu1 %v6762_v0  ;;  %v7115_v8 = vmax.f32 %v1443_v58, 0.0  ;;  %v1877_v16 = vsel %vm1827_vm2, %v1859_v46, %v1876_v1  ;;  %v1865_v30 = vrot.slane %v1703_v22, 7  ;;  %v1207_v58 = vld [vmem:[#allocation6 + $0x230] sm:$0xff] }
  0x8e   : > { %2388 = vmatpush2.msra.mxu0 %v1158_v61  ;;  %2693 = vmatpush2.msra.mxu1 %v1190_v62  ;;  %v1875_v61 = vsel %vm1827_vm2, %v1857_v32, %v1874_v47  ;;  %v1215_v62 = vld [vmem:[#allocation6 + $0x270] sm:$0xff]  ;;  %v7171_v41 = vsel %vm1827_vm2, %v1863_v14, %v1879_v28 }
  0x8f   : > { %2389 = vmatprep.subr.mxu0 %v6762_v0  ;;  %2694 = vmatprep.subr.mxu1 %v6762_v0  ;;  %v1867_v21 = vrot.slane %v7115_v8, 7 }
  0x90   : > { %2390 = vmatpush2.msra.mxu0 %v1157_v5  ;;  %2695 = vmatpush2.msra.mxu1 %v1189_v6  ;;  %v7112_v5 = vsel %vm1827_vm2, %v1861_v37, %v1846_v54  ;;  %v1847_v6 = vrot.slane %v7094_v56, 7  ;;  %v1706_v37 = vrot.slane %v7115_v8, 2 }
  0x91   : > { %2391 = vmatprep.subr.mxu0 %v6762_v0  ;;  %2696 = vmatprep.subr.mxu1 %v6762_v0 }
  0x92   : > { %2392 = vmatpush2.msra.mxu0 %v1156_v11  ;;  %2697 = vmatpush2.msra.mxu1 %v1188_v12  ;;  %v1444_v11 = vld [vmem:[%s6936_s10 + $0x48] sm:$0xff]  ;;  %v1889_v12 = vsel %vm1827_vm2, %v1874_v47, %v7101_v63  ;;  %v7136_v20 = vsel %vm1827_vm2, %v1846_v54, %v1847_v6  ;;  %v7161_v34 = vsel %vm1827_vm2, %v1847_v6, %v1867_v21  ;;  %v1208_v54 = vld [vmem:[#allocation6 + $0x238] sm:$0xff]  ;;  %v7219_v6 = vmax.f32 %v1447_v55, 0.0 }
  0x93   : > { %2393 = vmatprep.subr.mxu0 %v6762_v0  ;;  %2698 = vmatprep.subr.mxu1 %v6762_v0  ;;  %v7141_v23 = vmax.f32 %v1444_v11, 0.0 }
  0x94   : > { %2394 = vmatpush2.msra.mxu0 %v1155_v18  ;;  %2699 = vmatpush2.msra.mxu1 %v1187_v19  ;;  %v7132_v18 = vrot.slane %v7094_v56, 2  ;;  %v1609_v19 = vrot.slane %v7115_v8, 1  ;;  %v1206_v8 = vld [vmem:[#allocation6 + $0x228] sm:$0xff]  ;;  %v1617_v60 = vrot.slane %v7219_v6, 1 }
  0x95   : > { %2395 = vmatprep.subr.mxu0 %v6762_v0  ;;  %2700 = vmatprep.subr.mxu1 %v6762_v0  ;;  %v1611_v33 = vrot.slane %v7141_v23, 1  ;;  %v1883_v35 = vrot.slane %v7141_v23, 7  ;;  %v1708_v47 = vrot.slane %v7141_v23, 2 }
  0x96   : > { %2396 = vmatpush2.msra.mxu0 %v1154_v26  ;;  %2399 = vmatprep.mubr.f32.mxu0 %v1833_v27  ;;  %12341 = vst [vmem:[#allocation13_spill] sm:$0xff] %v7132_v18  ;;  %v1890_v26 = vsel %vm1827_vm2, %v1876_v1, %v7125_v13  ;;  %v7148_v27 = vsel %vm1827_vm2, %v7101_v63, %v1863_v14 }
  0x97   : > { %2397 = vmatprep.subr.mxu0 %v6762_v0  ;;  %2701 = vmatpush2.msra.mxu1 %v1186_v31  ;;  %v7154_v31 = vsel %vm1692_vm1, %v1702_v9, %v7132_v18  ;;  %v1610_v32 = vsel %vm1595_vm0, %v7108_v4, %v1609_v19  ;;  %v1612_v46 = vsel %vm1595_vm0, %v1609_v19, %v1611_v33  ;;  %v1448_v9 = vld [vmem:[%s6936_s10 + $0x68] sm:$0xff] }
  0x98   : > { %2398 = vmatpush2.msra.mxu0 %v1153_v36  ;;  %2702 = vmatprep.subr.mxu1 %v6762_v0  ;;  %v7164_v36 = vmax.f32 %v1445_v25, 0.0  ;;  %v1881_v42 = vrot.slane %v7154_v31, 7  ;;  %v1707_v51 = vsel %vm1692_vm1, %v7132_v18, %v1706_v37  ;;  %v7246_v23 = vmax.f32 %v1448_v9, 0.0  ;;  %v1449_v25 = vld [vmem:[%s6936_s10 + $0x70] sm:$0xff] }
  0x99   : > { %2400 = vmatmul.mubr.f32.vlgmr.msra.gmra.mxu0 %v1830_v40  ;;  %2945 = vmatprep.subr.mxu0 %v6762_v0  ;;  %v1446_v40 = vld [vmem:[%s6936_s10 + $0x58] sm:$0xff]  ;;  %v1231_v9 = vld [vmem:[#allocation6 + $0x2f0] sm:$0xff] }
  0x9a   : > { %2703 = vmatpush2.msra.mxu1 %v1185_v43  ;;  %2704 = vmatprep.mubr.f32.mxu1 %v7076_v44  ;;  %v7174_v43 = vrot.slane %v1610_v32, 7  ;;  %v1893_v50 = vrot.slane %v7164_v36, 7  ;;  %v7192_v52 = vmax.f32 %v1446_v40, 0.0  ;;  %v1714_v40 = vrot.slane %v7219_v6, 2 }
  0x9b   : > { %2946 = vmatpush1.msra.mxu0 %v1216_v48  ;;  %2705 = vmatmul.mubr.f32.vlgmr.msra.gmra.mxu1 %v1836_v45  ;;  %v7180_v45 = vsel %vm1827_vm2, %v7125_v13, %v1865_v30  ;;  %v1613_v48 = vrot.slane %v7164_v36, 1 }
  0x9c   : > { %2404 = vmatprep.mubr.f32.mxu0 %v1858_v49  ;;  %2709 = vmatprep.mubr.f32.mxu1 %v7089_v53  ;;  %v7187_v49 = vsel %vm1827_vm2, %v1867_v21, %v1883_v35  ;;  %v7203_v56 = vsel %vm1827_vm2, %v1879_v28, %v7174_v43  ;;  %v1615_v1 = vrot.slane %v7192_v52, 1  ;;  %v7216_v2 = vsel %vm1827_vm2, %v1883_v35, %v1893_v50 }
  0x9d   : > { %2405 = vmatmul.mubr.f32.gmra.mxu0 %v1856_v57  ;;  %2947 = vmatprep.subr.mxu0 %v6762_v0  ;;  %v1869_v57 = vrot.slane %v1612_v46, 7  ;;  %v1899_v3 = vrot.slane %v7192_v52, 7  ;;  %v1905_v21 = vrot.slane %v7219_v6, 7  ;;  %v1619_v35 = vrot.slane %v7246_v23, 1 }
  0x9e   : > { %2409 = vmatprep.mubr.f32.mxu0 %v1875_v61  ;;  %2948 = vmatpush1.msra.mxu0 %v1215_v62  ;;  %v7210_v61 = vsel %vm1692_vm1, %v1706_v37, %v1708_v47  ;;  %v1614_v62 = vsel %vm1595_vm0, %v1611_v33, %v1613_v48  ;;  %v1618_v33 = vsel %vm1595_vm0, %v1615_v1, %v1617_v60  ;;  %v1911_v37 = vrot.slane %v7246_v23, 7 }
  0x9f   : > { %2710 = vmatmul.mubr.f32.gmra.mxu1 %v1860_v59  ;;  %2949 = vmatprep.subr.mxu0 %v6762_v0  ;;  %v7207_v59 = vrot.slane %v1707_v51, 7  ;;  %v1885_v11 = vrot.slane %v1614_v62, 7  ;;  %v7242_v19 = vsel %vm1827_vm2, %v1893_v50, %v1899_v3  ;;  %v1201_v50 = vld [vmem:[#allocation6 + $0x200] sm:$0xff] }
  0xa0   : > { %2714 = vmatprep.mubr.f32.mxu1 %v7112_v5  ;;  %2950 = vmatpush1.msra.mxu0 %v1214_v7  ;;  %v1710_v7 = vrot.slane %v7164_v36, 2  ;;  %v7268_v36 = vsel %vm1827_vm2, %v1899_v3, %v1905_v21  ;;  %v1451_v3 = vld [vmem:[%s6936_s10 + $0x80] sm:$0xff] }
  0xa1   : > { %2410 = vmatmul.mubr.f32.gmra.mxu0 %v1873_v10  ;;  %2951 = vmatprep.subr.mxu0 %v6762_v0  ;;  %12342 = vst [vmem:[#allocation14_spill] sm:$0xff] %v7207_v59  ;;  %v1871_v10 = vrot.slane %v7210_v61, 7  ;;  %v7235_v14 = vsel %vm1827_vm2, %v1881_v42, %v7207_v59  ;;  %v7257_v28 = vsel %vm1827_vm2, %v1869_v57, %v1885_v11 }
  0xa2   : > { %2414 = vmatprep.mubr.f32.mxu0 %v1889_v12  ;;  %2952 = vmatpush1.msra.mxu0 %v1213_v15  ;;  %v1205_v12 = vld [vmem:[#allocation6 + $0x220] sm:$0xff]  ;;  %v1616_v15 = vsel %vm1595_vm0, %v1613_v48, %v1615_v1  ;;  %v1711_v22 = vsel %vm1692_vm1, %v1708_v47, %v1710_v7  ;;  %v1901_v48 = vrot.slane %v1618_v33, 7  ;;  %v1232_v1 = vld [vmem:[#allocation6 + $0x2f8] sm:$0xff] }
  0xa3   : > { %2715 = vmatmul.mubr.f32.gmra.mxu1 %v1877_v16  ;;  %2953 = vmatprep.subr.mxu0 %v6762_v0  ;;  %v1712_v16 = vrot.slane %v7192_v52, 2  ;;  %v1887_v31 = vrot.slane %v1711_v22, 7  ;;  %v1620_v52 = vsel %vm1595_vm0, %v1617_v60, %v1619_v35 }
  0xa4   : > { %2719 = vmatprep.mubr.f32.mxu1 %v7136_v20  ;;  %2954 = vmatpush1.msra.mxu0 %v1212_v24  ;;  %v1204_v24 = vld [vmem:[#allocation6 + $0x218] sm:$0xff] }
  0xa5   : > { %2415 = vmatmul.mubr.f32.gmra.mxu0 %v7076_v44  ;;  %2955 = vmatprep.subr.mxu0 %v6762_v0  ;;  %v1209_v44 = vld [vmem:[#allocation6 + $0x240] sm:$0xff]  ;;  %v7262_v32 = vsel %vm1692_vm1, %v1710_v7, %v1712_v16  ;;  %v7285_v51 = vsel %vm1827_vm2, %v1871_v10, %v1887_v31  ;;  %v1715_v61 = vsel %vm1692_vm1, %v1712_v16, %v1714_v40 }
  0xa6   : > { %2419 = vmatprep.mubr.f32.mxu0 %v7148_v27  ;;  %2956 = vmatpush1.msra.mxu0 %v1211_v29  ;;  %v1895_v29 = vrot.slane %v1616_v15, 7  ;;  %v1897_v47 = vrot.slane %v7262_v32, 7 }
  0xa7   : > { %2720 = vmatmul.mubr.f32.gmra.mxu1 %v1890_v26  ;;  %2957 = vmatprep.subr.mxu0 %v6762_v0  ;;  %v7254_v26 = vsel %vm1827_vm2, %v7207_v59, %v1871_v10  ;;  %v1903_v10 = vrot.slane %v1715_v61, 7 }
  0xa8   : > { %2724 = vmatprep.mubr.f32.mxu1 %v7161_v34  ;;  %2958 = vmatpush1.msra.mxu0 %v1210_v38  ;;  %v7271_v38 = vmax.f32 %v1449_v25, 0.0  ;;  %v7279_v46 = vsel %vm1827_vm2, %v1885_v11, %v1895_v29  ;;  %v7303_v6 = vsel %vm1827_vm2, %v1887_v31, %v1897_v47  ;;  %v7306_v7 = vsel %vm1827_vm2, %v1895_v29, %v1901_v48  ;;  %v1229_v31 = vld [vmem:[#allocation6 + $0x2e0] sm:$0xff] }
  0xa9   : > { %2420 = vmatmul.mubr.f32.gmra.mxu0 %v7089_v53  ;;  %2959 = vmatprep.subr.mxu0 %v6762_v0  ;;  %v7199_v53 = vsel %vm1827_vm2, %v1865_v30, %v1881_v42  ;;  %v1203_v30 = vld [vmem:[#allocation6 + $0x210] sm:$0xff]  ;;  %v1202_v42 = vld [vmem:[#allocation6 + $0x208] sm:$0xff]  ;;  %v7334_v32 = vsel %vm1827_vm2, %v1897_v47, %v1903_v10  ;;  %v1228_v47 = vld [vmem:[#allocation6 + $0x2d8] sm:$0xff] }
  0xaa   : > { %2424 = vmatprep.mubr.f32.mxu0 %v7171_v41  ;;  %2960 = vmatpush1.msra.mxu0 %v1209_v44  ;;  %v1450_v44 = vld [vmem:[%s6936_s10 + $0x78] sm:$0xff]  ;;  %v1621_v55 = vrot.slane %v7271_v38, 1  ;;  %v1718_v22 = vrot.slane %v7271_v38, 2 }
  0xab   : > { %2725 = vmatmul.mubr.f32.gmra.mxu1 %v7180_v45  ;;  %2961 = vmatprep.subr.mxu0 %v6762_v0  ;;  %v7296_v62 = vmax.f32 %v1450_v44, 0.0 }
  0xac   : > { %2729 = vmatprep.mubr.f32.mxu1 %v7187_v49  ;;  %2962 = vmatpush1.msra.mxu0 %v1208_v54  ;;  %v1716_v54 = vrot.slane %v7246_v23, 2  ;;  %v1230_v23 = vld [vmem:[#allocation6 + $0x2e8] sm:$0xff] }
  0xad   : > { %2425 = vmatmul.mubr.f32.gmra.mxu0 %v7112_v5  ;;  %2963 = vmatprep.subr.mxu0 %v6762_v0  ;;  %v7228_v5 = vsel %vm1827_vm2, %v7174_v43, %v1869_v57  ;;  %v7292_v57 = vsel %vm1827_vm2, %v1905_v21, %v1911_v37  ;;  %v1623_v15 = vrot.slane %v7296_v62, 1  ;;  %v1923_v60 = vrot.slane %v7296_v62, 7 }
  0xae   : > { %2429 = vmatprep.mubr.f32.mxu0 %v7203_v56  ;;  %2964 = vmatpush1.msra.mxu0 %v1207_v58  ;;  %v1917_v58 = vrot.slane %v7271_v38, 7  ;;  %v7311_v11 = vsel %vm1692_vm1, %v1714_v40, %v1716_v54  ;;  %v7320_v21 = vmax.f32 %v1451_v3, 0.0 }
  0xaf   : > { %2730 = vmatmul.mubr.f32.gmra.mxu1 %v7199_v53  ;;  %2965 = vmatprep.subr.mxu0 %v6762_v0  ;;  %v1909_v29 = vrot.slane %v7311_v11, 7  ;;  %v7337_v33 = vsel %vm1595_vm0, %v1621_v55, %v1623_v15  ;;  %v1248_v11 = vld [vmem:[#allocation6 + $0x378] sm:$0xff] }
  0xb0   : > { %2734 = vmatprep.mubr.f32.mxu1 %v7216_v2  ;;  %2966 = vmatpush1.msra.mxu0 %v1206_v8  ;;  %v1907_v8 = vrot.slane %v1620_v52, 7  ;;  %v7317_v16 = vsel %vm1827_vm2, %v1911_v37, %v1917_v58  ;;  %v1625_v37 = vrot.slane %v7320_v21, 1  ;;  %v7343_v38 = vsel %vm1827_vm2, %v1917_v58, %v1923_v60 }
  0xb1   : > { %2430 = vmatmul.mubr.f32.gmra.mxu0 %v7136_v20  ;;  %2967 = vmatprep.subr.mxu0 %v6762_v0  ;;  %12343 = vst [vmem:[#allocation15_spill] sm:$0xff] %v7343_v38  ;;  %v1929_v40 = vrot.slane %v7320_v21, 7 }
  0xb2   : > { %2434 = vmatprep.mubr.f32.mxu0 %v7228_v5  ;;  %2968 = vmatpush1.msra.mxu0 %v1205_v12  ;;  %v1622_v12 = vsel %vm1595_vm0, %v1619_v35, %v1621_v55  ;;  %v7328_v25 = vsel %vm1827_vm2, %v1901_v48, %v1907_v8  ;;  %v1720_v35 = vrot.slane %v7296_v62, 2  ;;  %v1453_v48 = vld [vmem:[%s6936_s10 + $0x90] sm:$0xff]  ;;  %v1919_v55 = vrot.slane %v7337_v33, 7 }
  0xb3   : > { %2735 = vmatmul.mubr.f32.gmra.mxu1 %v7235_v14  ;;  %2969 = vmatprep.subr.mxu0 %v6762_v0  ;;  %v1626_v62 = vsel %vm1595_vm0, %v1623_v15, %v1625_v37  ;;  %v7369_v3 = vsel %vm1827_vm2, %v1923_v60, %v1929_v40 }
  0xb4   : > { %2739 = vmatprep.mubr.f32.mxu1 %v7242_v19  ;;  %2970 = vmatpush1.msra.mxu0 %v1204_v24  ;;  %v1452_v24 = vld [vmem:[%s6936_s10 + $0x88] sm:$0xff]  ;;  %v7363_v61 = vsel %vm1692_vm1, %v1718_v22, %v1720_v35  ;;  %12344 = vst [vmem:[#allocation16_spill] sm:$0xff] %v7369_v3 }
  0xb5   : > { %2435 = vmatmul.mubr.f32.gmra.mxu0 %v7161_v34  ;;  %2971 = vmatprep.subr.mxu0 %v6762_v0  ;;  %v7347_v44 = vmax.f32 %v1452_v24, 0.0  ;;  %v1921_v60 = vrot.slane %v7363_v61, 7 }
  0xb6   : > { %2439 = vmatprep.mubr.f32.mxu0 %v7257_v28  ;;  %2972 = vmatpush1.msra.mxu0 %v1203_v30  ;;  %v1913_v30 = vrot.slane %v1622_v12, 7  ;;  %v1454_v12 = vld [vmem:[%s6936_s10 + $0x98] sm:$0xff] }
  0xb7   : > { %2740 = vmatmul.mubr.f32.gmra.mxu1 %v7254_v26  ;;  %2973 = vmatprep.subr.mxu0 %v6762_v0  ;;  %v1724_v24 = vrot.slane %v7347_v44, 2 }
  0xb8   : > { %2744 = vmatprep.mubr.f32.mxu1 %v7268_v36  ;;  %2974 = vmatpush1.msra.mxu0 %v1202_v42  ;;  %v1719_v42 = vsel %vm1692_vm1, %v1716_v54, %v1718_v22  ;;  %v7357_v52 = vsel %vm1827_vm2, %v1907_v8, %v1913_v30  ;;  %v1227_v54 = vld [vmem:[#allocation6 + $0x2d0] sm:$0xff]  ;;  %v1935_v8 = vrot.slane %v7347_v44, 7  ;;  %v7380_v15 = vsel %vm1827_vm2, %v1913_v30, %v1919_v55  ;;  %v1226_v30 = vld [vmem:[#allocation6 + $0x2c8] sm:$0xff] }
  0xb9   : > { %2440 = vmatmul.mubr.f32.gmra.mxu0 %v7187_v49  ;;  %2975 = vmatprep.subr.mxu0 %v6762_v0  ;;  %v1915_v58 = vrot.slane %v1719_v42, 7  ;;  %v1925_v22 = vrot.slane %v1626_v62, 7 }
  0xba   : > { %2444 = vmatprep.mubr.f32.mxu0 %v7279_v46  ;;  %2976 = vmatpush1.msra.mxu0 %v1201_v50  ;;  %v7354_v50 = vsel %vm1827_vm2, %v1903_v10, %v1909_v29  ;;  %v1722_v10 = vrot.slane %v7320_v21, 2  ;;  %v7395_v33 = vsel %vm1827_vm2, %v1929_v40, %v1935_v8 }
  0xbb   : > { %2745 = vmatmul.mubr.f32.gmra.mxu1 %v7285_v51  ;;  %2977 = vmatprep.subr.mxu0 %v6762_v0  ;;  %v7386_v21 = vsel %vm1827_vm2, %v1909_v29, %v1915_v58  ;;  %12345 = vst [vmem:[#allocation17_spill] sm:$0xff] %v7395_v33  ;;  %v7399_v29 = vmax.f32 %v1454_v12, 0.0  ;;  %v7409_v40 = vsel %vm1827_vm2, %v1915_v58, %v1921_v60 }
  0xbc   : > { %2749 = vmatprep.mubr.f32.mxu1 %v7292_v57  ;;  %2978 = vmatpush2.msra.mxu0 %v1232_v1  ;;  %v1627_v1 = vrot.slane %v7347_v44, 1  ;;  %v1723_v42 = vsel %vm1692_vm1, %v1720_v35, %v1722_v10  ;;  %v1455_v44 = vld [vmem:[%s6936_s10 + $0xa0] sm:$0xff]  ;;  %12346 = vst [vmem:[#allocation18_spill] sm:$0xff] %v7409_v40  ;;  %v7417_v62 = vsel %vm1692_vm1, %v1722_v10, %v1724_v24 }
  0xbd   : > { %2445 = vmatmul.mubr.f32.gmra.mxu0 %v7216_v2  ;;  %2979 = vmatprep.subr.mxu0 %v6762_v0  ;;  %v1927_v61 = vrot.slane %v1723_v42, 7  ;;  %v1631_v12 = vrot.slane %v7399_v29, 1  ;;  %v1947_v58 = vrot.slane %v7399_v29, 7  ;;  %v1245_v10 = vld [vmem:[#allocation6 + $0x360] sm:$0xff] }
  0xbe   : > { %2449 = vmatprep.mubr.f32.mxu0 %v7306_v7  ;;  %2980 = vmatpush2.msra.mxu0 %v1231_v9  ;;  %v7372_v9 = vmax.f32 %v1453_v48, 0.0  ;;  %v7412_v48 = vsel %vm1827_vm2, %v1919_v55, %v1925_v22 }
  0xbf   : > { %2750 = vmatmul.mubr.f32.gmra.mxu1 %v7303_v6  ;;  %2981 = vmatprep.subr.mxu0 %v6762_v0 }
  0xc0   : > { %2754 = vmatprep.mubr.f32.mxu1 %v7317_v16  ;;  %2982 = vmatpush2.msra.mxu0 %v1230_v23  ;;  %v7389_v23 = vsel %vm1595_vm0, %v1625_v37, %v1627_v1  ;;  %v1247_v37 = vld [vmem:[#allocation6 + $0x370] sm:$0xff] }
  0xc1   : > { %2450 = vmatmul.mubr.f32.gmra.mxu0 %v7242_v19  ;;  %2983 = vmatprep.subr.mxu0 %v6762_v0  ;;  %v1931_v35 = vrot.slane %v7389_v23, 7  ;;  %v7426_v23 = vmax.f32 %v1455_v44, 0.0 }
  0xc2   : > { %2454 = vmatprep.mubr.f32.mxu0 %v7328_v25  ;;  %2984 = vmatpush2.msra.mxu0 %v1229_v31  ;;  %v1629_v31 = vrot.slane %v7372_v9, 1 }
  0xc3   : > { %2755 = vmatmul.mubr.f32.gmra.mxu1 %v7334_v32  ;;  %2985 = vmatprep.subr.mxu0 %v6762_v0  ;;  %v7434_v42 = vsel %vm1827_vm2, %v1925_v22, %v1931_v35  ;;  %v1633_v59 = vrot.slane %v7426_v23, 1  ;;  %v1225_v22 = vld [vmem:[#allocation6 + $0x2c0] sm:$0xff] }
  0xc4   : > { %2759 = vmatprep.mubr.f32.mxu1 %v7343_v38  ;;  %2986 = vmatpush2.msra.mxu0 %v1228_v47  ;;  %v7401_v47 = vld [vmem:[#allocation2] sm:$0xff]  ;;  %12348 = vst [vmem:[#allocation20_spill] sm:$0xff] %v7434_v42  ;;  %v7443_v44 = vsel %vm1595_vm0, %v1629_v31, %v1631_v12 }
  0xc5   : > { %2455 = vmatmul.mubr.f32.gmra.mxu0 %v7268_v36  ;;  %2987 = vmatprep.subr.mxu0 %v6762_v0 }
  0xc6   : > { %2459 = vmatprep.mubr.f32.mxu0 %v7357_v52  ;;  %2988 = vmatpush2.msra.mxu0 %v1227_v54  ;;  %v1246_v54 = vld [vmem:[#allocation6 + $0x368] sm:$0xff] }
  0xc7   : > { %2760 = vmatmul.mubr.f32.gmra.mxu1 %v7354_v50  ;;  %3250 = vmatprep.subr.mxu1 %v6762_v0  ;;  %v1941_v0 = vrot.slane %v7372_v9, 7 }
  0xc8   : > { %2764 = vmatprep.mubr.f32.mxu1 %v7369_v3  ;;  %3251 = vmatpush1.msra.mxu1 %v1248_v11  ;;  %v1630_v11 = vsel %vm1595_vm0, %v1627_v1, %v1629_v31  ;;  %v1456_v1 = vld [vmem:[%s6936_s10 + $0xa8] sm:$0xff]  ;;  %v1244_v31 = vld [vmem:[#allocation6 + $0x358] sm:$0xff] }
  0xc9   : > { %2460 = vmatmul.mubr.f32.gmra.mxu0 %v7292_v57  ;;  %2989 = vmatprep.subr.mxu0 %v7401_v47  ;;  %v7423_v55 = vsel %vm1827_vm2, %v1935_v8, %v1941_v0  ;;  %v1933_v8 = vrot.slane %v7417_v62, 7  ;;  %v7449_v62 = vsel %vm1827_vm2, %v1941_v0, %v1947_v58 }
  0xca   : > { %2464 = vmatprep.mubr.f32.mxu0 %v7380_v15  ;;  %3252 = vmatprep.subr.mxu1 %v7401_v47  ;;  %12347 = vst [vmem:[#allocation19_spill] sm:$0xff] %v7423_v55  ;;  %12350 = vst [vmem:[#allocation22_spill] sm:$0xff] %v7449_v62 }
  0xcb   : > { %2765 = vmatmul.mubr.f32.gmra.mxu1 %v7386_v21  ;;  %2990 = vmatpush2.msra.mxu0 %v1226_v30  ;;  %v1726_v30 = vrot.slane %v7372_v9, 2  ;;  %v7440_v9 = vsel %vm1827_vm2, %v1921_v60, %v1927_v61  ;;  %v7453_v60 = vmax.f32 %v1456_v1, 0.0  ;;  %v1243_v1 = vld [vmem:[#allocation6 + $0x350] sm:$0xff] }
  0xcc   : > { %2769 = vmatprep.mubr.f32.mxu1 %v7395_v33  ;;  %3253 = vmatpush1.msra.mxu1 %v1247_v37  ;;  %v1937_v37 = vrot.slane %v1630_v11, 7  ;;  %12349 = vst [vmem:[#allocation21_spill] sm:$0xff] %v7440_v9  ;;  %v1953_v11 = vrot.slane %v7426_v23, 7 }
  0xcd   : > { %2465 = vmatmul.mubr.f32.gmra.mxu0 %v7317_v16  ;;  %3254 = vmatprep.subr.mxu1 %v7401_v47  ;;  %v1727_v18 = vsel %vm1692_vm1, %v1724_v24, %v1726_v30  ;;  %v1943_v24 = vrot.slane %v7443_v44, 7 }
  0xce   : > { %2469 = vmatprep.mubr.f32.mxu0 %v7412_v48  ;;  %3255 = vmatpush1.msra.mxu1 %v1246_v54  ;;  %v1728_v54 = vrot.slane %v7399_v29, 2  ;;  %v1457_v29 = vld [vmem:[%s6936_s10 + $0xb0] sm:$0xff]  ;;  %v7464_v0 = vsel %vm1827_vm2, %v1931_v35, %v1937_v37  ;;  %v7475_v35 = vsel %vm1827_vm2, %v1947_v58, %v1953_v11 }
  0xcf   : > { %2770 = vmatmul.mubr.f32.gmra.mxu1 %v7409_v40  ;;  %3256 = vmatprep.subr.mxu1 %v7401_v47  ;;  %12352 = vst [vmem:[#allocation24_spill] sm:$0xff] %v7464_v0  ;;  %v1939_v40 = vrot.slane %v1727_v18, 7  ;;  %12353 = vst [vmem:[#allocation25_spill] sm:$0xff] %v7475_v35  ;;  %v7478_v44 = vmax.f32 %v1457_v29, 0.0  ;;  %v1242_v18 = vld [vmem:[#allocation6 + $0x348] sm:$0xff] }
  0xd0   : > { %2774 = vmatprep.mubr.f32.mxu1 %v7423_v55  ;;  %3257 = vmatpush1.msra.mxu1 %v1245_v10  ;;  %v7461_v10 = vsel %vm1827_vm2, %v1927_v61, %v1933_v8  ;;  %v1959_v61 = vrot.slane %v7453_v60, 7 }
  0xd1   : > { %2470 = vmatmul.mubr.f32.gmra.mxu0 %v7343_v38  ;;  %2991 = vmatprep.subr.mxu0 %v7401_v47  ;;  %12351 = vst [vmem:[#allocation23_spill] sm:$0xff] %v7461_v10  ;;  %v1634_v38 = vsel %vm1595_vm0, %v1631_v12, %v1633_v59  ;;  %v1458_v12 = vld [vmem:[%s6936_s10 + $0xb8] sm:$0xff] }
  0xd2   : > { %2474 = vmatprep.mubr.f32.mxu0 %v7434_v42  ;;  %3258 = vmatprep.subr.mxu1 %v7401_v47  ;;  %v7469_v42 = vsel %vm1692_vm1, %v1726_v30, %v1728_v54  ;;  %v7486_v30 = vsel %vm1827_vm2, %v1937_v37, %v1943_v24  ;;  %v1224_v37 = vld [vmem:[#allocation6 + $0x2b8] sm:$0xff] }
  0xd3   : > { %2775 = vmatmul.mubr.f32.gmra.mxu1 %v7440_v9  ;;  %2992 = vmatpush2.msra.mxu0 %v1225_v22  ;;  %v1635_v9 = vrot.slane %v7453_v60, 1  ;;  %v1730_v22 = vrot.slane %v7426_v23, 2  ;;  %12354 = vst [vmem:[#allocation26_spill] sm:$0xff] %v7486_v30  ;;  %v1945_v58 = vrot.slane %v7469_v42, 7  ;;  %v7492_v23 = vsel %vm1827_vm2, %v1933_v8, %v1939_v40 }
  0xd4   : > { %2779 = vmatprep.mubr.f32.mxu1 %v7449_v62  ;;  %3259 = vmatpush1.msra.mxu1 %v1244_v31  ;;  %v1949_v31 = vrot.slane %v1634_v38, 7  ;;  %12355 = vst [vmem:[#allocation27_spill] sm:$0xff] %v7492_v23  ;;  %v7501_v38 = vsel %vm1827_vm2, %v1953_v11, %v1959_v61  ;;  %v1965_v42 = vrot.slane %v7478_v44, 7  ;;  %v7505_v8 = vmax.f32 %v1458_v12, 0.0  ;;  %v1240_v12 = vld [vmem:[#allocation6 + $0x338] sm:$0xff] }
  0xd5   : > { %2475 = vmatmul.mubr.f32.gmra.mxu0 %v7369_v3  ;;  %3260 = vmatprep.subr.mxu1 %v7401_v47  ;;  %v7495_v29 = vsel %vm1595_vm0, %v1633_v59, %v1635_v9  ;;  %12356 = vst [vmem:[#allocation28_spill] sm:$0xff] %v7501_v38  ;;  %v1241_v59 = vld [vmem:[#allocation6 + $0x340] sm:$0xff] }
  0xd6   : > { %2479 = vmatprep.mubr.f32.mxu0 %v7464_v0  ;;  %3261 = vmatpush1.msra.mxu1 %v1243_v1  ;;  %v1732_v1 = vrot.slane %v7453_v60, 2  ;;  %v1731_v0 = vsel %vm1692_vm1, %v1728_v54, %v1730_v22  ;;  %v1459_v60 = vld [vmem:[%s6936_s10 + $0xc0] sm:$0xff]  ;;  %v7516_v11 = vsel %vm1827_vm2, %v1943_v24, %v1949_v31  ;;  %v1955_v54 = vrot.slane %v7495_v29, 7 }
  0xd7   : > { %2780 = vmatmul.mubr.f32.gmra.mxu1 %v7461_v10  ;;  %3262 = vmatprep.subr.mxu1 %v7401_v47  ;;  %v1637_v10 = vrot.slane %v7478_v44, 1  ;;  %12358 = vst [vmem:[#allocation30_spill] sm:$0xff] %v7516_v11  ;;  %v1971_v24 = vrot.slane %v7505_v8, 7  ;;  %v7530_v29 = vmax.f32 %v1459_v60, 0.0 }
  0xd8   : > { %2784 = vmatprep.mubr.f32.mxu1 %v7475_v35  ;;  %3263 = vmatpush1.msra.mxu1 %v1242_v18  ;;  %v7513_v18 = vsel %vm1827_vm2, %v1939_v40, %v1945_v58  ;;  %v7527_v40 = vsel %vm1827_vm2, %v1959_v61, %v1965_v42 }
  0xd9   : > { %2480 = vmatmul.mubr.f32.gmra.mxu0 %v7395_v33  ;;  %2993 = vmatprep.subr.mxu0 %v7401_v47  ;;  %12357 = vst [vmem:[#allocation29_spill] sm:$0xff] %v7513_v18  ;;  %v1951_v33 = vrot.slane %v1731_v0, 7  ;;  %v1638_v3 = vsel %vm1595_vm0, %v1635_v9, %v1637_v10  ;;  %12359 = vst [vmem:[#allocation31_spill] sm:$0xff] %v7527_v40  ;;  %v1239_v0 = vld [vmem:[#allocation6 + $0x330] sm:$0xff]  ;;  %v1460_v9 = vld [vmem:[%s6936_s10 + $0xc8] sm:$0xff] }
  0xda   : > { %2484 = vmatprep.mubr.f32.mxu0 %v7486_v30  ;;  %3264 = vmatprep.subr.mxu1 %v7401_v47  ;;  %v7521_v30 = vsel %vm1692_vm1, %v1730_v22, %v1732_v1  ;;  %v7538_v22 = vsel %vm1827_vm2, %v1949_v31, %v1955_v54  ;;  %v1223_v31 = vld [vmem:[#allocation6 + $0x2b0] sm:$0xff] }
  0xdb   : > { %2785 = vmatmul.mubr.f32.gmra.mxu1 %v7492_v23  ;;  %2994 = vmatpush2.msra.mxu0 %v1224_v37  ;;  %v1639_v23 = vrot.slane %v7505_v8, 1  ;;  %v1734_v37 = vrot.slane %v7478_v44, 2  ;;  %12360 = vst [vmem:[#allocation32_spill] sm:$0xff] %v7538_v22  ;;  %v1957_v61 = vrot.slane %v7521_v30, 7  ;;  %v7544_v44 = vsel %vm1827_vm2, %v1945_v58, %v1951_v33 }
  0xdc   : > { %2789 = vmatprep.mubr.f32.mxu1 %v7501_v38  ;;  %3265 = vmatpush1.msra.mxu1 %v1241_v59  ;;  %v1961_v59 = vrot.slane %v1638_v3, 7  ;;  %12361 = vst [vmem:[#allocation33_spill] sm:$0xff] %v7544_v44  ;;  %v7553_v3 = vsel %vm1827_vm2, %v1965_v42, %v1971_v24  ;;  %v1977_v30 = vrot.slane %v7530_v29, 7  ;;  %v7557_v58 = vmax.f32 %v1460_v9, 0.0  ;;  %v1237_v9 = vld [vmem:[#allocation6 + $0x320] sm:$0xff] }
  0xdd   : > { %2485 = vmatmul.mubr.f32.gmra.mxu0 %v7423_v55  ;;  %3266 = vmatprep.subr.mxu1 %v7401_v47  ;;  %v7547_v60 = vsel %vm1595_vm0, %v1637_v10, %v1639_v23  ;;  %12362 = vst [vmem:[#allocation34_spill] sm:$0xff] %v7553_v3  ;;  %v1238_v10 = vld [vmem:[#allocation6 + $0x328] sm:$0xff] }
  0xde   : > { %2489 = vmatprep.mubr.f32.mxu0 %v7516_v11  ;;  %3267 = vmatpush1.msra.mxu1 %v1240_v12  ;;  %v1736_v12 = vrot.slane %v7505_v8, 2  ;;  %v1735_v11 = vsel %vm1692_vm1, %v1732_v1, %v1734_v37  ;;  %v1461_v8 = vld [vmem:[%s6936_s10 + $0xd0] sm:$0xff]  ;;  %v7568_v42 = vsel %vm1827_vm2, %v1955_v54, %v1961_v59  ;;  %v1967_v1 = vrot.slane %v7547_v60, 7 }
  0xdf   : > { %2790 = vmatmul.mubr.f32.gmra.mxu1 %v7513_v18  ;;  %3268 = vmatprep.subr.mxu1 %v7401_v47  ;;  %v1641_v18 = vrot.slane %v7530_v29, 1  ;;  %12364 = vst [vmem:[#allocation36_spill] sm:$0xff] %v7568_v42  ;;  %v1983_v54 = vrot.slane %v7557_v58, 7  ;;  %v7582_v60 = vmax.f32 %v1461_v8, 0.0 }
  0xe0   : > { %2794 = vmatprep.mubr.f32.mxu1 %v7527_v40  ;;  %3269 = vmatpush1.msra.mxu1 %v1239_v0  ;;  %v7565_v0 = vsel %vm1827_vm2, %v1951_v33, %v1957_v61  ;;  %v7579_v33 = vsel %vm1827_vm2, %v1971_v24, %v1977_v30 }
  0xe1   : > { %2490 = vmatmul.mubr.f32.gmra.mxu0 %v7449_v62  ;;  %2995 = vmatprep.subr.mxu0 %v7401_v47  ;;  %12363 = vst [vmem:[#allocation35_spill] sm:$0xff] %v7565_v0  ;;  %v1963_v62 = vrot.slane %v1735_v11, 7  ;;  %v1642_v55 = vsel %vm1595_vm0, %v1639_v23, %v1641_v18  ;;  %12365 = vst [vmem:[#allocation37_spill] sm:$0xff] %v7579_v33  ;;  %v1236_v11 = vld [vmem:[#allocation6 + $0x318] sm:$0xff] }
  0xe2   : > { %2494 = vmatprep.mubr.f32.mxu0 %v7538_v22  ;;  %3270 = vmatprep.subr.mxu1 %v7401_v47  ;;  %v7573_v22 = vsel %vm1692_vm1, %v1734_v37, %v1736_v12  ;;  %v1462_v23 = vld [vmem:[%s6936_s10 + $0xd8] sm:$0xff]  ;;  %v7590_v37 = vsel %vm1827_vm2, %v1961_v59, %v1967_v1  ;;  %v1222_v59 = vld [vmem:[#allocation6 + $0x2a8] sm:$0xff] }
  0xe3   : > { %2795 = vmatmul.mubr.f32.gmra.mxu1 %v7544_v44  ;;  %2996 = vmatpush2.msra.mxu0 %v1223_v31  ;;  %v1643_v44 = vrot.slane %v7557_v58, 1  ;;  %v1738_v31 = vrot.slane %v7530_v29, 2  ;;  %12366 = vst [vmem:[#allocation38_spill] sm:$0xff] %v7590_v37  ;;  %v1969_v24 = vrot.slane %v7573_v22, 7  ;;  %v7596_v29 = vsel %vm1827_vm2, %v1957_v61, %v1963_v62 }
  0xe4   : > { %2799 = vmatprep.mubr.f32.mxu1 %v7553_v3  ;;  %3271 = vmatpush1.msra.mxu1 %v1238_v10  ;;  %v1973_v10 = vrot.slane %v1642_v55, 7  ;;  %12367 = vst [vmem:[#allocation39_spill] sm:$0xff] %v7596_v29  ;;  %v7605_v55 = vsel %vm1827_vm2, %v1977_v30, %v1983_v54  ;;  %v1989_v22 = vrot.slane %v7582_v60, 7  ;;  %v7609_v61 = vmax.f32 %v1462_v23, 0.0  ;;  %v1234_v23 = vld [vmem:[#allocation6 + $0x308] sm:$0xff] }
  0xe5   : > { %2495 = vmatmul.mubr.f32.gmra.mxu0 %v7475_v35  ;;  %3272 = vmatprep.subr.mxu1 %v7401_v47  ;;  %v7599_v8 = vsel %vm1595_vm0, %v1641_v18, %v1643_v44  ;;  %12368 = vst [vmem:[#allocation40_spill] sm:$0xff] %v7605_v55  ;;  %v1235_v18 = vld [vmem:[#allocation6 + $0x310] sm:$0xff] }
  0xe6   : > { %2499 = vmatprep.mubr.f32.mxu0 %v7568_v42  ;;  %3273 = vmatpush1.msra.mxu1 %v1237_v9  ;;  %v1740_v9 = vrot.slane %v7557_v58, 2  ;;  %v1739_v42 = vsel %vm1692_vm1, %v1736_v12, %v1738_v31  ;;  %v1463_v58 = vld [vmem:[%s6936_s10 + $0xe0] sm:$0xff]  ;;  %v7620_v30 = vsel %vm1827_vm2, %v1967_v1, %v1973_v10  ;;  %v1979_v12 = vrot.slane %v7599_v8, 7 }
  0xe7   : > { %2800 = vmatmul.mubr.f32.gmra.mxu1 %v7565_v0  ;;  %3274 = vmatprep.subr.mxu1 %v7401_v47  ;;  %v1645_v0 = vrot.slane %v7582_v60, 1  ;;  %12370 = vst [vmem:[#allocation42_spill] sm:$0xff] %v7620_v30  ;;  %v1995_v1 = vrot.slane %v7609_v61, 7  ;;  %v7634_v8 = vmax.f32 %v1463_v58, 0.0 }
  0xe8   : > { %2804 = vmatprep.mubr.f32.mxu1 %v7579_v33  ;;  %3275 = vmatpush1.msra.mxu1 %v1236_v11  ;;  %v7617_v11 = vsel %vm1827_vm2, %v1963_v62, %v1969_v24  ;;  %v7631_v62 = vsel %vm1827_vm2, %v1983_v54, %v1989_v22 }
  0xe9   : > { %2500 = vmatmul.mubr.f32.gmra.mxu0 %v7501_v38  ;;  %2997 = vmatprep.subr.mxu0 %v7401_v47  ;;  %12369 = vst [vmem:[#allocation41_spill] sm:$0xff] %v7617_v11  ;;  %v1975_v38 = vrot.slane %v1739_v42, 7  ;;  %v1646_v35 = vsel %vm1595_vm0, %v1643_v44, %v1645_v0  ;;  %12371 = vst [vmem:[#allocation43_spill] sm:$0xff] %v7631_v62  ;;  %v1233_v42 = vld [vmem:[#allocation6 + $0x300] sm:$0xff]  ;;  %v1464_v44 = vld [vmem:[%s6936_s10 + $0xe8] sm:$0xff] }
  0xea   : > { %2504 = vmatprep.mubr.f32.mxu0 %v7590_v37  ;;  %3276 = vmatprep.subr.mxu1 %v7401_v47  ;;  %v7625_v37 = vsel %vm1692_vm1, %v1738_v31, %v1740_v9  ;;  %v7642_v31 = vsel %vm1827_vm2, %v1973_v10, %v1979_v12  ;;  %v1221_v10 = vld [vmem:[#allocation6 + $0x2a0] sm:$0xff] }
  0xeb   : > { %2805 = vmatmul.mubr.f32.gmra.mxu1 %v7596_v29  ;;  %2998 = vmatpush2.msra.mxu0 %v1222_v59  ;;  %v1647_v29 = vrot.slane %v7609_v61, 1  ;;  %v1742_v59 = vrot.slane %v7582_v60, 2  ;;  %12372 = vst [vmem:[#allocation44_spill] sm:$0xff] %v7642_v31  ;;  %v1981_v54 = vrot.slane %v7625_v37, 7  ;;  %v7648_v60 = vsel %vm1827_vm2, %v1969_v24, %v1975_v38 }
  0xec   : > { %2809 = vmatprep.mubr.f32.mxu1 %v7605_v55  ;;  %3277 = vmatpush1.msra.mxu1 %v1235_v18  ;;  %v1985_v18 = vrot.slane %v1646_v35, 7  ;;  %12373 = vst [vmem:[#allocation45_spill] sm:$0xff] %v7648_v60  ;;  %v7657_v35 = vsel %vm1827_vm2, %v1989_v22, %v1995_v1  ;;  %v2001_v37 = vrot.slane %v7634_v8, 7  ;;  %v7661_v24 = vmax.f32 %v1464_v44, 0.0  ;;  %v1263_v44 = vld [vmem:[#allocation6 + $0x3f0] sm:$0xff] }
  0xed   : > { %2505 = vmatmul.mubr.f32.gmra.mxu0 %v7527_v40  ;;  %3278 = vmatprep.subr.mxu1 %v7401_v47  ;;  %v7651_v58 = vsel %vm1595_vm0, %v1645_v0, %v1647_v29  ;;  %12374 = vst [vmem:[#allocation46_spill] sm:$0xff] %v7657_v35  ;;  %v1264_v0 = vld [vmem:[#allocation6 + $0x3f8] sm:$0xff] }
  0xee   : > { %2509 = vmatprep.mubr.f32.mxu0 %v7620_v30  ;;  %3279 = vmatpush1.msra.mxu1 %v1234_v23  ;;  %v1744_v23 = vrot.slane %v7609_v61, 2  ;;  %v1743_v30 = vsel %vm1692_vm1, %v1740_v9, %v1742_v59  ;;  %v1465_v61 = vld [vmem:[%s6936_s10 + $0xf0] sm:$0xff]  ;;  %v7672_v22 = vsel %vm1827_vm2, %v1979_v12, %v1985_v18  ;;  %v1991_v9 = vrot.slane %v7651_v58, 7 }
  0xef   : > { %2810 = vmatmul.mubr.f32.gmra.mxu1 %v7617_v11  ;;  %3280 = vmatprep.subr.mxu1 %v7401_v47  ;;  %v1649_v11 = vrot.slane %v7634_v8, 1  ;;  %12376 = vst [vmem:[#allocation48_spill] sm:$0xff] %v7672_v22  ;;  %v2007_v12 = vrot.slane %v7661_v24, 7  ;;  %v7686_v58 = vmax.f32 %v1465_v61, 0.0 }
  0xf0   : > { %2814 = vmatprep.mubr.f32.mxu1 %v7631_v62  ;;  %3281 = vmatpush1.msra.mxu1 %v1233_v42  ;;  %v7669_v42 = vsel %vm1827_vm2, %v1975_v38, %v1981_v54  ;;  %v7683_v38 = vsel %vm1827_vm2, %v1995_v1, %v2001_v37 }
  0xf1   : > { %2510 = vmatmul.mubr.f32.gmra.mxu0 %v7553_v3  ;;  %2999 = vmatprep.subr.mxu0 %v7401_v47  ;;  %12375 = vst [vmem:[#allocation47_spill] sm:$0xff] %v7669_v42  ;;  %v1987_v3 = vrot.slane %v1743_v30, 7  ;;  %v1650_v40 = vsel %vm1595_vm0, %v1647_v29, %v1649_v11  ;;  %12377 = vst [vmem:[#allocation49_spill] sm:$0xff] %v7683_v38  ;;  %v1262_v30 = vld [vmem:[#allocation6 + $0x3e8] sm:$0xff]  ;;  %v1466_v29 = vld [vmem:[%s6936_s10 + $0xf8] sm:$0xff] }
  0xf2   : > { %2514 = vmatprep.mubr.f32.mxu0 %v7642_v31  ;;  %3282 = vmatprep.subr.mxu1 %v7401_v47  ;;  %v7677_v31 = vsel %vm1692_vm1, %v1742_v59, %v1744_v23  ;;  %v7694_v59 = vsel %vm1827_vm2, %v1985_v18, %v1991_v9  ;;  %v1220_v18 = vld [vmem:[#allocation6 + $0x298] sm:$0xff] }
  0xf3   : > { %2815 = vmatmul.mubr.f32.gmra.mxu1 %v7648_v60  ;;  %3000 = vmatpush2.msra.mxu0 %v1221_v10  ;;  %v1651_v60 = vrot.slane %v7661_v24, 1  ;;  %v1746_v10 = vrot.slane %v7634_v8, 2  ;;  %12378 = vst [vmem:[#allocation50_spill] sm:$0xff] %v7694_v59  ;;  %v1993_v1 = vrot.slane %v7677_v31, 7  ;;  %v7700_v8 = vsel %vm1827_vm2, %v1981_v54, %v1987_v3 }
  0xf4   : > { %2819 = vmatprep.mubr.f32.mxu1 %v7657_v35  ;;  %3283 = vmatpush2.msra.mxu1 %v1264_v0  ;;  %v1997_v0 = vrot.slane %v1650_v40, 7  ;;  %12379 = vst [vmem:[#allocation51_spill] sm:$0xff] %v7700_v8  ;;  %v7709_v40 = vsel %vm1827_vm2, %v2001_v37, %v2007_v12  ;;  %v2013_v31 = vrot.slane %v7686_v58, 7  ;;  %v7713_v54 = vmax.f32 %v1466_v29, 0.0  ;;  %v1260_v29 = vld [vmem:[#allocation6 + $0x3d8] sm:$0xff] }
  0xf5   : > { %2515 = vmatmul.mubr.f32.gmra.mxu0 %v7579_v33  ;;  %3284 = vmatprep.subr.mxu1 %v7401_v47  ;;  %v7703_v61 = vsel %vm1595_vm0, %v1649_v11, %v1651_v60  ;;  %12380 = vst [vmem:[#allocation52_spill] sm:$0xff] %v7709_v40  ;;  %v1261_v11 = vld [vmem:[#allocation6 + $0x3e0] sm:$0xff] }
  0xf6   : > { %2519 = vmatprep.mubr.f32.mxu0 %v7672_v22  ;;  %3285 = vmatpush2.msra.mxu1 %v1263_v44  ;;  %v1748_v44 = vrot.slane %v7661_v24, 2  ;;  %v1747_v22 = vsel %vm1692_vm1, %v1744_v23, %v1746_v10  ;;  %v1467_v24 = vld [vmem:[%s6936_s10 + $0x100] sm:$0xff]  ;;  %v7724_v37 = vsel %vm1827_vm2, %v1991_v9, %v1997_v0  ;;  %v2003_v23 = vrot.slane %v7703_v61, 7 }
  0xf7   : > { %2820 = vmatmul.mubr.f32.gmra.mxu1 %v7669_v42  ;;  %3286 = vmatprep.subr.mxu1 %v7401_v47  ;;  %v1653_v42 = vrot.slane %v7686_v58, 1  ;;  %12382 = vst [vmem:[#allocation54_spill] sm:$0xff] %v7724_v37  ;;  %v2019_v9 = vrot.slane %v7713_v54, 7  ;;  %v7738_v61 = vmax.f32 %v1467_v24, 0.0 }
  0xf8   : > { %2824 = vmatprep.mubr.f32.mxu1 %v7683_v38  ;;  %3287 = vmatpush2.msra.mxu1 %v1262_v30  ;;  %v7721_v30 = vsel %vm1827_vm2, %v1987_v3, %v1993_v1  ;;  %v7735_v3 = vsel %vm1827_vm2, %v2007_v12, %v2013_v31 }
  0xf9   : > { %2520 = vmatmul.mubr.f32.gmra.mxu0 %v7605_v55  ;;  %3001 = vmatprep.subr.mxu0 %v7401_v47  ;;  %12381 = vst [vmem:[#allocation53_spill] sm:$0xff] %v7721_v30  ;;  %v1999_v55 = vrot.slane %v1747_v22, 7  ;;  %v1654_v33 = vsel %vm1595_vm0, %v1651_v60, %v1653_v42  ;;  %12383 = vst [vmem:[#allocation55_spill] sm:$0xff] %v7735_v3  ;;  %v1259_v22 = vld [vmem:[#allocation6 + $0x3d0] sm:$0xff]  ;;  %v1468_v60 = vld [vmem:[%s6936_s10 + $0x108] sm:$0xff] }
  0xfa   : > { %2524 = vmatprep.mubr.f32.mxu0 %v7694_v59  ;;  %3288 = vmatprep.subr.mxu1 %v7401_v47  ;;  %v7729_v59 = vsel %vm1692_vm1, %v1746_v10, %v1748_v44  ;;  %v7746_v10 = vsel %vm1827_vm2, %v1997_v0, %v2003_v23  ;;  %v1219_v0 = vld [vmem:[#allocation6 + $0x290] sm:$0xff] }
  0xfb   : > { %2825 = vmatmul.mubr.f32.gmra.mxu1 %v7700_v8  ;;  %3002 = vmatpush2.msra.mxu0 %v1220_v18  ;;  %v1655_v8 = vrot.slane %v7713_v54, 1  ;;  %v1750_v18 = vrot.slane %v7686_v58, 2  ;;  %12384 = vst [vmem:[#allocation56_spill] sm:$0xff] %v7746_v10  ;;  %v2005_v12 = vrot.slane %v7729_v59, 7  ;;  %v7752_v58 = vsel %vm1827_vm2, %v1993_v1, %v1999_v55 }
  0xfc   : > { %2829 = vmatprep.mubr.f32.mxu1 %v7709_v40  ;;  %3289 = vmatpush2.msra.mxu1 %v1261_v11  ;;  %v2009_v11 = vrot.slane %v1654_v33, 7  ;;  %12385 = vst [vmem:[#allocation57_spill] sm:$0xff] %v7752_v58  ;;  %v7761_v33 = vsel %vm1827_vm2, %v2013_v31, %v2019_v9  ;;  %v2025_v59 = vrot.slane %v7738_v61, 7  ;;  %v7765_v1 = vmax.f32 %v1468_v60, 0.0  ;;  %v1257_v60 = vld [vmem:[#allocation6 + $0x3c0] sm:$0xff] }
  0xfd   : > { %2525 = vmatmul.mubr.f32.gmra.mxu0 %v7631_v62  ;;  %3290 = vmatprep.subr.mxu1 %v7401_v47  ;;  %v7755_v24 = vsel %vm1595_vm0, %v1653_v42, %v1655_v8  ;;  %12386 = vst [vmem:[#allocation58_spill] sm:$0xff] %v7761_v33  ;;  %v1258_v42 = vld [vmem:[#allocation6 + $0x3c8] sm:$0xff] }
  0xfe   : > { %2529 = vmatprep.mubr.f32.mxu0 %v7724_v37  ;;  %3291 = vmatpush2.msra.mxu1 %v1260_v29  ;;  %v1752_v29 = vrot.slane %v7713_v54, 2  ;;  %v1751_v37 = vsel %vm1692_vm1, %v1748_v44, %v1750_v18  ;;  %v1469_v54 = vld [vmem:[%s6936_s10 + $0x110] sm:$0xff]  ;;  %v7776_v31 = vsel %vm1827_vm2, %v2003_v23, %v2009_v11  ;;  %v2015_v44 = vrot.slane %v7755_v24, 7 }
  0xff   : > { %2830 = vmatmul.mubr.f32.gmra.mxu1 %v7721_v30  ;;  %3292 = vmatprep.subr.mxu1 %v7401_v47  ;;  %v1657_v30 = vrot.slane %v7738_v61, 1  ;;  %12388 = vst [vmem:[#allocation60_spill] sm:$0xff] %v7776_v31  ;;  %v2031_v23 = vrot.slane %v7765_v1, 7  ;;  %v7790_v24 = vmax.f32 %v1469_v54, 0.0 }
 0x100   : > { %2834 = vmatprep.mubr.f32.mxu1 %v7735_v3  ;;  %3293 = vmatpush2.msra.mxu1 %v1259_v22  ;;  %v7773_v22 = vsel %vm1827_vm2, %v1999_v55, %v2005_v12  ;;  %v7787_v55 = vsel %vm1827_vm2, %v2019_v9, %v2025_v59 }
 0x101   : > { %2530 = vmatmul.mubr.f32.gmra.mxu0 %v7657_v35  ;;  %3003 = vmatprep.subr.mxu0 %v7401_v47  ;;  %12387 = vst [vmem:[#allocation59_spill] sm:$0xff] %v7773_v22  ;;  %v2011_v35 = vrot.slane %v1751_v37, 7  ;;  %v1658_v62 = vsel %vm1595_vm0, %v1655_v8, %v1657_v30  ;;  %12389 = vst [vmem:[#allocation61_spill] sm:$0xff] %v7787_v55  ;;  %v1256_v37 = vld [vmem:[#allocation6 + $0x3b8] sm:$0xff] }
 0x102   : > { %2534 = vmatprep.mubr.f32.mxu0 %v7746_v10  ;;  %3294 = vmatprep.subr.mxu1 %v7401_v47  ;;  %v7781_v10 = vsel %vm1692_vm1, %v1750_v18, %v1752_v29  ;;  %v1470_v8 = vld [vmem:[%s6936_s10 + $0x118] sm:$0xff]  ;;  %v7798_v18 = vsel %vm1827_vm2, %v2009_v11, %v2015_v44  ;;  %v1218_v11 = vld [vmem:[#allocation6 + $0x288] sm:$0xff] }
 0x103   : > { %2835 = vmatmul.mubr.f32.gmra.mxu1 %v7752_v58  ;;  %3004 = vmatpush2.msra.mxu0 %v1219_v0  ;;  %v1659_v58 = vrot.slane %v7765_v1, 1  ;;  %v1754_v0 = vrot.slane %v7738_v61, 2  ;;  %12390 = vst [vmem:[#allocation62_spill] sm:$0xff] %v7798_v18  ;;  %v2017_v9 = vrot.slane %v7781_v10, 7  ;;  %v7804_v61 = vsel %vm1827_vm2, %v2005_v12, %v2011_v35 }
 0x104   : > { %2839 = vmatprep.mubr.f32.mxu1 %v7761_v33  ;;  %3295 = vmatpush2.msra.mxu1 %v1258_v42  ;;  %v2021_v42 = vrot.slane %v1658_v62, 7  ;;  %12391 = vst [vmem:[#allocation63_spill] sm:$0xff] %v7804_v61  ;;  %v7813_v62 = vsel %vm1827_vm2, %v2025_v59, %v2031_v23  ;;  %v2037_v10 = vrot.slane %v7790_v24, 7  ;;  %v7817_v12 = vmax.f32 %v1470_v8, 0.0  ;;  %v1254_v8 = vld [vmem:[#allocation6 + $0x3a8] sm:$0xff] }
 0x105   : > { %2535 = vmatmul.mubr.f32.gmra.mxu0 %v7683_v38  ;;  %3296 = vmatprep.subr.mxu1 %v7401_v47  ;;  %v7807_v54 = vsel %vm1595_vm0, %v1657_v30, %v1659_v58  ;;  %12392 = vst [vmem:[#allocation64_spill] sm:$0xff] %v7813_v62  ;;  %v1255_v30 = vld [vmem:[#allocation6 + $0x3b0] sm:$0xff] }
 0x106   : > { %2539 = vmatprep.mubr.f32.mxu0 %v7776_v31  ;;  %3297 = vmatpush2.msra.mxu1 %v1257_v60  ;;  %v1756_v60 = vrot.slane %v7765_v1, 2  ;;  %v1755_v31 = vsel %vm1692_vm1, %v1752_v29, %v1754_v0  ;;  %v1471_v1 = vld [vmem:[%s6936_s10 + $0x120] sm:$0xff]  ;;  %v7828_v59 = vsel %vm1827_vm2, %v2015_v44, %v2021_v42  ;;  %v2027_v29 = vrot.slane %v7807_v54, 7 }
 0x107   : > { %2840 = vmatmul.mubr.f32.gmra.mxu1 %v7773_v22  ;;  %3298 = vmatprep.subr.mxu1 %v7401_v47  ;;  %v1661_v22 = vrot.slane %v7790_v24, 1  ;;  %12394 = vst [vmem:[#allocation66_spill] sm:$0xff] %v7828_v59  ;;  %v2043_v44 = vrot.slane %v7817_v12, 7  ;;  %v7842_v54 = vmax.f32 %v1471_v1, 0.0 }
 0x108   : > { %2844 = vmatprep.mubr.f32.mxu1 %v7787_v55  ;;  %3299 = vmatpush2.msra.mxu1 %v1256_v37  ;;  %v7825_v37 = vsel %vm1827_vm2, %v2011_v35, %v2017_v9  ;;  %v7839_v35 = vsel %vm1827_vm2, %v2031_v23, %v2037_v10 }
 0x109   : > { %2540 = vmatmul.mubr.f32.gmra.mxu0 %v7709_v40  ;;  %3005 = vmatprep.subr.mxu0 %v7401_v47  ;;  %12393 = vst [vmem:[#allocation65_spill] sm:$0xff] %v7825_v37  ;;  %v2023_v40 = vrot.slane %v1755_v31, 7  ;;  %v1662_v38 = vsel %vm1595_vm0, %v1659_v58, %v1661_v22  ;;  %12395 = vst [vmem:[#allocation67_spill] sm:$0xff] %v7839_v35  ;;  %v1253_v31 = vld [vmem:[#allocation6 + $0x3a0] sm:$0xff]  ;;  %v1472_v58 = vld [vmem:[%s6936_s10 + $0x128] sm:$0xff] }
 0x10a   : > { %2544 = vmatprep.mubr.f32.mxu0 %v7798_v18  ;;  %3300 = vmatprep.subr.mxu1 %v7401_v47  ;;  %v7833_v18 = vsel %vm1692_vm1, %v1754_v0, %v1756_v60  ;;  %v7850_v0 = vsel %vm1827_vm2, %v2021_v42, %v2027_v29  ;;  %v1217_v42 = vld [vmem:[#allocation6 + $0x280] sm:$0xff] }
 0x10b   : > { %2845 = vmatmul.mubr.f32.gmra.mxu1 %v7804_v61  ;;  %3006 = vmatpush2.msra.mxu0 %v1218_v11  ;;  %v1663_v61 = vrot.slane %v7817_v12, 1  ;;  %v1758_v11 = vrot.slane %v7790_v24, 2  ;;  %12396 = vst [vmem:[#allocation68_spill] sm:$0xff] %v7850_v0  ;;  %v2029_v23 = vrot.slane %v7833_v18, 7  ;;  %v7856_v24 = vsel %vm1827_vm2, %v2017_v9, %v2023_v40 }
 0x10c   : > { %2849 = vmatprep.mubr.f32.mxu1 %v7813_v62  ;;  %3301 = vmatpush2.msra.mxu1 %v1255_v30  ;;  %v2033_v30 = vrot.slane %v1662_v38, 7  ;;  %12397 = vst [vmem:[#allocation69_spill] sm:$0xff] %v7856_v24  ;;  %v7865_v38 = vsel %vm1827_vm2, %v2037_v10, %v2043_v44  ;;  %v2049_v18 = vrot.slane %v7842_v54, 7  ;;  %v7869_v9 = vmax.f32 %v1472_v58, 0.0  ;;  %v1251_v58 = vld [vmem:[#allocation6 + $0x390] sm:$0xff] }
 0x10d   : > { %2545 = vmatmul.mubr.f32.gmra.mxu0 %v7735_v3  ;;  %3302 = vmatprep.subr.mxu1 %v7401_v47  ;;  %v7859_v1 = vsel %vm1595_vm0, %v1661_v22, %v1663_v61  ;;  %12398 = vst [vmem:[#allocation70_spill] sm:$0xff] %v7865_v38  ;;  %v1252_v22 = vld [vmem:[#allocation6 + $0x398] sm:$0xff] }
 0x10e   : > { %2549 = vmatprep.mubr.f32.mxu0 %v7828_v59  ;;  %3303 = vmatpush2.msra.mxu1 %v1254_v8  ;;  %v1760_v8 = vrot.slane %v7817_v12, 2  ;;  %v1759_v59 = vsel %vm1692_vm1, %v1756_v60, %v1758_v11  ;;  %v1473_v12 = vld [vmem:[%s6936_s10 + $0x130] sm:$0xff]  ;;  %v7880_v10 = vsel %vm1827_vm2, %v2027_v29, %v2033_v30  ;;  %v2039_v60 = vrot.slane %v7859_v1, 7 }
 0x10f   : > { %2850 = vmatmul.mubr.f32.gmra.mxu1 %v7825_v37  ;;  %3304 = vmatprep.subr.mxu1 %v7401_v47  ;;  %v1665_v37 = vrot.slane %v7842_v54, 1  ;;  %12400 = vst [vmem:[#allocation72_spill] sm:$0xff] %v7880_v10  ;;  %v2055_v29 = vrot.slane %v7869_v9, 7  ;;  %v7892_v1 = vmax.f32 %v1473_v12, 0.0  ;;  %v7903_v12 = vld [vmem:[#allocation6 + $0x478] sm:$0xff] }
 0x110   : > { %2854 = vmatprep.mubr.f32.mxu1 %v7839_v35  ;;  %3305 = vmatpush2.msra.mxu1 %v1253_v31  ;;  %v7877_v31 = vsel %vm1827_vm2, %v2023_v40, %v2029_v23  ;;  %v7889_v40 = vsel %vm1827_vm2, %v2043_v44, %v2049_v18 }
 0x111   : > { %2550 = vmatmul.mubr.f32.gmra.mxu0 %v7761_v33  ;;  %3007 = vmatprep.subr.mxu0 %v7401_v47  ;;  %12399 = vst [vmem:[#allocation71_spill] sm:$0xff] %v7877_v31  ;;  %v2035_v33 = vrot.slane %v1759_v59, 7  ;;  %v1666_v3 = vsel %vm1595_vm0, %v1663_v61, %v1665_v37  ;;  %12401 = vst [vmem:[#allocation73_spill] sm:$0xff] %v7889_v40  ;;  %v1250_v59 = vld [vmem:[#allocation6 + $0x388] sm:$0xff]  ;;  %v1474_v61 = vld [vmem:[%s6936_s10 + $0x138] sm:$0xff] }
 0x112   : > { %2554 = vmatprep.mubr.f32.mxu0 %v7850_v0  ;;  %3306 = vmatprep.subr.mxu1 %v7401_v47  ;;  %v1761_v0 = vsel %vm1692_vm1, %v1758_v11, %v1760_v8  ;;  %v7900_v11 = vsel %vm1827_vm2, %v2033_v30, %v2039_v60 }
 0x113   : > { %2855 = vmatmul.mubr.f32.gmra.mxu1 %v7856_v24  ;;  %3008 = vmatpush2.msra.mxu0 %v1217_v42  ;;  %v1667_v24 = vrot.slane %v7869_v9, 1  ;;  %v1762_v42 = vrot.slane %v7842_v54, 2  ;;  %12402 = vst [vmem:[#allocation74_spill] sm:$0xff] %v7900_v11  ;;  %v2041_v44 = vrot.slane %v1761_v0, 7  ;;  %v7907_v54 = vsel %vm1827_vm2, %v2029_v23, %v2035_v33  ;;  %v1249_v23 = vld [vmem:[#allocation6 + $0x380] sm:$0xff] }
 0x114   : > { %2859 = vmatprep.mubr.f32.mxu1 %v7865_v38  ;;  %3307 = vmatpush2.msra.mxu1 %v1252_v22  ;;  %v2045_v22 = vrot.slane %v1666_v3, 7  ;;  %12403 = vst [vmem:[#allocation75_spill] sm:$0xff] %v7907_v54  ;;  %v7914_v3 = vsel %vm1827_vm2, %v2049_v18, %v2055_v29  ;;  %v2061_v0 = vrot.slane %v7892_v1, 7 }
 0x115   : > { %2555 = vmatmul.mubr.f32.gmra.mxu0 %v7787_v55  ;;  %3308 = vmatprep.subr.mxu1 %v7401_v47  ;;  %12404 = vst [vmem:[#allocation76_spill] sm:$0xff] %v7914_v3  ;;  %v1763_v30 = vsel %vm1692_vm1, %v1760_v8, %v1762_v42  ;;  %v7918_v55 = vmax.f32 %v1474_v61, 0.0 }
 0x116   : > { %2559 = vmatprep.mubr.f32.mxu0 %v7880_v10  ;;  %3309 = vmatpush2.msra.mxu1 %v1251_v58  ;;  %v1668_v10 = vsel %vm1595_vm0, %v1665_v37, %v1667_v24  ;;  %v1764_v58 = vrot.slane %v7869_v9, 2  ;;  %v1475_v37 = vld [vmem:[%s6936_s10 + $0x140] sm:$0xff]  ;;  %v7926_v9 = vsel %vm1827_vm2, %v2035_v33, %v2041_v44  ;;  %v7929_v18 = vsel %vm1827_vm2, %v2039_v60, %v2045_v22 }
 0x117   : > { %2860 = vmatmul.mubr.f32.gmra.mxu1 %v7877_v31  ;;  %3310 = vmatprep.subr.mxu1 %v7401_v47  ;;  %v1669_v31 = vrot.slane %v7892_v1, 1  ;;  %12405 = vst [vmem:[#allocation77_spill] sm:$0xff] %v7926_v9  ;;  %12406 = vst [vmem:[#allocation78_spill] sm:$0xff] %v7929_v18  ;;  %v2051_v8 = vrot.slane %v1668_v10, 7  ;;  %v7937_v33 = vsel %vm1827_vm2, %v2055_v29, %v2061_v0  ;;  %v1531_v60 = vmax.f32 %v1475_v37, 0.0 }
 0x118   : > { %2864 = vmatprep.mubr.f32.mxu1 %v7889_v40  ;;  %3311 = vmatpush2.msra.mxu1 %v1250_v59  ;;  %v2047_v59 = vrot.slane %v1763_v30, 7  ;;  %v1765_v61 = vsel %vm1692_vm1, %v1762_v42, %v1764_v58  ;;  %v1766_v10 = vrot.slane %v7892_v1, 2  ;;  %v1476_v42 = vld [vmem:[%s6936_s10 + $0x148] sm:$0xff] }
 0x119   : > { %2560 = vmatmul.mubr.f32.gmra.mxu0 %v7813_v62  ;;  %3312 = vmatprep.subr.mxu1 %v7401_v47  ;;  %v1671_v62 = vrot.slane %v7918_v55, 1  ;;  %v2053_v30 = vrot.slane %v1765_v61, 7  ;;  %v1673_v37 = vrot.slane %v1531_v60, 1  ;;  %v1532_v61 = vmax.f32 %v1476_v42, 0.0 }
 0x11a   : > { %2564 = vmatprep.mubr.f32.mxu0 %v7900_v11  ;;  %6041 = vmatprep.subr.mxu0 %v7903_v12  ;;  %v1670_v11 = vsel %vm1595_vm0, %v1667_v24, %v1669_v31  ;;  %v7946_v24 = vsel %vm1827_vm2, %v2045_v22, %v2051_v8  ;;  %v7950_v29 = vsel %vm1827_vm2, %v2041_v44, %v2047_v59 }
 0x11b   : > { %2865 = vmatmul.mubr.f32.gmra.mxu1 %v7907_v54  ;;  %v2067_v54 = vrot.slane %v7918_v55, 7  ;;  %12407 = vst [vmem:[#allocation79_spill] sm:$0xff] %v7946_v24  ;;  %12408 = vst [vmem:[#allocation80_spill] sm:$0xff] %v7950_v29  ;;  %v1672_v1 = vsel %vm1595_vm0, %v1669_v31, %v1671_v62  ;;  %v1767_v22 = vsel %vm1692_vm1, %v1764_v58, %v1766_v10  ;;  %v1675_v42 = vrot.slane %v1532_v61, 1 }
 0x11c   : > { %2869 = vmatprep.mubr.f32.mxu1 %v7914_v3  ;;  %3313 = vmatpush2.msra.mxu1 %v1249_v23  ;;  %v2057_v23 = vrot.slane %v1670_v11, 7  ;;  %v1477_v11 = vld [vmem:[%s6936_s10 + $0x150] sm:$0xff]  ;;  %v7963_v31 = vsel %vm1827_vm2, %v2047_v59, %v2053_v30  ;;  %v2063_v44 = vrot.slane %v1672_v1, 7  ;;  %v1674_v58 = vsel %vm1595_vm0, %v1671_v62, %v1673_v37 }
 0x11d   : > { %2565 = vmatmul.mubr.f32.gmra.mxu0 %v7839_v35  ;;  %4172 = vmatprep.subr.mxu1 %v7401_v47  ;;  %v1768_v47 = vrot.slane %v7918_v55, 2  ;;  %12410 = vst [vmem:[#allocation82_spill] sm:$0xff] %v7963_v31  ;;  %v1533_v59 = vmax.f32 %v1477_v11, 0.0  ;;  %v1770_v35 = vrot.slane %v1531_v60, 2  ;;  %v2069_v62 = vrot.slane %v1674_v58, 7 }
 0x11e   : > { %2569 = vmatprep.mubr.f32.mxu0 %v7929_v18  ;;  %v7956_v18 = vsel %vm1827_vm2, %v2061_v0, %v2067_v54  ;;  %v7966_v55 = vsel %vm1827_vm2, %v2051_v8, %v2057_v23  ;;  %v2059_v0 = vrot.slane %v1767_v22, 7  ;;  %v1478_v8 = vld [vmem:[%s6936_s10 + $0x158] sm:$0xff]  ;;  %v7979_v1 = vsel %vm1827_vm2, %v2057_v23, %v2063_v44 }
 0x11f   : > { %2870 = vmatmul.mubr.f32.gmra.mxu1 %v7926_v9  ;;  %12409 = vst [vmem:[#allocation81_spill] sm:$0xff] %v7956_v18  ;;  %v2073_v9 = vrot.slane %v1531_v60, 7  ;;  %12411 = vst [vmem:[#allocation83_spill] sm:$0xff] %v7966_v55  ;;  %v1772_v22 = vrot.slane %v1532_v61, 2  ;;  %v1676_v11 = vsel %vm1595_vm0, %v1673_v37, %v1675_v42  ;;  %v1677_v60 = vrot.slane %v1533_v59, 1 }
 0x120   : > { %2874 = vmatprep.mubr.f32.mxu1 %v7937_v33  ;;  %12413 = vst [vmem:[#allocation85_spill] sm:$0xff] %v7979_v1  ;;  %v1771_v23 = vsel %vm1692_vm1, %v1768_v47, %v1770_v35  ;;  %v7998_v37 = vsel %vm1827_vm2, %v2063_v44, %v2069_v62 }
 0x121   : > { %2570 = vmatmul.mubr.f32.gmra.mxu0 %v7865_v38  ;;  %v1769_v38 = vsel %vm1692_vm1, %v1766_v10, %v1768_v47  ;;  %12417 = vst [vmem:[#allocation89_spill] sm:$0xff] %v7998_v37  ;;  %v2071_v58 = vrot.slane %v1771_v23, 7  ;;  %v1678_v47 = vsel %vm1595_vm0, %v1675_v42, %v1677_v60 }
 0x122   : > { %2574 = vmatprep.mubr.f32.mxu0 %v7946_v24  ;;  %v7973_v24 = vsel %vm1827_vm2, %v2067_v54, %v2073_v9  ;;  %v2065_v10 = vrot.slane %v1769_v38, 7  ;;  %v7983_v54 = vsel %vm1827_vm2, %v2053_v30, %v2059_v0  ;;  %v1479_v38 = vld [vmem:[%s6936_s10 + $0x160] sm:$0xff]  ;;  %v2081_v42 = vrot.slane %v1678_v47, 7 }
 0x123   : > { %2875 = vmatmul.mubr.f32.gmra.mxu1 %v7950_v29  ;;  %12412 = vst [vmem:[#allocation84_spill] sm:$0xff] %v7973_v24  ;;  %v2079_v29 = vrot.slane %v1532_v61, 7  ;;  %12414 = vst [vmem:[#allocation86_spill] sm:$0xff] %v7983_v54  ;;  %v2075_v61 = vrot.slane %v1676_v11, 7 }
 0x124   : > { %2879 = vmatprep.mubr.f32.mxu1 %v7956_v18  ;;  %v7995_v30 = vsel %vm1827_vm2, %v2059_v0, %v2065_v10 }
 0x125   : > { %2575 = vmatmul.mubr.f32.gmra.mxu0 %v7889_v40  ;;  %v1534_v40 = vmax.f32 %v1478_v8, 0.0  ;;  %12416 = vst [vmem:[#allocation88_spill] sm:$0xff] %v7995_v30  ;;  %v1774_v8 = vrot.slane %v1533_v59, 2  ;;  %v8013_v11 = vsel %vm1827_vm2, %v2069_v62, %v2075_v61 }
 0x126   : > { %2579 = vmatprep.mubr.f32.mxu0 %v7966_v55  ;;  %v7988_v55 = vsel %vm1827_vm2, %v2073_v9, %v2079_v29  ;;  %v1773_v9 = vsel %vm1692_vm1, %v1770_v35, %v1772_v22  ;;  %v1480_v35 = vld [vmem:[%s6936_s10 + $0x168] sm:$0xff]  ;;  %12419 = vst [vmem:[#allocation91_spill] sm:$0xff] %v8013_v11 }
 0x127   : > { %2880 = vmatmul.mubr.f32.gmra.mxu1 %v7963_v31  ;;  %12415 = vst [vmem:[#allocation87_spill] sm:$0xff] %v7988_v55  ;;  %v2085_v31 = vrot.slane %v1533_v59, 7  ;;  %v2091_v0 = vrot.slane %v1534_v40, 7  ;;  %v2077_v44 = vrot.slane %v1773_v9, 7  ;;  %v1776_v59 = vrot.slane %v1534_v40, 2 }
 0x128   : > { %2884 = vmatprep.mubr.f32.mxu1 %v7973_v24  ;;  %v1775_v23 = vsel %vm1692_vm1, %v1772_v22, %v1774_v8  ;;  %v8027_v47 = vmax.f32 %v1480_v35, 0.0  ;;  %v8036_v22 = vsel %vm1827_vm2, %v2075_v61, %v2081_v42 }
 0x129   : > { %2580 = vmatmul.mubr.f32.gmra.mxu0 %v7914_v3  ;;  %v8007_v3 = vmax.f32 %v1479_v38, 0.0  ;;  %v8024_v9 = vsel %vm1827_vm2, %v2085_v31, %v2091_v0  ;;  %12423 = vst [vmem:[#allocation95_spill] sm:$0xff] %v8036_v22 }
 0x12a   : > { %2584 = vmatprep.mubr.f32.mxu0 %v7979_v1  ;;  %v1679_v1 = vrot.slane %v1534_v40, 1  ;;  %12421 = vst [vmem:[#allocation93_spill] sm:$0xff] %v8024_v9  ;;  %v1481_v40 = vld [vmem:[%s6936_s10 + $0x170] sm:$0xff]  ;;  %v2103_v61 = vrot.slane %v8027_v47, 7 }
 0x12b   : > { %2885 = vmatmul.mubr.f32.gmra.mxu1 %v7983_v54  ;;  %v8005_v54 = vsel %vm1827_vm2, %v2079_v29, %v2085_v31  ;;  %v8017_v29 = vsel %vm1827_vm2, %v2065_v10, %v2071_v58  ;;  %v2097_v62 = vrot.slane %v8007_v3, 7  ;;  %v8032_v10 = vsel %vm1827_vm2, %v2071_v58, %v2077_v44 }
 0x12c   : > { %2889 = vmatprep.mubr.f32.mxu1 %v7988_v55  ;;  %12418 = vst [vmem:[#allocation90_spill] sm:$0xff] %v8005_v54  ;;  %12420 = vst [vmem:[#allocation92_spill] sm:$0xff] %v8017_v29  ;;  %v1680_v38 = vsel %vm1595_vm0, %v1677_v60, %v1679_v1  ;;  %v2083_v60 = vrot.slane %v1775_v23, 7  ;;  %v1777_v31 = vsel %vm1692_vm1, %v1774_v8, %v1776_v59  ;;  %v1683_v58 = vrot.slane %v8027_v47, 1  ;;  %v1482_v8 = vld [vmem:[%s6936_s10 + $0x178] sm:$0xff] }
 0x12d   : > { %2585 = vmatmul.mubr.f32.gmra.mxu0 %v7937_v33  ;;  %12422 = vst [vmem:[#allocation94_spill] sm:$0xff] %v8032_v10  ;;  %v2089_v23 = vrot.slane %v1777_v31, 7  ;;  %v1483_v31 = vld [vmem:[%s6936_s10 + $0x180] sm:$0xff] }
 0x12e   : > { %2589 = vmatprep.mubr.f32.mxu0 %v7998_v37  ;;  %v1681_v37 = vrot.slane %v8007_v3, 1 }
 0x12f   : > { %2890 = vmatmul.mubr.f32.gmra.mxu1 %v7995_v30  ;;  %v2087_v30 = vrot.slane %v1680_v38, 7 }
 0x130   : > { %2894 = vmatprep.mubr.f32.mxu1 %v8005_v54  ;;  %v1682_v35 = vsel %vm1595_vm0, %v1679_v1, %v1681_v37  ;;  %v8054_v1 = vsel %vm1827_vm2, %v2077_v44, %v2083_v60  ;;  %v8066_v44 = vsel %vm1827_vm2, %v2097_v62, %v2103_v61 }
 0x131   : > { %2590 = vmatmul.mubr.f32.gmra.mxu0 %v7956_v18  ;;  %v8041_v18 = vmax.f32 %v1481_v40, 0.0  ;;  %12424 = vst [vmem:[#allocation96_spill] sm:$0xff] %v8054_v1  ;;  %v2093_v38 = vrot.slane %v1682_v35, 7 }
 0x132   : > { %2594 = vmatprep.mubr.f32.mxu0 %v8013_v11  ;;  %v1778_v11 = vrot.slane %v8007_v3, 2  ;;  %v8057_v3 = vsel %vm1827_vm2, %v2081_v42, %v2087_v30  ;;  %v1780_v42 = vrot.slane %v8027_v47, 2 }
 0x133   : > { %2895 = vmatmul.mubr.f32.gmra.mxu1 %v8017_v29  ;;  %v8047_v29 = vsel %vm1827_vm2, %v2091_v0, %v2097_v62  ;;  %12425 = vst [vmem:[#allocation97_spill] sm:$0xff] %v8057_v3  ;;  %v2109_v0 = vrot.slane %v8041_v18, 7 }
 0x134   : > { %2899 = vmatprep.mubr.f32.mxu1 %v8024_v9  ;;  %v1779_v40 = vsel %vm1692_vm1, %v1776_v59, %v1778_v11  ;;  %v8073_v59 = vsel %vm1827_vm2, %v2087_v30, %v2093_v38  ;;  %v1539_v30 = vmax.f32 %v1483_v31, 0.0 }
 0x135   : > { %2595 = vmatmul.mubr.f32.gmra.mxu0 %v7973_v24  ;;  %v1685_v24 = vrot.slane %v8041_v18, 1  ;;  %12426 = vst [vmem:[#allocation98_spill] sm:$0xff] %v8073_v59  ;;  %v8080_v62 = vsel %vm1827_vm2, %v2103_v61, %v2109_v0 }
 0x136   : > { %2599 = vmatprep.mubr.f32.mxu0 %v8036_v22  ;;  %v1684_v22 = vsel %vm1595_vm0, %v1681_v37, %v1683_v58  ;;  %v2095_v37 = vrot.slane %v1779_v40, 7  ;;  %v1782_v40 = vrot.slane %v8041_v18, 2  ;;  %v8099_v18 = vrot.slane %v1539_v30, 1 }
 0x137   : > { %2900 = vmatmul.mubr.f32.gmra.mxu1 %v8032_v10  ;;  %v1538_v10 = vmax.f32 %v1482_v8, 0.0  ;;  %v2099_v35 = vrot.slane %v1684_v22, 7  ;;  %v1686_v47 = vsel %vm1595_vm0, %v1683_v58, %v1685_v24  ;;  %v1484_v22 = vld [vmem:[%s6936_s10 + $0x188] sm:$0xff] }
 0x138   : > { %2904 = vmatprep.mubr.f32.mxu1 %v8047_v29  ;;  %v2105_v61 = vrot.slane %v1686_v47, 7  ;;  %v8097_v31 = vmax.f32 %v1484_v22, 0.0  ;;  %v1485_v47 = vld [vmem:[%s6936_s10 + $0x190] sm:$0xff] }
 0x139   : > { %2600 = vmatmul.mubr.f32.gmra.mxu0 %v7988_v55  ;;  %v8077_v55 = vsel %vm1827_vm2, %v2083_v60, %v2089_v23  ;;  %v1687_v8 = vrot.slane %v1538_v10, 1  ;;  %v8090_v60 = vsel %vm1827_vm2, %v2089_v23, %v2095_v37  ;;  %v8093_v58 = vsel %vm1827_vm2, %v2093_v38, %v2099_v35 }
 0x13a   : > { %2604 = vmatprep.mubr.f32.mxu0 %v8057_v3  ;;  %12427 = vst [vmem:[#allocation99_spill] sm:$0xff] %v8077_v55  ;;  %v2115_v3 = vrot.slane %v1538_v10, 7  ;;  %12428 = vst [vmem:[#allocation100_spill] sm:$0xff] %v8090_v60  ;;  %v2121_v23 = vrot.slane %v1539_v30, 7  ;;  %v1784_v38 = vrot.slane %v1538_v10, 2 }
 0x13b   : > { %2905 = vmatmul.mubr.f32.gmra.mxu1 %v8054_v1  ;;  %v1781_v1 = vsel %vm1692_vm1, %v1778_v11, %v1780_v42  ;;  %12429 = vst [vmem:[#allocation101_spill] sm:$0xff] %v8093_v58  ;;  %v1688_v11 = vsel %vm1595_vm0, %v1685_v24, %v1687_v8  ;;  %v8110_v24 = vsel %vm1827_vm2, %v2099_v35, %v2105_v61 }
 0x13c   : > { %2909 = vmatprep.mubr.f32.mxu1 %v8066_v44  ;;  %v1690_v10 = vsel %vm1595_vm0, %v1687_v8, %v8099_v18  ;;  %v1785_v35 = vsel %vm1692_vm1, %v1782_v40, %v1784_v38 }
 0x13d   : > { %2605 = vmatmul.mubr.f32.gmra.mxu0 %v8005_v54  ;;  %v2101_v54 = vrot.slane %v1781_v1, 7  ;;  %v2111_v1 = vrot.slane %v1688_v11, 7  ;;  %v1786_v11 = vrot.slane %v1539_v30, 2 }
 0x13e   : > { %2609 = vmatprep.mubr.f32.mxu0 %v8073_v59  ;;  %v1783_v59 = vsel %vm1692_vm1, %v1780_v42, %v1782_v40  ;;  %v8121_v42 = vsel %vm1827_vm2, %v2115_v3, %v2121_v23  ;;  %v2113_v40 = vrot.slane %v1785_v35, 7 }
 0x13f   : > { %2910 = vmatmul.mubr.f32.gmra.mxu1 %v8077_v55  ;;  %v8103_v55 = vsel %vm1827_vm2, %v2109_v0, %v2115_v3  ;;  %v8114_v22 = vsel %vm1827_vm2, %v2095_v37, %v2101_v54  ;;  %v2107_v0 = vrot.slane %v1783_v59, 7  ;;  %v1486_v37 = vld [vmem:[%s6936_s10 + $0x198] sm:$0xff]  ;;  %v8130_v59 = vsel %vm1827_vm2, %v2105_v61, %v2111_v1 }
 0x140   : > { %2914 = vmatprep.mubr.f32.mxu1 %v8080_v62  ;;  %12430 = vst [vmem:[#allocation102_spill] sm:$0xff] %v8114_v22  ;;  %v12154_v61 = vrot.slane %v8097_v31, 2 }
 0x141   : > { %2610 = vmatmul.mubr.f32.gmra.mxu0 %v8024_v9  ;;  %v2127_v9 = vrot.slane %v8097_v31, 7  ;;  %v8136_v3 = vsel %vm1827_vm2, %v2101_v54, %v2107_v0 }
 0x142   : > { %2614 = vmatprep.mubr.f32.mxu0 %v8093_v58  ;;  %v8132_v58 = vrot.slane %v1690_v10, 7  ;;  %12431 = vst [vmem:[#allocation103_spill] sm:$0xff] %v8136_v3  ;;  %v8156_v10 = vsel %vm1827_vm2, %v2107_v0, %v2113_v40 }
 0x143   : > { %2915 = vmatmul.mubr.f32.gmra.mxu1 %v8090_v60  ;;  %v8124_v60 = vmax.f32 %v1485_v47, 0.0  ;;  %v8139_v8 = vsel %vm1827_vm2, %v2121_v23, %v2127_v9  ;;  %v1787_v47 = vsel %vm1692_vm1, %v1784_v38, %v1786_v11  ;;  %v2157_v23 = vrot.slane %v8099_v18, 7  ;;  %12433 = vst [vmem:[#allocation105_spill] sm:$0xff] %v8156_v10 }
 0x144   : > { %2919 = vmatprep.mubr.f32.mxu1 %v8103_v55  ;;  %12432 = vst [vmem:[#allocation104_spill] sm:$0xff] %v8139_v8  ;;  %v8151_v54 = vsel %vm1827_vm2, %v2111_v1, %v8132_v58  ;;  %v2119_v38 = vrot.slane %v1787_v47, 7  ;;  %v8166_v1 = vsel %vm1692_vm1, %v1786_v11, %v12154_v61  ;;  %v1843_v47 = vrot.slane %v7067_v39, 7 }
 0x145   : > { %2615 = vmatmul.mubr.f32.gmra.mxu0 %v8047_v29  ;;  %v2133_v30 = vrot.slane %v8124_v60, 7  ;;  %v2158_v0 = vsel %vm1827_vm2, %v8132_v58, %v2157_v23  ;;  %v1840_v23 = vrot.slane %v7038_v17, 7 }
 0x146   : > { %2619 = vmatprep.mubr.f32.mxu0 %v8110_v24  ;;  %v1845_v39 = vsel %vm1827_vm2, %v1843_v47, %v7125_v13  ;;  %v8204_v13 = vld [vmem:[%s11995_s2] ss:$0 sm:$0xff] }
 0x147   : > { %2920 = vmatmul.mubr.f32.gmra.mxu1 %v8114_v22  ;;  %v8144_v22 = vmax.f32 %v1486_v37, 0.0  ;;  %v8160_v35 = vsel %vm1827_vm2, %v2127_v9, %v2133_v30  ;;  %v8175_v9 = vsel %vm1827_vm2, %v2113_v40, %v2119_v38  ;;  %v12156_v37 = vrot.slane %v8166_v1, 7 }
 0x148   : > { %2924 = vmatprep.mubr.f32.mxu1 %v8121_v42  ;;  %12434 = vst [vmem:[#allocation106_spill] sm:$0xff] %v8175_v9  ;;  %v1842_v17 = vsel %vm1827_vm2, %v1840_v23, %v7101_v63 }
 0x149   : > { %2620 = vmatmul.mubr.f32.gmra.mxu0 %v8066_v44  ;;  %v12435_v11 = vrot.slane %v8144_v22, 7  ;;  %v8193_v40 = vsel %vm1827_vm2, %v2119_v38, %v12156_v37 }
 0x14a   : > { %2624 = vmatprep.mubr.f32.mxu0 %v8130_v59 }
 0x14b   : > { %2925 = vmatmul.mubr.f32.gmra.mxu1 %v8136_v3  ;;  %v8182_v61 = vsel %vm1827_vm2, %v2133_v30, %v12435_v11  ;;  %v1279_v30 = vld [vmem:[#allocation6 + $0x470] sm:$0xff]  ;;  %v1277_v11 = vld [vmem:[#allocation6 + $0x460] sm:$0xff] }
 0x14c   : > { %2929 = vmatprep.mubr.f32.mxu1 %v8139_v8  ;;  %v1849_v8 = vrot.slane %v7108_v4, 7 }
 0x14d   : > { %2625 = vmatmul.mubr.f32.gmra.mxu0 %v8080_v62 }
 0x14e   : > { %2629 = vmatprep.mubr.f32.mxu0 %v8151_v54  ;;  %v1851_v4 = vsel %vm1827_vm2, %v1849_v8, %v7174_v43  ;;  %v1278_v43 = vld [vmem:[#allocation6 + $0x468] sm:$0xff] }
 0x14f   : > { %2930 = vmatmul.mubr.f32.gmra.mxu1 %v8156_v10 }
 0x150   : > { %2934 = vmatprep.mubr.f32.mxu1 %v8160_v35 }
 0x151   : > { %2630 = vmatmul.mubr.f32.gmra.mxu0 %v8103_v55 }
 0x152   : > { %2634 = vmatprep.mubr.f32.mxu0 %v2158_v0 }
 0x153   : > { %2935 = vmatmul.mubr.f32.gmra.mxu1 %v8175_v9 }
 0x154   : > { %2939 = vmatprep.mubr.f32.mxu1 %v8182_v61 }
 0x155   : > { %2635 = vmatmul.mubr.f32.gmra.mxu0 %v8121_v42 }
 0x156   : > { %3009 = vmatprep.mubr.f32.mxu0 %v1845_v39 }
 0x157   : > { %2940 = vmatmul.mubr.f32.gmra.mxu1 %v8193_v40 }
 0x158   : > { %3314 = vmatprep.mubr.f32.mxu1 %v1851_v4 }
 0x159   : > { %v2401_v38 = vpop.f32.mrf.mxu0  ;;  %3010 = vmatmul.mubr.f32.vlgmr.msra.gmra.mxu0 %v1842_v17 }
 0x15a   : > { %v2402_v0 = vadd.f32 %v8204_v13, %v2401_v38  ;;  %6042 = vmatpush3.msra.mxu0 %v7903_v12  ;;  %3014 = vmatprep.mubr.f32.mxu0 %v7180_v45  ;;  %v1276_v45 = vld [vmem:[#allocation6 + $0x458] sm:$0xff] }
 0x15b   : > { %v2403_v8 = vpop.f32.mrf.mxu0  ;;  %v2706_v63 = vpop.f32.mrf.mxu1  ;;  %3315 = vmatmul.mubr.f32.vlgmr.msra.gmra.mxu1 %v7136_v20  ;;  %6043 = vmatprep.subr.mxu0 %v1279_v30 }
 0x15c   : > { %v8210_v47 = vadd.f32 %v2706_v63, %v2402_v0  ;;  %3319 = vmatprep.mubr.f32.mxu1 %v7228_v5  ;;  %6044 = vmatpush3.msra.mxu0 %v1279_v30  ;;  %v1275_v30 = vld [vmem:[#allocation6 + $0x450] sm:$0xff]  ;;  %v1274_v0 = vld [vmem:[#allocation6 + $0x448] sm:$0xff]  ;;  %v1273_v63 = vld [vmem:[#allocation6 + $0x440] sm:$0xff] }
 0x15d   : > { %v2406_v23 = vpop.f32.mrf.mxu0  ;;  %v2708_v39 = vpop.f32.mrf.mxu1  ;;  %3015 = vmatmul.mubr.f32.gmra.mxu0 %v7148_v27  ;;  %6045 = vmatprep.subr.mxu0 %v1278_v43 }
 0x15e   : > { %v2407_v12 = vadd.f32 %v8204_v13, %v2406_v23  ;;  %3019 = vmatprep.mubr.f32.mxu0 %v7199_v53  ;;  %6046 = vmatpush3.msra.mxu0 %v1278_v43  ;;  %v1272_v23 = vld [vmem:[#allocation6 + $0x438] sm:$0xff] }
 0x15f   : > { %v2408_v4 = vpop.f32.mrf.mxu0  ;;  %v2711_v20 = vpop.f32.mrf.mxu1  ;;  %3320 = vmatmul.mubr.f32.gmra.mxu1 %v7161_v34  ;;  %6047 = vmatprep.subr.mxu0 %v1277_v11 }
 0x160   : > { %v8217_v17 = vadd.f32 %v2711_v20, %v2407_v12  ;;  %3324 = vmatprep.mubr.f32.mxu1 %v7257_v28  ;;  %6048 = vmatpush3.msra.mxu0 %v1277_v11 }
 0x161   : > { %v2411_v38 = vpop.f32.mrf.mxu0  ;;  %v2713_v27 = vpop.f32.mrf.mxu1  ;;  %3020 = vmatmul.mubr.f32.gmra.mxu0 %v7171_v41  ;;  %6049 = vmatprep.subr.mxu0 %v1276_v45 }
 0x162   : > { %v2412_v53 = vadd.f32 %v8204_v13, %v2411_v38  ;;  %3024 = vmatprep.mubr.f32.mxu0 %v7235_v14  ;;  %6050 = vmatpush3.msra.mxu0 %v1276_v45  ;;  %v1271_v45 = vld [vmem:[#allocation6 + $0x430] sm:$0xff] }
 0x163   : > { %v2413_v43 = vpop.f32.mrf.mxu0  ;;  %v2716_v34 = vpop.f32.mrf.mxu1  ;;  %3325 = vmatmul.mubr.f32.gmra.mxu1 %v7187_v49  ;;  %6051 = vmatprep.subr.mxu0 %v1275_v30 }
 0x164   : > { %v8224_v8 = vadd.f32 %v2716_v34, %v2412_v53  ;;  %3329 = vmatprep.mubr.f32.mxu1 %v7279_v46  ;;  %6052 = vmatpush3.msra.mxu0 %v1275_v30  ;;  %v1270_v30 = vld [vmem:[#allocation6 + $0x428] sm:$0xff]  ;;  %v1269_v53 = vld [vmem:[#allocation6 + $0x420] sm:$0xff]  ;;  %v1268_v34 = vld [vmem:[#allocation6 + $0x418] sm:$0xff] }
 0x165   : > { %v2416_v11 = vpop.f32.mrf.mxu0  ;;  %v2718_v41 = vpop.f32.mrf.mxu1  ;;  %3025 = vmatmul.mubr.f32.gmra.mxu0 %v7203_v56  ;;  %6053 = vmatprep.subr.mxu0 %v1274_v0 }
 0x166   : > { %v2417_v14 = vadd.f32 %v8204_v13, %v2416_v11  ;;  %3029 = vmatprep.mubr.f32.mxu0 %v7254_v26  ;;  %6054 = vmatpush3.msra.mxu0 %v1274_v0 }
 0x167   : > { %v2418_v39 = vpop.f32.mrf.mxu0  ;;  %v2721_v49 = vpop.f32.mrf.mxu1  ;;  %3330 = vmatmul.mubr.f32.gmra.mxu1 %v7216_v2  ;;  %6055 = vmatprep.subr.mxu0 %v1273_v63 }
 0x168   : > { %v8231_v12 = vadd.f32 %v2721_v49, %v2417_v14  ;;  %3334 = vmatprep.mubr.f32.mxu1 %v7306_v7  ;;  %6056 = vmatpush3.msra.mxu0 %v1273_v63 }
 0x169   : > { %v2421_v4 = vpop.f32.mrf.mxu0  ;;  %v2723_v56 = vpop.f32.mrf.mxu1  ;;  %3030 = vmatmul.mubr.f32.gmra.mxu0 %v7228_v5  ;;  %6057 = vmatprep.subr.mxu0 %v1272_v23 }
 0x16a   : > { %v2422_v20 = vadd.f32 %v8204_v13, %v2421_v4  ;;  %3034 = vmatprep.mubr.f32.mxu0 %v7285_v51  ;;  %6058 = vmatpush3.msra.mxu0 %v1272_v23  ;;  %v1267_v4 = vld [vmem:[#allocation6 + $0x410] sm:$0xff] }
 0x16b   : > { %v2423_v38 = vpop.f32.mrf.mxu0  ;;  %v2726_v2 = vpop.f32.mrf.mxu1  ;;  %3335 = vmatmul.mubr.f32.gmra.mxu1 %v7242_v19  ;;  %6059 = vmatprep.subr.mxu0 %v1271_v45 }
 0x16c   : > { %v8238_v27 = vadd.f32 %v2726_v2, %v2422_v20  ;;  %3339 = vmatprep.mubr.f32.mxu1 %v7328_v25  ;;  %6060 = vmatpush3.msra.mxu0 %v1271_v45 }
 0x16d   : > { %v2426_v0 = vpop.f32.mrf.mxu0  ;;  %v2728_v5 = vpop.f32.mrf.mxu1  ;;  %3035 = vmatmul.mubr.f32.gmra.mxu0 %v7257_v28  ;;  %6061 = vmatprep.subr.mxu0 %v1270_v30 }
 0x16e   : > { %v2427_v43 = vadd.f32 %v8204_v13, %v2426_v0  ;;  %3039 = vmatprep.mubr.f32.mxu0 %v7303_v6  ;;  %6062 = vmatpush3.msra.mxu0 %v1270_v30  ;;  %v12436_v0 = vld [vmem:[#allocation15_spill] sm:$0xff] }
 0x16f   : > { %v2428_v63 = vpop.f32.mrf.mxu0  ;;  %v2731_v19 = vpop.f32.mrf.mxu1  ;;  %3340 = vmatmul.mubr.f32.gmra.mxu1 %v7268_v36  ;;  %6063 = vmatprep.subr.mxu0 %v1269_v53 }
 0x170   : > { %v8245_v11 = vadd.f32 %v2731_v19, %v2427_v43  ;;  %3344 = vmatprep.mubr.f32.mxu1 %v7357_v52  ;;  %6064 = vmatpush3.msra.mxu0 %v1269_v53  ;;  %v12439_v19 = vld [vmem:[#allocation18_spill] sm:$0xff] }
 0x171   : > { %v2431_v41 = vpop.f32.mrf.mxu0  ;;  %v2733_v14 = vpop.f32.mrf.mxu1  ;;  %3040 = vmatmul.mubr.f32.gmra.mxu0 %v7279_v46  ;;  %6065 = vmatprep.subr.mxu0 %v1268_v34 }
 0x172   : > { %v2432_v28 = vadd.f32 %v8204_v13, %v2431_v41  ;;  %3044 = vmatprep.mubr.f32.mxu0 %v7334_v32  ;;  %6066 = vmatpush3.msra.mxu0 %v1268_v34  ;;  %v12440_v14 = vld [vmem:[#allocation16_spill] sm:$0xff] }
 0x173   : > { %v2433_v23 = vpop.f32.mrf.mxu0  ;;  %v2736_v39 = vpop.f32.mrf.mxu1  ;;  %3345 = vmatmul.mubr.f32.gmra.mxu1 %v7292_v57  ;;  %6067 = vmatprep.subr.mxu0 %v1267_v4 }
 0x174   : > { %v8252_v36 = vadd.f32 %v2736_v39, %v2432_v28  ;;  %3349 = vmatprep.mubr.f32.mxu1 %v7380_v15  ;;  %6068 = vmatpush3.msra.mxu0 %v1267_v4  ;;  %v12442_v23 = vld [vmem:[#allocation24_spill] sm:$0xff] }
 0x175   : > { %v2436_v49 = vpop.f32.mrf.mxu0  ;;  %v2738_v45 = vpop.f32.mrf.mxu1  ;;  %3045 = vmatmul.mubr.f32.gmra.mxu0 %v7306_v7 }
 0x176   : > { %v2437_v46 = vadd.f32 %v8204_v13, %v2436_v49  ;;  %3049 = vmatprep.mubr.f32.mxu0 %v7354_v50 }
 0x177   : > { %v2438_v56 = vpop.f32.mrf.mxu0  ;;  %v2741_v20 = vpop.f32.mrf.mxu1  ;;  %3350 = vmatmul.mubr.f32.gmra.mxu1 %v7317_v16  ;;  %v12438_v16 = vld [vmem:[#allocation20_spill] sm:$0xff] }
 0x178   : > { %v8259_v30 = vadd.f32 %v2741_v20, %v2437_v46  ;;  %3354 = vmatprep.mubr.f32.mxu1 %v7412_v48  ;;  %v12443_v46 = vld [vmem:[#allocation21_spill] sm:$0xff] }
 0x179   : > { %v2441_v57 = vpop.f32.mrf.mxu0  ;;  %v2743_v38 = vpop.f32.mrf.mxu1  ;;  %3050 = vmatmul.mubr.f32.gmra.mxu0 %v7328_v25  ;;  %v12444_v20 = vld [vmem:[#allocation17_spill] sm:$0xff] }
 0x17a   : > { %v2442_v7 = vadd.f32 %v8204_v13, %v2441_v57  ;;  %3054 = vmatprep.mubr.f32.mxu0 %v7386_v21  ;;  %v12446_v38 = vld [vmem:[#allocation26_spill] sm:$0xff] }
 0x17b   : > { %v2443_v2 = vpop.f32.mrf.mxu0  ;;  %v2746_v53 = vpop.f32.mrf.mxu1  ;;  %3355 = vmatmul.mubr.f32.gmra.mxu1 %v12436_v0 }
 0x17c   : > { %v8266_v5 = vadd.f32 %v2746_v53, %v2442_v7  ;;  %3359 = vmatprep.mubr.f32.mxu1 %v12438_v16  ;;  %v12447_v53 = vld [vmem:[#allocation23_spill] sm:$0xff] }
 0x17d   : > { %v2446_v43 = vpop.f32.mrf.mxu0  ;;  %v2748_v34 = vpop.f32.mrf.mxu1  ;;  %3055 = vmatmul.mubr.f32.gmra.mxu0 %v7357_v52  ;;  %v1266_v52 = vld [vmem:[#allocation6 + $0x408] sm:$0xff] }
 0x17e   : > { %12437 = vst [vmem:[#allocation15_spill] sm:$0xff] %v8266_v5  ;;  %v2447_v63 = vadd.f32 %v8204_v13, %v2446_v43  ;;  %3059 = vmatprep.mubr.f32.mxu0 %v12439_v19  ;;  %6069 = vmatprep.subr.mxu0 %v1266_v52  ;;  %v12448_v34 = vld [vmem:[#allocation19_spill] sm:$0xff] }
 0x17f   : > { %v2448_v25 = vpop.f32.mrf.mxu0  ;;  %v2751_v41 = vpop.f32.mrf.mxu1  ;;  %3360 = vmatmul.mubr.f32.gmra.mxu1 %v12440_v14  ;;  %6070 = vmatpush3.msra.mxu0 %v1266_v52  ;;  %v12452_v52 = vld [vmem:[#allocation22_spill] sm:$0xff]  ;;  %v12480_v5 = vld [vmem:[#allocation43_spill] sm:$0xff] }
 0x180   : > { %v8273_v28 = vadd.f32 %v2751_v41, %v2447_v63  ;;  %3364 = vmatprep.mubr.f32.mxu1 %v12442_v23  ;;  %v12450_v25 = vld [vmem:[#allocation30_spill] sm:$0xff] }
 0x181   : > { %v2451_v39 = vpop.f32.mrf.mxu0  ;;  %v2753_v49 = vpop.f32.mrf.mxu1  ;;  %3060 = vmatmul.mubr.f32.gmra.mxu0 %v7380_v15 }
 0x182   : > { %12441 = vst [vmem:[#allocation20_spill] sm:$0xff] %v8273_v28  ;;  %v2452_v45 = vadd.f32 %v8204_v13, %v2451_v39  ;;  %3064 = vmatprep.mubr.f32.mxu0 %v12443_v46  ;;  %v12451_v49 = vld [vmem:[#allocation27_spill] sm:$0xff] }
 0x183   : > { %v2453_v4 = vpop.f32.mrf.mxu0  ;;  %v2756_v56 = vpop.f32.mrf.mxu1  ;;  %3365 = vmatmul.mubr.f32.gmra.mxu1 %v12444_v20 }
 0x184   : > { %v8280_v57 = vadd.f32 %v2756_v56, %v2452_v45  ;;  %3369 = vmatprep.mubr.f32.mxu1 %v12446_v38  ;;  %v12454_v56 = vld [vmem:[#allocation32_spill] sm:$0xff] }
 0x185   : > { %v2456_v7 = vpop.f32.mrf.mxu0  ;;  %v2758_v2 = vpop.f32.mrf.mxu1  ;;  %3065 = vmatmul.mubr.f32.gmra.mxu0 %v7412_v48 }
 0x186   : > { %12445 = vst [vmem:[#allocation18_spill] sm:$0xff] %v8280_v57  ;;  %v2457_v15 = vadd.f32 %v8204_v13, %v2456_v7  ;;  %3069 = vmatprep.mubr.f32.mxu0 %v12447_v53  ;;  %v12474_v57 = vld [vmem:[#allocation48_spill] sm:$0xff] }
 0x187   : > { %v2458_v0 = vpop.f32.mrf.mxu0  ;;  %v2761_v43 = vpop.f32.mrf.mxu1  ;;  %3370 = vmatmul.mubr.f32.gmra.mxu1 %v12448_v34  ;;  %v12456_v34 = vld [vmem:[#allocation25_spill] sm:$0xff] }
 0x188   : > { %v8287_v63 = vadd.f32 %v2761_v43, %v2457_v15  ;;  %3374 = vmatprep.mubr.f32.mxu1 %v12450_v25  ;;  %v12455_v15 = vld [vmem:[#allocation29_spill] sm:$0xff] }
 0x189   : > { %v2461_v41 = vpop.f32.mrf.mxu0  ;;  %v2763_v14 = vpop.f32.mrf.mxu1  ;;  %3070 = vmatmul.mubr.f32.gmra.mxu0 %v12438_v16  ;;  %v1265_v16 = vld [vmem:[#allocation6 + $0x400] sm:$0xff] }
 0x18a   : > { %12449 = vst [vmem:[#allocation16_spill] sm:$0xff] %v8287_v63  ;;  %v2462_v39 = vadd.f32 %v8204_v13, %v2461_v41  ;;  %3074 = vmatprep.mubr.f32.mxu0 %v12451_v49  ;;  %6071 = vmatprep.subr.mxu0 %v1265_v16  ;;  %v12458_v14 = vld [vmem:[#allocation36_spill] sm:$0xff] }
 0x18b   : > { %v2463_v48 = vpop.f32.mrf.mxu0  ;;  %v2766_v45 = vpop.f32.mrf.mxu1  ;;  %3375 = vmatmul.mubr.f32.gmra.mxu1 %v12452_v52  ;;  %6072 = vmatpush3.msra.mxu0 %v1265_v16  ;;  %v12459_v52 = vld [vmem:[#allocation33_spill] sm:$0xff]  ;;  %v12470_v63 = vld [vmem:[#allocation44_spill] sm:$0xff] }
 0x18c   : > { %v8294_v4 = vadd.f32 %v2766_v45, %v2462_v39  ;;  %3379 = vmatprep.mubr.f32.mxu1 %v12454_v56 }
 0x18d   : > { %v2466_v20 = vpop.f32.mrf.mxu0  ;;  %v2768_v7 = vpop.f32.mrf.mxu1  ;;  %3075 = vmatmul.mubr.f32.gmra.mxu0 %v12442_v23  ;;  %v8305_v23 = vld [vmem:[#allocation2] sm:$0xff] }
 0x18e   : > { %12453 = vst [vmem:[#allocation24_spill] sm:$0xff] %v8294_v4  ;;  %v2467_v2 = vadd.f32 %v8204_v13, %v2466_v20  ;;  %3079 = vmatprep.mubr.f32.mxu0 %v12455_v15  ;;  %4477 = vmatprep.subr.mxu0 %v8305_v23  ;;  %v12466_v4 = vld [vmem:[#allocation42_spill] sm:$0xff] }
 0x18f   : > { %v2468_v0 = vpop.f32.mrf.mxu0  ;;  %v2771_v43 = vpop.f32.mrf.mxu1  ;;  %3380 = vmatmul.mubr.f32.gmra.mxu1 %v12456_v34 }
 0x190   : > { %v8301_v41 = vadd.f32 %v2771_v43, %v2467_v2  ;;  %3384 = vmatprep.mubr.f32.mxu1 %v12458_v14  ;;  %v12460_v0 = vld [vmem:[#allocation28_spill] sm:$0xff]  ;;  %v12462_v43 = vld [vmem:[#allocation38_spill] sm:$0xff] }
 0x191   : > { %v2471_v39 = vpop.f32.mrf.mxu0  ;;  %v2773_v48 = vpop.f32.mrf.mxu1  ;;  %3080 = vmatmul.mubr.f32.gmra.mxu0 %v12446_v38 }
 0x192   : > { %12457 = vst [vmem:[#allocation21_spill] sm:$0xff] %v8301_v41  ;;  %v2472_v45 = vadd.f32 %v8204_v13, %v2471_v39  ;;  %3084 = vmatprep.mubr.f32.mxu0 %v12459_v52  ;;  %v12463_v48 = vld [vmem:[#allocation35_spill] sm:$0xff] }
 0x193   : > { %v2473_v20 = vpop.f32.mrf.mxu0  ;;  %v2776_v7 = vpop.f32.mrf.mxu1  ;;  %3385 = vmatmul.mubr.f32.gmra.mxu1 %v12460_v0  ;;  %v12464_v41 = vld [vmem:[#allocation31_spill] sm:$0xff] }
 0x194   : > { %v8311_v2 = vadd.f32 %v2776_v7, %v2472_v45  ;;  %3389 = vmatprep.mubr.f32.mxu1 %v12462_v43 }
 0x195   : > { %v2476_v16 = vpop.f32.mrf.mxu0  ;;  %v2778_v34 = vpop.f32.mrf.mxu1  ;;  %3085 = vmatmul.mubr.f32.gmra.mxu0 %v12450_v25 }
 0x196   : > { %12461 = vst [vmem:[#allocation17_spill] sm:$0xff] %v8311_v2  ;;  %v2477_v38 = vadd.f32 %v8204_v13, %v2476_v16  ;;  %3089 = vmatprep.mubr.f32.mxu0 %v12463_v48  ;;  %v12467_v34 = vld [vmem:[#allocation39_spill] sm:$0xff]  ;;  %v12468_v2 = vld [vmem:[#allocation34_spill] sm:$0xff] }
 0x197   : > { %v2478_v37 = vpop.f32.mrf.mxu0  ;;  %v2781_v39 = vpop.f32.mrf.mxu1  ;;  %3390 = vmatmul.mubr.f32.gmra.mxu1 %v12464_v41 }
 0x198   : > { %v8318_v20 = vadd.f32 %v2781_v39, %v2477_v38  ;;  %3394 = vmatprep.mubr.f32.mxu1 %v12466_v4 }
 0x199   : > { %v2481_v45 = vpop.f32.mrf.mxu0  ;;  %v2783_v7 = vpop.f32.mrf.mxu1  ;;  %3090 = vmatmul.mubr.f32.gmra.mxu0 %v12454_v56 }
 0x19a   : > { %12465 = vst [vmem:[#allocation26_spill] sm:$0xff] %v8318_v20  ;;  %v2482_v0 = vadd.f32 %v8204_v13, %v2481_v45  ;;  %3094 = vmatprep.mubr.f32.mxu0 %v12467_v34  ;;  %v12471_v7 = vld [vmem:[#allocation41_spill] sm:$0xff] }
 0x19b   : > { %v2483_v25 = vpop.f32.mrf.mxu0  ;;  %v2786_v16 = vpop.f32.mrf.mxu1  ;;  %3395 = vmatmul.mubr.f32.gmra.mxu1 %v12468_v2  ;;  %v12472_v20 = vld [vmem:[#allocation37_spill] sm:$0xff]  ;;  %v1296_v2 = vld [vmem:[#allocation8 + $0x78] sm:$0xff] }
 0x19c   : > { %v8325_v37 = vadd.f32 %v2786_v16, %v2482_v0  ;;  %3399 = vmatprep.mubr.f32.mxu1 %v12470_v63  ;;  %4173 = vmatpush1.msra.mxu1 %v1296_v2  ;;  %v12479_v2 = vld [vmem:[#allocation47_spill] sm:$0xff] }
 0x19d   : > { %v2486_v41 = vpop.f32.mrf.mxu0  ;;  %v2788_v38 = vpop.f32.mrf.mxu1  ;;  %3095 = vmatmul.mubr.f32.gmra.mxu0 %v12458_v14  ;;  %4174 = vmatprep.subr.mxu1 %v8305_v23 }
 0x19e   : > { %12469 = vst [vmem:[#allocation23_spill] sm:$0xff] %v8325_v37  ;;  %v2487_v39 = vadd.f32 %v8204_v13, %v2486_v41  ;;  %3099 = vmatprep.mubr.f32.mxu0 %v12471_v7  ;;  %v12475_v38 = vld [vmem:[#allocation45_spill] sm:$0xff]  ;;  %v12476_v37 = vld [vmem:[#allocation40_spill] sm:$0xff] }
 0x19f   : > { %v2488_v56 = vpop.f32.mrf.mxu0  ;;  %v2791_v45 = vpop.f32.mrf.mxu1  ;;  %3400 = vmatmul.mubr.f32.gmra.mxu1 %v12472_v20 }
 0x1a0   : > { %v8332_v25 = vadd.f32 %v2791_v45, %v2487_v39  ;;  %3404 = vmatprep.mubr.f32.mxu1 %v12474_v57  ;;  %v12478_v39 = vld [vmem:[#allocation50_spill] sm:$0xff] }
 0x1a1   : > { %v2491_v0 = vpop.f32.mrf.mxu0  ;;  %v2793_v16 = vpop.f32.mrf.mxu1  ;;  %3100 = vmatmul.mubr.f32.gmra.mxu0 %v12462_v43 }
 0x1a2   : > { %12473 = vst [vmem:[#allocation19_spill] sm:$0xff] %v8332_v25  ;;  %v2492_v14 = vadd.f32 %v8204_v13, %v2491_v0  ;;  %3104 = vmatprep.mubr.f32.mxu0 %v12475_v38  ;;  %v1295_v0 = vld [vmem:[#allocation8 + $0x70] sm:$0xff] }
 0x1a3   : > { %v2493_v41 = vpop.f32.mrf.mxu0  ;;  %v2796_v56 = vpop.f32.mrf.mxu1  ;;  %3405 = vmatmul.mubr.f32.gmra.mxu1 %v12476_v37  ;;  %v12482_v37 = vld [vmem:[#allocation54_spill] sm:$0xff] }
 0x1a4   : > { %v8340_v20 = vadd.f32 %v2796_v56, %v2492_v14  ;;  %3409 = vmatprep.mubr.f32.mxu1 %v12478_v39  ;;  %4175 = vmatpush1.msra.mxu1 %v1295_v0 }
 0x1a5   : > { %v2496_v45 = vpop.f32.mrf.mxu0  ;;  %v2798_v25 = vpop.f32.mrf.mxu1  ;;  %3105 = vmatmul.mubr.f32.gmra.mxu0 %v12466_v4  ;;  %4176 = vmatprep.subr.mxu1 %v8305_v23 }
 0x1a6   : > { %12477 = vst [vmem:[#allocation30_spill] sm:$0xff] %v8340_v20  ;;  %v2497_v43 = vadd.f32 %v8204_v13, %v2496_v45  ;;  %3109 = vmatprep.mubr.f32.mxu0 %v12479_v2  ;;  %v12483_v25 = vld [vmem:[#allocation51_spill] sm:$0xff]  ;;  %v12484_v20 = vld [vmem:[#allocation46_spill] sm:$0xff]  ;;  %v12492_v2 = vld [vmem:[#allocation52_spill] sm:$0xff] }
 0x1a7   : > { %v2498_v16 = vpop.f32.mrf.mxu0  ;;  %v2801_v28 = vpop.f32.mrf.mxu1  ;;  %3410 = vmatmul.mubr.f32.gmra.mxu1 %v12480_v5 }
 0x1a8   : > { %v8347_v41 = vadd.f32 %v2801_v28, %v2497_v43  ;;  %3414 = vmatprep.mubr.f32.mxu1 %v12482_v37  ;;  %v12486_v28 = vld [vmem:[#allocation56_spill] sm:$0xff]  ;;  %v1294_v43 = vld [vmem:[#allocation8 + $0x68] sm:$0xff] }
 0x1a9   : > { %v2501_v14 = vpop.f32.mrf.mxu0  ;;  %v2803_v56 = vpop.f32.mrf.mxu1  ;;  %3110 = vmatmul.mubr.f32.gmra.mxu0 %v12470_v63  ;;  %4177 = vmatpush1.msra.mxu1 %v1294_v43  ;;  %v1293_v43 = vld [vmem:[#allocation8 + $0x60] sm:$0xff] }
 0x1aa   : > { %12481 = vst [vmem:[#allocation27_spill] sm:$0xff] %v8347_v41  ;;  %v2502_v4 = vadd.f32 %v8204_v13, %v2501_v14  ;;  %3114 = vmatprep.mubr.f32.mxu0 %v12483_v25  ;;  %v12487_v56 = vld [vmem:[#allocation53_spill] sm:$0xff]  ;;  %4178 = vmatprep.subr.mxu1 %v8305_v23 }
 0x1ab   : > { %v2503_v45 = vpop.f32.mrf.mxu0  ;;  %v2806_v16 = vpop.f32.mrf.mxu1  ;;  %3415 = vmatmul.mubr.f32.gmra.mxu1 %v12484_v20  ;;  %v12488_v25 = vld [vmem:[#allocation49_spill] sm:$0xff] }
 0x1ac   : > { %v8355_v5 = vadd.f32 %v2806_v16, %v2502_v4  ;;  %3419 = vmatprep.mubr.f32.mxu1 %v12486_v28  ;;  %v12490_v4 = vld [vmem:[#allocation60_spill] sm:$0xff]  ;;  %4179 = vmatpush1.msra.mxu1 %v1293_v43 }
 0x1ad   : > { %v2506_v0 = vpop.f32.mrf.mxu0  ;;  %v2808_v41 = vpop.f32.mrf.mxu1  ;;  %3115 = vmatmul.mubr.f32.gmra.mxu0 %v12474_v57  ;;  %4180 = vmatprep.subr.mxu1 %v8305_v23 }
 0x1ae   : > { %12485 = vst [vmem:[#allocation22_spill] sm:$0xff] %v8355_v5  ;;  %v2507_v63 = vadd.f32 %v8204_v13, %v2506_v0  ;;  %3119 = vmatprep.mubr.f32.mxu0 %v12487_v56  ;;  %v12491_v41 = vld [vmem:[#allocation57_spill] sm:$0xff] }
 0x1af   : > { %v2508_v14 = vpop.f32.mrf.mxu0  ;;  %v2811_v45 = vpop.f32.mrf.mxu1  ;;  %3420 = vmatmul.mubr.f32.gmra.mxu1 %v12488_v25  ;;  %v12494_v25 = vld [vmem:[#allocation62_spill] sm:$0xff] }
 0x1b0   : > { %v8363_v20 = vadd.f32 %v2811_v45, %v2507_v63  ;;  %3424 = vmatprep.mubr.f32.mxu1 %v12490_v4 }
 0x1b1   : > { %v2511_v16 = vpop.f32.mrf.mxu0  ;;  %v2813_v5 = vpop.f32.mrf.mxu1  ;;  %3120 = vmatmul.mubr.f32.gmra.mxu0 %v12478_v39 }
 0x1b2   : > { %12489 = vst [vmem:[#allocation32_spill] sm:$0xff] %v8363_v20  ;;  %v2512_v57 = vadd.f32 %v8204_v13, %v2511_v16  ;;  %3124 = vmatprep.mubr.f32.mxu0 %v12491_v41  ;;  %v12495_v5 = vld [vmem:[#allocation59_spill] sm:$0xff]  ;;  %v12504_v41 = vld [vmem:[#allocation61_spill] sm:$0xff] }
 0x1b3   : > { %v2513_v0 = vpop.f32.mrf.mxu0  ;;  %v2816_v56 = vpop.f32.mrf.mxu1  ;;  %3425 = vmatmul.mubr.f32.gmra.mxu1 %v12492_v2  ;;  %v12496_v20 = vld [vmem:[#allocation55_spill] sm:$0xff] }
 0x1b4   : > { %v8370_v14 = vadd.f32 %v2816_v56, %v2512_v57  ;;  %3429 = vmatprep.mubr.f32.mxu1 %v12494_v25  ;;  %v12498_v56 = vld [vmem:[#allocation66_spill] sm:$0xff]  ;;  %v1292_v57 = vld [vmem:[#allocation8 + $0x58] sm:$0xff] }
 0x1b5   : > { %v2516_v63 = vpop.f32.mrf.mxu0  ;;  %v2818_v45 = vpop.f32.mrf.mxu1  ;;  %3125 = vmatmul.mubr.f32.gmra.mxu0 %v12482_v37  ;;  %4181 = vmatpush1.msra.mxu1 %v1292_v57  ;;  %v1291_v57 = vld [vmem:[#allocation8 + $0x50] sm:$0xff] }
 0x1b6   : > { %12493 = vst [vmem:[#allocation29_spill] sm:$0xff] %v8370_v14  ;;  %v2517_v39 = vadd.f32 %v8204_v13, %v2516_v63  ;;  %3129 = vmatprep.mubr.f32.mxu0 %v12495_v5  ;;  %v12499_v45 = vld [vmem:[#allocation63_spill] sm:$0xff]  ;;  %4182 = vmatprep.subr.mxu1 %v8305_v23  ;;  %v12500_v5 = vld [vmem:[#allocation58_spill] sm:$0xff] }
 0x1b7   : > { %v2518_v16 = vpop.f32.mrf.mxu0  ;;  %v2821_v0 = vpop.f32.mrf.mxu1  ;;  %3430 = vmatmul.mubr.f32.gmra.mxu1 %v12496_v20 }
 0x1b8   : > { %v8378_v2 = vadd.f32 %v2821_v0, %v2517_v39  ;;  %3434 = vmatprep.mubr.f32.mxu1 %v12498_v56  ;;  %v12502_v39 = vld [vmem:[#allocation68_spill] sm:$0xff]  ;;  %4183 = vmatpush1.msra.mxu1 %v1291_v57 }
 0x1b9   : > { %v2521_v43 = vpop.f32.mrf.mxu0  ;;  %v2823_v14 = vpop.f32.mrf.mxu1  ;;  %3130 = vmatmul.mubr.f32.gmra.mxu0 %v12486_v28  ;;  %4184 = vmatprep.subr.mxu1 %v8305_v23 }
 0x1ba   : > { %12497 = vst [vmem:[#allocation25_spill] sm:$0xff] %v8378_v2  ;;  %v2522_v37 = vadd.f32 %v8204_v13, %v2521_v43  ;;  %3134 = vmatprep.mubr.f32.mxu0 %v12499_v45  ;;  %v12503_v14 = vld [vmem:[#allocation65_spill] sm:$0xff] }
 0x1bb   : > { %v2523_v63 = vpop.f32.mrf.mxu0  ;;  %v2826_v16 = vpop.f32.mrf.mxu1  ;;  %3435 = vmatmul.mubr.f32.gmra.mxu1 %v12500_v5  ;;  %v12506_v5 = vld [vmem:[#allocation72_spill] sm:$0xff] }
 0x1bc   : > { %v8386_v20 = vadd.f32 %v2826_v16, %v2522_v37  ;;  %3439 = vmatprep.mubr.f32.mxu1 %v12502_v39 }
 0x1bd   : > { %v2526_v0 = vpop.f32.mrf.mxu0  ;;  %v2828_v2 = vpop.f32.mrf.mxu1  ;;  %3135 = vmatmul.mubr.f32.gmra.mxu0 %v12490_v4 }
 0x1be   : > { %12501 = vst [vmem:[#allocation36_spill] sm:$0xff] %v8386_v20  ;;  %v2527_v28 = vadd.f32 %v8204_v13, %v2526_v0  ;;  %3139 = vmatprep.mubr.f32.mxu0 %v12503_v14  ;;  %v12507_v2 = vld [vmem:[#allocation69_spill] sm:$0xff]  ;;  %v12508_v20 = vld [vmem:[#allocation64_spill] sm:$0xff]  ;;  %v12516_v14 = vld [vmem:[#allocation70_spill] sm:$0xff] }
 0x1bf   : > { %v2528_v43 = vpop.f32.mrf.mxu0  ;;  %v2831_v45 = vpop.f32.mrf.mxu1  ;;  %3440 = vmatmul.mubr.f32.gmra.mxu1 %v12504_v41 }
 0x1c0   : > { %v8393_v63 = vadd.f32 %v2831_v45, %v2527_v28  ;;  %3444 = vmatprep.mubr.f32.mxu1 %v12506_v5  ;;  %v12510_v45 = vld [vmem:[#allocation74_spill] sm:$0xff] }
 0x1c1   : > { %v2531_v37 = vpop.f32.mrf.mxu0  ;;  %v2833_v16 = vpop.f32.mrf.mxu1  ;;  %3140 = vmatmul.mubr.f32.gmra.mxu0 %v12494_v25  ;;  %v1290_v28 = vld [vmem:[#allocation8 + $0x48] sm:$0xff] }
 0x1c2   : > { %12505 = vst [vmem:[#allocation33_spill] sm:$0xff] %v8393_v63  ;;  %v2532_v4 = vadd.f32 %v8204_v13, %v2531_v37  ;;  %3144 = vmatprep.mubr.f32.mxu0 %v12507_v2  ;;  %4185 = vmatpush1.msra.mxu1 %v1290_v28  ;;  %v12511_v16 = vld [vmem:[#allocation71_spill] sm:$0xff]  ;;  %v1289_v28 = vld [vmem:[#allocation8 + $0x40] sm:$0xff] }
 0x1c3   : > { %v2533_v0 = vpop.f32.mrf.mxu0  ;;  %v2836_v43 = vpop.f32.mrf.mxu1  ;;  %3445 = vmatmul.mubr.f32.gmra.mxu1 %v12508_v20  ;;  %4186 = vmatprep.subr.mxu1 %v8305_v23  ;;  %v12512_v2 = vld [vmem:[#allocation67_spill] sm:$0xff] }
 0x1c4   : > { %v8401_v41 = vadd.f32 %v2836_v43, %v2532_v4  ;;  %3449 = vmatprep.mubr.f32.mxu1 %v12510_v45  ;;  %v12514_v4 = vld [vmem:[#allocation78_spill] sm:$0xff]  ;;  %4187 = vmatpush1.msra.mxu1 %v1289_v28 }
 0x1c5   : > { %v2536_v57 = vpop.f32.mrf.mxu0  ;;  %v2838_v63 = vpop.f32.mrf.mxu1  ;;  %3145 = vmatmul.mubr.f32.gmra.mxu0 %v12498_v56  ;;  %4188 = vmatprep.subr.mxu1 %v8305_v23 }
 0x1c6   : > { %12509 = vst [vmem:[#allocation28_spill] sm:$0xff] %v8401_v41  ;;  %v2537_v25 = vadd.f32 %v8204_v13, %v2536_v57  ;;  %3149 = vmatprep.mubr.f32.mxu0 %v12511_v16  ;;  %v12515_v63 = vld [vmem:[#allocation75_spill] sm:$0xff] }
 0x1c7   : > { %v2538_v37 = vpop.f32.mrf.mxu0  ;;  %v2841_v0 = vpop.f32.mrf.mxu1  ;;  %3450 = vmatmul.mubr.f32.gmra.mxu1 %v12512_v2  ;;  %v12518_v2 = vld [vmem:[#allocation79_spill] sm:$0xff] }
 0x1c8   : > { %v8409_v20 = vadd.f32 %v2841_v0, %v2537_v25  ;;  %3454 = vmatprep.mubr.f32.mxu1 %v12514_v4 }
 0x1c9   : > { %v2541_v43 = vpop.f32.mrf.mxu0  ;;  %v2843_v41 = vpop.f32.mrf.mxu1  ;;  %3150 = vmatmul.mubr.f32.gmra.mxu0 %v12502_v39 }
 0x1ca   : > { %12513 = vst [vmem:[#allocation38_spill] sm:$0xff] %v8409_v20  ;;  %v2542_v56 = vadd.f32 %v8204_v13, %v2541_v43  ;;  %3154 = vmatprep.mubr.f32.mxu0 %v12515_v63  ;;  %v12519_v41 = vld [vmem:[#allocation77_spill] sm:$0xff] }
 0x1cb   : > { %v2543_v57 = vpop.f32.mrf.mxu0  ;;  %v2846_v16 = vpop.f32.mrf.mxu1  ;;  %3455 = vmatmul.mubr.f32.gmra.mxu1 %v12516_v14  ;;  %v12520_v20 = vld [vmem:[#allocation73_spill] sm:$0xff] }
 0x1cc   : > { %v8416_v37 = vadd.f32 %v2846_v16, %v2542_v56  ;;  %3459 = vmatprep.mubr.f32.mxu1 %v12518_v2  ;;  %v12522_v16 = vld [vmem:[#allocation83_spill] sm:$0xff]  ;;  %v1288_v56 = vld [vmem:[#allocation8 + $0x38] sm:$0xff] }
 0x1cd   : > { %v2546_v25 = vpop.f32.mrf.mxu0  ;;  %v2848_v0 = vpop.f32.mrf.mxu1  ;;  %3155 = vmatmul.mubr.f32.gmra.mxu0 %v12506_v5  ;;  %4189 = vmatpush1.msra.mxu1 %v1288_v56  ;;  %v1287_v56 = vld [vmem:[#allocation8 + $0x30] sm:$0xff] }
 0x1ce   : > { %12517 = vst [vmem:[#allocation35_spill] sm:$0xff] %v8416_v37  ;;  %v2547_v39 = vadd.f32 %v8204_v13, %v2546_v25  ;;  %3159 = vmatprep.mubr.f32.mxu0 %v12519_v41  ;;  %v12523_v0 = vld [vmem:[#allocation80_spill] sm:$0xff]  ;;  %4190 = vmatprep.subr.mxu1 %v8305_v23 }
 0x1cf   : > { %v2548_v43 = vpop.f32.mrf.mxu0  ;;  %v2851_v57 = vpop.f32.mrf.mxu1  ;;  %3460 = vmatmul.mubr.f32.gmra.mxu1 %v12520_v20  ;;  %v12524_v41 = vld [vmem:[#allocation76_spill] sm:$0xff] }
 0x1d0   : > { %v8424_v14 = vadd.f32 %v2851_v57, %v2547_v39  ;;  %3464 = vmatprep.mubr.f32.mxu1 %v12522_v16  ;;  %v12526_v39 = vld [vmem:[#allocation85_spill] sm:$0xff]  ;;  %4191 = vmatpush1.msra.mxu1 %v1287_v56 }
 0x1d1   : > { %v2551_v28 = vpop.f32.mrf.mxu0  ;;  %v2853_v37 = vpop.f32.mrf.mxu1  ;;  %3160 = vmatmul.mubr.f32.gmra.mxu0 %v12510_v45  ;;  %4192 = vmatprep.subr.mxu1 %v8305_v23 }
 0x1d2   : > { %12521 = vst [vmem:[#allocation31_spill] sm:$0xff] %v8424_v14  ;;  %v2552_v5 = vadd.f32 %v8204_v13, %v2551_v28  ;;  %3164 = vmatprep.mubr.f32.mxu0 %v12523_v0  ;;  %v12527_v37 = vld [vmem:[#allocation82_spill] sm:$0xff] }
 0x1d3   : > { %v2553_v25 = vpop.f32.mrf.mxu0  ;;  %v2856_v43 = vpop.f32.mrf.mxu1  ;;  %3465 = vmatmul.mubr.f32.gmra.mxu1 %v12524_v41  ;;  %v12529_v41 = vld [vmem:[#allocation89_spill] sm:$0xff] }
 0x1d4   : > { %v8432_v20 = vadd.f32 %v2856_v43, %v2552_v5  ;;  %3469 = vmatprep.mubr.f32.mxu1 %v12526_v39 }
 0x1d5   : > { %v2556_v57 = vpop.f32.mrf.mxu0  ;;  %v2858_v14 = vpop.f32.mrf.mxu1  ;;  %3165 = vmatmul.mubr.f32.gmra.mxu0 %v12514_v4 }
 0x1d6   : > { %12525 = vst [vmem:[#allocation42_spill] sm:$0xff] %v8432_v20  ;;  %v2557_v45 = vadd.f32 %v8204_v13, %v2556_v57  ;;  %3169 = vmatprep.mubr.f32.mxu0 %v12527_v37  ;;  %v12530_v14 = vld [vmem:[#allocation86_spill] sm:$0xff]  ;;  %v12531_v20 = vld [vmem:[#allocation81_spill] sm:$0xff]  ;;  %v12539_v37 = vld [vmem:[#allocation87_spill] sm:$0xff] }
 0x1d7   : > { %v2558_v28 = vpop.f32.mrf.mxu0  ;;  %v2861_v0 = vpop.f32.mrf.mxu1  ;;  %3470 = vmatmul.mubr.f32.gmra.mxu1 %v7937_v33 }
 0x1d8   : > { %v8439_v25 = vadd.f32 %v2861_v0, %v2557_v45  ;;  %3474 = vmatprep.mubr.f32.mxu1 %v12529_v41  ;;  %v12533_v0 = vld [vmem:[#allocation91_spill] sm:$0xff]  ;;  %v1286_v45 = vld [vmem:[#allocation8 + $0x28] sm:$0xff] }
 0x1d9   : > { %v2561_v5 = vpop.f32.mrf.mxu0  ;;  %v2863_v43 = vpop.f32.mrf.mxu1  ;;  %3170 = vmatmul.mubr.f32.gmra.mxu0 %v12518_v2  ;;  %4193 = vmatpush1.msra.mxu1 %v1286_v45  ;;  %v1285_v45 = vld [vmem:[#allocation8 + $0x20] sm:$0xff] }
 0x1da   : > { %12528 = vst [vmem:[#allocation39_spill] sm:$0xff] %v8439_v25  ;;  %v2562_v4 = vadd.f32 %v8204_v13, %v2561_v5  ;;  %3174 = vmatprep.mubr.f32.mxu0 %v12530_v14  ;;  %v12534_v43 = vld [vmem:[#allocation88_spill] sm:$0xff]  ;;  %4194 = vmatprep.subr.mxu1 %v8305_v23 }
 0x1db   : > { %v2563_v57 = vpop.f32.mrf.mxu0  ;;  %v2866_v28 = vpop.f32.mrf.mxu1  ;;  %3475 = vmatmul.mubr.f32.gmra.mxu1 %v12531_v20  ;;  %v12535_v14 = vld [vmem:[#allocation84_spill] sm:$0xff] }
 0x1dc   : > { %v8447_v33 = vadd.f32 %v2866_v28, %v2562_v4  ;;  %3479 = vmatprep.mubr.f32.mxu1 %v12533_v0  ;;  %v12537_v4 = vld [vmem:[#allocation95_spill] sm:$0xff]  ;;  %4195 = vmatpush1.msra.mxu1 %v1285_v45 }
 0x1dd   : > { %v2566_v56 = vpop.f32.mrf.mxu0  ;;  %v2868_v25 = vpop.f32.mrf.mxu1  ;;  %3175 = vmatmul.mubr.f32.gmra.mxu0 %v12522_v16  ;;  %4196 = vmatprep.subr.mxu1 %v8305_v23 }
 0x1de   : > { %12532 = vst [vmem:[#allocation34_spill] sm:$0xff] %v8447_v33  ;;  %v2567_v2 = vadd.f32 %v8204_v13, %v2566_v56  ;;  %3179 = vmatprep.mubr.f32.mxu0 %v12534_v43  ;;  %v12538_v25 = vld [vmem:[#allocation92_spill] sm:$0xff] }
 0x1df   : > { %v2568_v5 = vpop.f32.mrf.mxu0  ;;  %v2871_v57 = vpop.f32.mrf.mxu1  ;;  %3480 = vmatmul.mubr.f32.gmra.mxu1 %v12535_v14  ;;  %v12541_v14 = vld [vmem:[#allocation97_spill] sm:$0xff] }
 0x1e0   : > { %v8455_v20 = vadd.f32 %v2871_v57, %v2567_v2  ;;  %3484 = vmatprep.mubr.f32.mxu1 %v12537_v4 }
 0x1e1   : > { %v2571_v28 = vpop.f32.mrf.mxu0  ;;  %v2873_v33 = vpop.f32.mrf.mxu1  ;;  %3180 = vmatmul.mubr.f32.gmra.mxu0 %v12526_v39 }
 0x1e2   : > { %12536 = vst [vmem:[#allocation44_spill] sm:$0xff] %v8455_v20  ;;  %v2572_v16 = vadd.f32 %v8204_v13, %v2571_v28  ;;  %3184 = vmatprep.mubr.f32.mxu0 %v12538_v25  ;;  %v12542_v33 = vld [vmem:[#allocation94_spill] sm:$0xff] }
 0x1e3   : > { %v2573_v56 = vpop.f32.mrf.mxu0  ;;  %v2876_v43 = vpop.f32.mrf.mxu1  ;;  %3485 = vmatmul.mubr.f32.gmra.mxu1 %v12539_v37  ;;  %v12543_v20 = vld [vmem:[#allocation90_spill] sm:$0xff] }
 0x1e4   : > { %v8462_v5 = vadd.f32 %v2876_v43, %v2572_v16  ;;  %3489 = vmatprep.mubr.f32.mxu1 %v12541_v14  ;;  %v12545_v43 = vld [vmem:[#allocation98_spill] sm:$0xff]  ;;  %v1284_v16 = vld [vmem:[#allocation8 + $0x18] sm:$0xff] }
 0x1e5   : > { %v2576_v2 = vpop.f32.mrf.mxu0  ;;  %v2878_v57 = vpop.f32.mrf.mxu1  ;;  %3185 = vmatmul.mubr.f32.gmra.mxu0 %v12529_v41  ;;  %4197 = vmatpush1.msra.mxu1 %v1284_v16  ;;  %v1792_v16 = vrot.slane %v8097_v31, 1 }
 0x1e6   : > { %12540 = vst [vmem:[#allocation41_spill] sm:$0xff] %v8462_v5  ;;  %v2577_v39 = vadd.f32 %v8204_v13, %v2576_v2  ;;  %3189 = vmatprep.mubr.f32.mxu0 %v12542_v33  ;;  %v12546_v57 = vld [vmem:[#allocation96_spill] sm:$0xff]  ;;  %4198 = vmatprep.subr.mxu1 %v8305_v23  ;;  %v12547_v33 = vld [vmem:[#allocation93_spill] sm:$0xff] }
 0x1e7   : > { %v2578_v28 = vpop.f32.mrf.mxu0  ;;  %v2881_v56 = vpop.f32.mrf.mxu1  ;;  %3490 = vmatmul.mubr.f32.gmra.mxu1 %v12543_v20 }
 0x1e8   : > { %v8470_v37 = vadd.f32 %v2881_v56, %v2577_v39  ;;  %3494 = vmatprep.mubr.f32.mxu1 %v12545_v43  ;;  %v12549_v39 = vld [vmem:[#allocation101_spill] sm:$0xff] }
 0x1e9   : > { %v2581_v45 = vpop.f32.mrf.mxu0  ;;  %v2883_v5 = vpop.f32.mrf.mxu1  ;;  %3190 = vmatmul.mubr.f32.gmra.mxu0 %v12533_v0 }
 0x1ea   : > { %12544 = vst [vmem:[#allocation37_spill] sm:$0xff] %v8470_v37  ;;  %v2582_v41 = vadd.f32 %v8204_v13, %v2581_v45  ;;  %3194 = vmatprep.mubr.f32.mxu0 %v12546_v57  ;;  %v12550_v5 = vld [vmem:[#allocation99_spill] sm:$0xff] }
 0x1eb   : > { %v2583_v2 = vpop.f32.mrf.mxu0  ;;  %v2886_v28 = vpop.f32.mrf.mxu1  ;;  %3495 = vmatmul.mubr.f32.gmra.mxu1 %v12547_v33  ;;  %v1283_v45 = vld [vmem:[#allocation8 + $0x10] sm:$0xff] }
 0x1ec   : > { %v8478_v20 = vadd.f32 %v2886_v28, %v2582_v41  ;;  %3499 = vmatprep.mubr.f32.mxu1 %v12549_v39  ;;  %4199 = vmatpush1.msra.mxu1 %v1283_v45  ;;  %v12552_v28 = vld [vmem:[#allocation100_spill] sm:$0xff]  ;;  %v1487_v45 = vld [vmem:[%s6936_s10 + $0x1a0] sm:$0xff] }
 0x1ed   : > { %v2586_v56 = vpop.f32.mrf.mxu0  ;;  %v2888_v37 = vpop.f32.mrf.mxu1  ;;  %3195 = vmatmul.mubr.f32.gmra.mxu0 %v12537_v4  ;;  %4200 = vmatprep.subr.mxu1 %v8305_v23 }
 0x1ee   : > { %12548 = vst [vmem:[#allocation48_spill] sm:$0xff] %v8478_v20  ;;  %v2587_v0 = vadd.f32 %v8204_v13, %v2586_v56  ;;  %3199 = vmatprep.mubr.f32.mxu0 %v12550_v5  ;;  %v12554_v20 = vld [vmem:[#allocation102_spill] sm:$0xff] }
 0x1ef   : > { %v2588_v57 = vpop.f32.mrf.mxu0  ;;  %v2891_v2 = vpop.f32.mrf.mxu1  ;;  %3500 = vmatmul.mubr.f32.gmra.mxu1 %v8047_v29  ;;  %v1794_v29 = vrot.slane %v8124_v60, 1 }
 0x1f0   : > { %v8486_v33 = vadd.f32 %v2891_v2, %v2587_v0  ;;  %3504 = vmatprep.mubr.f32.mxu1 %v8110_v24  ;;  %v1793_v57 = vsel %vm1595_vm0, %v8099_v18, %v1792_v16 }
 0x1f1   : > { %v2591_v37 = vpop.f32.mrf.mxu0  ;;  %v2893_v41 = vpop.f32.mrf.mxu1  ;;  %3200 = vmatmul.mubr.f32.gmra.mxu0 %v12541_v14  ;;  %v1282_v14 = vld [vmem:[#allocation8 + $0x8] sm:$0xff] }
 0x1f2   : > { %12551 = vst [vmem:[#allocation45_spill] sm:$0xff] %v8486_v33  ;;  %v2592_v4 = vadd.f32 %v8204_v13, %v2591_v37  ;;  %3204 = vmatprep.mubr.f32.mxu0 %v12552_v28  ;;  %v2123_v33 = vrot.slane %v1793_v57, 7  ;;  %4201 = vmatpush1.msra.mxu1 %v1282_v14 }
 0x1f3   : > { %v2593_v56 = vpop.f32.mrf.mxu0  ;;  %v2896_v0 = vpop.f32.mrf.mxu1  ;;  %3505 = vmatmul.mubr.f32.gmra.mxu1 %v8066_v44  ;;  %v8506_v44 = vrot.slane %v8144_v22, 1  ;;  %4202 = vmatprep.subr.mxu1 %v8305_v23 }
 0x1f4   : > { %v8498_v2 = vadd.f32 %v2896_v0, %v2592_v4  ;;  %3509 = vmatprep.mubr.f32.mxu1 %v8130_v59  ;;  %v1795_v56 = vsel %vm1595_vm0, %v1792_v16, %v1794_v29  ;;  %v8508_v4 = vmax.f32 %v1487_v45, 0.0  ;;  %v8519_v16 = vsel %vm1827_vm2, %v8132_v58, %v2123_v33 }
 0x1f5   : > { %v2596_v41 = vpop.f32.mrf.mxu0  ;;  %v2898_v37 = vpop.f32.mrf.mxu1  ;;  %3205 = vmatmul.mubr.f32.gmra.mxu0 %v12545_v43  ;;  %v1488_v43 = vld [vmem:[%s6936_s10 + $0x1a8] sm:$0xff]  ;;  %v2129_v45 = vrot.slane %v1795_v56, 7 }
 0x1f6   : > { %12553 = vst [vmem:[#allocation40_spill] sm:$0xff] %v8498_v2  ;;  %v2597_v18 = vadd.f32 %v8204_v13, %v2596_v41  ;;  %3209 = vmatprep.mubr.f32.mxu0 %v12554_v20 }
 0x1f7   : > { %v2598_v0 = vpop.f32.mrf.mxu0  ;;  %v2901_v2 = vpop.f32.mrf.mxu1  ;;  %3510 = vmatmul.mubr.f32.gmra.mxu1 %v8080_v62  ;;  %v1797_v62 = vsel %vm1595_vm0, %v1794_v29, %v8506_v44  ;;  %v8536_v29 = vsel %vm1827_vm2, %v2123_v33, %v2129_v45 }
 0x1f8   : > { %v8513_v57 = vadd.f32 %v2901_v2, %v2597_v18  ;;  %3514 = vmatprep.mubr.f32.mxu1 %v8151_v54  ;;  %v1807_v2 = vrot.slane %v8508_v4, 1  ;;  %v8526_v18 = vmax.f32 %v1488_v43, 0.0  ;;  %v1281_v0 = vld [vmem:[#allocation8] sm:$0xff]  ;;  %v8538_v43 = vrot.slane %v1797_v62, 7 }
 0x1f9   : > { %v2601_v14 = vpop.f32.mrf.mxu0  ;;  %v2903_v41 = vpop.f32.mrf.mxu1  ;;  %3210 = vmatmul.mubr.f32.gmra.mxu0 %v12549_v39  ;;  %v1489_v39 = vld [vmem:[%s6936_s10 + $0x1b0] sm:$0xff]  ;;  %4203 = vmatpush1.msra.mxu1 %v1281_v0 }
 0x1fa   : > { %12555 = vst [vmem:[#allocation50_spill] sm:$0xff] %v8513_v57  ;;  %v2602_v37 = vadd.f32 %v8204_v13, %v2601_v14  ;;  %3214 = vmatprep.mubr.f32.mxu0 %v8136_v3  ;;  %v1799_v13 = vrot.slane %v8124_v60, 2  ;;  %4204 = vmatprep.subr.mxu1 %v8305_v23  ;;  %v1808_v60 = vsel %vm1595_vm0, %v8506_v44, %v1807_v2  ;;  %v8551_v33 = vmax.f32 %v1489_v39, 0.0 }
 0x1fb   : > { %v2603_v41 = vpop.f32.mrf.mxu0  ;;  %v2906_v57 = vpop.f32.mrf.mxu1  ;;  %3515 = vmatmul.mubr.f32.gmra.mxu1 %v8103_v55  ;;  %v8544_v55 = vld [vmem:[%s11995_s2] ss:$0 sm:$0xff]  ;;  %v8564_v39 = vsel %vm1827_vm2, %v2129_v45, %v8538_v43 }
 0x1fc   : > { %v8530_v58 = vadd.f32 %v2906_v57, %v2602_v37  ;;  %3519 = vmatprep.mubr.f32.mxu1 %v8519_v16  ;;  %v12558_v41 = vrot.slane %v8097_v31, 2 }
 0x1fd   : > { %v2606_v56 = vpop.f32.mrf.mxu0  ;;  %v2908_v14 = vpop.f32.mrf.mxu1  ;;  %3215 = vmatmul.mubr.f32.gmra.mxu0 %v8110_v24  ;;  %v1809_v24 = vrot.slane %v8526_v18, 1 }
 0x1fe   : > { %12556 = vst [vmem:[#allocation43_spill] sm:$0xff] %v8530_v58  ;;  %v2607_v57 = vadd.f32 %v8544_v55, %v2606_v56  ;;  %3219 = vmatprep.mubr.f32.mxu0 %v8156_v10  ;;  %v1800_v56 = vsel %vm1692_vm1, %v12558_v41, %v1799_v13  ;;  %v1801_v14 = vrot.slane %v8144_v22, 2  ;;  %v1312_v58 = vld [vmem:[#allocation8 + $0xf8] sm:$0xff] }
 0x1ff   : > { %v2608_v37 = vpop.f32.mrf.mxu0  ;;  %v2911_v62 = vpop.f32.mrf.mxu1  ;;  %3520 = vmatmul.mubr.f32.gmra.mxu1 %v8121_v42  ;;  %v2141_v42 = vrot.slane %v1808_v60, 7  ;;  %v1810_v31 = vsel %vm1595_vm0, %v1807_v2, %v1809_v24  ;;  %v12559_v41 = vld [vmem:[#allocation104_spill] sm:$0xff] }
 0x200   : > { %v8554_v0 = vadd.f32 %v2911_v62, %v2607_v57  ;;  %3524 = vmatprep.mubr.f32.mxu1 %v8536_v29  ;;  %4205 = vmatpush2.msra.mxu1 %v1312_v58  ;;  %v1811_v37 = vrot.slane %v8551_v33, 1  ;;  %v1802_v45 = vsel %vm1692_vm1, %v1799_v13, %v1801_v14  ;;  %v12561_v13 = vrot.slane %v8166_v1, 7 }
 0x201   : > { %v2611_v10 = vpop.f32.mrf.mxu0  ;;  %v2913_v3 = vpop.f32.mrf.mxu1  ;;  %3220 = vmatmul.mubr.f32.gmra.mxu0 %v8130_v59  ;;  %4206 = vmatprep.subr.mxu1 %v8305_v23  ;;  %v2131_v59 = vrot.slane %v1800_v56, 7  ;;  %v2142_v2 = vsel %vm1827_vm2, %v8538_v43, %v2141_v42 }
 0x202   : > { %12557 = vst [vmem:[#allocation54_spill] sm:$0xff] %v8554_v0  ;;  %v2612_v57 = vadd.f32 %v8544_v55, %v2611_v10  ;;  %3224 = vmatprep.mubr.f32.mxu0 %v8175_v9  ;;  %v1812_v56 = vsel %vm1595_vm0, %v1809_v24, %v1811_v37 }
 0x203   : > { %v2613_v62 = vpop.f32.mrf.mxu0  ;;  %v2916_v3 = vpop.f32.mrf.mxu1  ;;  %3525 = vmatmul.mubr.f32.gmra.mxu1 %v12559_v41  ;;  %v2153_v1 = vrot.slane %v1812_v56, 7  ;;  %v2151_v56 = vrot.slane %v8526_v18, 7 }
 0x204   : > { %v8572_v0 = vadd.f32 %v2916_v3, %v2612_v57  ;;  %3529 = vmatprep.mubr.f32.mxu1 %v8564_v39  ;;  %v2147_v62 = vrot.slane %v1810_v31, 7  ;;  %v1311_v57 = vld [vmem:[#allocation8 + $0xf0] sm:$0xff]  ;;  %v2145_v31 = vrot.slane %v8508_v4, 7 }
 0x205   : > { %v2616_v58 = vpop.f32.mrf.mxu0  ;;  %v2918_v60 = vpop.f32.mrf.mxu1  ;;  %3225 = vmatmul.mubr.f32.gmra.mxu0 %v8151_v54  ;;  %v2137_v54 = vrot.slane %v1802_v45, 7  ;;  %4207 = vmatpush2.msra.mxu1 %v1311_v57 }
 0x206   : > { %12560 = vst [vmem:[#allocation46_spill] sm:$0xff] %v8572_v0  ;;  %v2617_v9 = vadd.f32 %v8544_v55, %v2616_v58  ;;  %3229 = vmatprep.mubr.f32.mxu0 %v8193_v40  ;;  %v8587_v60 = vsel %vm1827_vm2, %v12561_v13, %v2131_v59  ;;  %v12562_v58 = vrot.slane %v8508_v4, 2  ;;  %4208 = vmatprep.subr.mxu1 %v8305_v23 }
 0x207   : > { %v2618_v3 = vpop.f32.mrf.mxu0  ;;  %v2921_v41 = vpop.f32.mrf.mxu1  ;;  %3530 = vmatmul.mubr.f32.gmra.mxu1 %v8160_v35  ;;  %v2148_v35 = vsel %vm1827_vm2, %v2141_v42, %v2147_v62 }
 0x208   : > { %v8589_v10 = vadd.f32 %v2921_v41, %v2617_v9  ;;  %3534 = vmatprep.mubr.f32.mxu1 %v2142_v2  ;;  %v8595_v24 = vsel %vm1692_vm1, %v1801_v14, %v12562_v58  ;;  %v8604_v14 = vsel %vm1827_vm2, %v2131_v59, %v2137_v54  ;;  %v1310_v41 = vld [vmem:[#allocation8 + $0xe8] sm:$0xff]  ;;  %v2163_v59 = vrot.slane %v1811_v37, 7 }
 0x209   : > { %v2621_v3 = vpop.f32.mrf.mxu0  ;;  %v2923_v0 = vpop.f32.mrf.mxu1  ;;  %3230 = vmatmul.mubr.f32.gmra.mxu0 %v8519_v16  ;;  %v12563_v16 = vrot.slane %v8144_v22, 7  ;;  %4209 = vmatpush2.msra.mxu1 %v1310_v41 }
 0x20a   : > { %v2622_v9 = vadd.f32 %v8544_v55, %v2621_v3  ;;  %3234 = vmatprep.mubr.f32.mxu0 %v8587_v60  ;;  %v2143_v0 = vrot.slane %v8595_v24, 7  ;;  %4210 = vmatprep.subr.mxu1 %v8305_v23  ;;  %v12620_v24 = vld [vmem:[#allocation29_spill] sm:$0xff] }
 0x20b   : > { %v2623_v45 = vpop.f32.mrf.mxu0  ;;  %v2926_v2 = vpop.f32.mrf.mxu1  ;;  %3535 = vmatmul.mubr.f32.gmra.mxu1 %v8182_v61  ;;  %v2146_v42 = vsel %vm1827_vm2, %v12563_v16, %v2145_v31  ;;  %v2154_v61 = vsel %vm1827_vm2, %v2147_v62, %v2153_v1  ;;  %v2161_v16 = vrot.slane %v8551_v33, 7 }
 0x20c   : > { %v8607_v57 = vadd.f32 %v2926_v2, %v2622_v9  ;;  %3539 = vmatprep.mubr.f32.mxu1 %v2148_v35  ;;  %v2159_v35 = vrot.slane %v8506_v44, 7  ;;  %v8622_v45 = vsel %vm1827_vm2, %v2137_v54, %v2143_v0  ;;  %v2152_v2 = vsel %vm1827_vm2, %v2145_v31, %v2151_v56  ;;  %v12565_v31 = vld [vmem:[#allocation14_spill] sm:$0xff] }
 0x20d   : > { %v2626_v13 = vpop.f32.mrf.mxu0  ;;  %v2928_v58 = vpop.f32.mrf.mxu1  ;;  %3235 = vmatmul.mubr.f32.gmra.mxu0 %v8536_v29  ;;  %v12564_v29 = vld [vmem:[#allocation13_spill] sm:$0xff] }
 0x20e   : > { %v2627_v3 = vadd.f32 %v8544_v55, %v2626_v13  ;;  %3239 = vmatprep.mubr.f32.mxu0 %v8604_v14  ;;  %v1852_v62 = vrot.slane %v12564_v29, 7  ;;  %v2160_v54 = vsel %vm1827_vm2, %v8538_v43, %v2159_v35  ;;  %v1309_v58 = vld [vmem:[#allocation8 + $0xe0] sm:$0xff] }
 0x20f   : > { %v2628_v22 = vpop.f32.mrf.mxu0  ;;  %v2931_v9 = vpop.f32.mrf.mxu1  ;;  %3540 = vmatmul.mubr.f32.gmra.mxu1 %v2146_v42  ;;  %v2164_v42 = vsel %vm1827_vm2, %v2153_v1, %v2163_v59 }
 0x210   : > { %v8625_v37 = vadd.f32 %v2931_v9, %v2627_v3  ;;  %3544 = vmatprep.mubr.f32.mxu1 %v2154_v61  ;;  %v1854_v22 = vsel %vm1827_vm2, %v1852_v62, %v12565_v31  ;;  %4211 = vmatpush2.msra.mxu1 %v1309_v58  ;;  %v1308_v62 = vld [vmem:[#allocation8 + $0xd8] sm:$0xff] }
 0x211   : > { %v2631_v44 = vpop.f32.mrf.mxu0  ;;  %v2933_v41 = vpop.f32.mrf.mxu1  ;;  %3240 = vmatmul.mubr.f32.gmra.mxu0 %v8564_v39  ;;  %v2162_v39 = vsel %vm1827_vm2, %v2151_v56, %v2161_v16  ;;  %4212 = vmatprep.subr.mxu1 %v8305_v23 }
 0x212   : > { %v2632_v13 = vadd.f32 %v8544_v55, %v2631_v44  ;;  %3244 = vmatprep.mubr.f32.mxu0 %v8622_v45  ;;  %4213 = vmatpush2.msra.mxu1 %v1308_v62 }
 0x213   : > { %v2633_v3 = vpop.f32.mrf.mxu0  ;;  %v2936_v61 = vpop.f32.mrf.mxu1  ;;  %3545 = vmatmul.mubr.f32.gmra.mxu1 %v2152_v2  ;;  %4214 = vmatprep.subr.mxu1 %v8305_v23 }
 0x214   : > { %v8637_v9 = vadd.f32 %v2936_v61, %v2632_v13  ;;  %3549 = vmatprep.mubr.f32.mxu1 %v2164_v42 }
 0x215   : > { %v2636_v1 = vpop.f32.mrf.mxu0  ;;  %v2938_v59 = vpop.f32.mrf.mxu1  ;;  %3245 = vmatmul.mubr.f32.gmra.mxu0 %v2160_v54 }
 0x216   : > { %v2637_v43 = vadd.f32 %v8544_v55, %v2636_v1  ;;  %6073 = vmatprep.mubr.f32.mxu0 %v1854_v22 }
 0x217   : > { %v2638_v35 = vpop.f32.mrf.mxu0  ;;  %v2941_v29 = vpop.f32.mrf.mxu1  ;;  %3550 = vmatmul.mubr.f32.gmra.mxu1 %v2162_v39 }
 0x218   : > { %v8642_v2 = vadd.f32 %v2941_v29, %v2637_v43  ;;  %4236 = vmatprep.mubr.f32.mxu1 %v8305_v23 }
 0x219   : > { %v2943_v44 = vpop.f32.mrf.mxu1  ;;  %v3011_v41 = vpop.f32.mrf.mxu0  ;;  %6074 = vmatmul.mubr.f32.vlgmr.msra.gmra.mxu0 %v7254_v26  ;;  %v1307_v26 = vld [vmem:[#allocation8 + $0xd0] sm:$0xff] }
 0x21a   : > { %v3012_v56 = vadd.f32 %v3011_v41, %v8210_v47  ;;  %6076 = vmatprep.mubr.f32.mxu0 %v7285_v51  ;;  %4215 = vmatpush2.msra.mxu1 %v1307_v26  ;;  %v1328_v44 = vld [vmem:[#allocation8 + $0x178] sm:$0xff] }
 0x21b   : > { %v3013_v55 = vpop.f32.mrf.mxu0  ;;  %v3316_v16 = vpop.f32.mrf.mxu1  ;;  %4216 = vmatprep.subr.mxu1 %v8305_v23  ;;  %4478 = vmatpush1.msra.mxu0 %v1328_v44  ;;  %v1304_v26 = vld [vmem:[#allocation8 + $0xb8] sm:$0xff]  ;;  %v1302_v44 = vld [vmem:[#allocation8 + $0xa8] sm:$0xff] }
 0x21c   : > { %v8649_v42 = vadd.f32 %v3316_v16, %v3012_v56  ;;  %4479 = vmatprep.subr.mxu0 %v8305_v23  ;;  %v1327_v56 = vld [vmem:[#allocation8 + $0x170] sm:$0xff] }
 0x21d   : > { %v3016_v13 = vpop.f32.mrf.mxu0  ;;  %v3318_v54 = vpop.f32.mrf.mxu1  ;;  %6077 = vmatmul.mubr.f32.gmra.mxu0 %v7303_v6 }
 0x21e   : > { %v3017_v58 = vadd.f32 %v3016_v13, %v8217_v17  ;;  %6079 = vmatprep.mubr.f32.mxu0 %v7334_v32  ;;  %v1306_v32 = vld [vmem:[#allocation8 + $0xc8] sm:$0xff]  ;;  %4480 = vmatpush1.msra.mxu0 %v1327_v56  ;;  %v8678_v54 = vld [vmem:[#allocation2] sm:$0xff] }
 0x21f   : > { %v3018_v3 = vpop.f32.mrf.mxu0  ;;  %v3321_v61 = vpop.f32.mrf.mxu1  ;;  %4217 = vmatpush2.msra.mxu1 %v1306_v32  ;;  %4481 = vmatprep.subr.mxu0 %v8678_v54 }
 0x220   : > { %v8654_v47 = vadd.f32 %v3321_v61, %v3017_v58  ;;  %4218 = vmatprep.subr.mxu1 %v8305_v23 }
 0x221   : > { %v3021_v51 = vpop.f32.mrf.mxu0  ;;  %v3323_v31 = vpop.f32.mrf.mxu1  ;;  %6080 = vmatmul.mubr.f32.gmra.mxu0 %v7354_v50 }
 0x222   : > { %v3022_v22 = vadd.f32 %v3021_v51, %v8224_v8  ;;  %6082 = vmatprep.mubr.f32.mxu0 %v7386_v21  ;;  %v1324_v51 = vld [vmem:[#allocation8 + $0x158] sm:$0xff] }
 0x223   : > { %v3023_v6 = vpop.f32.mrf.mxu0  ;;  %v3326_v17 = vpop.f32.mrf.mxu1 }
 0x224   : > { %v8660_v39 = vadd.f32 %v3326_v17, %v3022_v22 }
 0x225   : > { %v3026_v1 = vpop.f32.mrf.mxu0  ;;  %v3328_v59 = vpop.f32.mrf.mxu1  ;;  %6083 = vmatmul.mubr.f32.gmra.mxu0 %v12439_v19  ;;  %v1305_v19 = vld [vmem:[#allocation8 + $0xc0] sm:$0xff] }
 0x226   : > { %12566 = vst [vmem:[#allocation56_spill] sm:$0xff] %v8660_v39  ;;  %v3027_v43 = vadd.f32 %v3026_v1, %v8231_v12  ;;  %6085 = vmatprep.mubr.f32.mxu0 %v12443_v46  ;;  %4219 = vmatpush2.msra.mxu1 %v1305_v19  ;;  %v1322_v1 = vld [vmem:[#allocation8 + $0x148] sm:$0xff] }
 0x227   : > { %v3028_v50 = vpop.f32.mrf.mxu0  ;;  %v3331_v8 = vpop.f32.mrf.mxu1  ;;  %4220 = vmatprep.subr.mxu1 %v8305_v23  ;;  %v1325_v23 = vld [vmem:[#allocation8 + $0x160] sm:$0xff]  ;;  %v12690_v39 = vld [vmem:[#allocation50_spill] sm:$0xff] }
 0x228   : > { %v8666_v35 = vadd.f32 %v3331_v8, %v3027_v43  ;;  %4221 = vmatpush2.msra.mxu1 %v1304_v26  ;;  %v12572_v50 = vld [vmem:[#allocation47_spill] sm:$0xff] }
 0x229   : > { %v3031_v21 = vpop.f32.mrf.mxu0  ;;  %v3333_v29 = vpop.f32.mrf.mxu1  ;;  %6086 = vmatmul.mubr.f32.gmra.mxu0 %v12447_v53  ;;  %v1326_v53 = vld [vmem:[#allocation8 + $0x168] sm:$0xff]  ;;  %4222 = vmatprep.subr.mxu1 %v8678_v54  ;;  %v1319_v26 = vld [vmem:[#allocation8 + $0x130] sm:$0xff] }
 0x22a   : > { %12567 = vst [vmem:[#allocation49_spill] sm:$0xff] %v8666_v35  ;;  %v3032_v62 = vadd.f32 %v3031_v21, %v8238_v27  ;;  %6088 = vmatprep.mubr.f32.mxu0 %v12451_v49  ;;  %4482 = vmatpush1.msra.mxu0 %v1326_v53  ;;  %v12574_v21 = vld [vmem:[#allocation51_spill] sm:$0xff]  ;;  %v12578_v53 = vld [vmem:[#allocation57_spill] sm:$0xff] }
 0x22b   : > { %v3033_v41 = vpop.f32.mrf.mxu0  ;;  %v3336_v12 = vpop.f32.mrf.mxu1  ;;  %4483 = vmatprep.subr.mxu0 %v8678_v54 }
 0x22c   : > { %v8671_v46 = vadd.f32 %v3336_v12, %v3032_v62  ;;  %4484 = vmatpush1.msra.mxu0 %v1325_v23  ;;  %v1320_v41 = vld [vmem:[#allocation8 + $0x138] sm:$0xff] }
 0x22d   : > { %v3036_v55 = vpop.f32.mrf.mxu0  ;;  %v3338_v16 = vpop.f32.mrf.mxu1  ;;  %6089 = vmatmul.mubr.f32.gmra.mxu0 %v12455_v15  ;;  %4485 = vmatprep.subr.mxu0 %v8678_v54 }
 0x22e   : > { %12568 = vst [vmem:[#allocation60_spill] sm:$0xff] %v8671_v46  ;;  %v3037_v27 = vadd.f32 %v3036_v55, %v8245_v11  ;;  %6091 = vmatprep.mubr.f32.mxu0 %v12459_v52  ;;  %4486 = vmatpush1.msra.mxu0 %v1324_v51  ;;  %v12576_v55 = vld [vmem:[#allocation53_spill] sm:$0xff]  ;;  %v12577_v16 = vld [vmem:[#allocation20_spill] sm:$0xff] }
 0x22f   : > { %v3038_v49 = vpop.f32.mrf.mxu0  ;;  %v3341_v13 = vpop.f32.mrf.mxu1  ;;  %4487 = vmatprep.subr.mxu0 %v8678_v54 }
 0x230   : > { %v8681_v58 = vadd.f32 %v3341_v13, %v3037_v27 }
 0x231   : > { %v3041_v3 = vpop.f32.mrf.mxu0  ;;  %v3343_v61 = vpop.f32.mrf.mxu1  ;;  %6092 = vmatmul.mubr.f32.gmra.mxu0 %v12463_v48  ;;  %v1323_v48 = vld [vmem:[#allocation8 + $0x150] sm:$0xff] }
 0x232   : > { %12569 = vst [vmem:[#allocation52_spill] sm:$0xff] %v8681_v58  ;;  %v3042_v11 = vadd.f32 %v3041_v3, %v8252_v36  ;;  %6094 = vmatprep.mubr.f32.mxu0 %v12467_v34  ;;  %v1303_v34 = vld [vmem:[#allocation8 + $0xb0] sm:$0xff]  ;;  %4488 = vmatpush1.msra.mxu0 %v1323_v48 }
 0x233   : > { %v3043_v15 = vpop.f32.mrf.mxu0  ;;  %v3346_v52 = vpop.f32.mrf.mxu1  ;;  %4223 = vmatpush2.msra.mxu1 %v1303_v34  ;;  %4489 = vmatprep.subr.mxu0 %v8678_v54  ;;  %v1317_v34 = vld [vmem:[#allocation8 + $0x120] sm:$0xff] }
 0x234   : > { %v8688_v31 = vadd.f32 %v3346_v52, %v3042_v11  ;;  %4224 = vmatprep.subr.mxu1 %v8678_v54  ;;  %4490 = vmatpush1.msra.mxu0 %v1322_v1  ;;  %v12580_v11 = vld [vmem:[#allocation59_spill] sm:$0xff]  ;;  %v1318_v15 = vld [vmem:[#allocation8 + $0x128] sm:$0xff] }
 0x235   : > { %v3046_v22 = vpop.f32.mrf.mxu0  ;;  %v3348_v6 = vpop.f32.mrf.mxu1  ;;  %6095 = vmatmul.mubr.f32.gmra.mxu0 %v12471_v7  ;;  %4491 = vmatprep.subr.mxu0 %v8678_v54  ;;  %v12581_v52 = vld [vmem:[#allocation18_spill] sm:$0xff] }
 0x236   : > { %12570 = vst [vmem:[#allocation62_spill] sm:$0xff] %v8688_v31  ;;  %v3047_v36 = vadd.f32 %v3046_v22, %v8259_v30  ;;  %6097 = vmatprep.mubr.f32.mxu0 %v12475_v38  ;;  %v1321_v30 = vld [vmem:[#allocation8 + $0x140] sm:$0xff]  ;;  %v12573_v38 = vld [vmem:[#allocation15_spill] sm:$0xff]  ;;  %4225 = vmatpush2.msra.mxu1 %v1302_v44  ;;  %v1300_v44 = vld [vmem:[#allocation8 + $0x98] sm:$0xff] }
 0x237   : > { %v3048_v17 = vpop.f32.mrf.mxu0  ;;  %v3351_v32 = vpop.f32.mrf.mxu1  ;;  %4492 = vmatpush1.msra.mxu0 %v1321_v30  ;;  %4226 = vmatprep.subr.mxu1 %v8678_v54  ;;  %v12582_v22 = vld [vmem:[#allocation63_spill] sm:$0xff]  ;;  %v1301_v6 = vld [vmem:[#allocation8 + $0xa0] sm:$0xff] }
 0x238   : > { %v8695_v59 = vadd.f32 %v3351_v32, %v3047_v36  ;;  %4493 = vmatprep.subr.mxu0 %v8678_v54  ;;  %4227 = vmatpush2.msra.mxu1 %v1301_v6 }
 0x239   : > { %v3051_v43 = vpop.f32.mrf.mxu0  ;;  %v3353_v7 = vpop.f32.mrf.mxu1  ;;  %6098 = vmatmul.mubr.f32.gmra.mxu0 %v12572_v50  ;;  %4228 = vmatprep.subr.mxu1 %v8678_v54  ;;  %v12585_v50 = vld [vmem:[#allocation16_spill] sm:$0xff] }
 0x23a   : > { %12571 = vst [vmem:[#allocation55_spill] sm:$0xff] %v8695_v59  ;;  %v3052_v8 = vadd.f32 %v3051_v43, %v12573_v38  ;;  %6100 = vmatprep.mubr.f32.mxu0 %v12574_v21  ;;  %4494 = vmatpush1.msra.mxu0 %v1320_v41  ;;  %v12584_v43 = vld [vmem:[#allocation65_spill] sm:$0xff]  ;;  %v1316_v7 = vld [vmem:[#allocation8 + $0x118] sm:$0xff] }
 0x23b   : > { %v3053_v29 = vpop.f32.mrf.mxu0  ;;  %v3356_v62 = vpop.f32.mrf.mxu1  ;;  %4495 = vmatprep.subr.mxu0 %v8678_v54  ;;  %v12586_v38 = vld [vmem:[#allocation69_spill] sm:$0xff]  ;;  %4229 = vmatpush2.msra.mxu1 %v1300_v44 }
 0x23c   : > { %v8703_v19 = vadd.f32 %v3356_v62, %v3052_v8  ;;  %4496 = vmatpush1.msra.mxu0 %v1319_v26  ;;  %v1315_v29 = vld [vmem:[#allocation8 + $0x110] sm:$0xff]  ;;  %4230 = vmatprep.subr.mxu1 %v8678_v54 }
 0x23d   : > { %v3056_v12 = vpop.f32.mrf.mxu0  ;;  %v3358_v56 = vpop.f32.mrf.mxu1  ;;  %6101 = vmatmul.mubr.f32.gmra.mxu0 %v12576_v55  ;;  %4497 = vmatprep.subr.mxu0 %v8678_v54  ;;  %v1314_v55 = vld [vmem:[#allocation8 + $0x108] sm:$0xff] }
 0x23e   : > { %12575 = vst [vmem:[#allocation66_spill] sm:$0xff] %v8703_v19  ;;  %v3057_v27 = vadd.f32 %v3056_v12, %v12577_v16  ;;  %6103 = vmatprep.mubr.f32.mxu0 %v12578_v53  ;;  %4498 = vmatpush1.msra.mxu0 %v1318_v15  ;;  %v12588_v56 = vld [vmem:[#allocation71_spill] sm:$0xff]  ;;  %v12589_v16 = vld [vmem:[#allocation24_spill] sm:$0xff] }
 0x23f   : > { %v3058_v49 = vpop.f32.mrf.mxu0  ;;  %v3361_v13 = vpop.f32.mrf.mxu1  ;;  %4499 = vmatprep.subr.mxu0 %v8678_v54  ;;  %v1344_v15 = vld [vmem:[#allocation8 + $0x1f8] sm:$0xff] }
 0x240   : > { %v8710_v23 = vadd.f32 %v3361_v13, %v3057_v27  ;;  %4500 = vmatpush1.msra.mxu0 %v1317_v34  ;;  %v1313_v13 = vld [vmem:[#allocation8 + $0x100] sm:$0xff] }
 0x241   : > { %v3061_v3 = vpop.f32.mrf.mxu0  ;;  %v3363_v61 = vpop.f32.mrf.mxu1  ;;  %6104 = vmatmul.mubr.f32.gmra.mxu0 %v12580_v11  ;;  %4501 = vmatprep.subr.mxu0 %v8678_v54  ;;  %v12591_v11 = vld [vmem:[#allocation77_spill] sm:$0xff] }
 0x242   : > { %12579 = vst [vmem:[#allocation58_spill] sm:$0xff] %v8710_v23  ;;  %v3062_v51 = vadd.f32 %v3061_v3, %v12581_v52  ;;  %6106 = vmatprep.mubr.f32.mxu0 %v12582_v22  ;;  %4502 = vmatpush1.msra.mxu0 %v1316_v7  ;;  %v1299_v22 = vld [vmem:[#allocation8 + $0x90] sm:$0xff]  ;;  %v1342_v7 = vld [vmem:[#allocation8 + $0x1e8] sm:$0xff]  ;;  %v12679_v23 = vld [vmem:[#allocation40_spill] sm:$0xff] }
 0x243   : > { %v3063_v48 = vpop.f32.mrf.mxu0  ;;  %v3366_v36 = vpop.f32.mrf.mxu1  ;;  %4503 = vmatprep.subr.mxu0 %v8678_v54  ;;  %4231 = vmatpush2.msra.mxu1 %v1299_v22  ;;  %v12603_v22 = vld [vmem:[#allocation23_spill] sm:$0xff] }
 0x244   : > { %v8717_v17 = vadd.f32 %v3366_v36, %v3062_v51  ;;  %4504 = vmatpush1.msra.mxu0 %v1315_v29  ;;  %v12593_v51 = vld [vmem:[#allocation80_spill] sm:$0xff]  ;;  %v1343_v36 = vld [vmem:[#allocation8 + $0x1f0] sm:$0xff]  ;;  %4232 = vmatprep.subr.mxu1 %v8678_v54  ;;  %v1341_v29 = vld [vmem:[#allocation8 + $0x1e0] sm:$0xff] }
 0x245   : > { %v3066_v32 = vpop.f32.mrf.mxu0  ;;  %v3368_v1 = vpop.f32.mrf.mxu1  ;;  %6107 = vmatmul.mubr.f32.gmra.mxu0 %v12584_v43  ;;  %4505 = vmatprep.subr.mxu0 %v8678_v54  ;;  %v12595_v43 = vld [vmem:[#allocation82_spill] sm:$0xff] }
 0x246   : > { %12583 = vst [vmem:[#allocation68_spill] sm:$0xff] %v8717_v17  ;;  %v3067_v30 = vadd.f32 %v3066_v32, %v12585_v50  ;;  %6109 = vmatprep.mubr.f32.mxu0 %v12586_v38  ;;  %4506 = vmatpush1.msra.mxu0 %v1314_v55  ;;  %v12596_v50 = vld [vmem:[#allocation17_spill] sm:$0xff]  ;;  %v12597_v38 = vld [vmem:[#allocation86_spill] sm:$0xff]  ;;  %v12599_v55 = vld [vmem:[#allocation88_spill] sm:$0xff] }
 0x247   : > { %v3068_v8 = vpop.f32.mrf.mxu0  ;;  %v3371_v21 = vpop.f32.mrf.mxu1  ;;  %4507 = vmatprep.subr.mxu0 %v8678_v54 }
 0x248   : > { %v8725_v62 = vadd.f32 %v3371_v21, %v3067_v30  ;;  %4508 = vmatpush1.msra.mxu0 %v1313_v13 }
 0x249   : > { %v3071_v41 = vpop.f32.mrf.mxu0  ;;  %v3373_v12 = vpop.f32.mrf.mxu1  ;;  %6110 = vmatmul.mubr.f32.gmra.mxu0 %v12588_v56  ;;  %4509 = vmatprep.subr.mxu0 %v8678_v54 }
 0x24a   : > { %12587 = vst [vmem:[#allocation61_spill] sm:$0xff] %v8725_v62  ;;  %v3072_v27 = vadd.f32 %v3071_v41, %v12589_v16  ;;  %6112 = vmatprep.mubr.f32.mxu0 %v12515_v63  ;;  %v12592_v63 = vld [vmem:[#allocation21_spill] sm:$0xff]  ;;  %4510 = vmatpush2.msra.mxu0 %v1344_v15  ;;  %v1298_v41 = vld [vmem:[#allocation8 + $0x88] sm:$0xff]  ;;  %v1340_v16 = vld [vmem:[#allocation8 + $0x1d8] sm:$0xff] }
 0x24b   : > { %v3073_v53 = vpop.f32.mrf.mxu0  ;;  %v3376_v49 = vpop.f32.mrf.mxu1  ;;  %4511 = vmatprep.subr.mxu0 %v8678_v54  ;;  %4233 = vmatpush2.msra.mxu1 %v1298_v41  ;;  %v1335_v41 = vld [vmem:[#allocation8 + $0x1b0] sm:$0xff] }
 0x24c   : > { %v8732_v26 = vadd.f32 %v3376_v49, %v3072_v27  ;;  %4512 = vmatpush2.msra.mxu0 %v1343_v36  ;;  %v12600_v27 = vld [vmem:[#allocation26_spill] sm:$0xff]  ;;  %4234 = vmatprep.subr.mxu1 %v8678_v54 }
 0x24d   : > { %v3076_v3 = vpop.f32.mrf.mxu0  ;;  %v3378_v61 = vpop.f32.mrf.mxu1  ;;  %6113 = vmatmul.mubr.f32.gmra.mxu0 %v12591_v11  ;;  %4513 = vmatprep.subr.mxu0 %v8678_v54  ;;  %v1297_v11 = vld [vmem:[#allocation8 + $0x80] sm:$0xff] }
 0x24e   : > { %12590 = vst [vmem:[#allocation72_spill] sm:$0xff] %v8732_v26  ;;  %v3077_v52 = vadd.f32 %v3076_v3, %v12592_v63  ;;  %6115 = vmatprep.mubr.f32.mxu0 %v12593_v51  ;;  %4514 = vmatpush2.msra.mxu0 %v1342_v7  ;;  %v1339_v3 = vld [vmem:[#allocation8 + $0x1d0] sm:$0xff]  ;;  %v4004_v51 = vld [vmem:[#allocation2 + $0x7] sm:$0xff] }
 0x24f   : > { %v3078_v6 = vpop.f32.mrf.mxu0  ;;  %v3381_v48 = vpop.f32.mrf.mxu1  ;;  %4515 = vmatprep.subr.mxu0 %v8678_v54  ;;  %4235 = vmatpush2.msra.mxu1 %v1297_v11  ;;  %v1814_v11 = vrot.slane %v8526_v18, 2  ;;  %v4006_v18 = vld [vmem:[#allocation2 + $0x17] sm:$0xff] }
 0x250   : > { %v8740_v34 = vadd.f32 %v3381_v48, %v3077_v52  ;;  %4516 = vmatpush2.msra.mxu0 %v1341_v29  ;;  %v12602_v52 = vld [vmem:[#allocation94_spill] sm:$0xff]  ;;  %v12604_v48 = vld [vmem:[#allocation96_spill] sm:$0xff]  ;;  %4237 = vmatmul.mubr.f32.vlgmr.msra.gmra.mxu1 %v4004_v51 }
 0x251   : > { %v3081_v32 = vpop.f32.mrf.mxu0  ;;  %v3383_v1 = vpop.f32.mrf.mxu1  ;;  %6116 = vmatmul.mubr.f32.gmra.mxu0 %v12595_v43  ;;  %4517 = vmatprep.subr.mxu0 %v8678_v54 }
 0x252   : > { %12594 = vst [vmem:[#allocation64_spill] sm:$0xff] %v8740_v34  ;;  %v3082_v30 = vadd.f32 %v3081_v32, %v12596_v50  ;;  %6118 = vmatprep.mubr.f32.mxu0 %v12597_v38  ;;  %4518 = vmatpush2.msra.mxu0 %v1340_v16  ;;  %v1337_v1 = vld [vmem:[#allocation8 + $0x1c0] sm:$0xff]  ;;  %v12606_v38 = vld [vmem:[#allocation19_spill] sm:$0xff] }
 0x253   : > { %v3083_v8 = vpop.f32.mrf.mxu0  ;;  %v3386_v21 = vpop.f32.mrf.mxu1  ;;  %4519 = vmatprep.subr.mxu0 %v8678_v54  ;;  %4782 = vmatprep.subr.mxu1 %v8678_v54 }
 0x254   : > { %v8748_v44 = vadd.f32 %v3386_v21, %v3082_v30  ;;  %4520 = vmatpush2.msra.mxu0 %v1339_v3  ;;  %v1336_v30 = vld [vmem:[#allocation8 + $0x1b8] sm:$0xff]  ;;  %4241 = vmatprep.mubr.f32.mxu1 %v8678_v54 }
 0x255   : > { %v3086_v12 = vpop.f32.mrf.mxu0  ;;  %v3388_v56 = vpop.f32.mrf.mxu1  ;;  %6119 = vmatmul.mubr.f32.gmra.mxu0 %v12599_v55  ;;  %4521 = vmatprep.subr.mxu0 %v8678_v54 }
 0x256   : > { %12598 = vst [vmem:[#allocation74_spill] sm:$0xff] %v8748_v44  ;;  %v3087_v53 = vadd.f32 %v3086_v12, %v12600_v27  ;;  %6121 = vmatprep.mubr.f32.mxu0 %v12538_v25  ;;  %v1338_v25 = vld [vmem:[#allocation8 + $0x1c8] sm:$0xff]  ;;  %v1490_v56 = vld [vmem:[%s6936_s10 + $0x1b8] sm:$0xff] }
 0x257   : > { %v3088_v49 = vpop.f32.mrf.mxu0  ;;  %v3391_v13 = vpop.f32.mrf.mxu1  ;;  %4522 = vmatpush2.msra.mxu0 %v1338_v25  ;;  %v12608_v27 = vld [vmem:[#allocation30_spill] sm:$0xff] }
 0x258   : > { %v8755_v61 = vadd.f32 %v3391_v13, %v3087_v53  ;;  %4523 = vmatprep.subr.mxu0 %v8678_v54  ;;  %v12609_v49 = vld [vmem:[#allocation103_spill] sm:$0xff] }
 0x259   : > { %v3091_v15 = vpop.f32.mrf.mxu0  ;;  %v3393_v63 = vpop.f32.mrf.mxu1  ;;  %6122 = vmatmul.mubr.f32.gmra.mxu0 %v12602_v52  ;;  %v1333_v52 = vld [vmem:[#allocation8 + $0x1a0] sm:$0xff] }
 0x25a   : > { %12601 = vst [vmem:[#allocation67_spill] sm:$0xff] %v8755_v61  ;;  %v3092_v6 = vadd.f32 %v3091_v15, %v12603_v22  ;;  %6124 = vmatprep.mubr.f32.mxu0 %v12604_v48  ;;  %4524 = vmatpush2.msra.mxu0 %v1337_v1  ;;  %v1546_v15 = vmax.f32 %v1490_v56, 0.0  ;;  %v12611_v22 = vld [vmem:[#allocation105_spill] sm:$0xff]  ;;  %v12612_v48 = vld [vmem:[#allocation27_spill] sm:$0xff] }
 0x25b   : > { %v3093_v36 = vpop.f32.mrf.mxu0  ;;  %v3396_v32 = vpop.f32.mrf.mxu1  ;;  %4525 = vmatprep.subr.mxu0 %v8678_v54  ;;  %v1331_v56 = vld [vmem:[#allocation8 + $0x190] sm:$0xff] }
 0x25c   : > { %v8763_v43 = vadd.f32 %v3396_v32, %v3092_v6  ;;  %4526 = vmatpush2.msra.mxu0 %v1336_v30  ;;  %v1360_v6 = vld [vmem:[#allocation8 + $0x278] sm:$0xff]  ;;  %v12613_v32 = vld [vmem:[#allocation106_spill] sm:$0xff]  ;;  %v1818_v30 = vrot.slane %v1546_v15, 2 }
 0x25d   : > { %v3096_v7 = vpop.f32.mrf.mxu0  ;;  %v3398_v50 = vpop.f32.mrf.mxu1  ;;  %6125 = vmatmul.mubr.f32.gmra.mxu0 %v12550_v5  ;;  %v4005_v5 = vld [vmem:[#allocation2 + $0xf] sm:$0xff]  ;;  %4527 = vmatprep.subr.mxu0 %v8678_v54  ;;  %v12618_v15 = vld [vmem:[#allocation32_spill] sm:$0xff] }
 0x25e   : > { %12605 = vst [vmem:[#allocation78_spill] sm:$0xff] %v8763_v43  ;;  %v3097_v8 = vadd.f32 %v3096_v7, %v12606_v38  ;;  %6127 = vmatprep.mubr.f32.mxu0 %v12552_v28  ;;  %v1334_v28 = vld [vmem:[#allocation8 + $0x1a8] sm:$0xff]  ;;  %4528 = vmatpush2.msra.mxu0 %v1335_v41  ;;  %v1332_v38 = vld [vmem:[#allocation8 + $0x198] sm:$0xff] }
 0x25f   : > { %v3098_v21 = vpop.f32.mrf.mxu0  ;;  %v3401_v29 = vpop.f32.mrf.mxu1  ;;  %4529 = vmatprep.subr.mxu0 %v8678_v54  ;;  %4242 = vmatmul.mubr.f32.gmra.mxu1 %v4005_v5 }
 0x260   : > { %v8771_v12 = vadd.f32 %v3401_v29, %v3097_v8  ;;  %4530 = vmatpush2.msra.mxu0 %v1334_v28  ;;  %4246 = vmatprep.mubr.f32.mxu1 %v8678_v54 }
 0x261   : > { %v3101_v55 = vpop.f32.mrf.mxu0  ;;  %v3403_v16 = vpop.f32.mrf.mxu1  ;;  %6128 = vmatmul.mubr.f32.gmra.mxu0 %v12554_v20  ;;  %v1816_v20 = vrot.slane %v8551_v33, 2  ;;  %4531 = vmatprep.subr.mxu0 %v8678_v54  ;;  %v12614_v33 = vrot.slane %v8508_v4, 2  ;;  %v12616_v4 = vld [vmem:[#allocation22_spill] sm:$0xff] }
 0x262   : > { %12607 = vst [vmem:[#allocation75_spill] sm:$0xff] %v8771_v12  ;;  %v3102_v53 = vadd.f32 %v3101_v55, %v12608_v27  ;;  %6130 = vmatprep.mubr.f32.mxu0 %v12609_v49  ;;  %4783 = vmatpush1.msra.mxu1 %v1360_v6  ;;  %v1359_v49 = vld [vmem:[#allocation8 + $0x270] sm:$0xff] }
 0x263   : > { %v3103_v13 = vpop.f32.mrf.mxu0  ;;  %v3406_v3 = vpop.f32.mrf.mxu1  ;;  %v1815_v50 = vsel %vm1692_vm1, %v12614_v33, %v1814_v11  ;;  %4532 = vmatpush2.msra.mxu0 %v1333_v52  ;;  %4784 = vmatprep.subr.mxu1 %v8678_v54  ;;  %v1817_v21 = vsel %vm1692_vm1, %v1814_v11, %v1816_v20 }
 0x264   : > { %v8781_v63 = vadd.f32 %v3406_v3, %v3102_v53  ;;  %4533 = vmatprep.subr.mxu0 %v8678_v54  ;;  %4247 = vmatmul.mubr.f32.gmra.mxu1 %v4006_v18  ;;  %v2149_v55 = vrot.slane %v1815_v50, 7  ;;  %v2155_v27 = vrot.slane %v1817_v21, 7  ;;  %v1819_v53 = vsel %vm1692_vm1, %v1816_v20, %v1818_v30  ;;  %v1330_v13 = vld [vmem:[#allocation8 + $0x188] sm:$0xff] }
 0x265   : > { %v3106_v25 = vpop.f32.mrf.mxu0  ;;  %v3408_v51 = vpop.f32.mrf.mxu1  ;;  %6131 = vmatmul.mubr.f32.gmra.mxu0 %v12611_v22  ;;  %4785 = vmatpush1.msra.mxu1 %v1359_v49  ;;  %v272_v30 = vlaneseq }
 0x266   : > { %12610 = vst [vmem:[#allocation70_spill] sm:$0xff] %v8781_v63  ;;  %v3107_v36 = vadd.f32 %v3106_v25, %v12612_v48  ;;  %6133 = vmatprep.mubr.f32.mxu0 %v12613_v32  ;;  %4534 = vmatpush2.msra.mxu0 %v1332_v38  ;;  %v2150_v20 = vsel %vm1827_vm2, %v2143_v0, %v2149_v55  ;;  %v2165_v25 = vrot.slane %v1819_v53, 7  ;;  %v12622_v38 = vld [vmem:[#allocation25_spill] sm:$0xff] }
 0x267   : > { %v3108_v1 = vpop.f32.mrf.mxu0  ;;  %v3411_v7 = vpop.f32.mrf.mxu1  ;;  %4535 = vmatprep.subr.mxu0 %v8678_v54  ;;  %v2156_v6 = vsel %vm1827_vm2, %v2149_v55, %v2155_v27  ;;  %4786 = vmatprep.subr.mxu1 %v8678_v54 }
 0x268   : > { %v8793_v8 = vadd.f32 %v3411_v7, %v3107_v36  ;;  %4536 = vmatpush2.msra.mxu0 %v1331_v56  ;;  %v2166_v36 = vsel %vm1827_vm2, %v2155_v27, %v2165_v25  ;;  %v1357_v56 = vld [vmem:[#allocation8 + $0x260] sm:$0xff] }
 0x269   : > { %v3111_v29 = vpop.f32.mrf.mxu0  ;;  %v3413_v41 = vpop.f32.mrf.mxu1  ;;  %6134 = vmatmul.mubr.f32.gmra.mxu0 %v8193_v40  ;;  %4537 = vmatprep.subr.mxu0 %v8678_v54 }
 0x26a   : > { %12615 = vst [vmem:[#allocation79_spill] sm:$0xff] %v8793_v8  ;;  %v3112_v5 = vadd.f32 %v3111_v29, %v12616_v4  ;;  %6136 = vmatprep.mubr.f32.mxu0 %v8587_v60  ;;  %v1329_v60 = vld [vmem:[#allocation8 + $0x180] sm:$0xff]  ;;  %4538 = vmatpush2.msra.mxu0 %v1330_v13 }
 0x26b   : > { %v3113_v16 = vpop.f32.mrf.mxu0  ;;  %v3416_v28 = vpop.f32.mrf.mxu1  ;;  %4539 = vmatprep.subr.mxu0 %v8678_v54 }
 0x26c   : > { %v8802_v3 = vadd.f32 %v3416_v28, %v3112_v5  ;;  %4540 = vmatpush2.msra.mxu0 %v1329_v60  ;;  %v8825_v16 = vshrl.u32 %v272_v30, 7  ;;  %v12624_v28 = vld [vmem:[#allocation36_spill] sm:$0xff] }
 0x26d   : > { %v3116_v40 = vpop.f32.mrf.mxu0  ;;  %v3418_v11 = vpop.f32.mrf.mxu1  ;;  %6137 = vmatmul.mubr.f32.gmra.mxu0 %v8604_v14  ;;  %5087 = vmatprep.subr.mxu0 %v8678_v54 }
 0x26e   : > { %12617 = vst [vmem:[#allocation73_spill] sm:$0xff] %v8802_v3  ;;  %v3117_v52 = vadd.f32 %v3116_v40, %v12618_v15  ;;  %6139 = vmatprep.mubr.f32.mxu0 %v8622_v45  ;;  %v1358_v45 = vld [vmem:[#allocation8 + $0x268] sm:$0xff]  ;;  %v274_v60 = vadd.s32 8, %v8825_v16  ;;  %v1356_v15 = vld [vmem:[#allocation8 + $0x258] sm:$0xff]  ;;  %v9168_v19 = vadd.s32 152, %v8825_v16 }
 0x26f   : > { %v3118_v51 = vpop.f32.mrf.mxu0  ;;  %v3421_v22 = vpop.f32.mrf.mxu1  ;;  %4787 = vmatpush1.msra.mxu1 %v1358_v45 }
 0x270   : > { %v8814_v14 = vadd.f32 %v3421_v22, %v3117_v52  ;;  %4788 = vmatprep.subr.mxu1 %v8678_v54  ;;  %v12626_v52 = vld [vmem:[#allocation33_spill] sm:$0xff] }
 0x271   : > { %v3121_v18 = vpop.f32.mrf.mxu0  ;;  %v3423_v48 = vpop.f32.mrf.mxu1  ;;  %6140 = vmatmul.mubr.f32.gmra.mxu0 %v2150_v20  ;;  %4789 = vmatpush1.msra.mxu1 %v1357_v56  ;;  %v8849_v56 = vadd.s32 24, %v8825_v16 }
 0x272   : > { %12619 = vst [vmem:[#allocation83_spill] sm:$0xff] %v8814_v14  ;;  %v3122_v0 = vadd.f32 %v3121_v18, %v12620_v24  ;;  %6142 = vmatprep.mubr.f32.mxu0 %v2156_v6  ;;  %4790 = vmatprep.subr.mxu1 %v8678_v54  ;;  %v8836_v48 = vmul.u32.u64.low 2863311531, %v274_v60  ;;  %v8837_v45 = vmul.u32.u64.high 2863311531, %v274_v60, %v8836_v48  ;;  %v12628_v24 = vld [vmem:[#allocation28_spill] sm:$0xff] }
 0x273   : > { %v3123_v32 = vpop.f32.mrf.mxu0  ;;  %v3426_v1 = vpop.f32.mrf.mxu1  ;;  %4791 = vmatpush1.msra.mxu1 %v1356_v15  ;;  %v12632_v15 = vld [vmem:[#allocation35_spill] sm:$0xff] }
 0x274   : > { %v8820_v7 = vadd.f32 %v3426_v1, %v3122_v0  ;;  %4792 = vmatprep.subr.mxu1 %v8678_v54  ;;  %v1355_v1 = vld [vmem:[#allocation8 + $0x250] sm:$0xff] }
 0x275   : > { %v3126_v33 = vpop.f32.mrf.mxu0  ;;  %v3428_v50 = vpop.f32.mrf.mxu1  ;;  %6143 = vmatmul.mubr.f32.gmra.mxu0 %v2166_v36  ;;  %4793 = vmatpush1.msra.mxu1 %v1355_v1 }
 0x276   : > { %12621 = vst [vmem:[#allocation76_spill] sm:$0xff] %v8820_v7  ;;  %v3127_v21 = vadd.f32 %v3126_v33, %v12622_v38  ;;  %4794 = vmatprep.subr.mxu1 %v8678_v54  ;;  %v12630_v38 = vld [vmem:[#allocation38_spill] sm:$0xff] }
 0x277   : > { %v3128_v29 = vpop.f32.mrf.mxu0  ;;  %v3431_v41 = vpop.f32.mrf.mxu1 }
 0x278   : > { %v8823_v4 = vadd.f32 %v3431_v41, %v3127_v21  ;;  %v8845_v29 = vmul.u32.u64.low 2863311531, %v8825_v16  ;;  %v8846_v41 = vmul.u32.u64.high 2863311531, %v8825_v16, %v8845_v29 }
 0x279   : > { %v3131_v5 = vpop.f32.mrf.mxu0  ;;  %v3433_v55 = vpop.f32.mrf.mxu1  ;;  %v1353_v29 = vld [vmem:[#allocation8 + $0x240] sm:$0xff] }
 0x27a   : > { %12623 = vst [vmem:[#allocation85_spill] sm:$0xff] %v8823_v4  ;;  %v3132_v27 = vadd.f32 %v3131_v5, %v12624_v28  ;;  %v8852_v28 = vadd.s32 16, %v8825_v16 }
 0x27b   : > { %v3133_v53 = vpop.f32.mrf.mxu0  ;;  %v3436_v49 = vpop.f32.mrf.mxu1 }
 0x27c   : > { %v8829_v13 = vadd.f32 %v3436_v49, %v3132_v27 }
 0x27d   : > { %v3136_v40 = vpop.f32.mrf.mxu0  ;;  %v3438_v11 = vpop.f32.mrf.mxu1 }
 0x27e   : > { %12625 = vst [vmem:[#allocation89_spill] sm:$0xff] %v8829_v13  ;;  %v3137_v20 = vadd.f32 %v3136_v40, %v12626_v52  ;;  %v338_v40 = vshrl.u32 %v8837_v45, 4  ;;  %v1354_v11 = vld [vmem:[#allocation8 + $0x248] sm:$0xff] }
 0x27f   : > { %v3138_v25 = vpop.f32.mrf.mxu0  ;;  %v3441_v51 = vpop.f32.mrf.mxu1  ;;  %4795 = vmatpush1.msra.mxu1 %v1354_v11 }
 0x280   : > { %v8834_v22 = vadd.f32 %v3441_v51, %v3137_v20  ;;  %v8859_v20 = vmul.u32.u64.low 2863311531, %v8849_v56  ;;  %v8860_v25 = vmul.u32.u64.high 2863311531, %v8849_v56, %v8859_v20  ;;  %4796 = vmatprep.subr.mxu1 %v8678_v54 }
 0x281   : > { %v3141_v6 = vpop.f32.mrf.mxu0  ;;  %v3443_v18 = vpop.f32.mrf.mxu1  ;;  %4797 = vmatpush1.msra.mxu1 %v1353_v29  ;;  %v1352_v29 = vld [vmem:[#allocation8 + $0x238] sm:$0xff] }
 0x282   : > { %12627 = vst [vmem:[#allocation81_spill] sm:$0xff] %v8834_v22  ;;  %v3142_v0 = vadd.f32 %v3141_v6, %v12628_v24  ;;  %v8863_v18 = vmul.u32.u64.low 2863311531, %v8852_v28  ;;  %v8864_v48 = vmul.u32.u64.high 2863311531, %v8852_v28, %v8863_v18  ;;  %4798 = vmatprep.subr.mxu1 %v8678_v54  ;;  %v360_v20 = vshrl.u32 %v8860_v25, 4 }
 0x283   : > { %v3143_v36 = vpop.f32.mrf.mxu0  ;;  %v3446_v32 = vpop.f32.mrf.mxu1  ;;  %4799 = vmatpush1.msra.mxu1 %v1352_v29 }
 0x284   : > { %v8840_v33 = vadd.f32 %v3446_v32, %v3142_v0  ;;  %v339_v36 = vmul.u32 24, %v338_v40  ;;  %v12634_v32 = vld [vmem:[#allocation31_spill] sm:$0xff]  ;;  %v8882_v40 = vadd.s32 56, %v8825_v16  ;;  %v349_v18 = vshrl.u32 %v8864_v48, 4  ;;  %4800 = vmatprep.subr.mxu1 %v8678_v54 }
 0x285   : > { %v3146_v50 = vpop.f32.mrf.mxu0  ;;  %v3448_v30 = vpop.f32.mrf.mxu1 }
 0x286   : > { %12629 = vst [vmem:[#allocation91_spill] sm:$0xff] %v8840_v33  ;;  %v3147_v21 = vadd.f32 %v3146_v50, %v12630_v38  ;;  %v327_v50 = vshrl.u32 %v8846_v41, 4  ;;  %v8879_v11 = vsub.s32 %v274_v60, %v339_v36  ;;  %v12636_v41 = vld [vmem:[#allocation42_spill] sm:$0xff]  ;;  %v8893_v60 = vadd.s32 48, %v8825_v16  ;;  %v1351_v33 = vld [vmem:[#allocation8 + $0x230] sm:$0xff] }
 0x287   : > { %v3148_v5 = vpop.f32.mrf.mxu0  ;;  %v3451_v55 = vpop.f32.mrf.mxu1  ;;  %4801 = vmatpush1.msra.mxu1 %v1351_v33 }
 0x288   : > { %v8854_v27 = vadd.f32 %v3451_v55, %v3147_v21  ;;  %v8872_v21 = vadd.s32 40, %v8825_v16  ;;  %v8877_v55 = vadd.s32 32, %v8825_v16  ;;  %vm850_vm3 = vcmp.ne.s32.totalorder %v8879_v11, 0  ;;  %4802 = vmatprep.subr.mxu1 %v8678_v54 }
 0x289   : > { %v3151_v53 = vpop.f32.mrf.mxu0  ;;  %v3453_v49 = vpop.f32.mrf.mxu1  ;;  %vm898_vm4 = vcmp.lt.s32.totalorder %v8879_v11, 0 }
 0x28a   : > { %12631 = vst [vmem:[#allocation84_spill] sm:$0xff] %v8854_v27  ;;  %v3152_v52 = vadd.f32 %v3151_v53, %v12632_v15  ;;  %vm8935_vm5 = vmand %vm898_vm4, %vm850_vm3 }
 0x28b   : > { %v3153_v51 = vpop.f32.mrf.mxu0  ;;  %v3456_v6 = vpop.f32.mrf.mxu1 }
 0x28c   : > { %v8867_v24 = vadd.f32 %v3456_v6, %v3152_v52  ;;  %v328_v52 = vmul.u32 24, %v327_v50  ;;  %v8902_v50 = vadd.s32 72, %v8825_v16 }
 0x28d   : > { %v3156_v0 = vpop.f32.mrf.mxu0  ;;  %v3458_v45 = vpop.f32.mrf.mxu1 }
 0x28e   : > { %12633 = vst [vmem:[#allocation95_spill] sm:$0xff] %v8867_v24  ;;  %v3157_v1 = vadd.f32 %v3156_v0, %v12634_v32  ;;  %v8889_v0 = vmul.u32.u64.low 2863311531, %v8872_v21  ;;  %v8890_v45 = vmul.u32.u64.high 2863311531, %v8872_v21, %v8889_v0 }
 0x28f   : > { %v3158_v30 = vpop.f32.mrf.mxu0  ;;  %v3461_v38 = vpop.f32.mrf.mxu1  ;;  %v8915_v0 = vadd.s32 24, %v8879_v11 }
 0x290   : > { %v8874_v5 = vadd.f32 %v3461_v38, %v3157_v1  ;;  %v8898_v32 = vmul.u32.u64.low 2863311531, %v8877_v55  ;;  %v8899_v1 = vmul.u32.u64.high 2863311531, %v8877_v55, %v8898_v32 }
 0x291   : > { %v3161_v53 = vpop.f32.mrf.mxu0  ;;  %v3463_v49 = vpop.f32.mrf.mxu1  ;;  %v8906_v48 = vmul.u32.u64.low 2863311531, %v8882_v40  ;;  %v8907_v38 = vmul.u32.u64.high 2863311531, %v8882_v40, %v8906_v48  ;;  %v350_v32 = vmul.u32 24, %v349_v18 }
 0x292   : > { %12635 = vst [vmem:[#allocation92_spill] sm:$0xff] %v8874_v5  ;;  %v3162_v15 = vadd.f32 %v3161_v53, %v12636_v41  ;;  %v12638_v53 = vld [vmem:[#allocation39_spill] sm:$0xff]  ;;  %v361_v41 = vmul.u32 24, %v360_v20  ;;  %v8925_v20 = vsub.s32 %v8825_v16, %v328_v52  ;;  %v382_v5 = vshrl.u32 %v8890_v45, 4 }
 0x293   : > { %v3163_v51 = vpop.f32.mrf.mxu0  ;;  %v3466_v6 = vpop.f32.mrf.mxu1  ;;  %v8928_v48 = vmul.u32.u64.low 2863311531, %v8902_v50  ;;  %v8929_v29 = vmul.u32.u64.high 2863311531, %v8902_v50, %v8928_v48  ;;  %v8965_v45 = vadd.s32 88, %v8825_v16 }
 0x294   : > { %v8895_v36 = vadd.f32 %v3466_v6, %v3162_v15  ;;  %v8912_v15 = vadd.s32 64, %v8825_v16  ;;  %vm849_vm6 = vcmp.ne.s32.totalorder %v8925_v20, 0  ;;  %vm897_vm7 = vcmp.lt.s32.totalorder %v8925_v20, 0 }
 0x295   : > { %v3166_v25 = vpop.f32.mrf.mxu0  ;;  %v3468_v30 = vpop.f32.mrf.mxu1  ;;  %vm8987_vm12 = vmand %vm897_vm7, %vm849_vm6 }
 0x296   : > { %12637 = vst [vmem:[#allocation87_spill] sm:$0xff] %v8895_v36  ;;  %v3167_v49 = vadd.f32 %v3166_v25, %v12638_v53  ;;  %v8918_v30 = vmul.u32.u64.low 2863311531, %v8893_v60  ;;  %v8919_v36 = vmul.u32.u64.high 2863311531, %v8893_v60, %v8918_v30 }
 0x297   : > { %v3168_v51 = vpop.f32.mrf.mxu0  ;;  %v3471_v6 = vpop.f32.mrf.mxu1  ;;  %v12642_v30 = vld [vmem:[#allocation34_spill] sm:$0xff] }
 0x298   : > { %v8922_v25 = vadd.f32 %v3471_v6, %v3167_v49  ;;  %v8941_v6 = vsub.s32 %v8849_v56, %v361_v41  ;;  %v371_v41 = vshrl.u32 %v8899_v1, 4 }
 0x299   : > { %v3171_v53 = vpop.f32.mrf.mxu0  ;;  %v3473_v51 = vpop.f32.mrf.mxu1 }
 0x29a   : > { %12639 = vst [vmem:[#allocation97_spill] sm:$0xff] %v8922_v25  ;;  %v3172_v49 = vadd.f32 %v3171_v53, %v12642_v30  ;;  %v8944_v52 = vmul.u32.u64.low 2863311531, %v8912_v15  ;;  %v8945_v25 = vmul.u32.u64.high 2863311531, %v8912_v15, %v8944_v52  ;;  %v8948_v51 = vsub.s32 %v8852_v28, %v350_v32  ;;  %v12644_v32 = vld [vmem:[#allocation44_spill] sm:$0xff] }
 0x29b   : > { %v3173_v48 = vpop.f32.mrf.mxu0  ;;  %v3476_v24 = vpop.f32.mrf.mxu1  ;;  %v8961_v28 = vadd.s32 24, %v8925_v20  ;;  %vm852_vm8 = vcmp.ne.s32.totalorder %v8941_v6, 0  ;;  %vm900_vm9 = vcmp.lt.s32.totalorder %v8941_v6, 0  ;;  %v8972_v33 = vadd.s32 24, %v8941_v6 }
 0x29c   : > { %v8951_v27 = vadd.f32 %v3476_v24, %v3172_v49  ;;  %v404_v24 = vshrl.u32 %v8907_v38, 4  ;;  %vm851_vm10 = vcmp.ne.s32.totalorder %v8948_v51, 0  ;;  %v383_v48 = vmul.u32 24, %v382_v5  ;;  %vm9003_vm13 = vmand %vm900_vm9, %vm852_vm8 }
 0x29d   : > { %v3176_v53 = vpop.f32.mrf.mxu0  ;;  %v3478_v30 = vpop.f32.mrf.mxu1  ;;  %v393_v38 = vshrl.u32 %v8919_v36, 4  ;;  %vm899_vm11 = vcmp.lt.s32.totalorder %v8948_v51, 0  ;;  %v415_v22 = vshrl.u32 %v8945_v25, 4 }
 0x29e   : > { %12643 = vst [vmem:[#allocation90_spill] sm:$0xff] %v8951_v27  ;;  %v3177_v49 = vadd.f32 %v3176_v53, %v12644_v32  ;;  %v8977_v30 = vadd.s32 80, %v8825_v16  ;;  %v372_v53 = vmul.u32 24, %v371_v41  ;;  %v426_v32 = vshrl.u32 %v8929_v29, 4  ;;  %v1350_v41 = vld [vmem:[#allocation8 + $0x228] sm:$0xff]  ;;  %v12648_v29 = vld [vmem:[#allocation41_spill] sm:$0xff]  ;;  %vm9032_vm14 = vmand %vm899_vm11, %vm851_vm10 }
 0x29f   : > { %v3178_v1 = vpop.f32.mrf.mxu0  ;;  %v3481_v52 = vpop.f32.mrf.mxu1  ;;  %v405_v36 = vmul.u32 24, %v404_v24  ;;  %v9008_v24 = vadd.s32 24, %v8948_v51  ;;  %4803 = vmatpush1.msra.mxu1 %v1350_v41  ;;  %v416_v43 = vmul.u32 24, %v415_v22 }
 0x2a0   : > { %v8979_v56 = vadd.f32 %v3481_v52, %v3177_v49  ;;  %v8992_v1 = vmul.u32.u64.low 2863311531, %v8965_v45  ;;  %v8993_v49 = vmul.u32.u64.high 2863311531, %v8965_v45, %v8992_v1  ;;  %v8996_v52 = vadd.s32 104, %v8825_v16  ;;  %4804 = vmatprep.subr.mxu1 %v8678_v54 }
 0x2a1   : > { %v3181_v27 = vpop.f32.mrf.mxu0  ;;  %v3483_v13 = vpop.f32.mrf.mxu1  ;;  %v9012_v1 = vadd.s32 96, %v8825_v16  ;;  %v9018_v3 = vmul.u32.u64.low 2863311531, %v8977_v30  ;;  %v9019_v14 = vmul.u32.u64.high 2863311531, %v8977_v30, %v9018_v3 }
 0x2a2   : > { %12645 = vst [vmem:[#allocation98_spill] sm:$0xff] %v8979_v56  ;;  %v3182_v56 = vadd.f32 %v3181_v27, %v12648_v29  ;;  %v9015_v27 = vsub.s32 %v8872_v21, %v383_v48  ;;  %v394_v29 = vmul.u32 24, %v393_v38  ;;  %v9037_v21 = vsub.s32 %v8877_v55, %v372_v53 }
 0x2a3   : > { %v3183_v7 = vpop.f32.mrf.mxu0  ;;  %v3486_v4 = vpop.f32.mrf.mxu1  ;;  %v427_v3 = vmul.u32 24, %v426_v32  ;;  %v9044_v38 = vsub.s32 %v8882_v40, %v405_v36  ;;  %v9047_v41 = vmul.u32.u64.low 2863311531, %v8996_v52  ;;  %v9048_v25 = vmul.u32.u64.high 2863311531, %v8996_v52, %v9047_v41 }
 0x2a4   : > { %v9022_v63 = vadd.f32 %v3486_v4, %v3182_v56  ;;  %12654 = vst [vmem:[#allocation101_spill] sm:$0xff] %v9037_v21  ;;  %v9052_v55 = vmul.u32.u64.low 2863311531, %v9012_v1  ;;  %v9053_v53 = vmul.u32.u64.high 2863311531, %v9012_v1, %v9052_v55  ;;  %vm854_vm15 = vcmp.ne.s32.totalorder %v9015_v27, 0  ;;  %v12667_v56 = vld [vmem:[#allocation45_spill] sm:$0xff] }
 0x2a5   : > { %v3186_v48 = vpop.f32.mrf.mxu0  ;;  %v3488_v4 = vpop.f32.mrf.mxu1  ;;  %12655 = vst [vmem:[#allocation99_spill] sm:$0xff] %v9044_v38  ;;  %vm902_vm0 = vcmp.lt.s32.totalorder %v9015_v27, 0  ;;  %v9062_v40 = vsub.s32 %v8893_v60, %v394_v29  ;;  %v9067_v36 = vadd.s32 24, %v9015_v27  ;;  %vm853_vm1 = vcmp.ne.s32.totalorder %v9037_v21, 0 }
 0x2a6   : > { %12651 = vst [vmem:[#allocation93_spill] sm:$0xff] %v9022_v63  ;;  %v12656_v63 = vld [vmem:[#allocation37_spill] sm:$0xff]  ;;  %vm901_vm2 = vcmp.lt.s32.totalorder %v9037_v21, 0  ;;  %vm856_vm3 = vcmp.ne.s32.totalorder %v9044_v38, 0  ;;  %vm904_vm4 = vcmp.lt.s32.totalorder %v9044_v38, 0  ;;  %v9082_v29 = vadd.s32 24, %v9044_v38  ;;  %vm9116_vm10 = vmand %vm902_vm0, %vm854_vm15 }
 0x2a7   : > { %v3187_v8 = vadd.f32 %v3186_v48, %v12656_v63  ;;  %v3188_v32 = vpop.f32.mrf.mxu0  ;;  %v3491_v4 = vpop.f32.mrf.mxu1  ;;  %12657 = vst [vmem:[#allocation100_spill] sm:$0xff] %v9062_v40  ;;  %v1349_v63 = vld [vmem:[#allocation8 + $0x220] sm:$0xff]  ;;  %v9071_v48 = vsub.s32 %v8902_v50, %v427_v3  ;;  %v9085_v50 = vsub.s32 %v8912_v15, %v416_v43  ;;  %v448_v3 = vshrl.u32 %v8993_v49, 4  ;;  %vm9126_vm9 = vmand %vm901_vm2, %vm853_vm1 }
 0x2a8   : > { %4805 = vmatpush1.msra.mxu1 %v1349_v63  ;;  %v9075_v32 = vadd.s32 24, %v9037_v21  ;;  %12662 = vst [vmem:[#allocation14_spill] sm:$0xff] %v9082_v29  ;;  %vm855_vm6 = vcmp.ne.s32.totalorder %v9062_v40, 0  ;;  %vm903_vm7 = vcmp.lt.s32.totalorder %v9062_v40, 0  ;;  %v9101_v43 = vadd.s32 112, %v8825_v16  ;;  %vm9146_vm15 = vmand %vm904_vm4, %vm856_vm3  ;;  %v1376_v21 = vld [vmem:[#allocation8 + $0x2f8] sm:$0xff] }
 0x2a9   : > { %v9064_v22 = vadd.f32 %v3491_v4, %v3187_v8  ;;  %12659 = vst [vmem:[#allocation104_spill] sm:$0xff] %v9071_v48  ;;  %v3191_v41 = vpop.f32.mrf.mxu0  ;;  %v3493_v55 = vpop.f32.mrf.mxu1  ;;  %4806 = vmatprep.subr.mxu1 %v8678_v54  ;;  %v12661_v8 = vld [vmem:[#allocation48_spill] sm:$0xff]  ;;  %12663 = vst [vmem:[#allocation47_spill] sm:$0xff] %v9085_v50  ;;  %v9092_v54 = vadd.s32 120, %v8825_v16  ;;  %vm858_vm8 = vcmp.ne.s32.totalorder %v9071_v48, 0  ;;  %vm857_vm11 = vcmp.ne.s32.totalorder %v9085_v50, 0 }
 0x2aa   : > { %12660 = vst [vmem:[#allocation13_spill] sm:$0xff] %v9075_v32  ;;  %v3192_v60 = vadd.f32 %v3191_v41, %v12661_v8  ;;  %v437_v55 = vshrl.u32 %v9019_v14, 4  ;;  %v9097_v8 = vadd.s32 24, %v9062_v40  ;;  %v470_v14 = vshrl.u32 %v9048_v25, 4  ;;  %vm9159_vm1 = vmand %vm903_vm7, %vm855_vm6  ;;  %v12703_v40 = vld [vmem:[#allocation54_spill] sm:$0xff] }
 0x2ab   : > { %12658 = vst [vmem:[#allocation102_spill] sm:$0xff] %v9064_v22  ;;  %v3193_v4 = vpop.f32.mrf.mxu0  ;;  %v3496_v63 = vpop.f32.mrf.mxu1  ;;  %v459_v12 = vshrl.u32 %v9053_v53, 4  ;;  %v9131_v61 = vmul.u32.u64.low 2863311531, %v9092_v54  ;;  %v9132_v26 = vmul.u32.u64.high 2863311531, %v9092_v54, %v9131_v61  ;;  %v9137_v53 = vld [vmem:[#allocation2] sm:$0xff]  ;;  %vm905_vm0 = vcmp.lt.s32.totalorder %v9085_v50, 0 }
 0x2ac   : > { %v9094_v41 = vadd.f32 %v3496_v63, %v3192_v60  ;;  %12665 = vst [vmem:[#allocation51_spill] sm:$0xff] %v9097_v8  ;;  %v9105_v4 = vadd.s32 24, %v9071_v48  ;;  %v9109_v60 = vadd.s32 136, %v8825_v16  ;;  %v1348_v63 = vld [vmem:[#allocation8 + $0x218] sm:$0xff]  ;;  %vm12680_vm2 = vcmp.lt.s32.totalorder %v9071_v48, 0  ;;  %vm9193_vm4 = vmand %vm905_vm0, %vm857_vm11 }
 0x2ad   : > { %v3196_v15 = vpop.f32.mrf.mxu0  ;;  %v3498_v49 = vpop.f32.mrf.mxu1  ;;  %4807 = vmatpush1.msra.mxu1 %v1348_v63  ;;  %vm9175_vm3 = vmand %vm12680_vm2, %vm858_vm8  ;;  %v9180_v31 = vadd.s32 24, %v9085_v50 }
 0x2ae   : > { %12664 = vst [vmem:[#allocation15_spill] sm:$0xff] %v9094_v41  ;;  %12666 = vst [vmem:[#allocation53_spill] sm:$0xff] %v9105_v4  ;;  %v3197_v41 = vadd.f32 %v3196_v15, %v12667_v56  ;;  %v449_v49 = vmul.u32 24, %v448_v3  ;;  %v438_v15 = vmul.u32 24, %v437_v55  ;;  %v9135_v3 = vadd.s32 128, %v8825_v16  ;;  %4808 = vmatprep.subr.mxu1 %v9137_v53 }
 0x2af   : > { %v3198_v25 = vpop.f32.mrf.mxu0  ;;  %v3501_v44 = vpop.f32.mrf.mxu1  ;;  %v9152_v61 = vmul.u32.u64.low 2863311531, %v9101_v43  ;;  %v9153_v55 = vmul.u32.u64.high 2863311531, %v9101_v43, %v9152_v61  ;;  %12684 = vst [vmem:[#allocation63_spill] sm:$0xff] %v9180_v31 }
 0x2b0   : > { %v9140_v63 = vadd.f32 %v3501_v44, %v3197_v41  ;;  %v12673_v25 = vmov 0  ;;  %v12676_v44 = vmov 0  ;;  %v471_v41 = vmul.u32 24, %v470_v14 }
 0x2b1   : > { %v12674_v25 = vsel %vm9146_vm15, 4294967295, %v12673_v25  ;;  %v3201_v34 = vpop.f32.mrf.mxu0  ;;  %v3503_v17 = vpop.f32.mrf.mxu1  ;;  %v12677_v44 = vsel %vm9159_vm1, 4294967295, %v12676_v44  ;;  %v9183_v14 = vsub.s32 %v8965_v45, %v449_v49  ;;  %v9198_v58 = vsub.s32 %v8977_v30, %v438_v15  ;;  %v1347_v45 = vld [vmem:[#allocation8 + $0x210] sm:$0xff] }
 0x2b2   : > { %12672 = vst [vmem:[#allocation20_spill] sm:$0xff] %v9140_v63  ;;  %12675 = vst [vmem:[#allocation57_spill] sm:$0xff] %v12674_v25  ;;  %v9164_v63 = vmul.u32.u64.low 2863311531, %v9109_v60  ;;  %v9165_v62 = vmul.u32.u64.high 2863311531, %v9109_v60, %v9164_v63  ;;  %v3202_v61 = vadd.f32 %v3201_v34, %v12679_v23  ;;  %v12681_v17 = vmov 0  ;;  %4809 = vmatpush1.msra.mxu1 %v1347_v45 }
 0x2b3   : > { %12678 = vst [vmem:[#allocation59_spill] sm:$0xff] %v12677_v44  ;;  %v12682_v17 = vsel %vm9175_vm3, 4294967295, %v12681_v17  ;;  %v460_v63 = vmul.u32 24, %v459_v12  ;;  %v3203_v59 = vpop.f32.mrf.mxu0  ;;  %v3506_v46 = vpop.f32.mrf.mxu1  ;;  %v12685_v34 = vmov 0  ;;  %4810 = vmatprep.subr.mxu1 %v9137_v53  ;;  %vm860_vm6 = vcmp.ne.s32.totalorder %v9183_v14, 0 }
 0x2b4   : > { %12683 = vst [vmem:[#allocation18_spill] sm:$0xff] %v12682_v17  ;;  %v12686_v34 = vsel %vm9193_vm4, 4294967295, %v12685_v34  ;;  %v9201_v12 = vmul.u32.u64.low 2863311531, %v9135_v3  ;;  %v9202_v59 = vmul.u32.u64.high 2863311531, %v9135_v3, %v9201_v12  ;;  %v9204_v49 = vadd.f32 %v3506_v46, %v3202_v61 }
 0x2b5   : > { %12687 = vst [vmem:[#allocation65_spill] sm:$0xff] %v12686_v34  ;;  %v3206_v15 = vpop.f32.mrf.mxu0  ;;  %v3508_v12 = vpop.f32.mrf.mxu1  ;;  %v9223_v61 = vsub.s32 %v8996_v52, %v471_v41  ;;  %vm908_vm7 = vcmp.lt.s32.totalorder %v9183_v14, 0  ;;  %vm859_vm8 = vcmp.ne.s32.totalorder %v9198_v58, 0  ;;  %v9249_v45 = vadd.s32 24, %v9198_v58 }
 0x2b6   : > { %12688 = vst [vmem:[#allocation16_spill] sm:$0xff] %v9204_v49  ;;  %v9226_v23 = vmul.u32.u64.low 2863311531, %v9168_v19  ;;  %v9227_v49 = vmul.u32.u64.high 2863311531, %v9168_v19, %v9226_v23  ;;  %v3207_v44 = vadd.f32 %v3206_v15, %v12690_v39  ;;  %v9237_v12 = vsub.s32 %v9012_v1, %v460_v63  ;;  %vm9278_vm11 = vmand %vm908_vm7, %vm860_vm6 }
 0x2b7   : > { %12689 = vst [vmem:[#allocation69_spill] sm:$0xff] %v9223_v61  ;;  %v3208_v52 = vpop.f32.mrf.mxu0  ;;  %v3511_v41 = vpop.f32.mrf.mxu1  ;;  %v9241_v23 = vadd.s32 24, %v9183_v14  ;;  %v492_v39 = vshrl.u32 %v9132_v26, 4  ;;  %v481_v1 = vshrl.u32 %v9153_v55, 4  ;;  %v514_v46 = vshrl.u32 %v9165_v62, 4  ;;  %v1346_v26 = vld [vmem:[#allocation8 + $0x208] sm:$0xff] }
 0x2b8   : > { %12691 = vst [vmem:[#allocation71_spill] sm:$0xff] %v9237_v12  ;;  %v9245_v15 = vadd.f32 %v3511_v41, %v3207_v44  ;;  %v9256_v30 = vadd.s32 144, %v8825_v16  ;;  %v12693_v44 = vld [vmem:[#allocation43_spill] sm:$0xff]  ;;  %v9264_v55 = vadd.s32 168, %v8825_v16  ;;  %4811 = vmatpush1.msra.mxu1 %v1346_v26  ;;  %v503_v31 = vshrl.u32 %v9202_v59, 4 }
 0x2b9   : > { %v3211_v63 = vpop.f32.mrf.mxu0  ;;  %v3513_v52 = vpop.f32.mrf.mxu1  ;;  %v493_v62 = vmul.u32 24, %v492_v39  ;;  %v9269_v34 = vadd.s32 160, %v8825_v16  ;;  %4812 = vmatprep.subr.mxu1 %v9137_v53  ;;  %v12696_v26 = vmov 0  ;;  %v482_v39 = vmul.u32 24, %v481_v1  ;;  %v1345_v1 = vld [vmem:[#allocation8 + $0x200] sm:$0xff] }
 0x2ba   : > { %12692 = vst [vmem:[#allocation24_spill] sm:$0xff] %v9245_v15  ;;  %v3212_v41 = vadd.f32 %v3211_v63, %v12693_v44  ;;  %v9260_v15 = vadd.s32 24, %v9223_v61  ;;  %v12697_v26 = vsel %vm9278_vm11, 4294967295, %v12696_v26  ;;  %v9283_v44 = vadd.s32 24, %v9237_v12  ;;  %4813 = vmatpush1.msra.mxu1 %v1345_v1 }
 0x2bb   : > { %v3213_v52 = vpop.f32.mrf.mxu0  ;;  %v3516_v50 = vpop.f32.mrf.mxu1  ;;  %v9286_v59 = vadd.s32 184, %v8825_v16  ;;  %vm12699_vm2 = vcmp.lt.s32.totalorder %v9198_v58, 0  ;;  %v9298_v4 = vmul.u32.u64.low 2863311531, %v9256_v30  ;;  %v9299_v17 = vmul.u32.u64.high 2863311531, %v9256_v30, %v9298_v4  ;;  %4814 = vmatprep.subr.mxu1 %v9137_v53 }
 0x2bc   : > { %12694 = vst [vmem:[#allocation77_spill] sm:$0xff] %v9260_v15  ;;  %v9272_v63 = vadd.f32 %v3516_v50, %v3212_v41  ;;  %12698 = vst [vmem:[#allocation80_spill] sm:$0xff] %v9283_v44  ;;  %v12700_v50 = vmov 0  ;;  %v515_v41 = vmul.u32 24, %v514_v46  ;;  %vm12704_vm6 = vcmp.ne.s32.totalorder %v9223_v61, 0  ;;  %4815 = vmatpush2.msra.mxu1 %v1376_v21  ;;  %v12716_v21 = vld [vmem:[#allocation46_spill] sm:$0xff] }
 0x2bd   : > { %v3216_v52 = vpop.f32.mrf.mxu0  ;;  %v3518_v48 = vpop.f32.mrf.mxu1  ;;  %vm9292_vm0 = vmand %vm12699_vm2, %vm859_vm8  ;;  %vm12705_vm7 = vcmp.lt.s32.totalorder %v9223_v61, 0  ;;  %v9311_v38 = vmul.u32.u64.low 2863311531, %v9264_v55  ;;  %v9312_v46 = vmul.u32.u64.high 2863311531, %v9264_v55, %v9311_v38  ;;  %vm12710_vm8 = vcmp.ne.s32.totalorder %v9237_v12, 0  ;;  %4816 = vmatprep.subr.mxu1 %v9137_v53 }
 0x2be   : > { %12695 = vst [vmem:[#allocation21_spill] sm:$0xff] %v9272_v63  ;;  %v12701_v50 = vsel %vm9292_vm0, 4294967295, %v12700_v50  ;;  %v536_v63 = vshrl.u32 %v9227_v49, 4  ;;  %v3217_v8 = vadd.f32 %v3216_v52, %v12703_v40  ;;  %vm9306_vm4 = vmand %vm12705_vm7, %vm12704_vm6  ;;  %v12706_v48 = vmov 0 }
 0x2bf   : > { %12702 = vst [vmem:[#allocation82_spill] sm:$0xff] %v12701_v50  ;;  %v12707_v48 = vsel %vm9306_vm4, 4294967295, %v12706_v48  ;;  %v9315_v49 = vadd.s32 176, %v8825_v16  ;;  %v3218_v4 = vpop.f32.mrf.mxu0  ;;  %v3521_v29 = vpop.f32.mrf.mxu1  ;;  %v9318_v40 = vsub.s32 %v9092_v54, %v493_v62  ;;  %v504_v52 = vmul.u32 24, %v503_v31 }
 0x2c0   : > { %v9321_v25 = vmul.u32.u64.low 2863311531, %v9269_v34  ;;  %v9322_v35 = vmul.u32.u64.high 2863311531, %v9269_v34, %v9321_v25  ;;  %v9325_v32 = vadd.f32 %v3521_v29, %v3217_v8  ;;  %vm12711_vm2 = vcmp.lt.s32.totalorder %v9237_v12, 0 }
 0x2c1   : > { %12708 = vst [vmem:[#allocation17_spill] sm:$0xff] %v9318_v40  ;;  %vm9331_vm6 = vmand %vm12711_vm2, %vm12710_vm8  ;;  %v12712_v38 = vmov 0  ;;  %v9336_v54 = vsub.s32 %v9101_v43, %v482_v39  ;;  %v9339_v31 = vmul.u32.u64.low 2863311531, %v9286_v59  ;;  %v9340_v62 = vmul.u32.u64.high 2863311531, %v9286_v59, %v9339_v31  ;;  %v3221_v25 = vpop.f32.mrf.mxu0  ;;  %v3523_v1 = vpop.f32.mrf.mxu1 }
 0x2c2   : > { %12709 = vst [vmem:[#allocation86_spill] sm:$0xff] %v9325_v32  ;;  %v12713_v38 = vsel %vm9331_vm6, 4294967295, %v12712_v38  ;;  %v537_v39 = vmul.u32 24, %v536_v63  ;;  %v3222_v4 = vadd.f32 %v3221_v25, %v12716_v21  ;;  %v9357_v31 = vsub.s32 %v9109_v60, %v515_v41  ;;  %v1375_v60 = vld [vmem:[#allocation8 + $0x2f0] sm:$0xff] }
 0x2c3   : > { %12714 = vst [vmem:[#allocation88_spill] sm:$0xff] %v12713_v38  ;;  %12715 = vst [vmem:[#allocation26_spill] sm:$0xff] %v9336_v54  ;;  %v9360_v1 = vmul.u32.u64.low 2863311531, %v9315_v49  ;;  %v9361_v29 = vmul.u32.u64.high 2863311531, %v9315_v49, %v9360_v1  ;;  %v3223_v32 = vpop.f32.mrf.mxu0  ;;  %v3526_v50 = vpop.f32.mrf.mxu1  ;;  %v9370_v63 = vsub.s32 %v9135_v3, %v504_v52  ;;  %v9375_v25 = vadd.s32 24, %v9318_v40  ;;  %4817 = vmatpush2.msra.mxu1 %v1375_v60 }
 0x2c4   : > { %v9372_v41 = vadd.f32 %v3526_v50, %v3222_v4  ;;  %v9379_v32 = vadd.s32 200, %v8825_v16  ;;  %v9383_v8 = vadd.s32 24, %v9336_v54  ;;  %v9386_v3 = vsub.s32 %v9168_v19, %v537_v39  ;;  %4818 = vmatprep.subr.mxu1 %v9137_v53 }
 0x2c5   : > { %v3226_v21 = vpop.f32.mrf.mxu0  ;;  %v3528_v1 = vpop.f32.mrf.mxu1  ;;  %v525_v50 = vshrl.u32 %v9299_v17, 4  ;;  %v558_v4 = vshrl.u32 %v9312_v46, 4  ;;  %v9395_v43 = vadd.s32 24, %v9357_v31  ;;  %v547_v19 = vshrl.u32 %v9322_v35, 4 }
 0x2c6   : > { %12717 = vst [vmem:[#allocation94_spill] sm:$0xff] %v9372_v41  ;;  %12718 = vst [vmem:[#allocation23_spill] sm:$0xff] %v9383_v8  ;;  %v3227_v52 = vadd.f32 %v3226_v21, %v8589_v10  ;;  %v9400_v17 = vadd.s32 192, %v8825_v16  ;;  %v580_v10 = vshrl.u32 %v9340_v62, 4  ;;  %vm12721_vm8 = vcmp.ne.s32.totalorder %v9318_v40, 0 }
 0x2c7   : > { %12719 = vst [vmem:[#allocation96_spill] sm:$0xff] %v9386_v3  ;;  %v3228_v60 = vpop.f32.mrf.mxu0  ;;  %v3531_v1 = vpop.f32.mrf.mxu1  ;;  %v9406_v21 = vmul.u32.u64.low 2863311531, %v9379_v32  ;;  %v9407_v41 = vmul.u32.u64.high 2863311531, %v9379_v32, %v9406_v21  ;;  %vm12722_vm2 = vcmp.lt.s32.totalorder %v9318_v40, 0  ;;  %v12723_v12 = vmov 0 }
 0x2c8   : > { %v9402_v39 = vadd.f32 %v3531_v1, %v3227_v52  ;;  %vm9413_vm7 = vmand %vm12722_vm2, %vm12721_vm8  ;;  %v526_v35 = vmul.u32 24, %v525_v50  ;;  %v9420_v62 = vadd.s32 216, %v8825_v16  ;;  %vm12725_vm0 = vcmp.ne.s32.totalorder %v9336_v54, 0 }
 0x2c9   : > { %v3231_v46 = vpop.f32.mrf.mxu0  ;;  %v3533_v60 = vpop.f32.mrf.mxu1  ;;  %v12724_v12 = vsel %vm9413_vm7, 4294967295, %v12723_v12  ;;  %vm12726_vm11 = vcmp.lt.s32.totalorder %v9336_v54, 0  ;;  %v12727_v1 = vmov 0  ;;  %vm916_vm8 = vcmp.lt.s32.totalorder %v9386_v3, 0 }
 0x2ca   : > { %12720 = vst [vmem:[#allocation19_spill] sm:$0xff] %v9402_v39  ;;  %v3232_v52 = vadd.f32 %v3231_v46, %v8607_v57  ;;  %vm9427_vm3 = vmand %vm12726_vm11, %vm12725_vm0  ;;  %v559_v21 = vmul.u32 24, %v558_v4  ;;  %v569_v60 = vshrl.u32 %v9361_v29, 4  ;;  %vm12730_vm2 = vcmp.ne.s32.totalorder %v9357_v31, 0  ;;  %v1374_v4 = vld [vmem:[#allocation8 + $0x2e8] sm:$0xff] }
 0x2cb   : > { %v12728_v1 = vsel %vm9427_vm3, 4294967295, %v12727_v1  ;;  %v3233_v39 = vpop.f32.mrf.mxu0  ;;  %v3536_v50 = vpop.f32.mrf.mxu1  ;;  %vm12731_vm4 = vcmp.lt.s32.totalorder %v9357_v31, 0  ;;  %v12732_v57 = vmov 0  ;;  %v9442_v46 = vadd.s32 24, %v9370_v63  ;;  %4819 = vmatpush2.msra.mxu1 %v1374_v4 }
 0x2cc   : > { %12729 = vst [vmem:[#allocation30_spill] sm:$0xff] %v12728_v1  ;;  %vm9437_vm6 = vmand %vm12731_vm4, %vm12730_vm2  ;;  %v548_v44 = vmul.u32 24, %v547_v19  ;;  %v9445_v38 = vmul.u32.u64.low 2863311531, %v9400_v17  ;;  %v9446_v61 = vmul.u32.u64.high 2863311531, %v9400_v17, %v9445_v38  ;;  %v9448_v29 = vadd.f32 %v3536_v50, %v3232_v52  ;;  %4820 = vmatprep.subr.mxu1 %v9137_v53  ;;  %v1373_v39 = vld [vmem:[#allocation8 + $0x2e0] sm:$0xff] }
 0x2cd   : > { %v12733_v57 = vsel %vm9437_vm6, 4294967295, %v12732_v57  ;;  %vm12735_vm4 = vcmp.ne.s32.totalorder %v9370_v63, 0  ;;  %vm12736_vm11 = vcmp.lt.s32.totalorder %v9370_v63, 0  ;;  %v12737_v15 = vmov 0  ;;  %v3236_v52 = vpop.f32.mrf.mxu0  ;;  %v3538_v50 = vpop.f32.mrf.mxu1  ;;  %4821 = vmatpush2.msra.mxu1 %v1373_v39 }
 0x2ce   : > { %12734 = vst [vmem:[#allocation103_spill] sm:$0xff] %v9448_v29  ;;  %vm9458_vm0 = vmand %vm12736_vm11, %vm12735_vm4  ;;  %v9463_v19 = vadd.s32 24, %v9386_v3  ;;  %v581_v38 = vmul.u32 24, %v580_v10  ;;  %vm12740_vm2 = vcmp.ne.s32.totalorder %v9386_v3, 0  ;;  %v12741_v29 = vmov 0  ;;  %4822 = vmatprep.subr.mxu1 %v9137_v53 }
 0x2cf   : > { %v12738_v15 = vsel %vm9458_vm0, 4294967295, %v12737_v15  ;;  %vm9473_vm4 = vmand %vm916_vm8, %vm12740_vm2  ;;  %v9478_v40 = vsub.s32 %v9256_v30, %v526_v35  ;;  %v9481_v10 = vmul.u32.u64.low 2863311531, %v9420_v62  ;;  %v9482_v4 = vmul.u32.u64.high 2863311531, %v9420_v62, %v9481_v10  ;;  %v3238_v1 = vpop.f32.mrf.mxu0  ;;  %v3541_v30 = vpop.f32.mrf.mxu1 }
 0x2d0   : > { %12739 = vst [vmem:[#allocation105_spill] sm:$0xff] %v9463_v19  ;;  %v12742_v29 = vsel %vm9473_vm4, 4294967295, %v12741_v29  ;;  %v3237_v50 = vadd.f32 %v3236_v52, %v8625_v37  ;;  %v9491_v54 = vsub.s32 %v9264_v55, %v559_v21  ;;  %v570_v8 = vmul.u32 24, %v569_v60 }
 0x2d1   : > { %12743 = vst [vmem:[#allocation27_spill] sm:$0xff] %v9478_v40  ;;  %v9498_v10 = vsub.s32 %v9269_v34, %v548_v44  ;;  %v9501_v37 = vadd.s32 208, %v8825_v16  ;;  %v9504_v52 = vadd.s32 232, %v8825_v16  ;;  %v9513_v21 = vsub.s32 %v9286_v59, %v581_v38  ;;  %v3241_v44 = vpop.f32.mrf.mxu0  ;;  %v3543_v60 = vpop.f32.mrf.mxu1 }
 0x2d2   : > { %12744 = vst [vmem:[#allocation106_spill] sm:$0xff] %v9491_v54  ;;  %v9506_v55 = vadd.f32 %v3541_v30, %v3237_v50  ;;  %v602_v34 = vshrl.u32 %v9407_v41, 4  ;;  %vm867_vm8 = vcmp.ne.s32.totalorder %v9478_v40, 0  ;;  %v9519_v50 = vadd.s32 24, %v9478_v40 }
 0x2d3   : > { %12745 = vst [vmem:[#allocation22_spill] sm:$0xff] %v9498_v10  ;;  %12747 = vst [vmem:[#allocation29_spill] sm:$0xff] %v9513_v21  ;;  %v9522_v30 = vadd.s32 224, %v8825_v16  ;;  %v3242_v59 = vadd.f32 %v3241_v44, %v8637_v9  ;;  %v9529_v41 = vsub.s32 %v9315_v49, %v570_v8  ;;  %v3243_v39 = vpop.f32.mrf.mxu0  ;;  %v3546_v38 = vpop.f32.mrf.mxu1  ;;  %v12750_v60 = vsel %vm8935_vm5, %v8915_v0, %v8879_v11 }
 0x2d4   : > { %12746 = vst [vmem:[#allocation32_spill] sm:$0xff] %v9506_v55  ;;  %12748 = vst [vmem:[#allocation25_spill] sm:$0xff] %v9519_v50  ;;  %vm9536_vm11 = vcmp.lt.s32.totalorder %v12750_v60, 16  ;;  %v9541_v9 = vadd.s32 24, %v9491_v54  ;;  %v591_v49 = vshrl.u32 %v9446_v61, 4  ;;  %vm12755_vm0 = vcmp.lt.s32.totalorder %v9478_v40, 0 }
 0x2d5   : > { %12749 = vst [vmem:[#allocation36_spill] sm:$0xff] %v9529_v41  ;;  %v9546_v8 = vadd.f32 %v3546_v38, %v3242_v59  ;;  %vm9552_vm5 = vmand %vm12755_vm0, %vm867_vm8  ;;  %v12756_v11 = vmov 0  ;;  %v603_v0 = vmul.u32 24, %v602_v34  ;;  %v3246_v18 = vpop.f32.mrf.mxu0  ;;  %v3548_v44 = vpop.f32.mrf.mxu1  ;;  %v12759_v61 = vsel %vm8987_vm12, %v8961_v28, %v8925_v20 }
 0x2d6   : > { %12753 = vst [vmem:[#allocation33_spill] sm:$0xff] %v9541_v9  ;;  %v12757_v11 = vsel %vm9552_vm5, 4294967295, %v12756_v11  ;;  %vm9563_vm4 = vcmp.lt.s32.totalorder %v12759_v61, 16  ;;  %vm12762_vm0 = vcmp.ne.s32.totalorder %v9491_v54, 0  ;;  %vm12763_vm8 = vcmp.lt.s32.totalorder %v9491_v54, 0 }
 0x2d7   : > { %12754 = vst [vmem:[#allocation28_spill] sm:$0xff] %v9546_v8  ;;  %12758 = vst [vmem:[#allocation38_spill] sm:$0xff] %v12757_v11  ;;  %v12764_v39 = vmov 0  ;;  %v9576_v34 = vadd.s32 24, %v9498_v10  ;;  %v624_v5 = vshrl.u32 %v9482_v4, 4  ;;  %v3247_v28 = vadd.f32 %v3246_v18, %v8642_v2  ;;  %v3248_v4 = vpop.f32.mrf.mxu0  ;;  %v3551_v61 = vpop.f32.mrf.mxu1  ;;  %v12841_v11 = vld [vmem:[#allocation47_spill] sm:$0xff] }
 0x2d8   : > { %vm9571_vm2 = vmand %vm12763_vm8, %vm12762_vm0  ;;  %v9580_v38 = vmul.u32.u64.low 2863311531, %v9501_v37  ;;  %v9581_v20 = vmul.u32.u64.high 2863311531, %v9501_v37, %v9580_v38  ;;  %vm12768_vm12 = vcmp.ne.s32.totalorder %v9498_v10, 0  ;;  %vm12769_vm3 = vcmp.lt.s32.totalorder %v9498_v10, 0  ;;  %v12813_v10 = vld [vmem:[#allocation100_spill] sm:$0xff] }
 0x2d9   : > { %v12765_v39 = vsel %vm9571_vm2, 4294967295, %v12764_v39  ;;  %12767 = vst [vmem:[#allocation31_spill] sm:$0xff] %v9576_v34  ;;  %vm9588_vm6 = vmand %vm12769_vm3, %vm12768_vm12  ;;  %v12770_v60 = vmov 0  ;;  %v9593_v44 = vadd.s32 24, %v9513_v21  ;;  %vm871_vm0 = vcmp.ne.s32.totalorder %v9529_v41, 0 }
 0x2da   : > { %12766 = vst [vmem:[#allocation35_spill] sm:$0xff] %v12765_v39  ;;  %v12771_v60 = vsel %vm9588_vm6, 4294967295, %v12770_v60  ;;  %v12774_v2 = vsel %vm9003_vm13, %v8972_v33, %v8941_v6  ;;  %vm12777_vm3 = vcmp.ne.s32.totalorder %v9513_v21, 0  ;;  %vm12778_vm12 = vcmp.lt.s32.totalorder %v9513_v21, 0  ;;  %v12836_v39 = vld [vmem:[#allocation60_spill] sm:$0xff] }
 0x2db   : > { %12772 = vst [vmem:[#allocation42_spill] sm:$0xff] %v12771_v60  ;;  %12773 = vst [vmem:[#allocation39_spill] sm:$0xff] %v9593_v44  ;;  %vm9602_vm7 = vcmp.lt.s32.totalorder %v12774_v2, 16  ;;  %v12779_v4 = vmov 0  ;;  %v592_v13 = vmul.u32 24, %v591_v49  ;;  %v1372_v2 = vld [vmem:[#allocation8 + $0x2d8] sm:$0xff]  ;;  %v9622_v35 = vadd.f32 %v3551_v61, %v3247_v28  ;;  %v6075_v49 = vpop.f32.mrf.mxu0 }
 0x2dc   : > { %vm9614_vm8 = vmand %vm12778_vm12, %vm12777_vm3  ;;  %v9619_v6 = vmul.u32.u64.low 2863311531, %v9504_v52  ;;  %v9620_v33 = vmul.u32.u64.high 2863311531, %v9504_v52, %v9619_v6  ;;  %v9629_v8 = vadd.s32 24, %v9529_v41  ;;  %v9632_v55 = vsub.s32 %v9379_v32, %v603_v0  ;;  %4823 = vmatpush2.msra.mxu1 %v1372_v2  ;;  %v3553_v0 = vpop.f32.mrf.mxu1  ;;  %v1371_v44 = vld [vmem:[#allocation8 + $0x2d0] sm:$0xff] }
 0x2dd   : > { %v12780_v4 = vsel %vm9614_vm8, 4294967295, %v12779_v4  ;;  %12782 = vst [vmem:[#allocation44_spill] sm:$0xff] %v9622_v35  ;;  %v12784_v6 = vsel %vm9032_vm14, %v9008_v24, %v8948_v51  ;;  %vm12787_vm3 = vcmp.lt.s32.totalorder %v9529_v41, 0  ;;  %v12788_v32 = vmov 0  ;;  %4824 = vmatprep.subr.mxu1 %v9137_v53  ;;  %v3621_v38 = vpop.f32.mrf.mxu0  ;;  %v12805_v41 = vld [vmem:[#allocation99_spill] sm:$0xff] }
 0x2de   : > { %12781 = vst [vmem:[#allocation34_spill] sm:$0xff] %v12780_v4  ;;  %12783 = vst [vmem:[#allocation41_spill] sm:$0xff] %v9629_v8  ;;  %vm9639_vm13 = vcmp.lt.s32.totalorder %v12784_v6, 16  ;;  %v625_v7 = vmul.u32 24, %v624_v5  ;;  %v9656_v51 = vadd.s32 248, %v8825_v16  ;;  %v9659_v24 = vadd.s32 240, %v8825_v16  ;;  %4825 = vmatpush2.msra.mxu1 %v1371_v44 }
 0x2df   : > { %vm9651_vm12 = vmand %vm12787_vm3, %vm871_vm0  ;;  %v9663_v2 = vadd.f32 %v6075_v49, %v8654_v47  ;;  %v9670_v61 = vadd.s32 264, %v8825_v16  ;;  %v9673_v5 = vadd.s32 256, %v8825_v16  ;;  %v12791_v0 = vsel %vm9116_vm10, %v9067_v36, %v9015_v27  ;;  %v6078_v36 = vpop.f32.mrf.mxu0  ;;  %4826 = vmatprep.subr.mxu1 %v9137_v53  ;;  %v12959_v47 = vld [vmem:[#allocation33_spill] sm:$0xff] }
 0x2e0   : > { %v12789_v32 = vsel %vm9651_vm12, 4294967295, %v12788_v32  ;;  %vm9680_vm14 = vcmp.lt.s32.totalorder %v12791_v0, 16  ;;  %v9685_v49 = vsub.s32 %v9400_v17, %v592_v13  ;;  %v9692_v21 = vadd.s32 280, %v8825_v16  ;;  %v12795_v17 = vld [vmem:[#allocation13_spill] sm:$0xff] }
 0x2e1   : > { %12790 = vst [vmem:[#allocation37_spill] sm:$0xff] %v12789_v32  ;;  %v9688_v6 = vmul.u32.u64.low 2863311531, %v9522_v30  ;;  %v9689_v35 = vmul.u32.u64.high 2863311531, %v9522_v30, %v9688_v6  ;;  %v3622_v4 = vadd.f32 %v3621_v38, %v8649_v42  ;;  %v12796_v13 = vld [vmem:[#allocation101_spill] sm:$0xff]  ;;  %v9711_v42 = vsub.s32 %v9420_v62, %v625_v7  ;;  %v3631_v62 = vpop.f32.mrf.mxu0  ;;  %v12804_v7 = vld [vmem:[#allocation14_spill] sm:$0xff] }
 0x2e2   : > { %12794 = vst [vmem:[#allocation48_spill] sm:$0xff] %v9685_v49  ;;  %v12797_v6 = vsel %vm9126_vm9, %v12795_v17, %v12796_v13  ;;  %v613_v38 = vshrl.u32 %v9581_v20, 4  ;;  %v9715_v27 = vmul.u32.u64.low 2863311531, %v9656_v51  ;;  %v9716_v22 = vmul.u32.u64.high 2863311531, %v9656_v51, %v9715_v27  ;;  %v12802_v13 = vld [vmem:[#allocation49_spill] sm:$0xff] }
 0x2e3   : > { %vm9706_vm0 = vcmp.lt.s32.totalorder %v12797_v6, 16  ;;  %12800 = vst [vmem:[#allocation45_spill] sm:$0xff] %v9711_v42  ;;  %v12801_v56 = vmax.f32 %v9663_v2, 0.0  ;;  %v3860_v17 = vmax.f32 %v3622_v4, 0.0  ;;  %v9724_v6 = vadd.f32 %v6078_v36, %v12802_v13  ;;  %v6081_v20 = vpop.f32.mrf.mxu0 }
 0x2e4   : > { %vm922_vm9 = vcmp.lt.s32.totalorder %v9632_v55, 0  ;;  %v12806_v27 = vsel %vm9146_vm15, %v12804_v7, %v12805_v41  ;;  %v12807_v8 = vmov 0  ;;  %v9737_v32 = vadd.s32 24, %v9632_v55 }
 0x2e5   : > { %v3909_v44 = vsel %vm9536_vm11, %v12801_v56, 0.0  ;;  %vm9732_vm3 = vcmp.lt.s32.totalorder %v12806_v27, 16  ;;  %v646_v4 = vshrl.u32 %v9620_v33, 4  ;;  %v3908_v36 = vsel %vm9563_vm4, %v3860_v17, 0.0  ;;  %v12812_v27 = vld [vmem:[#allocation51_spill] sm:$0xff]  ;;  %6572 = vmatprep.mubr.msk.f32.mxu1 %vm9563_vm4, %v3860_v17  ;;  %v12822_v17 = vld [vmem:[#allocation18_spill] sm:$0xff] }
 0x2e6   : > { %3957 = vst [vmem:[#allocation2 + $0x28] sm:$0xff] %v3909_v44  ;;  %v12808_v8 = vsel %vm9732_vm3, 4294967295, %v12807_v8  ;;  %v12809_v44 = vld [vmem:[#allocation56_spill] sm:$0xff]  ;;  %v9749_v13 = vadd.s32 24, %v9685_v49  ;;  %3956 = vst [vmem:[#allocation2 + $0x20] sm:$0xff] %v3908_v36  ;;  %v12814_v34 = vsel %vm9159_vm1, %v12812_v27, %v12813_v10  ;;  %v12817_v36 = vmax.f32 %v9724_v6, 0.0 }
 0x2e7   : > { %v9746_v41 = vadd.f32 %v3631_v62, %v12809_v44  ;;  %vm9756_vm15 = vcmp.lt.s32.totalorder %v12814_v34, 16  ;;  %v614_v62 = vmul.u32 24, %v613_v38  ;;  %v12818_v34 = vld [vmem:[#allocation52_spill] sm:$0xff]  ;;  %vm12819_vm1 = vcmp.ne.s32.totalorder %v9632_v55, 0  ;;  %v3641_v38 = vpop.f32.mrf.mxu0 }
 0x2e8   : > { %12810 = vst [vmem:[#allocation40_spill] sm:$0xff] %v9749_v13  ;;  %v9764_v44 = vmul.u32.u64.low 2863311531, %v9659_v24  ;;  %v9765_v56 = vmul.u32.u64.high 2863311531, %v9659_v24, %v9764_v44  ;;  %v3911_v7 = vsel %vm9602_vm7, %v12817_v36, 0.0  ;;  %v9773_v27 = vadd.f32 %v6081_v20, %v12818_v34  ;;  %vm9779_vm4 = vmand %vm922_vm9, %vm12819_vm1  ;;  %v12825_v36 = vld [vmem:[#allocation104_spill] sm:$0xff] }
 0x2e9   : > { %v12820_v59 = vmov 0  ;;  %vm924_vm12 = vcmp.lt.s32.totalorder %v9711_v42, 0  ;;  %3959 = vst [vmem:[#allocation2 + $0x38] sm:$0xff] %v3911_v7  ;;  %vm12823_vm10 = vnez %v12822_v17  ;;  %v12824_v44 = vld [vmem:[#allocation53_spill] sm:$0xff]  ;;  %v12827_v20 = vmov 0 }
 0x2ea   : > { %v12821_v59 = vsel %vm9779_vm4, 4294967295, %v12820_v59  ;;  %v12826_v10 = vsel %vm12823_vm10, %v12824_v44, %v12825_v36  ;;  %vm12830_vm6 = vcmp.ne.s32.totalorder %v9685_v49, 0  ;;  %vm12831_vm9 = vcmp.lt.s32.totalorder %v9685_v49, 0  ;;  %v1370_v44 = vld [vmem:[#allocation8 + $0x2c8] sm:$0xff] }
 0x2eb   : > { %vm9789_vm8 = vcmp.lt.s32.totalorder %v12826_v10, 16  ;;  %vm9797_vm1 = vmand %vm12831_vm9, %vm12830_vm6  ;;  %v12832_v34 = vmov 0  ;;  %v647_v60 = vmul.u32 24, %v646_v4  ;;  %v635_v7 = vshrl.u32 %v9689_v35, 4  ;;  %4827 = vmatpush2.msra.mxu1 %v1370_v44  ;;  %v6084_v35 = vpop.f32.mrf.mxu0  ;;  %v12838_v4 = vld [vmem:[#allocation65_spill] sm:$0xff] }
 0x2ec   : > { %v12828_v20 = vsel %vm9789_vm8, 4294967295, %v12827_v20  ;;  %v12833_v34 = vsel %vm9797_vm1, 4294967295, %v12832_v34  ;;  %v9803_v17 = vmul.u32.u64.low 2863311531, %v9670_v61  ;;  %v9804_v54 = vmul.u32.u64.high 2863311531, %v9670_v61, %v9803_v17  ;;  %4828 = vmatprep.subr.mxu1 %v9137_v53 }
 0x2ed   : > { %12829 = vst [vmem:[#allocation50_spill] sm:$0xff] %v12828_v20  ;;  %12834 = vst [vmem:[#allocation43_spill] sm:$0xff] %v12833_v34  ;;  %v12835_v10 = vmax.f32 %v9746_v41, 0.0  ;;  %v12216_v9 = vmax.f32 %v9773_v27, 0.0  ;;  %v9812_v40 = vadd.f32 %v3641_v38, %v12836_v39  ;;  %v9815_v50 = vadd.s32 24, %v9711_v42  ;;  %v12840_v17 = vld [vmem:[#allocation63_spill] sm:$0xff] }
 0x2ee   : > { %vm12839_vm6 = vnez %v12838_v4  ;;  %v12843_v19 = vmov 0  ;;  %vm12846_vm9 = vcmp.ne.s32.totalorder %v9711_v42, 0  ;;  %v12847_v38 = vmov 0  ;;  %v12850_v4 = vld [vmem:[#allocation55_spill] sm:$0xff]  ;;  %v12858_v34 = vld [vmem:[#allocation82_spill] sm:$0xff] }
 0x2ef   : > { %v3910_v36 = vsel %vm9639_vm13, %v12835_v10, 0.0  ;;  %12837 = vst [vmem:[#allocation54_spill] sm:$0xff] %v9815_v50  ;;  %v12842_v3 = vsel %vm12839_vm6, %v12840_v17, %v12841_v11  ;;  %vm9834_vm2 = vmand %vm924_vm12, %vm12846_vm9  ;;  %v9839_v44 = vsub.s32 %v9501_v37, %v614_v62  ;;  %v9843_v11 = vadd.s32 272, %v8825_v16  ;;  %v4100_v62 = vld [vmem:[#allocation2 + $0x9] sm:$0xff]  ;;  %v1369_v37 = vld [vmem:[#allocation8 + $0x2c0] sm:$0xff] }
 0x2f0   : > { %3958 = vst [vmem:[#allocation2 + $0x30] sm:$0xff] %v3910_v36  ;;  %vm9822_vm10 = vcmp.lt.s32.totalorder %v12842_v3, 16  ;;  %v12848_v38 = vsel %vm9834_vm2, 4294967295, %v12847_v38  ;;  %v668_v3 = vshrl.u32 %v9716_v22, 4  ;;  %v3913_v10 = vsel %vm9680_vm14, %v12216_v9, 0.0  ;;  %v3651_v22 = vpop.f32.mrf.mxu0  ;;  %4829 = vmatpush2.msra.mxu1 %v1369_v37  ;;  %v4101_v50 = vld [vmem:[#allocation2 + $0x11] sm:$0xff] }
 0x2f1   : > { %v12844_v19 = vsel %vm9822_vm10, 4294967295, %v12843_v19  ;;  %12849 = vst [vmem:[#allocation13_spill] sm:$0xff] %v12848_v38  ;;  %v9852_v17 = vadd.f32 %v6084_v35, %v12850_v4  ;;  %3961 = vst [vmem:[#allocation2 + $0x48] sm:$0xff] %v3913_v10  ;;  %vm12851_vm12 = vnez %v12697_v26  ;;  %v12853_v9 = vmov 0  ;;  %4830 = vmatprep.subr.mxu1 %v9137_v53  ;;  %v12898_v38 = vld [vmem:[#allocation26_spill] sm:$0xff] }
 0x2f2   : > { %12845 = vst [vmem:[#allocation46_spill] sm:$0xff] %v12844_v19  ;;  %v12852_v39 = vsel %vm12851_vm12, %v9241_v23, %v9183_v14  ;;  %v9868_v35 = vsub.s32 %v9504_v52, %v647_v60  ;;  %v636_v4 = vmul.u32 24, %v635_v7  ;;  %v9871_v36 = vadd.s32 296, %v8825_v16  ;;  %v4007_v52 = vld [vmem:[#allocation2 + $0x1f] sm:$0xff]  ;;  %v6087_v13 = vpop.f32.mrf.mxu0 }
 0x2f3   : > { %vm9863_vm6 = vcmp.lt.s32.totalorder %v12852_v39, 16  ;;  %v9874_v10 = vadd.s32 288, %v8825_v16  ;;  %v12856_v26 = vmax.f32 %v9812_v40, 0.0  ;;  %v12224_v23 = vmax.f32 %v9852_v17, 0.0  ;;  %v12857_v39 = vld [vmem:[#allocation62_spill] sm:$0xff]  ;;  %v1392_v7 = vld [vmem:[#allocation8 + $0x378] sm:$0xff]  ;;  %4541 = vmatprep.mubr.f32.mxu0 %v4007_v52  ;;  %4252 = vmatmul.mubr.f32.gmra.mxu1 %v4007_v52 }
 0x2f4   : > { %v12854_v9 = vsel %vm9863_vm6, 4294967295, %v12853_v9  ;;  %v9882_v49 = vadd.f32 %v3651_v22, %v12857_v39  ;;  %vm12859_vm9 = vnez %v12858_v34  ;;  %v12861_v22 = vmov 0  ;;  %4542 = vmatmul.mubr.f32.vlgmr.msra.gmra.mxu0 %v4100_v62  ;;  %v3661_v42 = vpop.f32.mrf.mxu0 }
 0x2f5   : > { %12855 = vst [vmem:[#allocation101_spill] sm:$0xff] %v12854_v9  ;;  %v3912_v14 = vsel %vm9706_vm0, %v12856_v26, 0.0  ;;  %v12860_v26 = vsel %vm12859_vm9, %v9249_v45, %v9198_v58  ;;  %v9900_v39 = vadd.s32 24, %v9839_v44  ;;  %v669_v37 = vmul.u32 24, %v668_v3  ;;  %v12863_v58 = vld [vmem:[#allocation58_spill] sm:$0xff]  ;;  %v1391_v3 = vld [vmem:[#allocation8 + $0x370] sm:$0xff]  ;;  %5088 = vmatpush1.msra.mxu0 %v1392_v7 }
 0x2f6   : > { %3960 = vst [vmem:[#allocation2 + $0x40] sm:$0xff] %v3912_v14  ;;  %vm9893_vm12 = vcmp.lt.s32.totalorder %v12860_v26, 16  ;;  %v3915_v34 = vsel %vm9732_vm3, %v12224_v23, 0.0  ;;  %v9908_v45 = vadd.f32 %v6087_v13, %v12863_v58  ;;  %v12865_v52 = vmax.f32 %v9663_v2, 0.0  ;;  %v4008_v26 = vld [vmem:[#allocation2 + $0x27] sm:$0xff]  ;;  %5089 = vmatprep.subr.mxu0 %v9137_v53  ;;  %v12878_v7 = vld [vmem:[#allocation71_spill] sm:$0xff] }
 0x2f7   : > { %v12862_v22 = vsel %vm9893_vm12, 4294967295, %v12861_v22  ;;  %v657_v60 = vshrl.u32 %v9765_v56, 4  ;;  %3963 = vst [vmem:[#allocation2 + $0x58] sm:$0xff] %v3915_v34  ;;  %4546 = vmatprep.mubr.f32.mxu0 %v4008_v26  ;;  %vm12866_vm9 = vnez %v12707_v48  ;;  %v12867_v23 = vld [vmem:[#allocation77_spill] sm:$0xff]  ;;  %v12870_v62 = vmov 0  ;;  %5090 = vmatpush1.msra.mxu0 %v1391_v3 }
 0x2f8   : > { %12864 = vst [vmem:[#allocation49_spill] sm:$0xff] %v9908_v45  ;;  %6573 = vmatprep.mubr.msk.f32.mxu1 %vm9536_vm11, %v12865_v52  ;;  %v12868_v14 = vld [vmem:[#allocation69_spill] sm:$0xff]  ;;  %v9926_v1 = vsub.s32 %v9522_v30, %v636_v4  ;;  %v690_v2 = vshrl.u32 %v9804_v54, 4  ;;  %v9930_v56 = vadd.s32 312, %v8825_v16  ;;  %v12873_v48 = vmax.f32 %v9882_v49, 0.0  ;;  %v6090_v54 = vpop.f32.mrf.mxu0  ;;  %v12875_v30 = vld [vmem:[#allocation88_spill] sm:$0xff]  ;;  %4547 = vmatmul.mubr.f32.gmra.mxu0 %v4101_v50 }
 0x2f9   : > { %v12869_v13 = vsel %vm12866_vm9, %v12867_v23, %v12868_v14  ;;  %v12225_v34 = vmax.f32 %v9908_v45, 0.0  ;;  %v12874_v14 = vld [vmem:[#allocation66_spill] sm:$0xff]  ;;  %4257 = vmatmul.mubr.f32.gmra.mxu1 %v4008_v26  ;;  %vm12876_vm9 = vnez %v12875_v30  ;;  %v12877_v4 = vld [vmem:[#allocation80_spill] sm:$0xff]  ;;  %v9985_v28 = vadd.s32 304, %v8825_v16  ;;  %5091 = vmatprep.subr.mxu0 %v9137_v53  ;;  %v12897_v45 = vld [vmem:[#allocation23_spill] sm:$0xff] }
 0x2fa   : > { %vm9920_vm4 = vcmp.lt.s32.totalorder %v12869_v13, 16  ;;  %v3914_v23 = vsel %vm9756_vm15, %v12873_v48, 0.0  ;;  %v9938_v58 = vadd.f32 %v3661_v42, %v12874_v14  ;;  %v12879_v52 = vsel %vm12876_vm9, %v12877_v4, %v12878_v7  ;;  %v1390_v26 = vld [vmem:[#allocation8 + $0x368] sm:$0xff]  ;;  %v12884_v7 = vld [vmem:[#allocation61_spill] sm:$0xff]  ;;  %v3671_v3 = vpop.f32.mrf.mxu0 }
 0x2fb   : > { %v12871_v62 = vsel %vm9920_vm4, 4294967295, %v12870_v62  ;;  %3962 = vst [vmem:[#allocation2 + $0x50] sm:$0xff] %v3914_v23  ;;  %vm9948_vm1 = vcmp.lt.s32.totalorder %v12879_v52, 16  ;;  %v12880_v13 = vmov 0  ;;  %v9953_v42 = vadd.s32 24, %v9868_v35  ;;  %5092 = vmatpush1.msra.mxu0 %v1390_v26 }
 0x2fc   : > { %12872 = vst [vmem:[#allocation57_spill] sm:$0xff] %v12871_v62  ;;  %v12881_v13 = vsel %vm9948_vm1, 4294967295, %v12880_v13  ;;  %v9956_v48 = vsub.s32 %v9656_v51, %v669_v37  ;;  %v9959_v14 = vmul.u32.u64.low 2863311531, %v9673_v5  ;;  %v9960_v23 = vmul.u32.u64.high 2863311531, %v9673_v5, %v9959_v14  ;;  %v4009_v37 = vld [vmem:[#allocation2 + $0x2f] sm:$0xff]  ;;  %5093 = vmatprep.subr.mxu0 %v9137_v53 }
 0x2fd   : > { %12882 = vst [vmem:[#allocation14_spill] sm:$0xff] %v12881_v13  ;;  %v3917_v30 = vsel %vm9789_vm8, %v12225_v34, 0.0  ;;  %v9968_v52 = vadd.f32 %v6090_v54, %v12884_v7  ;;  %v12886_v51 = vmax.f32 %v9746_v41, 0.0  ;;  %v658_v14 = vmul.u32 24, %v657_v60  ;;  %4551 = vmatprep.mubr.f32.mxu0 %v4009_v37  ;;  %v12888_v34 = vld [vmem:[#allocation17_spill] sm:$0xff]  ;;  %v1368_v60 = vld [vmem:[#allocation8 + $0x2b8] sm:$0xff] }
 0x2fe   : > { %12883 = vst [vmem:[#allocation99_spill] sm:$0xff] %v9956_v48  ;;  %3965 = vst [vmem:[#allocation2 + $0x68] sm:$0xff] %v3917_v30  ;;  %vm12887_vm9 = vnez %v12724_v12  ;;  %v12890_v4 = vmov 0  ;;  %v691_v50 = vmul.u32 24, %v690_v2  ;;  %v9988_v41 = vadd.s32 328, %v8825_v16  ;;  %v1389_v2 = vld [vmem:[#allocation8 + $0x360] sm:$0xff]  ;;  %4831 = vmatpush2.msra.mxu1 %v1368_v60  ;;  %v6093_v30 = vpop.f32.mrf.mxu0 }
 0x2ff   : > { %12885 = vst [vmem:[#allocation56_spill] sm:$0xff] %v9968_v52  ;;  %6574 = vmatprep.mubr.msk.f32.mxu1 %vm9639_vm13, %v12886_v51  ;;  %v12889_v20 = vsel %vm12887_vm9, %v9375_v25, %v12888_v34  ;;  %v12893_v12 = vmax.f32 %v9938_v58, 0.0  ;;  %v12894_v34 = vld [vmem:[#allocation68_spill] sm:$0xff]  ;;  %v12895_v51 = vld [vmem:[#allocation30_spill] sm:$0xff]  ;;  %v10014_v26 = vmul.u32.u64.low 2863311531, %v9692_v21  ;;  %v10015_v60 = vmul.u32.u64.high 2863311531, %v9692_v21, %v10014_v26  ;;  %5094 = vmatpush1.msra.mxu0 %v1389_v2 }
 0x300   : > { %vm9979_vm11 = vcmp.lt.s32.totalorder %v12889_v20, 16  ;;  %v12233_v20 = vmax.f32 %v9968_v52, 0.0  ;;  %v9997_v54 = vadd.f32 %v3671_v3, %v12894_v34  ;;  %4262 = vmatmul.mubr.f32.gmra.mxu1 %v4009_v37  ;;  %v4102_v7 = vld [vmem:[#allocation2 + $0x19] sm:$0xff]  ;;  %vm12896_vm9 = vnez %v12895_v51  ;;  %5095 = vmatprep.subr.mxu0 %v9137_v53 }
 0x301   : > { %v12891_v4 = vsel %vm9979_vm11, 4294967295, %v12890_v4  ;;  %v3916_v25 = vsel %vm9822_vm10, %v12893_v12, 0.0  ;;  %v12899_v19 = vsel %vm12896_vm9, %v12897_v45, %v12898_v38  ;;  %v12900_v12 = vmov 0  ;;  %v12903_v45 = vld [vmem:[#allocation64_spill] sm:$0xff]  ;;  %4552 = vmatmul.mubr.f32.gmra.mxu0 %v4102_v7  ;;  %v3681_v7 = vpop.f32.mrf.mxu0  ;;  %4832 = vmatprep.subr.mxu1 %v9137_v53  ;;  %v10231_v52 = vld [vmem:[#allocation2] sm:$0xff] }
 0x302   : > { %12892 = vst [vmem:[#allocation59_spill] sm:$0xff] %v12891_v4  ;;  %3964 = vst [vmem:[#allocation2 + $0x60] sm:$0xff] %v3916_v25  ;;  %vm10005_vm8 = vcmp.lt.s32.totalorder %v12899_v19, 16  ;;  %v10010_v3 = vadd.s32 24, %v9926_v1  ;;  %v3919_v38 = vsel %vm9863_vm6, %v12233_v20, 0.0  ;;  %v12240_v19 = vmax.f32 %v9997_v54, 0.0 }
 0x303   : > { %v12901_v12 = vsel %vm10005_vm8, 4294967295, %v12900_v12  ;;  %v10024_v37 = vadd.f32 %v6093_v30, %v12903_v45  ;;  %v12905_v25 = vmax.f32 %v9724_v6, 0.0  ;;  %v4010_v34 = vld [vmem:[#allocation2 + $0x37] sm:$0xff]  ;;  %vm12906_vm9 = vcmp.ne.s32.totalorder %v9839_v44, 0  ;;  %3967 = vst [vmem:[#allocation2 + $0x78] sm:$0xff] %v3919_v38  ;;  %v12982_v6 = vld [vmem:[#allocation34_spill] sm:$0xff] }
 0x304   : > { %12902 = vst [vmem:[#allocation51_spill] sm:$0xff] %v12901_v12  ;;  %vm12907_vm13 = vcmp.lt.s32.totalorder %v9839_v44, 0  ;;  %v12908_v51 = vmov 0  ;;  %v10039_v26 = vsub.s32 %v9659_v24, %v658_v14  ;;  %v1388_v30 = vld [vmem:[#allocation8 + $0x358] sm:$0xff]  ;;  %4556 = vmatprep.mubr.f32.mxu0 %v4010_v34  ;;  %vm12910_vm6 = vnez %v12733_v57 }
 0x305   : > { %12904 = vst [vmem:[#allocation100_spill] sm:$0xff] %v10024_v37  ;;  %6575 = vmatprep.mubr.msk.f32.mxu1 %vm9602_vm7, %v12905_v25  ;;  %vm10034_vm2 = vmand %vm12907_vm13, %vm12906_vm9  ;;  %v12911_v18 = vsel %vm12910_vm6, %v9395_v43, %v9357_v31  ;;  %v10052_v45 = vsub.s32 %v9670_v61, %v691_v50  ;;  %v10055_v24 = vmul.u32.u64.low 2863311531, %v9843_v11  ;;  %v10056_v14 = vmul.u32.u64.high 2863311531, %v9843_v11, %v10055_v24  ;;  %v12915_v31 = vld [vmem:[#allocation72_spill] sm:$0xff]  ;;  %v6096_v61 = vpop.f32.mrf.mxu0  ;;  %v4103_v50 = vld [vmem:[#allocation2 + $0x21] sm:$0xff]  ;;  %5096 = vmatpush1.msra.mxu0 %v1388_v30 }
 0x306   : > { %v12909_v51 = vsel %vm10034_vm2, 4294967295, %v12908_v51  ;;  %vm10046_vm7 = vcmp.lt.s32.totalorder %v12911_v18, 16  ;;  %v3918_v57 = vsel %vm9893_vm12, %v12240_v19, 0.0  ;;  %v12239_v43 = vmax.f32 %v10024_v37, 0.0  ;;  %4267 = vmatmul.mubr.f32.gmra.mxu1 %v4010_v34  ;;  %4557 = vmatmul.mubr.f32.gmra.mxu0 %v4103_v50  ;;  %v12930_v50 = vld [vmem:[#allocation96_spill] sm:$0xff] }
 0x307   : > { %12914 = vst [vmem:[#allocation52_spill] sm:$0xff] %v10052_v45  ;;  %v10064_v38 = vadd.f32 %v3681_v7, %v12915_v31  ;;  %v10067_v25 = vadd.s32 24, %v9956_v48  ;;  %3966 = vst [vmem:[#allocation2 + $0x70] sm:$0xff] %v3918_v57  ;;  %vm12917_vm6 = vnez %v12738_v15  ;;  %v12919_v18 = vmov 0  ;;  %v1387_v15 = vld [vmem:[#allocation8 + $0x350] sm:$0xff]  ;;  %5097 = vmatprep.subr.mxu0 %v9137_v53 }
 0x308   : > { %v12918_v2 = vsel %vm12917_vm6, %v9442_v46, %v9370_v63  ;;  %v679_v24 = vshrl.u32 %v9960_v23, 4  ;;  %v10086_v57 = vmul.u32.u64.low 2863311531, %v9871_v36  ;;  %v10087_v34 = vmul.u32.u64.high 2863311531, %v9871_v36, %v10086_v57  ;;  %v1367_v31 = vld [vmem:[#allocation8 + $0x2b0] sm:$0xff]  ;;  %5098 = vmatpush1.msra.mxu0 %v1387_v15 }
 0x309   : > { %12916 = vst [vmem:[#allocation18_spill] sm:$0xff] %v10064_v38  ;;  %vm10076_vm9 = vcmp.lt.s32.totalorder %v12918_v2, 16  ;;  %v3921_v63 = vsel %vm9920_vm4, %v12239_v43, 0.0  ;;  %v12241_v46 = vmax.f32 %v10064_v38, 0.0  ;;  %v12921_v2 = vld [vmem:[#allocation67_spill] sm:$0xff]  ;;  %v12923_v23 = vmax.f32 %v9812_v40, 0.0  ;;  %4833 = vmatpush2.msra.mxu1 %v1367_v31  ;;  %5099 = vmatprep.subr.mxu0 %v9137_v53 }
 0x30a   : > { %v12920_v18 = vsel %vm10076_vm9, 4294967295, %v12919_v18  ;;  %v10095_v20 = vadd.f32 %v6096_v61, %v12921_v2  ;;  %v4011_v57 = vld [vmem:[#allocation2 + $0x3f] sm:$0xff]  ;;  %vm12924_vm6 = vcmp.ne.s32.totalorder %v9868_v35, 0  ;;  %vm12925_vm13 = vcmp.lt.s32.totalorder %v9868_v35, 0  ;;  %3969 = vst [vmem:[#allocation2 + $0x88] sm:$0xff] %v3921_v63  ;;  %v3691_v61 = vpop.f32.mrf.mxu0  ;;  %v4104_v7 = vld [vmem:[#allocation2 + $0x29] sm:$0xff]  ;;  %4834 = vmatprep.subr.mxu1 %v10231_v52 }
 0x30b   : > { %6576 = vmatprep.mubr.msk.f32.mxu1 %vm9706_vm0, %v12923_v23  ;;  %vm10105_vm12 = vmand %vm12925_vm13, %vm12924_vm6  ;;  %4561 = vmatprep.mubr.f32.mxu0 %v4011_v57  ;;  %vm12928_vm2 = vnez %v12742_v29  ;;  %v12929_v40 = vld [vmem:[#allocation105_spill] sm:$0xff]  ;;  %vm12934_vm10 = vcmp.ne.s32.totalorder %v9926_v1, 0  ;;  %vm12935_vm13 = vcmp.lt.s32.totalorder %v9926_v1, 0  ;;  %v10165_v31 = vadd.s32 24, %v10039_v26  ;;  %v1364_v23 = vld [vmem:[#allocation8 + $0x298] sm:$0xff] }
 0x30c   : > { %12922 = vst [vmem:[#allocation53_spill] sm:$0xff] %v10095_v20  ;;  %v12931_v0 = vsel %vm12928_vm2, %v12929_v40, %v12930_v50  ;;  %vm10123_vm6 = vmand %vm12935_vm13, %vm12934_vm10  ;;  %v10130_v29 = vmul.u32.u64.low 2863311531, %v9874_v10  ;;  %v10131_v63 = vmul.u32.u64.high 2863311531, %v9874_v10, %v10130_v29  ;;  %v3920_v40 = vsel %vm9948_vm1, %v12241_v46, 0.0  ;;  %v6099_v46 = vpop.f32.mrf.mxu0  ;;  %4272 = vmatmul.mubr.f32.gmra.mxu1 %v4011_v57  ;;  %4562 = vmatmul.mubr.f32.gmra.mxu0 %v4104_v7 }
 0x30d   : > { %vm10115_vm0 = vcmp.lt.s32.totalorder %v12931_v0, 16  ;;  %v12938_v0 = vld [vmem:[#allocation74_spill] sm:$0xff]  ;;  %vm12940_vm2 = vcmp.ne.s32.totalorder %v9956_v48, 0  ;;  %vm12941_vm10 = vcmp.lt.s32.totalorder %v9956_v48, 0  ;;  %3968 = vst [vmem:[#allocation2 + $0x80] sm:$0xff] %v3920_v40  ;;  %v680_v40 = vmul.u32 24, %v679_v24 }
 0x30e   : > { %v10140_v43 = vadd.f32 %v3691_v61, %v12938_v0  ;;  %vm10146_vm13 = vmand %vm12941_vm10, %vm12940_vm2  ;;  %v1386_v29 = vld [vmem:[#allocation8 + $0x348] sm:$0xff]  ;;  %v12945_v61 = vld [vmem:[#allocation25_spill] sm:$0xff]  ;;  %v10168_v57 = vadd.s32 320, %v8825_v16  ;;  %v12950_v50 = vmax.f32 %v10095_v20, 0.0  ;;  %v12952_v15 = vmax.f32 %v9773_v27, 0.0  ;;  %v3701_v7 = vpop.f32.mrf.mxu0 }
 0x30f   : > { %v12946_v0 = vld [vmem:[#allocation27_spill] sm:$0xff]  ;;  %v4012_v24 = vld [vmem:[#allocation2 + $0x47] sm:$0xff]  ;;  %vm12954_vm2 = vcmp.lt.s32.totalorder %v10039_v26, 0  ;;  %5100 = vmatpush1.msra.mxu0 %v1386_v29  ;;  %v10229_v9 = vadd.s32 336, %v8825_v16  ;;  %v723_v33 = vshrl.u32 %v10131_v63, 4 }
 0x310   : > { %12939 = vst [vmem:[#allocation104_spill] sm:$0xff] %v10140_v43  ;;  %v12947_v62 = vsel %vm9552_vm5, %v12945_v61, %v12946_v0  ;;  %v12951_v0 = vld [vmem:[#allocation75_spill] sm:$0xff]  ;;  %6577 = vmatprep.mubr.msk.f32.mxu1 %vm9680_vm14, %v12952_v15  ;;  %vm12953_vm5 = vcmp.ne.s32.totalorder %v10039_v26, 0  ;;  %v1385_v61 = vld [vmem:[#allocation8 + $0x340] sm:$0xff]  ;;  %4566 = vmatprep.mubr.f32.mxu0 %v4012_v24  ;;  %v12970_v20 = vld [vmem:[#allocation78_spill] sm:$0xff] }
 0x311   : > { %vm10156_vm4 = vcmp.lt.s32.totalorder %v12947_v62, 16  ;;  %v3923_v62 = vsel %vm9979_vm11, %v12950_v50, 0.0  ;;  %v3707_v13 = vadd.f32 %v6099_v46, %v12951_v0  ;;  %vm10185_vm10 = vmand %vm12954_vm2, %vm12953_vm5  ;;  %v10190_v50 = vadd.s32 24, %v10052_v45  ;;  %v12957_v27 = vld [vmem:[#allocation35_spill] sm:$0xff]  ;;  %v12960_v46 = vld [vmem:[#allocation106_spill] sm:$0xff]  ;;  %12972 = vst [vmem:[#allocation63_spill] sm:$0xff] %v10229_v9  ;;  %5101 = vmatprep.subr.mxu0 %v10231_v52  ;;  %4277 = vmatmul.mubr.f32.gmra.mxu1 %v4012_v24 }
 0x312   : > { %3971 = vst [vmem:[#allocation2 + $0x98] sm:$0xff] %v3923_v62  ;;  %vm12958_vm3 = vnez %v12957_v27  ;;  %vm12964_vm5 = vcmp.ne.s32.totalorder %v10052_v45, 0  ;;  %vm12965_vm2 = vcmp.lt.s32.totalorder %v10052_v45, 0  ;;  %v10226_v38 = vadd.f32 %v3701_v7, %v12970_v20  ;;  %v4105_v29 = vld [vmem:[#allocation2 + $0x31] sm:$0xff]  ;;  %5102 = vmatpush1.msra.mxu0 %v1385_v61  ;;  %v12985_v61 = vld [vmem:[#allocation29_spill] sm:$0xff]  ;;  %v13018_v0 = vld [vmem:[#allocation54_spill] sm:$0xff] }
 0x313   : > { %v12961_v15 = vsel %vm12958_vm3, %v12959_v47, %v12960_v46  ;;  %vm10213_vm11 = vmand %vm12965_vm2, %vm12964_vm5  ;;  %v712_v47 = vshrl.u32 %v10015_v60, 4  ;;  %v10219_v46 = vadd.s32 344, %v8825_v16  ;;  %v3877_v62 = vmax.f32 %v3707_v13, 0.0  ;;  %v6102_v60 = vpop.f32.mrf.mxu0  ;;  %v12976_v13 = vld [vmem:[#allocation22_spill] sm:$0xff]  ;;  %4567 = vmatmul.mubr.f32.gmra.mxu0 %v4105_v29  ;;  %5103 = vmatprep.subr.mxu0 %v10231_v52 }
 0x314   : > { %vm10197_vm14 = vcmp.lt.s32.totalorder %v12961_v15, 16  ;;  %v12969_v15 = vmax.f32 %v10140_v43, 0.0  ;;  %12971 = vst [vmem:[#allocation65_spill] sm:$0xff] %v10226_v38  ;;  %v12973_v43 = vld [vmem:[#allocation42_spill] sm:$0xff]  ;;  %v10249_v9 = vsub.s32 %v9673_v5, %v680_v40  ;;  %v734_v24 = vshrl.u32 %v10087_v34, 4  ;;  %v12984_v40 = vld [vmem:[#allocation39_spill] sm:$0xff] }
 0x315   : > { %12968 = vst [vmem:[#allocation60_spill] sm:$0xff] %v10219_v46  ;;  %vm12974_vm3 = vnez %v12973_v43  ;;  %v1384_v43 = vld [vmem:[#allocation8 + $0x338] sm:$0xff]  ;;  %v1366_v46 = vld [vmem:[#allocation8 + $0x2a8] sm:$0xff]  ;;  %v12981_v7 = vmax.f32 %v9882_v49, 0.0  ;;  %v3711_v34 = vpop.f32.mrf.mxu0  ;;  %v713_v49 = vmul.u32 24, %v712_v47  ;;  %v1383_v47 = vld [vmem:[#allocation8 + $0x330] sm:$0xff] }
 0x316   : > { %v3922_v4 = vsel %vm10005_vm8, %v12969_v15, 0.0  ;;  %v12975_v15 = vld [vmem:[#allocation31_spill] sm:$0xff]  ;;  %5104 = vmatpush1.msra.mxu0 %v1384_v43  ;;  %4835 = vmatpush2.msra.mxu1 %v1366_v46  ;;  %v735_v43 = vmul.u32 24, %v734_v24 }
 0x317   : > { %3970 = vst [vmem:[#allocation2 + $0x90] sm:$0xff] %v3922_v4  ;;  %v12977_v12 = vsel %vm12974_vm3, %v12975_v15, %v12976_v13  ;;  %v701_v4 = vshrl.u32 %v10056_v14, 4  ;;  %v12258_v15 = vmax.f32 %v10226_v38, 0.0  ;;  %v12980_v13 = vld [vmem:[#allocation79_spill] sm:$0xff]  ;;  %6578 = vmatprep.mubr.msk.f32.mxu1 %vm9756_vm15, %v12981_v7  ;;  %v6105_v63 = vpop.f32.mrf.mxu0  ;;  %v12992_v14 = vld [vmem:[#allocation41_spill] sm:$0xff]  ;;  %v12993_v38 = vld [vmem:[#allocation36_spill] sm:$0xff]  ;;  %5105 = vmatprep.subr.mxu0 %v10231_v52 }
 0x318   : > { %vm10240_vm5 = vcmp.lt.s32.totalorder %v12977_v12, 16  ;;  %v3925_v12 = vsel %vm10046_vm7, %v3877_v62, 0.0  ;;  %v3717_v48 = vadd.f32 %v6102_v60, %v12980_v13  ;;  %v4013_v5 = vld [vmem:[#allocation2 + $0x4f] sm:$0xff]  ;;  %vm12983_vm7 = vnez %v12982_v6  ;;  %5106 = vmatpush1.msra.mxu0 %v1383_v47  ;;  %4836 = vmatprep.subr.mxu1 %v10231_v52  ;;  %v13008_v47 = vld [vmem:[#allocation48_spill] sm:$0xff] }
 0x319   : > { %3973 = vst [vmem:[#allocation2 + $0xa8] sm:$0xff] %v3925_v12  ;;  %4571 = vmatprep.mubr.f32.mxu0 %v4013_v5  ;;  %v12986_v62 = vsel %vm12983_vm7, %v12984_v40, %v12985_v61  ;;  %v10276_v29 = vmul.u32.u64.low 2863311531, %v9930_v56  ;;  %v10277_v7 = vmul.u32.u64.high 2863311531, %v9930_v56, %v10276_v29  ;;  %v3924_v12 = vsel %vm10076_vm9, %v12258_v15, 0.0  ;;  %v12989_v6 = vld [vmem:[#allocation70_spill] sm:$0xff]  ;;  %4282 = vmatmul.mubr.f32.gmra.mxu1 %v4013_v5  ;;  %v3721_v24 = vpop.f32.mrf.mxu0  ;;  %v1379_v60 = vld [vmem:[#allocation8 + $0x310] sm:$0xff] }
 0x31a   : > { %vm10270_vm2 = vcmp.lt.s32.totalorder %v12986_v62, 16  ;;  %v3879_v13 = vmax.f32 %v3717_v48, 0.0  ;;  %v3712_v40 = vadd.f32 %v3711_v34, %v12989_v6  ;;  %v10286_v61 = vadd.s32 360, %v8825_v16  ;;  %3972 = vst [vmem:[#allocation2 + $0xa0] sm:$0xff] %v3924_v12  ;;  %v4106_v62 = vld [vmem:[#allocation2 + $0x39] sm:$0xff]  ;;  %v12997_v34 = vld [vmem:[#allocation83_spill] sm:$0xff]  ;;  %5107 = vmatprep.subr.mxu0 %v10231_v52 }
 0x31b   : > { %v12990_v29 = vld [vmem:[#allocation37_spill] sm:$0xff]  ;;  %v702_v48 = vmul.u32 24, %v701_v4  ;;  %v3727_v12 = vadd.f32 %v6105_v63, %v12997_v34  ;;  %4572 = vmatmul.mubr.f32.gmra.mxu0 %v4106_v62  ;;  %v1382_v4 = vld [vmem:[#allocation8 + $0x328] sm:$0xff]  ;;  %vm13000_vm9 = vnez %v12821_v59  ;;  %v10347_v34 = vsub.s32 %v9871_v36, %v735_v43 }
 0x31c   : > { %vm12991_vm15 = vnez %v12990_v29  ;;  %v3927_v46 = vsel %vm10115_vm0, %v3879_v13, 0.0  ;;  %v3878_v5 = vmax.f32 %v3712_v40, 0.0  ;;  %v13001_v2 = vsel %vm13000_vm9, %v9737_v32, %v9632_v55  ;;  %v13004_v62 = vld [vmem:[#allocation73_spill] sm:$0xff]  ;;  %5108 = vmatpush1.msra.mxu0 %v1382_v4  ;;  %v13067_v19 = vld [vmem:[#allocation60_spill] sm:$0xff] }
 0x31d   : > { %v12994_v45 = vsel %vm12991_vm15, %v12992_v14, %v12993_v38  ;;  %vm12999_vm15 = vnez %v12808_v8  ;;  %v4014_v38 = vld [vmem:[#allocation2 + $0x57] sm:$0xff]  ;;  %v10308_v14 = vadd.s32 24, %v10249_v9  ;;  %3975 = vst [vmem:[#allocation2 + $0xb8] sm:$0xff] %v3927_v46  ;;  %vm10315_vm0 = vcmp.lt.s32.totalorder %v13001_v2, 16  ;;  %v4107_v32 = vld [vmem:[#allocation2 + $0x41] sm:$0xff]  ;;  %5109 = vmatprep.subr.mxu0 %v10231_v52 }
 0x31e   : > { %vm10293_vm3 = vcmp.lt.s32.totalorder %v12994_v45, 16  ;;  %v12998_v45 = vmax.f32 %v9852_v17, 0.0  ;;  %4576 = vmatprep.mubr.f32.mxu0 %v4014_v38  ;;  %v10320_v8 = vsub.s32 %v9692_v21, %v713_v49  ;;  %v724_v17 = vmul.u32 24, %v723_v33  ;;  %v6108_v21 = vpop.f32.mrf.mxu0  ;;  %v13005_v49 = vld [vmem:[#allocation43_spill] sm:$0xff]  ;;  %v13007_v33 = vld [vmem:[#allocation40_spill] sm:$0xff] }
 0x31f   : > { %v10323_v6 = vmul.u32.u64.low 2863311531, %v9985_v28  ;;  %v10324_v40 = vmul.u32.u64.high 2863311531, %v9985_v28, %v10323_v6  ;;  %v3926_v63 = vsel %vm10156_vm4, %v3878_v5, 0.0  ;;  %v3881_v59 = vmax.f32 %v3727_v12, 0.0  ;;  %4577 = vmatmul.mubr.f32.gmra.mxu0 %v4107_v32  ;;  %v4015_v36 = vld [vmem:[#allocation2 + $0x5f] sm:$0xff] }
 0x320   : > { %6579 = vmatprep.mubr.msk.f32.mxu1 %vm12999_vm15, %v12998_v45  ;;  %v3722_v29 = vadd.f32 %v3721_v24, %v13004_v62  ;;  %v10330_v55 = vadd.s32 352, %v8825_v16  ;;  %3974 = vst [vmem:[#allocation2 + $0xb0] sm:$0xff] %v3926_v63  ;;  %vm13006_vm9 = vnez %v13005_v49  ;;  %v10344_v5 = vsub.s32 %v9843_v11, %v702_v48  ;;  %v1381_v24 = vld [vmem:[#allocation8 + $0x320] sm:$0xff]  ;;  %v13014_v48 = vld [vmem:[#allocation46_spill] sm:$0xff]  ;;  %v3731_v4 = vpop.f32.mrf.mxu0  ;;  %4581 = vmatprep.mubr.f32.mxu0 %v4015_v36 }
 0x321   : > { %4287 = vmatmul.mubr.f32.gmra.mxu1 %v4014_v38  ;;  %v13009_v37 = vsel %vm13006_vm9, %v13007_v33, %v13008_v47  ;;  %v10350_v12 = vmul.u32.u64.low 2863311531, %v9988_v41  ;;  %v10351_v45 = vmul.u32.u64.high 2863311531, %v9988_v41, %v10350_v12  ;;  %v1365_v38 = vld [vmem:[#allocation8 + $0x2a0] sm:$0xff]  ;;  %v3929_v2 = vsel %vm10197_vm14, %v3881_v59, 0.0  ;;  %5110 = vmatpush1.msra.mxu0 %v1381_v24 }
 0x322   : > { %vm10339_vm4 = vcmp.lt.s32.totalorder %v13009_v37, 16  ;;  %v3880_v6 = vmax.f32 %v3722_v29, 0.0  ;;  %v13012_v63 = vld [vmem:[#allocation85_spill] sm:$0xff]  ;;  %v13013_v11 = vmax.f32 %v9938_v58, 0.0  ;;  %vm13015_vm15 = vnez %v13014_v48  ;;  %3977 = vst [vmem:[#allocation2 + $0xc8] sm:$0xff] %v3929_v2  ;;  %v13023_v37 = vld [vmem:[#allocation76_spill] sm:$0xff]  ;;  %4837 = vmatpush2.msra.mxu1 %v1365_v38  ;;  %5111 = vmatprep.subr.mxu0 %v10231_v52 }
 0x323   : > { %v3737_v62 = vadd.f32 %v6108_v21, %v13012_v63  ;;  %v10361_v43 = vadd.s32 376, %v8825_v16  ;;  %v13016_v49 = vld [vmem:[#allocation13_spill] sm:$0xff]  ;;  %v10375_v58 = vsub.s32 %v9874_v10, %v724_v17  ;;  %v756_v32 = vshrl.u32 %v10277_v7, 4  ;;  %v1380_v63 = vld [vmem:[#allocation8 + $0x318] sm:$0xff]  ;;  %v4108_v10 = vld [vmem:[#allocation2 + $0x49] sm:$0xff]  ;;  %4838 = vmatprep.subr.mxu1 %v10231_v52 }
 0x324   : > { %6580 = vmatprep.mubr.msk.f32.mxu1 %vm13015_vm15, %v13013_v11  ;;  %vm13017_vm9 = vnez %v13016_v49  ;;  %v13019_v59 = vld [vmem:[#allocation45_spill] sm:$0xff]  ;;  %v3928_v33 = vsel %vm10240_vm5, %v3880_v6, 0.0  ;;  %v3732_v12 = vadd.f32 %v3731_v4, %v13023_v37  ;;  %v10383_v2 = vadd.s32 24, %v10320_v8  ;;  %v6111_v11 = vpop.f32.mrf.mxu0  ;;  %4582 = vmatmul.mubr.f32.gmra.mxu0 %v4108_v10 }
 0x325   : > { %v13020_v29 = vsel %vm13017_vm9, %v13018_v0, %v13019_v59  ;;  %v3883_v47 = vmax.f32 %v3737_v62, 0.0  ;;  %3976 = vst [vmem:[#allocation2 + $0xc0] sm:$0xff] %v3928_v33  ;;  %4292 = vmatmul.mubr.f32.gmra.mxu1 %v4015_v36  ;;  %vm13024_vm9 = vnez %v12909_v51  ;;  %v10397_v17 = vadd.s32 24, %v10344_v5  ;;  %v13029_v24 = vld [vmem:[#allocation49_spill] sm:$0xff]  ;;  %v13031_v62 = vld [vmem:[#allocation50_spill] sm:$0xff]  ;;  %5112 = vmatpush1.msra.mxu0 %v1380_v63  ;;  %v13072_v59 = vld [vmem:[#allocation92_spill] sm:$0xff] }
 0x326   : > { %vm10368_vm14 = vcmp.lt.s32.totalorder %v13020_v29, 16  ;;  %v13025_v7 = vsel %vm13024_vm9, %v9900_v39, %v9839_v44  ;;  %v3882_v38 = vmax.f32 %v3732_v12, 0.0  ;;  %v13028_v44 = vld [vmem:[#allocation81_spill] sm:$0xff]  ;;  %v13030_v6 = vmax.f32 %v13029_v24, 0.0  ;;  %v3741_v4 = vpop.f32.mrf.mxu0  ;;  %5113 = vmatprep.subr.mxu0 %v10231_v52  ;;  %4839 = vmatpush2.msra.mxu1 %v1364_v23  ;;  %v1407_v36 = vld [vmem:[#allocation8 + $0x3f0] sm:$0xff] }
 0x327   : > { %vm10390_vm15 = vcmp.lt.s32.totalorder %v13025_v7, 16  ;;  %v3931_v51 = vsel %vm10270_vm2, %v3883_v47, 0.0  ;;  %v3747_v39 = vadd.f32 %v6111_v11, %v13028_v44  ;;  %vm13032_vm9 = vnez %v13031_v62  ;;  %v4016_v48 = vld [vmem:[#allocation2 + $0x67] sm:$0xff]  ;;  %5114 = vmatpush1.msra.mxu0 %v1379_v60  ;;  %v13052_v44 = vld [vmem:[#allocation84_spill] sm:$0xff]  ;;  %4840 = vmatprep.subr.mxu1 %v10231_v52 }
 0x328   : > { %6581 = vmatprep.mubr.msk.f32.mxu1 %vm13032_vm9, %v13030_v6  ;;  %vm13033_vm7 = vcmp.ne.s32.totalorder %v10249_v9, 0  ;;  %vm13034_vm5 = vcmp.lt.s32.totalorder %v10249_v9, 0  ;;  %3979 = vst [vmem:[#allocation2 + $0xd8] sm:$0xff] %v3931_v51  ;;  %4586 = vmatprep.mubr.f32.mxu0 %v4016_v48  ;;  %v13037_v49 = vsel %vm10105_vm12, %v9953_v42, %v9868_v35  ;;  %v10435_v29 = vadd.s32 24, %v10347_v34  ;;  %v13044_v47 = vld [vmem:[#allocation89_spill] sm:$0xff]  ;;  %v6114_v15 = vpop.f32.mrf.mxu0 }
 0x329   : > { %vm10412_vm8 = vmand %vm13034_vm5, %vm13033_vm7  ;;  %vm10422_vm9 = vcmp.lt.s32.totalorder %v13037_v49, 16  ;;  %vm13040_vm7 = vcmp.ne.s32.totalorder %v10320_v8, 0  ;;  %vm13041_vm5 = vcmp.lt.s32.totalorder %v10320_v8, 0  ;;  %v757_v30 = vmul.u32 24, %v756_v32  ;;  %4297 = vmatmul.mubr.f32.gmra.mxu1 %v4016_v48  ;;  %5115 = vmatprep.subr.mxu0 %v10231_v52 }
 0x32a   : > { %vm10430_vm1 = vmand %vm13041_vm5, %vm13040_vm7  ;;  %v745_v35 = vshrl.u32 %v10324_v40, 4  ;;  %v3930_v42 = vsel %vm10293_vm3, %v3882_v38, 0.0  ;;  %v3885_v33 = vmax.f32 %v3747_v39, 0.0  ;;  %v3742_v37 = vadd.f32 %v3741_v4, %v13044_v47  ;;  %v4109_v40 = vld [vmem:[#allocation2 + $0x51] sm:$0xff]  ;;  %v1378_v38 = vld [vmem:[#allocation8 + $0x308] sm:$0xff]  ;;  %v3751_v62 = vpop.f32.mrf.mxu0 }
 0x32b   : > { %vm13045_vm12 = vcmp.ne.s32.totalorder %v10344_v5, 0  ;;  %vm13046_vm7 = vcmp.lt.s32.totalorder %v10344_v5, 0  ;;  %3978 = vst [vmem:[#allocation2 + $0xd0] sm:$0xff] %v3930_v42  ;;  %v13049_v32 = vsel %vm10123_vm6, %v10010_v3, %v9926_v1  ;;  %v1073_v11 = vsel %vm10412_vm8, %v10308_v14, %v10249_v9  ;;  %4587 = vmatmul.mubr.f32.gmra.mxu0 %v4109_v40 }
 0x32c   : > { %vm10446_vm5 = vmand %vm13046_vm7, %vm13045_vm12  ;;  %vm10458_vm3 = vcmp.lt.s32.totalorder %v13049_v32, 16  ;;  %v778_v10 = vshrl.u32 %v10351_v45, 4  ;;  %v10468_v7 = vmul.u32.u64.low 2863311531, %v10168_v57  ;;  %v10469_v51 = vmul.u32.u64.high 2863311531, %v10168_v57, %v10468_v7  ;;  %v4017_v45 = vld [vmem:[#allocation2 + $0x6f] sm:$0xff]  ;;  %5116 = vmatpush1.msra.mxu0 %v1378_v38 }
 0x32d   : > { %v3933_v1 = vsel %vm10315_vm0, %v3885_v33, 0.0  ;;  %v3884_v3 = vmax.f32 %v3742_v37, 0.0  ;;  %v3757_v39 = vadd.f32 %v6114_v15, %v13052_v44  ;;  %v13053_v24 = vmax.f32 %v9997_v54, 0.0  ;;  %4591 = vmatprep.mubr.f32.mxu0 %v4017_v45  ;;  %v13068_v37 = vld [vmem:[#allocation91_spill] sm:$0xff]  ;;  %5117 = vmatprep.subr.mxu0 %v10231_v52  ;;  %v1408_v44 = vld [vmem:[#allocation8 + $0x3f8] sm:$0xff] }
 0x32e   : > { %vm13054_vm6 = vnez %v12862_v22  ;;  %vm13055_vm12 = vcmp.ne.s32.totalorder %v10347_v34, 0  ;;  %vm13056_vm7 = vcmp.lt.s32.totalorder %v10347_v34, 0  ;;  %v10487_v13 = vadd.s32 24, %v10375_v58  ;;  %3981 = vst [vmem:[#allocation2 + $0xe8] sm:$0xff] %v3933_v1  ;;  %v13059_v22 = vld [vmem:[#allocation99_spill] sm:$0xff]  ;;  %v13075_v1 = vld [vmem:[#allocation101_spill] sm:$0xff] }
 0x32f   : > { %6582 = vmatprep.mubr.msk.f32.mxu1 %vm13054_vm6, %v13053_v24  ;;  %vm10482_vm2 = vmand %vm13056_vm7, %vm13055_vm12  ;;  %v13060_v54 = vsel %vm10146_vm13, %v10067_v25, %v13059_v22  ;;  %vm13063_vm6 = vcmp.ne.s32.totalorder %v10375_v58, 0  ;;  %vm13064_vm12 = vcmp.lt.s32.totalorder %v10375_v58, 0  ;;  %v10507_v4 = vsub.s32 %v9930_v56, %v757_v30  ;;  %v1377_v56 = vld [vmem:[#allocation8 + $0x300] sm:$0xff]  ;;  %v6117_v30 = vpop.f32.mrf.mxu0  ;;  %v13081_v22 = vld [vmem:[#allocation63_spill] sm:$0xff] }
 0x330   : > { %vm10494_vm0 = vcmp.lt.s32.totalorder %v13060_v54, 16  ;;  %vm10502_vm7 = vmand %vm13064_vm12, %vm13063_vm6  ;;  %v746_v49 = vmul.u32 24, %v745_v35  ;;  %v10510_v42 = vmul.u32.u64.low 2863311531, %v13067_v19  ;;  %v10511_v33 = vmul.u32.u64.high 2863311531, %v13067_v19, %v10510_v42  ;;  %4302 = vmatmul.mubr.f32.gmra.mxu1 %v4017_v45  ;;  %v4110_v35 = vld [vmem:[#allocation2 + $0x59] sm:$0xff]  ;;  %5118 = vmatpush1.msra.mxu0 %v1377_v56 }
 0x331   : > { %v3932_v25 = vsel %vm10339_vm4, %v3884_v3, 0.0  ;;  %v3887_v47 = vmax.f32 %v3757_v39, 0.0  ;;  %v10517_v15 = vadd.f32 %v3751_v62, %v13068_v37  ;;  %v10520_v40 = vadd.s32 368, %v8825_v16  ;;  %4592 = vmatmul.mubr.f32.gmra.mxu0 %v4110_v35  ;;  %v4018_v3 = vld [vmem:[#allocation2 + $0x77] sm:$0xff]  ;;  %v3761_v21 = vpop.f32.mrf.mxu0  ;;  %5119 = vmatprep.subr.mxu0 %v10231_v52 }
 0x332   : > { %3980 = vst [vmem:[#allocation2 + $0xe0] sm:$0xff] %v3932_v25  ;;  %v13069_v46 = vsel %vm10185_vm10, %v10165_v31, %v10039_v26  ;;  %v1076_v16 = vsel %vm10430_vm1, %v10383_v2, %v10320_v8  ;;  %v1075_v7 = vsel %vm10446_vm5, %v10397_v17, %v10344_v5  ;;  %v1078_v53 = vsel %vm10482_vm2, %v10435_v29, %v10347_v34  ;;  %v13073_v2 = vld [vmem:[#allocation56_spill] sm:$0xff]  ;;  %v13082_v25 = vld [vmem:[#allocation95_spill] sm:$0xff]  ;;  %v13095_v17 = vld [vmem:[#allocation98_spill] sm:$0xff] }
 0x333   : > { %vm10527_vm13 = vcmp.lt.s32.totalorder %v13069_v46, 16  ;;  %v779_v26 = vmul.u32 24, %v778_v10  ;;  %v3935_v31 = vsel %vm10368_vm14, %v3887_v47, 0.0  ;;  %v12278_v23 = vmax.f32 %v10517_v15, 0.0  ;;  %4596 = vmatprep.mubr.f32.mxu0 %v4018_v3  ;;  %v13077_v39 = vld [vmem:[#allocation52_spill] sm:$0xff]  ;;  %5120 = vmatpush2.msra.mxu0 %v1408_v44 }
 0x334   : > { %v10548_v8 = vadd.f32 %v6117_v30, %v13072_v59  ;;  %v13074_v38 = vmax.f32 %v13073_v2, 0.0  ;;  %vm13076_vm1 = vnez %v13075_v1  ;;  %v1077_v10 = vsel %vm10502_vm7, %v10487_v13, %v10375_v58  ;;  %3983 = vst [vmem:[#allocation2 + $0xf8] sm:$0xff] %v3935_v31  ;;  %v1363_v31 = vld [vmem:[#allocation8 + $0x290] sm:$0xff]  ;;  %v13088_v2 = vld [vmem:[#allocation14_spill] sm:$0xff]  ;;  %5121 = vmatprep.subr.mxu0 %v10231_v52  ;;  %v13116_v58 = vld [vmem:[#allocation104_spill] sm:$0xff] }
 0x335   : > { %v13078_v24 = vsel %vm10213_vm11, %v10190_v50, %v13077_v39  ;;  %vm888_vm4 = vcmp.ne.s32.totalorder %v10507_v4, 0  ;;  %v10569_v62 = vsub.s32 %v9985_v28, %v746_v49  ;;  %v3934_v27 = vsel %vm10390_vm15, %v12278_v23, 0.0  ;;  %v6120_v28 = vpop.f32.mrf.mxu0  ;;  %v4111_v49 = vld [vmem:[#allocation2 + $0x61] sm:$0xff]  ;;  %4841 = vmatpush2.msra.mxu1 %v1363_v31  ;;  %5122 = vmatpush2.msra.mxu0 %v1407_v36  ;;  %v13096_v36 = vld [vmem:[#allocation100_spill] sm:$0xff] }
 0x336   : > { %6583 = vmatprep.mubr.msk.f32.mxu1 %vm13076_vm1, %v13074_v38  ;;  %vm10563_vm10 = vcmp.lt.s32.totalorder %v13078_v24, 16  ;;  %v10572_v54 = vmul.u32.u64.low 2863311531, %v13081_v22  ;;  %v10573_v42 = vmul.u32.u64.high 2863311531, %v13081_v22, %v10572_v54  ;;  %v12275_v50 = vmax.f32 %v10548_v8, 0.0  ;;  %3982 = vst [vmem:[#allocation2 + $0xf0] sm:$0xff] %v3934_v27  ;;  %4597 = vmatmul.mubr.f32.gmra.mxu0 %v4111_v49  ;;  %v4019_v38 = vld [vmem:[#allocation2 + $0x7f] sm:$0xff] }
 0x337   : > { %v10581_v47 = vadd.f32 %v3761_v21, %v13082_v25  ;;  %vm936_vm11 = vcmp.lt.s32.totalorder %v10507_v4, 0  ;;  %4307 = vmatmul.mubr.f32.gmra.mxu1 %v4018_v3  ;;  %vm10591_vm14 = vcmp.lt.s32.totalorder %v1073_v11, 16  ;;  %v10596_v56 = vadd.s32 24, %v10507_v4  ;;  %v13085_v11 = vld [vmem:[#allocation97_spill] sm:$0xff]  ;;  %v3771_v3 = vpop.f32.mrf.mxu0  ;;  %4601 = vmatprep.mubr.f32.mxu0 %v4019_v38  ;;  %v13092_v24 = vld [vmem:[#allocation87_spill] sm:$0xff]  ;;  %v1406_v25 = vld [vmem:[#allocation8 + $0x3e8] sm:$0xff] }
 0x338   : > { %v10599_v30 = vsub.s32 %v9988_v41, %v779_v26  ;;  %v10602_v35 = vmul.u32.u64.low 2863311531, %v10286_v61  ;;  %v10603_v46 = vmul.u32.u64.high 2863311531, %v10286_v61, %v10602_v35  ;;  %v3937_v9 = vsel %vm10422_vm9, %v12275_v50, 0.0  ;;  %v13086_v41 = vld [vmem:[#allocation18_spill] sm:$0xff]  ;;  %5123 = vmatprep.subr.mxu0 %v10231_v52  ;;  %vm10670_vm12 = vmand %vm936_vm11, %vm888_vm4  ;;  %4842 = vmatprep.subr.mxu1 %v10231_v52 }
 0x339   : > { %v12276_v14 = vmax.f32 %v10581_v47, 0.0  ;;  %v10611_v59 = vadd.f32 %v6120_v28, %v13085_v11  ;;  %v13087_v26 = vmax.f32 %v13086_v41, 0.0  ;;  %vm13089_vm8 = vnez %v13088_v2  ;;  %3985 = vst [vmem:[#allocation2 + $0x108] sm:$0xff] %v3937_v9  ;;  %v6123_v28 = vpop.f32.mrf.mxu0  ;;  %v4112_v49 = vld [vmem:[#allocation2 + $0x69] sm:$0xff]  ;;  %v13098_v11 = vld [vmem:[#allocation57_spill] sm:$0xff]  ;;  %5124 = vmatpush2.msra.mxu0 %v1406_v25  ;;  %v10718_v25 = vpop.f32.mrf.mxu1 }
 0x33a   : > { %v767_v1 = vshrl.u32 %v10469_v51, 4  ;;  %vm10618_vm6 = vcmp.lt.s32.totalorder %v1076_v16, 16  ;;  %v13090_v44 = vmov 0  ;;  %v10635_v54 = vadd.f32 %v3771_v3, %v13092_v24  ;;  %4602 = vmatmul.mubr.f32.gmra.mxu0 %v4112_v49  ;;  %v4020_v41 = vld [vmem:[#allocation2 + $0x87] sm:$0xff]  ;;  %5125 = vmatprep.subr.mxu0 %v10231_v52 }
 0x33b   : > { %6584 = vmatprep.mubr.msk.f32.mxu1 %vm13089_vm8, %v13087_v26  ;;  %v13091_v44 = vsel %vm10618_vm6, 4294967295, %v13090_v44  ;;  %v10625_v21 = vmul.u32.u64.low 2863311531, %v10330_v55  ;;  %v10626_v39 = vmul.u32.u64.high 2863311531, %v10330_v55, %v10625_v21  ;;  %v3936_v51 = vsel %vm10458_vm3, %v12276_v14, 0.0  ;;  %v3781_v3 = vpop.f32.mrf.mxu0  ;;  %4606 = vmatprep.mubr.f32.mxu0 %v4020_v41  ;;  %v13120_v26 = vld [vmem:[#allocation93_spill] sm:$0xff] }
 0x33c   : > { %v12271_v16 = vmax.f32 %v10611_v59, 0.0  ;;  %v800_v27 = vshrl.u32 %v10511_v33, 4  ;;  %3984 = vst [vmem:[#allocation2 + $0x100] sm:$0xff] %v3936_v51  ;;  %4312 = vmatmul.mubr.f32.gmra.mxu1 %v4019_v38  ;;  %vm10643_vm8 = vcmp.lt.s32.totalorder %v1075_v7, 16  ;;  %v13093_v35 = vmov 0  ;;  %v1405_v38 = vld [vmem:[#allocation8 + $0x3e0] sm:$0xff] }
 0x33d   : > { %v13094_v35 = vsel %vm10643_vm8, 4294967295, %v13093_v35  ;;  %v10650_v33 = vmul.u32.u64.low 2863311531, %v10361_v43  ;;  %v10651_v31 = vmul.u32.u64.high 2863311531, %v10361_v43, %v10650_v33  ;;  %v12273_v5 = vmax.f32 %v10635_v54, 0.0  ;;  %5126 = vmatpush2.msra.mxu0 %v1405_v38  ;;  %v4240_v38 = vpop.f32.mrf.mxu1  ;;  %v11163_v20 = vld [vmem:[#allocation2 + $0xe1] sm:$0xff]  ;;  %v11185_v63 = vld [vmem:[#allocation2 + $0xf1] sm:$0xff] }
 0x33e   : > { %v3939_v12 = vsel %vm10494_vm0, %v12271_v16, 0.0  ;;  %v10660_v7 = vadd.f32 %v6123_v28, %v13095_v17  ;;  %v13097_v9 = vmax.f32 %v13096_v36, 0.0  ;;  %vm13099_vm5 = vnez %v13098_v11  ;;  %v10720_v17 = vld [vmem:[#allocation2 + $0x71] sm:$0xff]  ;;  %5127 = vmatprep.subr.mxu0 %v10231_v52 }
 0x33f   : > { %v10675_v2 = vadd.s32 24, %v10569_v62  ;;  %3987 = vst [vmem:[#allocation2 + $0x118] sm:$0xff] %v3939_v12  ;;  %v13102_v21 = vmov 0  ;;  %vm13104_vm4 = vcmp.ne.s32.totalorder %v10569_v62, 0  ;;  %vm13105_vm11 = vcmp.lt.s32.totalorder %v10569_v62, 0  ;;  %v6126_v12 = vpop.f32.mrf.mxu0  ;;  %4607 = vmatmul.mubr.f32.gmra.mxu0 %v10720_v17 }
 0x340   : > { %6585 = vmatprep.mubr.msk.f32.mxu1 %vm13099_vm5, %v13097_v9  ;;  %vm10682_vm5 = vcmp.lt.s32.totalorder %v1078_v53, 16  ;;  %vm10690_vm1 = vmand %vm13105_vm11, %vm13104_vm4  ;;  %v768_v24 = vmul.u32 24, %v767_v1  ;;  %v789_v28 = vshrl.u32 %v10573_v42, 4  ;;  %v3938_v34 = vsel %vm10527_vm13, %v12273_v5, 0.0  ;;  %v13108_v53 = vld [vmem:[#allocation90_spill] sm:$0xff] }
 0x341   : > { %v13103_v21 = vsel %vm10682_vm5, 4294967295, %v13102_v21  ;;  %v10696_v6 = vmul.u32.u64.low 2863311531, %v10520_v40  ;;  %v10697_v49 = vmul.u32.u64.high 2863311531, %v10520_v40, %v10696_v6  ;;  %v12262_v29 = vmax.f32 %v10660_v7, 0.0  ;;  %3986 = vst [vmem:[#allocation2 + $0x110] sm:$0xff] %v3938_v34  ;;  %4317 = vmatmul.mubr.f32.gmra.mxu1 %v4020_v41  ;;  %v13115_v34 = vld [vmem:[#allocation102_spill] sm:$0xff] }
 0x342   : > { %v10705_v33 = vadd.f32 %v3781_v3, %v13108_v53  ;;  %vm13109_vm2 = vcmp.ne.s32.totalorder %v10599_v30, 0  ;;  %vm13110_vm4 = vcmp.lt.s32.totalorder %v10599_v30, 0  ;;  %v1034_v1 = vadd.s32 24, %v10599_v30  ;;  %v1362_v3 = vld [vmem:[#allocation8 + $0x288] sm:$0xff]  ;;  %v1404_v6 = vld [vmem:[#allocation8 + $0x3d8] sm:$0xff] }
 0x343   : > { %vm10711_vm11 = vmand %vm13110_vm4, %vm13109_vm2  ;;  %vm10727_vm2 = vcmp.lt.s32.totalorder %v1077_v10, 16  ;;  %v801_v9 = vmul.u32 24, %v800_v27  ;;  %v822_v11 = vshrl.u32 %v10603_v46, 4  ;;  %v3941_v41 = vsel %vm10563_vm10, %v12262_v29, 0.0  ;;  %v13118_v10 = vld [vmem:[#allocation51_spill] sm:$0xff]  ;;  %v3791_v29 = vpop.f32.mrf.mxu0  ;;  %4843 = vmatpush2.msra.mxu1 %v1362_v3  ;;  %5128 = vmatpush2.msra.mxu0 %v1404_v6  ;;  %v13124_v6 = vld [vmem:[#allocation53_spill] sm:$0xff] }
 0x344   : > { %v12270_v60 = vmax.f32 %v10705_v33, 0.0  ;;  %v10738_v53 = vadd.f32 %v6126_v12, %v13115_v34  ;;  %v13117_v13 = vmax.f32 %v13116_v58, 0.0  ;;  %vm13119_vm7 = vnez %v13118_v10  ;;  %v4021_v46 = vld [vmem:[#allocation2 + $0x8f] sm:$0xff]  ;;  %3989 = vst [vmem:[#allocation2 + $0x128] sm:$0xff] %v3941_v41  ;;  %5129 = vmatprep.subr.mxu0 %v10231_v52  ;;  %4844 = vmatprep.subr.mxu1 %v10231_v52  ;;  %v11196_v0 = vld [vmem:[#allocation2 + $0xf9] sm:$0xff]  ;;  %v11207_v32 = vld [vmem:[#allocation2 + $0x101] sm:$0xff] }
 0x345   : > { %v1080_v27 = vsel %vm10670_vm12, %v10596_v56, %v10507_v4  ;;  %4611 = vmatprep.mubr.f32.mxu0 %v4021_v46  ;;  %v1079_v12 = vsel %vm10690_vm1, %v10675_v2, %v10569_v62  ;;  %v10754_v34 = vsub.s32 %v10168_v57, %v768_v24  ;;  %v790_v58 = vmul.u32 24, %v789_v28  ;;  %v1403_v62 = vld [vmem:[#allocation8 + $0x3d0] sm:$0xff]  ;;  %v10769_v2 = vld [vmem:[#allocation2 + $0x79] sm:$0xff]  ;;  %v1402_v10 = vld [vmem:[#allocation8 + $0x3c8] sm:$0xff] }
 0x346   : > { %6586 = vmatprep.mubr.msk.f32.mxu1 %vm13119_vm7, %v13117_v13  ;;  %v811_v13 = vshrl.u32 %v10626_v39, 4  ;;  %v3940_v4 = vsel %vm10591_vm14, %v12270_v60, 0.0  ;;  %v12268_v56 = vmax.f32 %v10738_v53, 0.0  ;;  %v10764_v41 = vadd.f32 %v3791_v29, %v13120_v26  ;;  %v6129_v39 = vpop.f32.mrf.mxu0  ;;  %4612 = vmatmul.mubr.f32.gmra.mxu0 %v10769_v2  ;;  %v13147_v60 = vld [vmem:[#allocation86_spill] sm:$0xff] }
 0x347   : > { %v1082_v57 = vsel %vm10711_vm11, %v1034_v1, %v10599_v30  ;;  %3988 = vst [vmem:[#allocation2 + $0x120] sm:$0xff] %v3940_v4  ;;  %4322 = vmatmul.mubr.f32.gmra.mxu1 %v4021_v46  ;;  %vm10771_vm12 = vcmp.lt.s32.totalorder %v1080_v27, 16  ;;  %v13121_v51 = vmov 0  ;;  %v10776_v24 = vsub.s32 %v13067_v19, %v801_v9  ;;  %v13123_v1 = vld [vmem:[#allocation20_spill] sm:$0xff]  ;;  %v13126_v9 = vld [vmem:[#allocation59_spill] sm:$0xff]  ;;  %5130 = vmatpush2.msra.mxu0 %v1403_v62  ;;  %v1361_v62 = vld [vmem:[#allocation8 + $0x280] sm:$0xff] }
 0x348   : > { %v13122_v51 = vsel %vm10771_vm12, 4294967295, %v13121_v51  ;;  %v823_v28 = vmul.u32 24, %v822_v11  ;;  %v844_v29 = vshrl.u32 %v10651_v31, 4  ;;  %v3943_v30 = vsel %vm10618_vm6, %v12268_v56, 0.0  ;;  %v4022_v31 = vld [vmem:[#allocation2 + $0x97] sm:$0xff]  ;;  %v3801_v46 = vpop.f32.mrf.mxu0  ;;  %5131 = vmatprep.subr.mxu0 %v10231_v52  ;;  %4845 = vmatpush2.msra.mxu1 %v1361_v62  ;;  %v11218_v48 = vld [vmem:[#allocation2 + $0x109] sm:$0xff] }
 0x349   : > { %v12269_v42 = vmax.f32 %v10764_v41, 0.0  ;;  %v10786_v3 = vadd.f32 %v6129_v39, %v13123_v1  ;;  %v13125_v19 = vmax.f32 %v13124_v6, 0.0  ;;  %vm13127_vm1 = vnez %v13126_v9  ;;  %3991 = vst [vmem:[#allocation2 + $0x138] sm:$0xff] %v3943_v30  ;;  %4616 = vmatprep.mubr.f32.mxu0 %v4022_v31  ;;  %v13132_v30 = vld [vmem:[#allocation15_spill] sm:$0xff]  ;;  %5132 = vmatpush2.msra.mxu0 %v1402_v10  ;;  %v1401_v6 = vld [vmem:[#allocation8 + $0x3c0] sm:$0xff] }
 0x34a   : > { %vm10793_vm4 = vcmp.lt.s32.totalorder %v1079_v12, 16  ;;  %vm10797_vm11 = vcmp.lt.s32.totalorder %v1082_v57, 16  ;;  %v13130_v27 = vmov 0  ;;  %v10803_v38 = vsub.s32 %v13081_v22, %v790_v58  ;;  %v10806_v12 = vpop.f32.mrf.mxu1  ;;  %v6132_v22 = vpop.f32.mrf.mxu0  ;;  %5133 = vmatprep.subr.mxu0 %v10231_v52  ;;  %v11229_v37 = vld [vmem:[#allocation2 + $0x111] sm:$0xff] }
 0x34b   : > { %6587 = vmatprep.mubr.msk.f32.mxu1 %vm13127_vm1, %v13125_v19  ;;  %v13131_v27 = vsel %vm10797_vm11, 4294967295, %v13130_v27  ;;  %v812_v4 = vmul.u32 24, %v811_v13  ;;  %v833_v26 = vshrl.u32 %v10697_v49, 4  ;;  %v3942_v39 = vsel %vm10643_vm8, %v12269_v42, 0.0  ;;  %v10819_v49 = vld [vmem:[#allocation2 + $0x81] sm:$0xff]  ;;  %5134 = vmatpush2.msra.mxu0 %v1401_v6  ;;  %v10890_v6 = vld [vmem:[#allocation8 + $0x478] sm:$0xff] }
 0x34c   : > { %v12266_v57 = vmax.f32 %v10786_v3, 0.0  ;;  %v10814_v1 = vadd.f32 %v3801_v46, %v13132_v30  ;;  %vm937_vm1 = vcmp.lt.s32.totalorder %v10754_v34, 0  ;;  %3990 = vst [vmem:[#allocation2 + $0x130] sm:$0xff] %v3942_v39  ;;  %4327 = vmatmul.mubr.f32.gmra.mxu1 %v4022_v31  ;;  %v10824_v58 = vsub.s32 %v10286_v61, %v823_v28  ;;  %v4245_v19 = vpop.f32.mrf.mxu1  ;;  %v13133_v46 = vld [vmem:[#allocation24_spill] sm:$0xff]  ;;  %4617 = vmatmul.mubr.f32.gmra.mxu0 %v10819_v49  ;;  %v13134_v30 = vld [vmem:[#allocation65_spill] sm:$0xff]  ;;  %v3811_v10 = vpop.f32.mrf.mxu0 }
 0x34d   : > { %v845_v13 = vmul.u32 24, %v844_v29  ;;  %v10832_v39 = vadd.f32 %v6132_v22, %v13133_v46  ;;  %v13135_v61 = vmax.f32 %v13134_v30, 0.0  ;;  %vm13136_vm6 = vnez %v12920_v18  ;;  %v10839_v28 = vld [vmem:[#allocation2 + $0x9f] sm:$0xff]  ;;  %5135 = vmatprep.subr.mxu0 %v10231_v52  ;;  %6145 = vmatprep.subr.mxu1 %v10890_v6 }
 0x34e   : > { %v3945_v9 = vsel %vm10682_vm5, %v12266_v57, 0.0  ;;  %v12267_v31 = vmax.f32 %v10814_v1, 0.0  ;;  %13137 = vst [vmem:[#allocation47_spill] sm:$0xff] %v10839_v28  ;;  %v1033_v29 = vadd.s32 24, %v10754_v34  ;;  %4621 = vmatprep.mubr.f32.mxu0 %v10839_v28  ;;  %vm13138_vm7 = vcmp.ne.s32.totalorder %v10754_v34, 0  ;;  %v13141_v30 = vld [vmem:[#allocation16_spill] sm:$0xff]  ;;  %v10874_v57 = vpop.f32.mrf.mxu1 }
 0x34f   : > { %6588 = vmatprep.mubr.msk.f32.mxu1 %vm13136_vm6, %v13135_v61  ;;  %3993 = vst [vmem:[#allocation2 + $0x148] sm:$0xff] %v3945_v9  ;;  %vm10847_vm5 = vmand %vm937_vm1, %vm13138_vm7  ;;  %vm891_vm8 = vcmp.ne.s32.totalorder %v10803_v38, 0  ;;  %v10854_v18 = vsub.s32 %v10330_v55, %v812_v4  ;;  %v834_v19 = vmul.u32 24, %v833_v26  ;;  %v12272_v46 = vmax.f32 %v10832_v39, 0.0  ;;  %v1400_v26 = vld [vmem:[#allocation8 + $0x3b8] sm:$0xff] }
 0x350   : > { %v3944_v9 = vsel %vm10727_vm2, %v12267_v31, 0.0  ;;  %v10863_v61 = vadd.f32 %v3811_v10, %v13141_v30  ;;  %vm13142_vm7 = vcmp.ne.s32.totalorder %v10776_v24, 0  ;;  %vm13143_vm1 = vcmp.lt.s32.totalorder %v10776_v24, 0  ;;  %v6135_v31 = vpop.f32.mrf.mxu0  ;;  %4332 = vmatmul.mubr.f32.gmra.mxu1 %v10839_v28  ;;  %v10877_v10 = vld [vmem:[#allocation2 + $0x89] sm:$0xff]  ;;  %5136 = vmatpush2.msra.mxu0 %v1400_v26  ;;  %v11240_v45 = vld [vmem:[#allocation2 + $0x119] sm:$0xff] }
 0x351   : > { %vm10869_vm6 = vmand %vm13143_vm1, %vm13142_vm7  ;;  %v1036_v4 = vadd.s32 24, %v10776_v24  ;;  %3992 = vst [vmem:[#allocation2 + $0x140] sm:$0xff] %v3944_v9  ;;  %v10879_v30 = vld [vmem:[#allocation2 + $0xa8] sm:$0xff]  ;;  %v10882_v56 = vadd.s32 24, %v10803_v38  ;;  %v10887_v62 = vsub.s32 %v10361_v43, %v845_v13  ;;  %v3947_v9 = vsel %vm10771_vm12, %v12272_v46, 0.0  ;;  %4622 = vmatmul.mubr.f32.gmra.mxu0 %v10877_v10  ;;  %5137 = vmatprep.subr.mxu0 %v10231_v52 }
 0x352   : > { %13146 = vst [vmem:[#allocation55_spill] sm:$0xff] %v10879_v30  ;;  %v12277_v42 = vmax.f32 %v10863_v61, 0.0  ;;  %v10898_v16 = vadd.f32 %v6135_v31, %v13147_v60  ;;  %v1081_v43 = vsel %vm10847_vm5, %v1033_v29, %v10754_v34  ;;  %4336 = vmatprep.mubr.f32.mxu1 %v10879_v30  ;;  %v10905_v13 = vld [vmem:[#allocation2 + $0xa7] sm:$0xff]  ;;  %vm13149_vm1 = vcmp.lt.s32.totalorder %v10803_v38, 0  ;;  %v1399_v60 = vld [vmem:[#allocation8 + $0x3b0] sm:$0xff]  ;;  %v4250_v31 = vpop.f32.mrf.mxu1  ;;  %3995 = vst [vmem:[#allocation2 + $0x158] sm:$0xff] %v3947_v9  ;;  %v3821_v5 = vpop.f32.mrf.mxu0 }
 0x353   : > { %13148 = vst [vmem:[#allocation62_spill] sm:$0xff] %v10905_v13  ;;  %vm10911_vm7 = vmand %vm13149_vm1, %vm891_vm8  ;;  %4626 = vmatprep.mubr.f32.mxu0 %v10905_v13  ;;  %v10917_v34 = vadd.s32 24, %v10824_v58  ;;  %v10922_v29 = vsub.s32 %v10520_v40, %v834_v19  ;;  %v13152_v31 = vld [vmem:[#allocation21_spill] sm:$0xff]  ;;  %v1084_v14 = vsel %vm10869_vm6, %v1036_v4, %v10776_v24  ;;  %vm13153_vm8 = vcmp.ne.s32.totalorder %v10824_v58, 0  ;;  %v10950_v24 = vld [vmem:[#allocation2 + $0x91] sm:$0xff]  ;;  %5138 = vmatpush2.msra.mxu0 %v1399_v60 }
 0x354   : > { %v3946_v22 = vsel %vm10793_vm4, %v12277_v42, 0.0  ;;  %v12280_v9 = vmax.f32 %v10898_v16, 0.0  ;;  %v10930_v50 = vadd.f32 %v3821_v5, %v13152_v31  ;;  %vm13154_vm1 = vcmp.lt.s32.totalorder %v10824_v58, 0  ;;  %v6138_v19 = vpop.f32.mrf.mxu0  ;;  %4337 = vmatmul.mubr.f32.gmra.mxu1 %v10905_v13  ;;  %13159 = vst [vmem:[#allocation82_spill] sm:$0xff] %v10950_v24  ;;  %v10956_v4 = vld [vmem:[#allocation2 + $0xb0] sm:$0xff]  ;;  %5139 = vmatprep.subr.mxu0 %v10231_v52  ;;  %v11007_v13 = vld [vmem:[#allocation2 + $0x99] sm:$0xff] }
 0x355   : > { %vm10939_vm12 = vmand %vm13154_vm1, %vm13153_vm8  ;;  %3994 = vst [vmem:[#allocation2 + $0x150] sm:$0xff] %v3946_v22  ;;  %vm10945_vm5 = vcmp.lt.s32.totalorder %v1081_v43, 16  ;;  %v1083_v55 = vsel %vm10911_vm7, %v10882_v56, %v10803_v38  ;;  %v1037_v26 = vadd.s32 24, %v10854_v18  ;;  %v1398_v43 = vld [vmem:[#allocation8 + $0x3a8] sm:$0xff]  ;;  %v13161_v42 = vld [vmem:[#allocation19_spill] sm:$0xff]  ;;  %4627 = vmatmul.mubr.f32.gmra.mxu0 %v10950_v24  ;;  %4341 = vmatprep.mubr.f32.mxu1 %v10956_v4  ;;  %vm13163_vm7 = vcmp.ne.s32.totalorder %v10854_v18, 0 }
 0x356   : > { %13160 = vst [vmem:[#allocation58_spill] sm:$0xff] %v10956_v4  ;;  %v3949_v22 = vsel %vm10797_vm11, %v12280_v9, 0.0  ;;  %v12284_v31 = vmax.f32 %v10930_v50, 0.0  ;;  %v10966_v23 = vadd.f32 %v6138_v19, %v13161_v42  ;;  %v10970_v56 = vld [vmem:[#allocation2 + $0xaf] sm:$0xff]  ;;  %vm13164_vm8 = vcmp.lt.s32.totalorder %v10854_v18, 0  ;;  %v3831_v46 = vpop.f32.mrf.mxu0  ;;  %5140 = vmatpush2.msra.mxu0 %v1398_v43  ;;  %13172 = vst [vmem:[#allocation69_spill] sm:$0xff] %v11007_v13 }
 0x357   : > { %13162 = vst [vmem:[#allocation77_spill] sm:$0xff] %v10970_v56  ;;  %vm10976_vm1 = vmand %vm13164_vm8, %vm13163_vm7  ;;  %vm944_vm6 = vcmp.lt.s32.totalorder %v10887_v62, 0  ;;  %vm10981_vm11 = vcmp.lt.s32.totalorder %v1084_v14, 16  ;;  %v13167_v42 = vmov 0  ;;  %4631 = vmatprep.mubr.f32.mxu0 %v10970_v56  ;;  %v1086_v60 = vsel %vm10939_vm12, %v10917_v34, %v10824_v58  ;;  %v13169_v9 = vld [vmem:[#allocation94_spill] sm:$0xff]  ;;  %v1397_v58 = vld [vmem:[#allocation8 + $0x3a0] sm:$0xff]  ;;  %5141 = vmatprep.subr.mxu0 %v10231_v52 }
 0x358   : > { %3997 = vst [vmem:[#allocation2 + $0x168] sm:$0xff] %v3949_v22  ;;  %v13168_v42 = vsel %vm10981_vm11, 4294967295, %v13167_v42  ;;  %v1040_v19 = vadd.s32 24, %v10887_v62  ;;  %v3948_v14 = vsel %vm10945_vm5, %v12284_v31, 0.0  ;;  %v12290_v22 = vmax.f32 %v10966_v23, 0.0  ;;  %v6141_v40 = vpop.f32.mrf.mxu0  ;;  %4342 = vmatmul.mubr.f32.gmra.mxu1 %v10970_v56  ;;  %v1396_v56 = vld [vmem:[#allocation8 + $0x398] sm:$0xff]  ;;  %5142 = vmatpush2.msra.mxu0 %v1397_v58 }
 0x359   : > { %v10999_v4 = vadd.f32 %v3831_v46, %v13169_v9  ;;  %3996 = vst [vmem:[#allocation2 + $0x160] sm:$0xff] %v3948_v14  ;;  %vm11002_vm12 = vcmp.lt.s32.totalorder %v1083_v55, 16  ;;  %v1085_v31 = vsel %vm10976_vm1, %v1037_v26, %v10854_v18  ;;  %v11012_v9 = vld [vmem:[#allocation2 + $0xb8] sm:$0xff]  ;;  %vm13174_vm8 = vcmp.ne.s32.totalorder %v10887_v62, 0  ;;  %4632 = vmatmul.mubr.f32.gmra.mxu0 %v11007_v13  ;;  %5143 = vmatprep.subr.mxu0 %v10231_v52  ;;  %v11063_v24 = vld [vmem:[#allocation2 + $0xa1] sm:$0xff] }
 0x35a   : > { %13173 = vst [vmem:[#allocation66_spill] sm:$0xff] %v11012_v9  ;;  %vm11018_vm7 = vmand %vm944_vm6, %vm13174_vm8  ;;  %v3951_v43 = vsel %vm10981_vm11, %v12290_v22, 0.0  ;;  %v13177_v18 = vld [vmem:[#allocation32_spill] sm:$0xff]  ;;  %4346 = vmatprep.mubr.f32.mxu1 %v11012_v9  ;;  %v1039_v14 = vadd.s32 24, %v10922_v29  ;;  %vm11034_vm6 = vcmp.lt.s32.totalorder %v1086_v60, 16  ;;  %v3841_v28 = vpop.f32.mrf.mxu0  ;;  %vm13180_vm1 = vcmp.ne.s32.totalorder %v10922_v29, 0  ;;  %5144 = vmatpush2.msra.mxu0 %v1396_v56 }
 0x35b   : > { %v12295_v38 = vmax.f32 %v10999_v4, 0.0  ;;  %v3847_v26 = vadd.f32 %v6141_v40, %v13177_v18  ;;  %v11031_v46 = vld [vmem:[#allocation2 + $0xb7] sm:$0xff]  ;;  %3999 = vst [vmem:[#allocation2 + $0x178] sm:$0xff] %v3951_v43  ;;  %vm13181_vm8 = vcmp.lt.s32.totalorder %v10922_v29, 0  ;;  %v1088_v9 = vsel %vm11018_vm7, %v1040_v19, %v10887_v62  ;;  %5145 = vmatprep.subr.mxu0 %v10231_v52  ;;  %v11295_v11 = vld [vmem:[#allocation2 + $0x141] sm:$0xff] }
 0x35c   : > { %4636 = vmatprep.mubr.f32.mxu0 %v11031_v46  ;;  %vm11043_vm11 = vmand %vm13181_vm8, %vm13180_vm1  ;;  %v13184_v18 = vld [vmem:[#allocation103_spill] sm:$0xff]  ;;  %vm11058_vm1 = vcmp.lt.s32.totalorder %v1085_v31, 16  ;;  %v6144_v58 = vpop.f32.mrf.mxu0  ;;  %4347 = vmatmul.mubr.f32.gmra.mxu1 %v11031_v46  ;;  %v13187_v19 = vld [vmem:[#allocation44_spill] sm:$0xff]  ;;  %vm11078_vm7 = vcmp.lt.s32.totalorder %v1088_v9, 16  ;;  %v13223_v5 = vmax.f32 %v10999_v4, 0.0 }
 0x35d   : > { %v3950_v60 = vsel %vm11002_vm12, %v12295_v38, 0.0  ;;  %v3905_v43 = vmax.f32 %v3847_v26, 0.0  ;;  %v11052_v22 = vadd.f32 %v3841_v28, %v13184_v18  ;;  %v11065_v26 = vld [vmem:[#allocation2 + $0xc0] sm:$0xff]  ;;  %v1395_v28 = vld [vmem:[#allocation8 + $0x390] sm:$0xff]  ;;  %4637 = vmatmul.mubr.f32.gmra.mxu0 %v11063_v24  ;;  %v1087_v31 = vsel %vm11043_vm11, %v1039_v14, %v10922_v29  ;;  %v13190_v14 = vld [vmem:[#allocation28_spill] sm:$0xff] }
 0x35e   : > { %3998 = vst [vmem:[#allocation2 + $0x170] sm:$0xff] %v3950_v60  ;;  %v3857_v60 = vadd.f32 %v6144_v58, %v13187_v19  ;;  %4351 = vmatprep.mubr.f32.mxu1 %v11065_v26  ;;  %v11076_v18 = vld [vmem:[#allocation2 + $0xbf] sm:$0xff]  ;;  %v3851_v30 = vpop.f32.mrf.mxu0  ;;  %5146 = vmatpush2.msra.mxu0 %v1395_v28  ;;  %v1394_v58 = vld [vmem:[#allocation8 + $0x388] sm:$0xff]  ;;  %vm1135_vm11 = vcmp.lt.s32.totalorder %v1087_v31, 16  ;;  %v11104_v56 = vld [vmem:[#allocation2 + $0xd0] sm:$0xff] }
 0x35f   : > { %v3953_v55 = vsel %vm11034_vm6, %v3905_v43, 0.0  ;;  %v12296_v62 = vmax.f32 %v11052_v22, 0.0  ;;  %4641 = vmatprep.mubr.f32.mxu0 %v11076_v18  ;;  %v3852_v43 = vadd.f32 %v3851_v30, %v13190_v14  ;;  %v11090_v9 = vld [vmem:[#allocation2 + $0xa9] sm:$0xff]  ;;  %v6428_v19 = vld [vmem:[#allocation2] sm:$0xff]  ;;  %v11102_v30 = vld [vmem:[#allocation2 + $0xb1] sm:$0xff]  ;;  %v13230_v34 = vmax.f32 %v11052_v22, 0.0 }
 0x360   : > { %4001 = vst [vmem:[#allocation2 + $0x188] sm:$0xff] %v3953_v55  ;;  %v3907_v29 = vmax.f32 %v3857_v60, 0.0  ;;  %4352 = vmatmul.mubr.f32.gmra.mxu1 %v11076_v18  ;;  %v11092_v55 = vld [vmem:[#allocation2 + $0xc8] sm:$0xff]  ;;  %5147 = vmatprep.subr.mxu0 %v6428_v19  ;;  %v1393_v60 = vld [vmem:[#allocation8 + $0x380] sm:$0xff]  ;;  %v11118_v14 = vld [vmem:[#allocation2 + $0xd7] sm:$0xff] }
 0x361   : > { %v3952_v40 = vsel %vm11058_vm1, %v12296_v62, 0.0  ;;  %v3906_v38 = vmax.f32 %v3852_v43, 0.0  ;;  %4642 = vmatmul.mubr.f32.gmra.mxu0 %v11090_v9  ;;  %4356 = vmatprep.mubr.f32.mxu1 %v11092_v55  ;;  %v11098_v28 = vld [vmem:[#allocation2 + $0xc7] sm:$0xff]  ;;  %13191 = vst [vmem:[#allocation88_spill] sm:$0xff] %v11118_v14  ;;  %v11142_v62 = vld [vmem:[#allocation2 + $0xd1] sm:$0xff] }
 0x362   : > { %4000 = vst [vmem:[#allocation2 + $0x180] sm:$0xff] %v3952_v40  ;;  %v3955_v52 = vsel %vm11078_vm7, %v3907_v29, 0.0  ;;  %4646 = vmatprep.mubr.f32.mxu0 %v11098_v28  ;;  %5148 = vmatpush2.msra.mxu0 %v1394_v58  ;;  %v11108_v40 = vld [vmem:[#allocation2 + $0xcf] sm:$0xff]  ;;  %v11114_v29 = vld [vmem:[#allocation2 + $0xd8] sm:$0xff]  ;;  %v11122_v43 = vld [vmem:[#allocation2 + $0xc1] sm:$0xff] }
 0x363   : > { %4003 = vst [vmem:[#allocation2 + $0x198] sm:$0xff] %v3955_v52  ;;  %v3954_v31 = vsel %vm1135_vm11, %v3906_v38, 0.0  ;;  %5149 = vmatprep.subr.mxu0 %v6428_v19  ;;  %v11112_v38 = vld [vmem:[#allocation2 + $0xb9] sm:$0xff]  ;;  %v11132_v52 = vld [vmem:[#allocation2 + $0xc9] sm:$0xff]  ;;  %v11273_v36 = vld [vmem:[#allocation2 + $0x131] sm:$0xff] }
 0x364   : > { %4002 = vst [vmem:[#allocation2 + $0x190] sm:$0xff] %v3954_v31  ;;  %4357 = vmatmul.mubr.f32.gmra.mxu1 %v11098_v28  ;;  %5150 = vmatpush2.msra.mxu0 %v1393_v60  ;;  %v11124_v58 = vld [vmem:[#allocation2 + $0xe0] sm:$0xff]  ;;  %v11134_v60 = vld [vmem:[#allocation2 + $0xe8] sm:$0xff] }
 0x365   : > { %4647 = vmatmul.mubr.f32.gmra.mxu0 %v11102_v30  ;;  %4361 = vmatprep.mubr.f32.mxu1 %v11104_v56  ;;  %13192 = vst [vmem:[#allocation80_spill] sm:$0xff] %v11124_v58  ;;  %v11128_v19 = vld [vmem:[#allocation2 + $0xdf] sm:$0xff]  ;;  %13194 = vst [vmem:[#allocation61_spill] sm:$0xff] %v11134_v60  ;;  %v11138_v31 = vld [vmem:[#allocation2 + $0xe7] sm:$0xff] }
 0x366   : > { %4651 = vmatprep.mubr.f32.mxu0 %v11108_v40  ;;  %13193 = vst [vmem:[#allocation71_spill] sm:$0xff] %v11128_v19  ;;  %13195 = vst [vmem:[#allocation17_spill] sm:$0xff] %v11138_v31  ;;  %v11339_v4 = vld [vmem:[#allocation2 + $0x161] sm:$0xff]  ;;  %v11356_v22 = vld [vmem:[#allocation2 + $0x171] sm:$0xff] }
 0x367   : > { %13229 = vst [vmem:[#allocation38_spill] sm:$0xff] %v11339_v4  ;;  %13234 = vst [vmem:[#allocation35_spill] sm:$0xff] %v11356_v22  ;;  %v6430_v13 = vld [vmem:[#allocation2 + $0x20] sm:$0xff] }
 0x368   : > { %4362 = vmatmul.mubr.f32.gmra.mxu1 %v11108_v40 }
 0x369   : > { %4652 = vmatmul.mubr.f32.gmra.mxu0 %v11112_v38  ;;  %4366 = vmatprep.mubr.f32.mxu1 %v11114_v29 }
 0x36a   : > { %4656 = vmatprep.mubr.f32.mxu0 %v11118_v14 }
 0x36c   : > { %4367 = vmatmul.mubr.f32.gmra.mxu1 %v11118_v14  ;;  %v11155_v14 = vld [vmem:[#allocation2 + $0xf8] sm:$0xff] }
 0x36d   : > { %4657 = vmatmul.mubr.f32.gmra.mxu0 %v11122_v43  ;;  %4371 = vmatprep.mubr.f32.mxu1 %v11124_v58  ;;  %v11149_v58 = vld [vmem:[#allocation2 + $0xef] sm:$0xff]  ;;  %13198 = vst [vmem:[#allocation30_spill] sm:$0xff] %v11155_v14 }
 0x36e   : > { %4661 = vmatprep.mubr.f32.mxu0 %v11128_v19  ;;  %13197 = vst [vmem:[#allocation68_spill] sm:$0xff] %v11149_v58 }
 0x370   : > { %4372 = vmatmul.mubr.f32.gmra.mxu1 %v11128_v19  ;;  %v13196_v19 = vmax.f32 %v10517_v15, 0.0  ;;  %v13200_v15 = vmax.f32 %v10581_v47, 0.0  ;;  %v13202_v47 = vmax.f32 %v10635_v54, 0.0  ;;  %v13204_v54 = vmax.f32 %v10705_v33, 0.0 }
 0x371   : > { %4662 = vmatmul.mubr.f32.gmra.mxu0 %v11132_v52  ;;  %4376 = vmatprep.mubr.f32.mxu1 %v11134_v60  ;;  %v11153_v60 = vld [vmem:[#allocation2 + $0xd9] sm:$0xff]  ;;  %v13206_v33 = vmax.f32 %v10764_v41, 0.0  ;;  %v13210_v41 = vmax.f32 %v10814_v1, 0.0  ;;  %v13213_v1 = vmax.f32 %v10863_v61, 0.0  ;;  %v13218_v61 = vmax.f32 %v10930_v50, 0.0  ;;  %v11317_v50 = vld [vmem:[#allocation2 + $0x151] sm:$0xff] }
 0x372   : > { %4666 = vmatprep.mubr.f32.mxu0 %v11138_v31 }
 0x374   : > { %4377 = vmatmul.mubr.f32.gmra.mxu1 %v11138_v31  ;;  %v11159_v31 = vld [vmem:[#allocation2 + $0xf7] sm:$0xff] }
 0x375   : > { %4667 = vmatmul.mubr.f32.gmra.mxu0 %v11142_v62  ;;  %6589 = vmatprep.mubr.msk.f32.mxu1 %vm10390_vm15, %v13196_v19  ;;  %13199 = vst [vmem:[#allocation23_spill] sm:$0xff] %v11159_v31  ;;  %v11170_v19 = vld [vmem:[#allocation2 + $0xff] sm:$0xff]  ;;  %vm13207_vm15 = vnez %v13094_v35 }
 0x376   : > { %4671 = vmatprep.mubr.f32.mxu0 %v11149_v58  ;;  %v11251_v35 = vld [vmem:[#allocation2 + $0x121] sm:$0xff] }
 0x378   : > { %4382 = vmatmul.mubr.f32.gmra.mxu1 %v11149_v58  ;;  %v11181_v58 = vld [vmem:[#allocation2 + $0x107] sm:$0xff] }
 0x379   : > { %4672 = vmatmul.mubr.f32.gmra.mxu0 %v11153_v60  ;;  %4386 = vmatprep.mubr.f32.mxu1 %v11155_v14  ;;  %v11174_v14 = vld [vmem:[#allocation2 + $0xe9] sm:$0xff] }
 0x37a   : > { %4676 = vmatprep.mubr.f32.mxu0 %v11159_v31 }
 0x37c   : > { %4387 = vmatmul.mubr.f32.gmra.mxu1 %v11159_v31  ;;  %v13201_v31 = vmax.f32 %v10548_v8, 0.0  ;;  %v13203_v8 = vmax.f32 %v10611_v59, 0.0  ;;  %v13205_v59 = vmax.f32 %v10660_v7, 0.0  ;;  %v13208_v7 = vmax.f32 %v10738_v53, 0.0 }
 0x37d   : > { %4677 = vmatmul.mubr.f32.gmra.mxu0 %v11163_v20  ;;  %6590 = vmatprep.mubr.msk.f32.mxu1 %vm10458_vm3, %v13200_v15  ;;  %v11192_v15 = vld [vmem:[#allocation2 + $0x10f] sm:$0xff]  ;;  %v13211_v53 = vmax.f32 %v10786_v3, 0.0  ;;  %vm13212_vm3 = vnez %v13103_v21  ;;  %v11284_v21 = vld [vmem:[#allocation2 + $0x139] sm:$0xff]  ;;  %v13215_v3 = vmax.f32 %v10832_v39, 0.0  ;;  %v13220_v39 = vmax.f32 %v10898_v16, 0.0 }
 0x37e   : > { %4681 = vmatprep.mubr.f32.mxu0 %v11170_v19  ;;  %v11328_v16 = vld [vmem:[#allocation2 + $0x159] sm:$0xff] }
 0x37f   : > { %13225 = vst [vmem:[#allocation96_spill] sm:$0xff] %v11328_v16 }
 0x380   : > { %4392 = vmatmul.mubr.f32.gmra.mxu1 %v11170_v19 }
 0x381   : > { %4682 = vmatmul.mubr.f32.gmra.mxu0 %v11174_v14  ;;  %6591 = vmatprep.mubr.msk.f32.mxu1 %vm10422_vm9, %v13201_v31  ;;  %v11203_v31 = vld [vmem:[#allocation2 + $0x117] sm:$0xff]  ;;  %vm13209_vm9 = vnez %v13091_v44  ;;  %v11262_v44 = vld [vmem:[#allocation2 + $0x129] sm:$0xff] }
 0x382   : > { %4686 = vmatprep.mubr.f32.mxu0 %v11181_v58 }
 0x384   : > { %4397 = vmatmul.mubr.f32.gmra.mxu1 %v11181_v58 }
 0x385   : > { %4687 = vmatmul.mubr.f32.gmra.mxu0 %v11185_v63  ;;  %6592 = vmatprep.mubr.msk.f32.mxu1 %vm10527_vm13, %v13202_v47  ;;  %v11214_v47 = vld [vmem:[#allocation2 + $0x11f] sm:$0xff]  ;;  %vm13221_vm13 = vnez %v13131_v27  ;;  %v13226_v27 = vmax.f32 %v10966_v23, 0.0  ;;  %v11350_v23 = vld [vmem:[#allocation2 + $0x169] sm:$0xff] }
 0x386   : > { %4691 = vmatprep.mubr.f32.mxu0 %v11192_v15  ;;  %13232 = vst [vmem:[#allocation27_spill] sm:$0xff] %v11350_v23 }
 0x388   : > { %4402 = vmatmul.mubr.f32.gmra.mxu1 %v11192_v15 }
 0x389   : > { %4692 = vmatmul.mubr.f32.gmra.mxu0 %v11196_v0  ;;  %6593 = vmatprep.mubr.msk.f32.mxu1 %vm10494_vm0, %v13203_v8  ;;  %v11225_v8 = vld [vmem:[#allocation2 + $0x127] sm:$0xff]  ;;  %vm13216_vm0 = vnez %v13122_v51 }
 0x38a   : > { %4696 = vmatprep.mubr.f32.mxu0 %v11203_v31  ;;  %v11306_v51 = vld [vmem:[#allocation2 + $0x149] sm:$0xff] }
 0x38c   : > { %4407 = vmatmul.mubr.f32.gmra.mxu1 %v11203_v31 }
 0x38d   : > { %4697 = vmatmul.mubr.f32.gmra.mxu0 %v11207_v32  ;;  %6594 = vmatprep.mubr.msk.f32.mxu1 %vm10591_vm14, %v13204_v54  ;;  %v11236_v54 = vld [vmem:[#allocation2 + $0x12f] sm:$0xff] }
 0x38e   : > { %4701 = vmatprep.mubr.f32.mxu0 %v11214_v47 }
 0x390   : > { %4412 = vmatmul.mubr.f32.gmra.mxu1 %v11214_v47 }
 0x391   : > { %4702 = vmatmul.mubr.f32.gmra.mxu0 %v11218_v48  ;;  %6595 = vmatprep.mubr.msk.f32.mxu1 %vm10563_vm10, %v13205_v59  ;;  %v11247_v59 = vld [vmem:[#allocation2 + $0x137] sm:$0xff]  ;;  %vm13227_vm10 = vnez %v13168_v42  ;;  %v11353_v42 = vld [vmem:[#allocation2 + $0x187] sm:$0xff] }
 0x392   : > { %4706 = vmatprep.mubr.f32.mxu0 %v11225_v8  ;;  %13233 = vst [vmem:[#allocation75_spill] sm:$0xff] %v11353_v42 }
 0x394   : > { %4417 = vmatmul.mubr.f32.gmra.mxu1 %v11225_v8 }
 0x395   : > { %4707 = vmatmul.mubr.f32.gmra.mxu0 %v11229_v37  ;;  %6596 = vmatprep.mubr.msk.f32.mxu1 %vm13207_vm15, %v13206_v33  ;;  %v11258_v33 = vld [vmem:[#allocation2 + $0x13f] sm:$0xff] }
 0x396   : > { %4711 = vmatprep.mubr.f32.mxu0 %v11236_v54 }
 0x398   : > { %4422 = vmatmul.mubr.f32.gmra.mxu1 %v11236_v54 }
 0x399   : > { %4712 = vmatmul.mubr.f32.gmra.mxu0 %v11240_v45  ;;  %6597 = vmatprep.mubr.msk.f32.mxu1 %vm13209_vm9, %v13208_v7  ;;  %v11269_v7 = vld [vmem:[#allocation2 + $0x147] sm:$0xff] }
 0x39a   : > { %4716 = vmatprep.mubr.f32.mxu0 %v11247_v59 }
 0x39c   : > { %4427 = vmatmul.mubr.f32.gmra.mxu1 %v11247_v59 }
 0x39d   : > { %4717 = vmatmul.mubr.f32.gmra.mxu0 %v11251_v35  ;;  %6598 = vmatprep.mubr.msk.f32.mxu1 %vm10727_vm2, %v13210_v41  ;;  %v11280_v41 = vld [vmem:[#allocation2 + $0x14f] sm:$0xff] }
 0x39e   : > { %4721 = vmatprep.mubr.f32.mxu0 %v11258_v33  ;;  %13214 = vst [vmem:[#allocation26_spill] sm:$0xff] %v11280_v41 }
 0x3a0   : > { %4432 = vmatmul.mubr.f32.gmra.mxu1 %v11258_v33 }
 0x3a1   : > { %4722 = vmatmul.mubr.f32.gmra.mxu0 %v11262_v44  ;;  %6599 = vmatprep.mubr.msk.f32.mxu1 %vm13212_vm3, %v13211_v53  ;;  %v11291_v53 = vld [vmem:[#allocation2 + $0x157] sm:$0xff] }
 0x3a2   : > { %4726 = vmatprep.mubr.f32.mxu0 %v11269_v7  ;;  %13217 = vst [vmem:[#allocation64_spill] sm:$0xff] %v11291_v53 }
 0x3a4   : > { %4437 = vmatmul.mubr.f32.gmra.mxu1 %v11269_v7 }
 0x3a5   : > { %4727 = vmatmul.mubr.f32.gmra.mxu0 %v11273_v36  ;;  %6600 = vmatprep.mubr.msk.f32.mxu1 %vm10793_vm4, %v13213_v1  ;;  %v11302_v1 = vld [vmem:[#allocation2 + $0x15f] sm:$0xff] }
 0x3a6   : > { %4731 = vmatprep.mubr.f32.mxu0 %v11280_v41  ;;  %13219 = vst [vmem:[#allocation72_spill] sm:$0xff] %v11302_v1 }
 0x3a8   : > { %4442 = vmatmul.mubr.f32.gmra.mxu1 %v11280_v41  ;;  %v11389_v41 = vld [vmem:[#allocation2 + $0x49] sm:$0xff] }
 0x3a9   : > { %4732 = vmatmul.mubr.f32.gmra.mxu0 %v11284_v21  ;;  %6601 = vmatprep.mubr.msk.f32.mxu1 %vm13216_vm0, %v13215_v3  ;;  %v11313_v3 = vld [vmem:[#allocation2 + $0x167] sm:$0xff]  ;;  %13242 = vst [vmem:[#allocation34_spill] sm:$0xff] %v11389_v41 }
 0x3aa   : > { %4736 = vmatprep.mubr.f32.mxu0 %v11291_v53  ;;  %13222 = vst [vmem:[#allocation67_spill] sm:$0xff] %v11313_v3 }
 0x3ac   : > { %4447 = vmatmul.mubr.f32.gmra.mxu1 %v11291_v53  ;;  %v1419_v53 = vld [vmem:[#allocation8 + $0x450] sm:$0xff] }
 0x3ad   : > { %4737 = vmatmul.mubr.f32.gmra.mxu0 %v11295_v11  ;;  %6602 = vmatprep.mubr.msk.f32.mxu1 %vm10945_vm5, %v13218_v61  ;;  %v11324_v61 = vld [vmem:[#allocation2 + $0x16f] sm:$0xff] }
 0x3ae   : > { %4741 = vmatprep.mubr.f32.mxu0 %v11302_v1  ;;  %13224 = vst [vmem:[#allocation105_spill] sm:$0xff] %v11324_v61 }
 0x3b0   : > { %4452 = vmatmul.mubr.f32.gmra.mxu1 %v11302_v1  ;;  %v11382_v1 = vld [vmem:[#allocation2 + $0x41] sm:$0xff] }
 0x3b1   : > { %4742 = vmatmul.mubr.f32.gmra.mxu0 %v11306_v51  ;;  %6603 = vmatprep.mubr.msk.f32.mxu1 %vm13221_vm13, %v13220_v39  ;;  %v11335_v39 = vld [vmem:[#allocation2 + $0x177] sm:$0xff]  ;;  %13240 = vst [vmem:[#allocation22_spill] sm:$0xff] %v11382_v1 }
 0x3b2   : > { %4746 = vmatprep.mubr.f32.mxu0 %v11313_v3  ;;  %13228 = vst [vmem:[#allocation74_spill] sm:$0xff] %v11335_v39 }
 0x3b4   : > { %4457 = vmatmul.mubr.f32.gmra.mxu1 %v11313_v3  ;;  %v6433_v3 = vld [vmem:[#allocation2 + $0x31] sm:$0xff] }
 0x3b5   : > { %4747 = vmatmul.mubr.f32.gmra.mxu0 %v11317_v50  ;;  %6604 = vmatprep.mubr.msk.f32.mxu1 %vm11002_vm12, %v13223_v5  ;;  %v11346_v5 = vld [vmem:[#allocation2 + $0x17f] sm:$0xff] }
 0x3b6   : > { %4751 = vmatprep.mubr.f32.mxu0 %v11324_v61  ;;  %13231 = vst [vmem:[#allocation25_spill] sm:$0xff] %v11346_v5 }
 0x3b8   : > { %4462 = vmatmul.mubr.f32.gmra.mxu1 %v11324_v61  ;;  %v11363_v61 = vld [vmem:[#allocation2 + $0x179] sm:$0xff] }
 0x3b9   : > { %4752 = vmatmul.mubr.f32.gmra.mxu0 %v11328_v16  ;;  %6605 = vmatprep.mubr.msk.f32.mxu1 %vm13227_vm10, %v13226_v27  ;;  %v6429_v27 = vld [vmem:[#allocation2 + $0x21] sm:$0xff]  ;;  %13236 = vst [vmem:[#allocation106_spill] sm:$0xff] %v11363_v61 }
 0x3ba   : > { %4756 = vmatprep.mubr.f32.mxu0 %v11335_v39 }
 0x3bc   : > { %4467 = vmatmul.mubr.f32.gmra.mxu1 %v11335_v39  ;;  %v11359_v39 = vld [vmem:[#allocation2 + $0x18f] sm:$0xff] }
 0x3bd   : > { %4757 = vmatmul.mubr.f32.gmra.mxu0 %v11339_v4  ;;  %6606 = vmatprep.mubr.msk.f32.mxu1 %vm11058_vm1, %v13230_v34  ;;  %v1423_v34 = vld [vmem:[#allocation8 + $0x470] sm:$0xff]  ;;  %13235 = vst [vmem:[#allocation33_spill] sm:$0xff] %v11359_v39 }
 0x3be   : > { %4761 = vmatprep.mubr.f32.mxu0 %v11346_v5 }
 0x3c0   : > { %4472 = vmatmul.mubr.f32.gmra.mxu1 %v11346_v5  ;;  %v6431_v5 = vld [vmem:[#allocation2 + $0x29] sm:$0xff] }
 0x3c1   : > { %4762 = vmatmul.mubr.f32.gmra.mxu0 %v11350_v23  ;;  %4846 = vmatprep.mubr.f32.mxu1 %v6429_v27  ;;  %v6432_v27 = vld [vmem:[#allocation2 + $0x28] sm:$0xff]  ;;  %v6437_v23 = vld [vmem:[#allocation2 + $0x37] sm:$0xff] }
 0x3c2   : > { %4766 = vmatprep.mubr.f32.mxu0 %v11353_v42  ;;  %v1422_v42 = vld [vmem:[#allocation8 + $0x468] sm:$0xff] }
 0x3c4   : > { %4847 = vmatmul.mubr.f32.vlgmr.msra.gmra.mxu1 %v6430_v13  ;;  %v11366_v13 = vld [vmem:[#allocation2 + $0x197] sm:$0xff] }
 0x3c5   : > { %4767 = vmatmul.mubr.f32.gmra.mxu0 %v11356_v22  ;;  %4851 = vmatprep.mubr.f32.mxu1 %v6431_v5  ;;  %13237 = vst [vmem:[#allocation78_spill] sm:$0xff] %v11366_v13  ;;  %v11369_v5 = vld [vmem:[#allocation2 + $0x181] sm:$0xff]  ;;  %v4543_v22 = vpop.f32.mrf.mxu0 }
 0x3c6   : > { %4771 = vmatprep.mubr.f32.mxu0 %v11359_v39  ;;  %6146 = vmatpush3.msra.mxu1 %v10890_v6  ;;  %13238 = vst [vmem:[#allocation42_spill] sm:$0xff] %v11369_v5  ;;  %v6434_v39 = vld [vmem:[#allocation2 + $0x30] sm:$0xff]  ;;  %v1421_v6 = vld [vmem:[#allocation8 + $0x460] sm:$0xff] }
 0x3c7   : > { %6147 = vmatprep.subr.mxu1 %v1423_v34 }
 0x3c8   : > { %4852 = vmatmul.mubr.f32.gmra.mxu1 %v6432_v27  ;;  %v11374_v27 = vld [vmem:[%s11997_s4] ss:$0 sm:$0xff] }
 0x3c9   : > { %4772 = vmatmul.mubr.f32.gmra.mxu0 %v11363_v61  ;;  %4856 = vmatprep.mubr.f32.mxu1 %v6433_v3  ;;  %v11377_v61 = vld [vmem:[#allocation2 + $0x39] sm:$0xff] }
 0x3ca   : > { %4776 = vmatprep.mubr.f32.mxu0 %v11366_v13  ;;  %6148 = vmatpush3.msra.mxu1 %v1423_v34  ;;  %13239 = vst [vmem:[#allocation31_spill] sm:$0xff] %v11377_v61  ;;  %v6436_v3 = vld [vmem:[#allocation2 + $0x38] sm:$0xff]  ;;  %v4239_v34 = vadd.f32 %v11374_v27, %v10718_v25  ;;  %v4244_v25 = vadd.f32 %v11374_v27, %v10806_v12 }
 0x3cb   : > { %6149 = vmatprep.subr.mxu1 %v1422_v42  ;;  %v1420_v13 = vld [vmem:[#allocation8 + $0x458] sm:$0xff]  ;;  %v4249_v12 = vadd.f32 %v11374_v27, %v10874_v57 }
 0x3cc   : > { %4857 = vmatmul.mubr.f32.gmra.mxu1 %v6434_v39  ;;  %v4253_v39 = vpop.f32.mrf.mxu1 }
 0x3cd   : > { %4777 = vmatmul.mubr.f32.gmra.mxu0 %v11369_v5  ;;  %4861 = vmatprep.mubr.f32.mxu1 %v11377_v61  ;;  %v11385_v5 = vadd.f32 %v4543_v22, %v4239_v34  ;;  %v6439_v61 = vld [vmem:[#allocation2 + $0x40] sm:$0xff]  ;;  %v6442_v34 = vld [vmem:[#allocation2 + $0x48] sm:$0xff]  ;;  %v4254_v57 = vadd.f32 %v11374_v27, %v4253_v39 }
 0x3ce   : > { %5151 = vmatprep.mubr.f32.mxu0 %v6436_v3  ;;  %6150 = vmatpush3.msra.mxu1 %v1422_v42  ;;  %v4255_v4 = vpop.f32.mrf.mxu1  ;;  %v4545_v42 = vpop.f32.mrf.mxu0 }
 0x3cf   : > { %6151 = vmatprep.subr.mxu1 %v1421_v6  ;;  %13241 = vst [vmem:[#allocation79_spill] sm:$0xff] %v11385_v5  ;;  %v1418_v42 = vld [vmem:[#allocation8 + $0x448] sm:$0xff] }
 0x3d0   : > { %4862 = vmatmul.mubr.f32.gmra.mxu1 %v6436_v3  ;;  %v4258_v3 = vpop.f32.mrf.mxu1  ;;  %v4548_v16 = vpop.f32.mrf.mxu0 }
 0x3d1   : > { %5152 = vmatmul.mubr.f32.vlgmr.msra.gmra.mxu0 %v6437_v23  ;;  %4866 = vmatprep.mubr.f32.mxu1 %v11382_v1  ;;  %v6440_v23 = vld [vmem:[#allocation2 + $0x3f] sm:$0xff]  ;;  %v11392_v22 = vadd.f32 %v4548_v16, %v4244_v25  ;;  %v11396_v1 = vld [vmem:[#allocation2 + $0x51] sm:$0xff]  ;;  %v4259_v39 = vadd.f32 %v11374_v27, %v4258_v3 }
 0x3d2   : > { %5156 = vmatprep.mubr.f32.mxu0 %v6439_v61  ;;  %6152 = vmatpush3.msra.mxu1 %v1421_v6  ;;  %v4260_v4 = vpop.f32.mrf.mxu1  ;;  %v4550_v6 = vpop.f32.mrf.mxu0  ;;  %13244 = vst [vmem:[#allocation29_spill] sm:$0xff] %v11396_v1  ;;  %v6445_v25 = vld [vmem:[#allocation2 + $0x50] sm:$0xff] }
 0x3d3   : > { %6153 = vmatprep.subr.mxu1 %v1420_v13  ;;  %13243 = vst [vmem:[#allocation39_spill] sm:$0xff] %v11392_v22 }
 0x3d4   : > { %4867 = vmatmul.mubr.f32.gmra.mxu1 %v6439_v61  ;;  %v4263_v61 = vpop.f32.mrf.mxu1  ;;  %v4553_v5 = vpop.f32.mrf.mxu0 }
 0x3d5   : > { %5157 = vmatmul.mubr.f32.gmra.mxu0 %v6440_v23  ;;  %4871 = vmatprep.mubr.f32.mxu1 %v11389_v41  ;;  %v6443_v23 = vld [vmem:[#allocation2 + $0x47] sm:$0xff]  ;;  %v11399_v16 = vadd.f32 %v4553_v5, %v4249_v12  ;;  %v6446_v41 = vld [vmem:[#allocation2 + $0x4f] sm:$0xff]  ;;  %v6448_v12 = vld [vmem:[#allocation2 + $0x58] sm:$0xff]  ;;  %v4264_v3 = vadd.f32 %v11374_v27, %v4263_v61 }
 0x3d6   : > { %5161 = vmatprep.mubr.f32.mxu0 %v6442_v34  ;;  %6154 = vmatpush3.msra.mxu1 %v1420_v13  ;;  %v4265_v13 = vpop.f32.mrf.mxu1  ;;  %v4555_v4 = vpop.f32.mrf.mxu0 }
 0x3d7   : > { %6155 = vmatprep.subr.mxu1 %v1419_v53  ;;  %13245 = vst [vmem:[#allocation70_spill] sm:$0xff] %v11399_v16 }
 0x3d8   : > { %4872 = vmatmul.mubr.f32.gmra.mxu1 %v6442_v34  ;;  %v4268_v6 = vpop.f32.mrf.mxu1  ;;  %v1417_v34 = vld [vmem:[#allocation8 + $0x440] sm:$0xff]  ;;  %v4558_v22 = vpop.f32.mrf.mxu0 }
 0x3d9   : > { %5162 = vmatmul.mubr.f32.gmra.mxu0 %v6443_v23  ;;  %4876 = vmatprep.mubr.f32.mxu1 %v11396_v1  ;;  %v11402_v23 = vld [vmem:[#allocation2 + $0x59] sm:$0xff]  ;;  %v11405_v5 = vadd.f32 %v4558_v22, %v4254_v57  ;;  %v4269_v61 = vadd.f32 %v11374_v27, %v4268_v6 }
 0x3da   : > { %5166 = vmatprep.mubr.f32.mxu0 %v6445_v25  ;;  %6156 = vmatpush3.msra.mxu1 %v1419_v53  ;;  %13246 = vst [vmem:[#allocation37_spill] sm:$0xff] %v11402_v23  ;;  %v4270_v13 = vpop.f32.mrf.mxu1  ;;  %v4560_v53 = vpop.f32.mrf.mxu0  ;;  %v6449_v1 = vld [vmem:[#allocation2 + $0x57] sm:$0xff]  ;;  %v6451_v57 = vld [vmem:[#allocation2 + $0x60] sm:$0xff] }
 0x3db   : > { %6157 = vmatprep.subr.mxu1 %v1418_v42  ;;  %13247 = vst [vmem:[#allocation41_spill] sm:$0xff] %v11405_v5  ;;  %v1413_v6 = vld [vmem:[#allocation8 + $0x420] sm:$0xff] }
 0x3dc   : > { %4877 = vmatmul.mubr.f32.gmra.mxu1 %v6445_v25  ;;  %v4273_v4 = vpop.f32.mrf.mxu1  ;;  %v1416_v25 = vld [vmem:[#allocation8 + $0x438] sm:$0xff]  ;;  %v4563_v16 = vpop.f32.mrf.mxu0 }
 0x3dd   : > { %5167 = vmatmul.mubr.f32.gmra.mxu0 %v6446_v41  ;;  %4881 = vmatprep.mubr.f32.mxu1 %v11402_v23  ;;  %v11408_v41 = vld [vmem:[#allocation2 + $0x61] sm:$0xff]  ;;  %v11411_v22 = vadd.f32 %v4563_v16, %v4259_v39 }
 0x3de   : > { %5171 = vmatprep.mubr.f32.mxu0 %v6448_v12  ;;  %6158 = vmatpush3.msra.mxu1 %v1418_v42  ;;  %13248 = vst [vmem:[#allocation36_spill] sm:$0xff] %v11408_v41  ;;  %v4275_v13 = vpop.f32.mrf.mxu1  ;;  %v4565_v42 = vpop.f32.mrf.mxu0  ;;  %v6452_v23 = vld [vmem:[#allocation2 + $0x5f] sm:$0xff]  ;;  %v6454_v39 = vld [vmem:[#allocation2 + $0x68] sm:$0xff] }
 0x3df   : > { %6159 = vmatprep.subr.mxu1 %v1417_v34  ;;  %13249 = vst [vmem:[#allocation83_spill] sm:$0xff] %v11411_v22 }
 0x3e0   : > { %4882 = vmatmul.mubr.f32.gmra.mxu1 %v6448_v12  ;;  %v4278_v53 = vpop.f32.mrf.mxu1  ;;  %v1415_v12 = vld [vmem:[#allocation8 + $0x430] sm:$0xff]  ;;  %v4568_v5 = vpop.f32.mrf.mxu0 }
 0x3e1   : > { %5172 = vmatmul.mubr.f32.gmra.mxu0 %v6449_v1  ;;  %4886 = vmatprep.mubr.f32.mxu1 %v11408_v41  ;;  %v11414_v1 = vld [vmem:[#allocation2 + $0x69] sm:$0xff]  ;;  %v11417_v16 = vadd.f32 %v4568_v5, %v4264_v3 }
 0x3e2   : > { %5176 = vmatprep.mubr.f32.mxu0 %v6451_v57  ;;  %6160 = vmatpush3.msra.mxu1 %v1417_v34  ;;  %v4280_v13 = vpop.f32.mrf.mxu1  ;;  %v4570_v34 = vpop.f32.mrf.mxu0  ;;  %v6455_v41 = vld [vmem:[#allocation2 + $0x67] sm:$0xff]  ;;  %v6456_v5 = vld [vmem:[#allocation2 + $0x70] sm:$0xff] }
 0x3e3   : > { %6161 = vmatprep.subr.mxu1 %v1416_v25  ;;  %13250 = vst [vmem:[#allocation73_spill] sm:$0xff] %v11417_v16  ;;  %v6457_v16 = vld [vmem:[#allocation2 + $0x6f] sm:$0xff] }
 0x3e4   : > { %4887 = vmatmul.mubr.f32.gmra.mxu1 %v6451_v57  ;;  %v4283_v42 = vpop.f32.mrf.mxu1  ;;  %v1414_v57 = vld [vmem:[#allocation8 + $0x428] sm:$0xff]  ;;  %v4573_v22 = vpop.f32.mrf.mxu0 }
 0x3e5   : > { %5177 = vmatmul.mubr.f32.gmra.mxu0 %v6452_v23  ;;  %4891 = vmatprep.mubr.f32.mxu1 %v11414_v1  ;;  %v11421_v23 = vadd.f32 %v4573_v22, %v4269_v61 }
 0x3e6   : > { %5181 = vmatprep.mubr.f32.mxu0 %v6454_v39  ;;  %6162 = vmatpush3.msra.mxu1 %v1416_v25  ;;  %v4285_v3 = vpop.f32.mrf.mxu1  ;;  %v4575_v13 = vpop.f32.mrf.mxu0  ;;  %v4274_v25 = vadd.f32 %v11374_v27, %v4273_v4  ;;  %v1412_v4 = vld [vmem:[#allocation8 + $0x418] sm:$0xff] }
 0x3e7   : > { %6163 = vmatprep.subr.mxu1 %v1415_v12  ;;  %v6459_v13 = vld [vmem:[#allocation2 + $0x77] sm:$0xff] }
 0x3e8   : > { %4892 = vmatmul.mubr.f32.gmra.mxu1 %v6454_v39  ;;  %v4288_v34 = vpop.f32.mrf.mxu1  ;;  %v4578_v39 = vpop.f32.mrf.mxu0 }
 0x3e9   : > { %5182 = vmatmul.mubr.f32.gmra.mxu0 %v6455_v41  ;;  %4896 = vmatprep.mubr.f32.mxu1 %v10720_v17  ;;  %v11425_v41 = vadd.f32 %v4578_v39, %v4274_v25  ;;  %v6458_v17 = vld [vmem:[#allocation2 + $0x78] sm:$0xff] }
 0x3ea   : > { %5186 = vmatprep.mubr.f32.mxu0 %v6456_v5  ;;  %6164 = vmatpush3.msra.mxu1 %v1415_v12  ;;  %v4290_v22 = vpop.f32.mrf.mxu1  ;;  %v4580_v61 = vpop.f32.mrf.mxu0  ;;  %v4279_v12 = vadd.f32 %v11374_v27, %v4278_v53  ;;  %v1411_v53 = vld [vmem:[#allocation8 + $0x410] sm:$0xff] }
 0x3eb   : > { %6165 = vmatprep.subr.mxu1 %v1414_v57  ;;  %v6461_v61 = vld [vmem:[#allocation2 + $0x7f] sm:$0xff] }
 0x3ec   : > { %4897 = vmatmul.mubr.f32.gmra.mxu1 %v6456_v5  ;;  %v4293_v3 = vpop.f32.mrf.mxu1  ;;  %v4583_v5 = vpop.f32.mrf.mxu0 }
 0x3ed   : > { %5187 = vmatmul.mubr.f32.gmra.mxu0 %v6457_v16  ;;  %4901 = vmatprep.mubr.f32.mxu1 %v10769_v2  ;;  %v11429_v16 = vadd.f32 %v4583_v5, %v4279_v12  ;;  %v6460_v2 = vld [vmem:[#allocation2 + $0x80] sm:$0xff] }
 0x3ee   : > { %5191 = vmatprep.mubr.f32.mxu0 %v6458_v17  ;;  %6166 = vmatpush3.msra.mxu1 %v1414_v57  ;;  %v4295_v25 = vpop.f32.mrf.mxu1  ;;  %v4585_v39 = vpop.f32.mrf.mxu0  ;;  %v4284_v57 = vadd.f32 %v11374_v27, %v4283_v42  ;;  %v1410_v42 = vld [vmem:[#allocation8 + $0x408] sm:$0xff] }
 0x3ef   : > { %6167 = vmatprep.subr.mxu1 %v1413_v6  ;;  %13251 = vst [vmem:[#allocation43_spill] sm:$0xff] %v11429_v16  ;;  %v6463_v39 = vld [vmem:[#allocation2 + $0x87] sm:$0xff] }
 0x3f0   : > { %4902 = vmatmul.mubr.f32.gmra.mxu1 %v6458_v17  ;;  %v4298_v22 = vpop.f32.mrf.mxu1  ;;  %v4588_v17 = vpop.f32.mrf.mxu0  ;;  %v13253_v16 = vld [vmem:[#allocation82_spill] sm:$0xff] }
 0x3f1   : > { %5192 = vmatmul.mubr.f32.gmra.mxu0 %v6459_v13  ;;  %4906 = vmatprep.mubr.f32.mxu1 %v10819_v49  ;;  %v11433_v13 = vadd.f32 %v4588_v17, %v4284_v57  ;;  %v6462_v49 = vld [vmem:[#allocation2 + $0x88] sm:$0xff] }
 0x3f2   : > { %5196 = vmatprep.mubr.f32.mxu0 %v6460_v2  ;;  %6168 = vmatpush3.msra.mxu1 %v1413_v6  ;;  %v4300_v12 = vpop.f32.mrf.mxu1  ;;  %v4590_v5 = vpop.f32.mrf.mxu0  ;;  %v4289_v6 = vadd.f32 %v11374_v27, %v4288_v34  ;;  %v1409_v34 = vld [vmem:[#allocation8 + $0x400] sm:$0xff] }
 0x3f3   : > { %6169 = vmatprep.subr.mxu1 %v1412_v4  ;;  %13252 = vst [vmem:[#allocation40_spill] sm:$0xff] %v11433_v13  ;;  %v6465_v5 = vld [vmem:[#allocation2 + $0x8f] sm:$0xff]  ;;  %v13254_v13 = vld [vmem:[#allocation69_spill] sm:$0xff] }
 0x3f4   : > { %4907 = vmatmul.mubr.f32.gmra.mxu1 %v6460_v2  ;;  %v4303_v25 = vpop.f32.mrf.mxu1  ;;  %v4593_v2 = vpop.f32.mrf.mxu0 }
 0x3f5   : > { %5197 = vmatmul.mubr.f32.gmra.mxu0 %v6461_v61  ;;  %4911 = vmatprep.mubr.f32.mxu1 %v10877_v10  ;;  %v11437_v61 = vadd.f32 %v4593_v2, %v4289_v6  ;;  %v6464_v10 = vld [vmem:[#allocation2 + $0x90] sm:$0xff] }
 0x3f6   : > { %5201 = vmatprep.mubr.f32.mxu0 %v6462_v49  ;;  %6170 = vmatpush3.msra.mxu1 %v1412_v4  ;;  %v4305_v57 = vpop.f32.mrf.mxu1  ;;  %v4595_v17 = vpop.f32.mrf.mxu0  ;;  %v4294_v4 = vadd.f32 %v11374_v27, %v4293_v3 }
 0x3f7   : > { %6171 = vmatprep.subr.mxu1 %v1411_v53 }
 0x3f8   : > { %4912 = vmatmul.mubr.f32.gmra.mxu1 %v6462_v49  ;;  %v4308_v12 = vpop.f32.mrf.mxu1  ;;  %v4598_v49 = vpop.f32.mrf.mxu0 }
 0x3f9   : > { %5202 = vmatmul.mubr.f32.gmra.mxu0 %v6463_v39  ;;  %4916 = vmatprep.mubr.f32.mxu1 %v13253_v16  ;;  %v11441_v39 = vadd.f32 %v4598_v49, %v4294_v4  ;;  %v6466_v16 = vld [vmem:[#allocation2 + $0x98] sm:$0xff] }
 0x3fa   : > { %5206 = vmatprep.mubr.f32.mxu0 %v6464_v10  ;;  %6172 = vmatpush3.msra.mxu1 %v1411_v53  ;;  %v4310_v6 = vpop.f32.mrf.mxu1  ;;  %v4600_v2 = vpop.f32.mrf.mxu0  ;;  %v4299_v53 = vadd.f32 %v11374_v27, %v4298_v22  ;;  %v13255_v22 = vld [vmem:[#allocation47_spill] sm:$0xff] }
 0x3fb   : > { %6173 = vmatprep.subr.mxu1 %v1410_v42  ;;  %v13256_v2 = vld [vmem:[#allocation55_spill] sm:$0xff] }
 0x3fc   : > { %4917 = vmatmul.mubr.f32.gmra.mxu1 %v6464_v10  ;;  %v4313_v57 = vpop.f32.mrf.mxu1  ;;  %v4603_v3 = vpop.f32.mrf.mxu0  ;;  %v6467_v10 = vld [vmem:[#allocation2 + $0x97] sm:$0xff] }
 0x3fd   : > { %5207 = vmatmul.mubr.f32.gmra.mxu0 %v6465_v5  ;;  %4921 = vmatprep.mubr.f32.mxu1 %v13254_v13  ;;  %v11445_v17 = vadd.f32 %v4603_v3, %v4299_v53  ;;  %v6468_v13 = vld [vmem:[#allocation2 + $0xa0] sm:$0xff]  ;;  %v4309_v3 = vadd.f32 %v11374_v27, %v4308_v12 }
 0x3fe   : > { %5211 = vmatprep.mubr.f32.mxu0 %v6466_v16  ;;  %6174 = vmatpush3.msra.mxu1 %v1410_v42  ;;  %v4315_v4 = vpop.f32.mrf.mxu1  ;;  %v4605_v49 = vpop.f32.mrf.mxu0  ;;  %v4304_v42 = vadd.f32 %v11374_v27, %v4303_v25  ;;  %v13257_v25 = vld [vmem:[#allocation62_spill] sm:$0xff] }
 0x3ff   : > { %6175 = vmatprep.subr.mxu1 %v1409_v34  ;;  %v13258_v4 = vld [vmem:[#allocation58_spill] sm:$0xff] }
 0x400   : > { %4922 = vmatmul.mubr.f32.gmra.mxu1 %v6466_v16  ;;  %v4608_v6 = vpop.f32.mrf.mxu0 }
 0x401   : > { %5212 = vmatmul.mubr.f32.gmra.mxu0 %v6467_v10  ;;  %4926 = vmatprep.mubr.f32.mxu1 %v11063_v24  ;;  %v4318_v5 = vpop.f32.mrf.mxu1  ;;  %v11450_v16 = vadd.f32 %v4608_v6, %v4304_v42  ;;  %v4314_v42 = vadd.f32 %v11374_v27, %v4313_v57 }
 0x402   : > { %5216 = vmatprep.mubr.f32.mxu0 %v6468_v13  ;;  %6176 = vmatpush3.msra.mxu1 %v1409_v34  ;;  %v4610_v53 = vpop.f32.mrf.mxu0 }
 0x403   : > { %v4320_v24 = vpop.f32.mrf.mxu1 }
 0x404   : > { %4927 = vmatmul.mubr.f32.gmra.mxu1 %v6468_v13  ;;  %v13260_v24 = vld [vmem:[#allocation66_spill] sm:$0xff] }
 0x405   : > { %5217 = vmatmul.mubr.f32.gmra.mxu0 %v13255_v22  ;;  %4931 = vmatprep.mubr.f32.mxu1 %v11090_v9  ;;  %v13259_v22 = vld [vmem:[#allocation77_spill] sm:$0xff] }
 0x406   : > { %5221 = vmatprep.mubr.f32.mxu0 %v13256_v2  ;;  %v4613_v34 = vpop.f32.mrf.mxu0 }
 0x407   : > { %v4323_v10 = vpop.f32.mrf.mxu1  ;;  %v11457_v13 = vadd.f32 %v4613_v34, %v4309_v3  ;;  %v4319_v3 = vadd.f32 %v11374_v27, %v4318_v5 }
 0x408   : > { %4932 = vmatmul.mubr.f32.gmra.mxu1 %v13256_v2  ;;  %v4615_v49 = vpop.f32.mrf.mxu0 }
 0x409   : > { %5222 = vmatmul.mubr.f32.gmra.mxu0 %v13257_v25  ;;  %4936 = vmatprep.mubr.f32.mxu1 %v11102_v30  ;;  %v4325_v9 = vpop.f32.mrf.mxu1 }
 0x40a   : > { %5226 = vmatprep.mubr.f32.mxu0 %v13258_v4  ;;  %v4324_v9 = vadd.f32 %v11374_v27, %v4323_v10 }
 0x40c   : > { %v4328_v6 = vpop.f32.mrf.mxu1  ;;  %4937 = vmatmul.mubr.f32.gmra.mxu1 %v13258_v4  ;;  %v4618_v12 = vpop.f32.mrf.mxu0 }
 0x40d   : > { %5227 = vmatmul.mubr.f32.gmra.mxu0 %v13259_v22  ;;  %4941 = vmatprep.mubr.f32.mxu1 %v11112_v38  ;;  %v11464_v2 = vadd.f32 %v4618_v12, %v4314_v42  ;;  %v4329_v12 = vadd.f32 %v11374_v27, %v4328_v6 }
 0x40e   : > { %5231 = vmatprep.mubr.f32.mxu0 %v13260_v24  ;;  %v4330_v30 = vpop.f32.mrf.mxu1  ;;  %v4620_v53 = vpop.f32.mrf.mxu0 }
 0x410   : > { %v4333_v34 = vpop.f32.mrf.mxu1  ;;  %4942 = vmatmul.mubr.f32.gmra.mxu1 %v13260_v24 }
 0x411   : > { %v4623_v57 = vpop.f32.mrf.mxu0  ;;  %5232 = vmatmul.mubr.f32.gmra.mxu0 %v11031_v46  ;;  %4946 = vmatprep.mubr.f32.mxu1 %v11122_v43  ;;  %v4334_v24 = vadd.f32 %v11374_v27, %v4333_v34 }
 0x412   : > { %v11471_v25 = vadd.f32 %v4623_v57, %v4319_v3  ;;  %5236 = vmatprep.mubr.f32.mxu0 %v11065_v26  ;;  %v4335_v38 = vpop.f32.mrf.mxu1  ;;  %v13261_v57 = vld [vmem:[#allocation88_spill] sm:$0xff] }
 0x413   : > { %v4625_v4 = vpop.f32.mrf.mxu0 }
 0x414   : > { %v4338_v49 = vpop.f32.mrf.mxu1  ;;  %4947 = vmatmul.mubr.f32.gmra.mxu1 %v11065_v26 }
 0x415   : > { %v4628_v5 = vpop.f32.mrf.mxu0  ;;  %5237 = vmatmul.mubr.f32.gmra.mxu0 %v11076_v18  ;;  %4951 = vmatprep.mubr.f32.mxu1 %v11132_v52  ;;  %v4339_v53 = vadd.f32 %v11374_v27, %v4338_v49 }
 0x416   : > { %v11478_v42 = vadd.f32 %v4628_v5, %v4324_v9  ;;  %5241 = vmatprep.mubr.f32.mxu0 %v11092_v55  ;;  %v4340_v46 = vpop.f32.mrf.mxu1  ;;  %v13263_v5 = vld [vmem:[#allocation71_spill] sm:$0xff] }
 0x417   : > { %v4630_v43 = vpop.f32.mrf.mxu0  ;;  %v13264_v46 = vld [vmem:[#allocation61_spill] sm:$0xff] }
 0x418   : > { %v4343_v22 = vpop.f32.mrf.mxu1  ;;  %4952 = vmatmul.mubr.f32.gmra.mxu1 %v11092_v55 }
 0x419   : > { %v4633_v10 = vpop.f32.mrf.mxu0  ;;  %5242 = vmatmul.mubr.f32.gmra.mxu0 %v11098_v28  ;;  %4956 = vmatprep.mubr.f32.mxu1 %v11142_v62  ;;  %v4344_v4 = vadd.f32 %v11374_v27, %v4343_v22 }
 0x41a   : > { %v11485_v26 = vadd.f32 %v4633_v10, %v4329_v12  ;;  %5246 = vmatprep.mubr.f32.mxu0 %v11104_v56  ;;  %v4345_v18 = vpop.f32.mrf.mxu1 }
 0x41b   : > { %v4635_v52 = vpop.f32.mrf.mxu0  ;;  %v13265_v18 = vld [vmem:[#allocation17_spill] sm:$0xff] }
 0x41c   : > { %v4348_v30 = vpop.f32.mrf.mxu1  ;;  %4957 = vmatmul.mubr.f32.gmra.mxu1 %v11104_v56 }
 0x41d   : > { %v4638_v6 = vpop.f32.mrf.mxu0  ;;  %5247 = vmatmul.mubr.f32.gmra.mxu0 %v11108_v40  ;;  %4961 = vmatprep.mubr.f32.mxu1 %v11153_v60  ;;  %v13262_v40 = vld [vmem:[#allocation80_spill] sm:$0xff]  ;;  %v4349_v12 = vadd.f32 %v11374_v27, %v4348_v30 }
 0x41e   : > { %v11492_v55 = vadd.f32 %v4638_v6, %v4334_v24  ;;  %5251 = vmatprep.mubr.f32.mxu0 %v11114_v29  ;;  %v4350_v62 = vpop.f32.mrf.mxu1  ;;  %v6469_v24 = vld [vmem:[#allocation2 + $0xf0] sm:$0xff]  ;;  %v13266_v30 = vld [vmem:[#allocation68_spill] sm:$0xff] }
 0x41f   : > { %v4640_v28 = vpop.f32.mrf.mxu0 }
 0x420   : > { %v4353_v3 = vpop.f32.mrf.mxu1  ;;  %4962 = vmatmul.mubr.f32.gmra.mxu1 %v11114_v29 }
 0x421   : > { %v4643_v34 = vpop.f32.mrf.mxu0  ;;  %5252 = vmatmul.mubr.f32.gmra.mxu0 %v13261_v57  ;;  %4966 = vmatprep.mubr.f32.mxu1 %v11163_v20  ;;  %v4354_v62 = vadd.f32 %v11374_v27, %v4353_v3  ;;  %v13267_v57 = vld [vmem:[#allocation30_spill] sm:$0xff]  ;;  %v13268_v3 = vld [vmem:[#allocation23_spill] sm:$0xff] }
 0x422   : > { %v11499_v56 = vadd.f32 %v4643_v34, %v4339_v53  ;;  %5256 = vmatprep.mubr.f32.mxu0 %v13262_v40  ;;  %v4355_v60 = vpop.f32.mrf.mxu1 }
 0x423   : > { %v4645_v38 = vpop.f32.mrf.mxu0 }
 0x424   : > { %v4358_v9 = vpop.f32.mrf.mxu1  ;;  %4967 = vmatmul.mubr.f32.gmra.mxu1 %v13262_v40 }
 0x425   : > { %v4648_v49 = vpop.f32.mrf.mxu0  ;;  %5257 = vmatmul.mubr.f32.gmra.mxu0 %v13263_v5  ;;  %4971 = vmatprep.mubr.f32.mxu1 %v11174_v14  ;;  %v4359_v60 = vadd.f32 %v11374_v27, %v4358_v9  ;;  %v6470_v5 = vld [vmem:[#allocation2 + $0x100] sm:$0xff] }
 0x426   : > { %v11506_v29 = vadd.f32 %v4648_v49, %v4344_v4  ;;  %5261 = vmatprep.mubr.f32.mxu0 %v13264_v46  ;;  %v4360_v20 = vpop.f32.mrf.mxu1 }
 0x427   : > { %v4650_v43 = vpop.f32.mrf.mxu0 }
 0x428   : > { %v4363_v10 = vpop.f32.mrf.mxu1  ;;  %4972 = vmatmul.mubr.f32.gmra.mxu1 %v13264_v46 }
 0x429   : > { %v4653_v22 = vpop.f32.mrf.mxu0  ;;  %5262 = vmatmul.mubr.f32.gmra.mxu0 %v13265_v18  ;;  %4976 = vmatprep.mubr.f32.mxu1 %v11185_v63  ;;  %v4364_v20 = vadd.f32 %v11374_v27, %v4363_v10 }
 0x42a   : > { %v11513_v52 = vadd.f32 %v4653_v22, %v4349_v12  ;;  %5266 = vmatprep.mubr.f32.mxu0 %v6469_v24  ;;  %v4365_v14 = vpop.f32.mrf.mxu1  ;;  %v6471_v22 = vld [vmem:[#allocation2 + $0x108] sm:$0xff] }
 0x42b   : > { %v4655_v6 = vpop.f32.mrf.mxu0 }
 0x42c   : > { %v4368_v28 = vpop.f32.mrf.mxu1  ;;  %4977 = vmatmul.mubr.f32.gmra.mxu1 %v6469_v24 }
 0x42d   : > { %v4658_v53 = vpop.f32.mrf.mxu0  ;;  %5267 = vmatmul.mubr.f32.gmra.mxu0 %v13266_v30  ;;  %4981 = vmatprep.mubr.f32.mxu1 %v11196_v0  ;;  %v4369_v24 = vadd.f32 %v11374_v27, %v4368_v28 }
 0x42e   : > { %v11518_v34 = vadd.f32 %v4658_v53, %v4354_v62  ;;  %5271 = vmatprep.mubr.f32.mxu0 %v13267_v57  ;;  %v4370_v63 = vpop.f32.mrf.mxu1 }
 0x42f   : > { %v4660_v40 = vpop.f32.mrf.mxu0 }
 0x430   : > { %v4373_v38 = vpop.f32.mrf.mxu1  ;;  %4982 = vmatmul.mubr.f32.gmra.mxu1 %v13267_v57 }
 0x431   : > { %v4663_v4 = vpop.f32.mrf.mxu0  ;;  %5272 = vmatmul.mubr.f32.gmra.mxu0 %v13268_v3  ;;  %4986 = vmatprep.mubr.f32.mxu1 %v11207_v32  ;;  %v4374_v53 = vadd.f32 %v11374_v27, %v4373_v38 }
 0x432   : > { %v11525_v49 = vadd.f32 %v4663_v4, %v4359_v60  ;;  %5276 = vmatprep.mubr.f32.mxu0 %v6470_v5  ;;  %v4375_v0 = vpop.f32.mrf.mxu1 }
 0x433   : > { %v4665_v46 = vpop.f32.mrf.mxu0 }
 0x434   : > { %v4378_v43 = vpop.f32.mrf.mxu1  ;;  %4987 = vmatmul.mubr.f32.gmra.mxu1 %v6470_v5 }
 0x435   : > { %v4668_v12 = vpop.f32.mrf.mxu0  ;;  %5277 = vmatmul.mubr.f32.gmra.mxu0 %v11170_v19  ;;  %4991 = vmatprep.mubr.f32.mxu1 %v11218_v48  ;;  %v6472_v19 = vld [vmem:[#allocation2 + $0x110] sm:$0xff]  ;;  %v4379_v40 = vadd.f32 %v11374_v27, %v4378_v43 }
 0x436   : > { %v11530_v9 = vadd.f32 %v4668_v12, %v4364_v20  ;;  %5281 = vmatprep.mubr.f32.mxu0 %v6471_v22  ;;  %v4380_v32 = vpop.f32.mrf.mxu1 }
 0x437   : > { %v4670_v18 = vpop.f32.mrf.mxu0 }
 0x438   : > { %v4383_v14 = vpop.f32.mrf.mxu1  ;;  %4992 = vmatmul.mubr.f32.gmra.mxu1 %v6471_v22 }
 0x439   : > { %v4673_v6 = vpop.f32.mrf.mxu0  ;;  %5282 = vmatmul.mubr.f32.gmra.mxu0 %v11181_v58  ;;  %4996 = vmatprep.mubr.f32.mxu1 %v11229_v37  ;;  %v6473_v58 = vld [vmem:[#allocation2 + $0x118] sm:$0xff]  ;;  %v4384_v5 = vadd.f32 %v11374_v27, %v4383_v14 }
 0x43a   : > { %v11535_v10 = vadd.f32 %v4673_v6, %v4369_v24  ;;  %5286 = vmatprep.mubr.f32.mxu0 %v6472_v19  ;;  %v4385_v48 = vpop.f32.mrf.mxu1 }
 0x43b   : > { %v4675_v62 = vpop.f32.mrf.mxu0 }
 0x43c   : > { %v4388_v30 = vpop.f32.mrf.mxu1  ;;  %4997 = vmatmul.mubr.f32.gmra.mxu1 %v6472_v19 }
 0x43d   : > { %v4678_v57 = vpop.f32.mrf.mxu0  ;;  %5287 = vmatmul.mubr.f32.gmra.mxu0 %v11192_v15  ;;  %5001 = vmatprep.mubr.f32.mxu1 %v11240_v45  ;;  %v6474_v15 = vld [vmem:[#allocation2 + $0x120] sm:$0xff]  ;;  %v4389_v12 = vadd.f32 %v11374_v27, %v4388_v30 }
 0x43e   : > { %v11540_v28 = vadd.f32 %v4678_v57, %v4374_v53  ;;  %5291 = vmatprep.mubr.f32.mxu0 %v6473_v58  ;;  %v4390_v37 = vpop.f32.mrf.mxu1 }
 0x43f   : > { %v4680_v63 = vpop.f32.mrf.mxu0 }
 0x440   : > { %v4393_v60 = vpop.f32.mrf.mxu1  ;;  %5002 = vmatmul.mubr.f32.gmra.mxu1 %v6473_v58 }
 0x441   : > { %v4683_v4 = vpop.f32.mrf.mxu0  ;;  %5292 = vmatmul.mubr.f32.gmra.mxu0 %v11203_v31  ;;  %5006 = vmatprep.mubr.f32.mxu1 %v11251_v35  ;;  %v6475_v31 = vld [vmem:[#allocation2 + $0x128] sm:$0xff]  ;;  %v4394_v14 = vadd.f32 %v11374_v27, %v4393_v60 }
 0x442   : > { %v11545_v38 = vadd.f32 %v4683_v4, %v4379_v40  ;;  %5296 = vmatprep.mubr.f32.mxu0 %v6474_v15  ;;  %v4395_v45 = vpop.f32.mrf.mxu1 }
 0x443   : > { %v4685_v3 = vpop.f32.mrf.mxu0 }
 0x444   : > { %v4398_v0 = vpop.f32.mrf.mxu1  ;;  %5007 = vmatmul.mubr.f32.gmra.mxu1 %v6474_v15 }
 0x445   : > { %v4688_v46 = vpop.f32.mrf.mxu0  ;;  %5297 = vmatmul.mubr.f32.gmra.mxu0 %v11214_v47  ;;  %5011 = vmatprep.mubr.f32.mxu1 %v11262_v44  ;;  %v6476_v47 = vld [vmem:[#allocation2 + $0x130] sm:$0xff]  ;;  %v4399_v53 = vadd.f32 %v11374_v27, %v4398_v0 }
 0x446   : > { %v11550_v20 = vadd.f32 %v4688_v46, %v4384_v5  ;;  %5301 = vmatprep.mubr.f32.mxu0 %v6475_v31  ;;  %v4400_v35 = vpop.f32.mrf.mxu1 }
 0x447   : > { %v4690_v43 = vpop.f32.mrf.mxu0 }
 0x448   : > { %v4403_v22 = vpop.f32.mrf.mxu1  ;;  %5012 = vmatmul.mubr.f32.gmra.mxu1 %v6475_v31 }
 0x449   : > { %v4693_v32 = vpop.f32.mrf.mxu0  ;;  %5302 = vmatmul.mubr.f32.gmra.mxu0 %v11225_v8  ;;  %5016 = vmatprep.mubr.f32.mxu1 %v11273_v36  ;;  %v6477_v8 = vld [vmem:[#allocation2 + $0x138] sm:$0xff]  ;;  %v4404_v63 = vadd.f32 %v11374_v27, %v4403_v22 }
 0x44a   : > { %v11555_v18 = vadd.f32 %v4693_v32, %v4389_v12  ;;  %5306 = vmatprep.mubr.f32.mxu0 %v6476_v47  ;;  %v4405_v44 = vpop.f32.mrf.mxu1  ;;  %v13269_v12 = vld [vmem:[#allocation26_spill] sm:$0xff]  ;;  %v13270_v22 = vld [vmem:[#allocation96_spill] sm:$0xff] }
 0x44b   : > { %v4695_v24 = vpop.f32.mrf.mxu0 }
 0x44c   : > { %v4408_v6 = vpop.f32.mrf.mxu1  ;;  %5017 = vmatmul.mubr.f32.gmra.mxu1 %v6476_v47 }
 0x44d   : > { %v4698_v19 = vpop.f32.mrf.mxu0  ;;  %5307 = vmatmul.mubr.f32.gmra.mxu0 %v11236_v54  ;;  %5021 = vmatprep.mubr.f32.mxu1 %v11284_v21  ;;  %v6478_v54 = vld [vmem:[#allocation2 + $0x140] sm:$0xff]  ;;  %v4409_v45 = vadd.f32 %v11374_v27, %v4408_v6  ;;  %v13271_v6 = vld [vmem:[#allocation64_spill] sm:$0xff] }
 0x44e   : > { %v11560_v48 = vadd.f32 %v4698_v19, %v4394_v14  ;;  %5311 = vmatprep.mubr.f32.mxu0 %v6477_v8  ;;  %v4410_v36 = vpop.f32.mrf.mxu1  ;;  %v13272_v19 = vld [vmem:[#allocation38_spill] sm:$0xff] }
 0x44f   : > { %v4700_v62 = vpop.f32.mrf.mxu0  ;;  %v6482_v36 = vld [vmem:[#allocation2 + $0x160] sm:$0xff] }
 0x450   : > { %v4413_v30 = vpop.f32.mrf.mxu1  ;;  %5022 = vmatmul.mubr.f32.gmra.mxu1 %v6477_v8 }
 0x451   : > { %v4703_v57 = vpop.f32.mrf.mxu0  ;;  %5312 = vmatmul.mubr.f32.gmra.mxu0 %v11247_v59  ;;  %5026 = vmatprep.mubr.f32.mxu1 %v11295_v11  ;;  %v6479_v59 = vld [vmem:[#allocation2 + $0x148] sm:$0xff]  ;;  %v4414_v31 = vadd.f32 %v11374_v27, %v4413_v30 }
 0x452   : > { %v11565_v58 = vadd.f32 %v4703_v57, %v4399_v53  ;;  %5316 = vmatprep.mubr.f32.mxu0 %v6478_v54  ;;  %v4415_v21 = vpop.f32.mrf.mxu1 }
 0x453   : > { %v4705_v37 = vpop.f32.mrf.mxu0  ;;  %v13273_v21 = vld [vmem:[#allocation72_spill] sm:$0xff] }
 0x454   : > { %v4418_v40 = vpop.f32.mrf.mxu1  ;;  %5027 = vmatmul.mubr.f32.gmra.mxu1 %v6478_v54  ;;  %v13274_v37 = vld [vmem:[#allocation27_spill] sm:$0xff] }
 0x455   : > { %v4708_v60 = vpop.f32.mrf.mxu0  ;;  %5317 = vmatmul.mubr.f32.gmra.mxu0 %v11258_v33  ;;  %5031 = vmatprep.mubr.f32.mxu1 %v11306_v51  ;;  %v6480_v33 = vld [vmem:[#allocation2 + $0x150] sm:$0xff]  ;;  %v4419_v44 = vadd.f32 %v11374_v27, %v4418_v40  ;;  %v6483_v40 = vld [vmem:[#allocation2 + $0x168] sm:$0xff] }
 0x456   : > { %v11570_v4 = vadd.f32 %v4708_v60, %v4404_v63  ;;  %5321 = vmatprep.mubr.f32.mxu0 %v6479_v59  ;;  %v4420_v11 = vpop.f32.mrf.mxu1 }
 0x457   : > { %v4710_v15 = vpop.f32.mrf.mxu0 }
 0x458   : > { %v4423_v3 = vpop.f32.mrf.mxu1  ;;  %5032 = vmatmul.mubr.f32.gmra.mxu1 %v6479_v59 }
 0x459   : > { %v4713_v5 = vpop.f32.mrf.mxu0  ;;  %5322 = vmatmul.mubr.f32.gmra.mxu0 %v11269_v7  ;;  %5036 = vmatprep.mubr.f32.mxu1 %v11317_v50  ;;  %v6481_v7 = vld [vmem:[#allocation2 + $0x158] sm:$0xff]  ;;  %v4424_v30 = vadd.f32 %v11374_v27, %v4423_v3  ;;  %v13276_v3 = vld [vmem:[#allocation35_spill] sm:$0xff] }
 0x45a   : > { %v11575_v0 = vadd.f32 %v4713_v5, %v4409_v45  ;;  %5326 = vmatprep.mubr.f32.mxu0 %v6480_v33  ;;  %v4425_v51 = vpop.f32.mrf.mxu1  ;;  %v13275_v5 = vld [vmem:[#allocation67_spill] sm:$0xff] }
 0x45b   : > { %v4715_v46 = vpop.f32.mrf.mxu0  ;;  %v6484_v51 = vld [vmem:[#allocation2 + $0x170] sm:$0xff] }
 0x45c   : > { %v4428_v35 = vpop.f32.mrf.mxu1  ;;  %5037 = vmatmul.mubr.f32.gmra.mxu1 %v6480_v33 }
 0x45d   : > { %v4718_v43 = vpop.f32.mrf.mxu0  ;;  %5327 = vmatmul.mubr.f32.gmra.mxu0 %v13269_v12  ;;  %5041 = vmatprep.mubr.f32.mxu1 %v13270_v22  ;;  %v4429_v11 = vadd.f32 %v11374_v27, %v4428_v35  ;;  %v13278_v35 = vld [vmem:[#allocation106_spill] sm:$0xff] }
 0x45e   : > { %v11580_v32 = vadd.f32 %v4718_v43, %v4414_v31  ;;  %5331 = vmatprep.mubr.f32.mxu0 %v6481_v7  ;;  %v4430_v50 = vpop.f32.mrf.mxu1 }
 0x45f   : > { %v4720_v47 = vpop.f32.mrf.mxu0 }
 0x460   : > { %v4433_v24 = vpop.f32.mrf.mxu1  ;;  %5042 = vmatmul.mubr.f32.gmra.mxu1 %v6481_v7  ;;  %v13277_v7 = vld [vmem:[#allocation105_spill] sm:$0xff]  ;;  %v6485_v47 = vld [vmem:[#allocation2 + $0x178] sm:$0xff] }
 0x461   : > { %v4723_v14 = vpop.f32.mrf.mxu0  ;;  %5332 = vmatmul.mubr.f32.gmra.mxu0 %v13271_v6  ;;  %5046 = vmatprep.mubr.f32.mxu1 %v13272_v19  ;;  %v4434_v43 = vadd.f32 %v11374_v27, %v4433_v24  ;;  %v13280_v24 = vld [vmem:[#allocation42_spill] sm:$0xff] }
 0x462   : > { %v11585_v8 = vadd.f32 %v4723_v14, %v4419_v44  ;;  %5336 = vmatprep.mubr.f32.mxu0 %v6482_v36  ;;  %v4435_v62 = vpop.f32.mrf.mxu1 }
 0x463   : > { %v4725_v53 = vpop.f32.mrf.mxu0  ;;  %v13279_v62 = vld [vmem:[#allocation74_spill] sm:$0xff] }
 0x464   : > { %v4438_v57 = vpop.f32.mrf.mxu1  ;;  %5047 = vmatmul.mubr.f32.gmra.mxu1 %v6482_v36 }
 0x465   : > { %v4728_v54 = vpop.f32.mrf.mxu0  ;;  %5337 = vmatmul.mubr.f32.gmra.mxu0 %v13273_v21  ;;  %5051 = vmatprep.mubr.f32.mxu1 %v13274_v37  ;;  %v4439_v6 = vadd.f32 %v11374_v27, %v4438_v57 }
 0x466   : > { %v11590_v63 = vadd.f32 %v4728_v54, %v4424_v30  ;;  %5341 = vmatprep.mubr.f32.mxu0 %v6483_v40  ;;  %v4440_v60 = vpop.f32.mrf.mxu1  ;;  %v6486_v30 = vld [vmem:[#allocation2 + $0x180] sm:$0xff] }
 0x467   : > { %v4730_v59 = vpop.f32.mrf.mxu0  ;;  %v11608_v60 = vld [vmem:[#allocation2 + $0x189] sm:$0xff] }
 0x468   : > { %v4443_v15 = vpop.f32.mrf.mxu1  ;;  %5052 = vmatmul.mubr.f32.gmra.mxu1 %v6483_v40  ;;  %v13281_v59 = vld [vmem:[#allocation25_spill] sm:$0xff] }
 0x469   : > { %v4733_v45 = vpop.f32.mrf.mxu0  ;;  %5342 = vmatmul.mubr.f32.gmra.mxu0 %v13275_v5  ;;  %5056 = vmatprep.mubr.f32.mxu1 %v13276_v3  ;;  %v4444_v37 = vadd.f32 %v11374_v27, %v4443_v15  ;;  %v11615_v15 = vld [vmem:[#allocation2 + $0x191] sm:$0xff] }
 0x46a   : > { %v11595_v33 = vadd.f32 %v4733_v45, %v4429_v11  ;;  %5346 = vmatprep.mubr.f32.mxu0 %v6484_v51  ;;  %v4445_v46 = vpop.f32.mrf.mxu1  ;;  %v4151_v11 = vld [vmem:[#allocation2 + $0x188] sm:$0xff] }
 0x46b   : > { %v4735_v31 = vpop.f32.mrf.mxu0 }
 0x46c   : > { %v4448_v12 = vpop.f32.mrf.mxu1  ;;  %5057 = vmatmul.mubr.f32.gmra.mxu1 %v6484_v51 }
 0x46d   : > { %v4738_v22 = vpop.f32.mrf.mxu0  ;;  %5347 = vmatmul.mubr.f32.gmra.mxu0 %v13277_v7  ;;  %5061 = vmatprep.mubr.f32.mxu1 %v13278_v35  ;;  %v4449_v51 = vadd.f32 %v11374_v27, %v4448_v12  ;;  %v11622_v12 = vld [vmem:[#allocation2 + $0x199] sm:$0xff] }
 0x46e   : > { %v11600_v50 = vadd.f32 %v4738_v22, %v4434_v43  ;;  %5351 = vmatprep.mubr.f32.mxu0 %v6485_v47  ;;  %v4450_v44 = vpop.f32.mrf.mxu1  ;;  %v13282_v43 = vld [vmem:[#allocation75_spill] sm:$0xff] }
 0x46f   : > { %v4740_v14 = vpop.f32.mrf.mxu0  ;;  %v4152_v22 = vld [vmem:[#allocation2 + $0x190] sm:$0xff] }
 0x470   : > { %v4453_v19 = vpop.f32.mrf.mxu1  ;;  %5062 = vmatmul.mubr.f32.gmra.mxu1 %v6485_v47 }
 0x471   : > { %v4743_v36 = vpop.f32.mrf.mxu0  ;;  %5352 = vmatmul.mubr.f32.gmra.mxu0 %v13279_v62  ;;  %5066 = vmatprep.mubr.f32.mxu1 %v13280_v24  ;;  %v4454_v44 = vadd.f32 %v11374_v27, %v4453_v19  ;;  %v4153_v62 = vld [vmem:[#allocation2 + $0x198] sm:$0xff] }
 0x472   : > { %v11605_v53 = vadd.f32 %v4743_v36, %v4439_v6  ;;  %5356 = vmatprep.mubr.f32.mxu0 %v6486_v30  ;;  %v4455_v54 = vpop.f32.mrf.mxu1  ;;  %v13283_v36 = vld [vmem:[#allocation33_spill] sm:$0xff] }
 0x473   : > { %v4745_v21 = vpop.f32.mrf.mxu0 }
 0x474   : > { %v4458_v40 = vpop.f32.mrf.mxu1  ;;  %5067 = vmatmul.mubr.f32.gmra.mxu1 %v6486_v30 }
 0x475   : > { %v4748_v57 = vpop.f32.mrf.mxu0  ;;  %5357 = vmatmul.mubr.f32.gmra.mxu0 %v13281_v59  ;;  %5071 = vmatprep.mubr.f32.mxu1 %v11608_v60  ;;  %v4459_v21 = vadd.f32 %v11374_v27, %v4458_v40  ;;  %v13285_v59 = vld [vmem:[#allocation31_spill] sm:$0xff] }
 0x476   : > { %v11612_v45 = vadd.f32 %v4748_v57, %v4444_v37  ;;  %5361 = vmatprep.mubr.f32.mxu0 %v4151_v11  ;;  %v4460_v5 = vpop.f32.mrf.mxu1  ;;  %v13284_v57 = vld [vmem:[#allocation78_spill] sm:$0xff] }
 0x477   : > { %v4750_v3 = vpop.f32.mrf.mxu0 }
 0x478   : > { %v4463_v46 = vpop.f32.mrf.mxu1  ;;  %5072 = vmatmul.mubr.f32.gmra.mxu1 %v4151_v11  ;;  %v6487_v3 = vld [vmem:[#allocation2] sm:$0xff] }
 0x479   : > { %v4753_v31 = vpop.f32.mrf.mxu0  ;;  %5362 = vmatmul.mubr.f32.gmra.mxu0 %v13282_v43  ;;  %5076 = vmatprep.mubr.f32.mxu1 %v11615_v15 }
 0x47a   : > { %v11619_v7 = vadd.f32 %v4753_v31, %v4449_v51  ;;  %5366 = vmatprep.mubr.f32.mxu0 %v4152_v22  ;;  %v4465_v35 = vpop.f32.mrf.mxu1  ;;  %v4464_v31 = vadd.f32 %v11374_v27, %v4463_v46  ;;  %v6488_v27 = vld [vmem:[%s11997_s4] ss:$0 sm:$0xff] }
 0x47b   : > { %v4755_v47 = vpop.f32.mrf.mxu0  ;;  %v13286_v35 = vld [vmem:[#allocation22_spill] sm:$0xff] }
 0x47c   : > { %v4468_v14 = vpop.f32.mrf.mxu1  ;;  %5077 = vmatmul.mubr.f32.gmra.mxu1 %v4152_v22  ;;  %v4157_v22 = vld [vmem:[#allocation2 + $0x19f] sm:$0xff]  ;;  %v13287_v47 = vld [vmem:[#allocation79_spill] sm:$0xff] }
 0x47d   : > { %v4758_v6 = vpop.f32.mrf.mxu0  ;;  %5367 = vmatmul.mubr.f32.gmra.mxu0 %v13283_v36  ;;  %5081 = vmatprep.mubr.f32.mxu1 %v11622_v12  ;;  %v4469_v46 = vadd.f32 %v6488_v27, %v4468_v14 }
 0x47e   : > { %v11626_v24 = vadd.f32 %v4758_v6, %v4454_v44  ;;  %5371 = vmatprep.mubr.f32.mxu0 %v4153_v62  ;;  %v4470_v30 = vpop.f32.mrf.mxu1  ;;  %v13288_v6 = vld [vmem:[#allocation34_spill] sm:$0xff] }
 0x47f   : > { %v4760_v54 = vpop.f32.mrf.mxu0  ;;  %v4158_v30 = vld [vmem:[#allocation2 + $0x1a7] sm:$0xff] }
 0x480   : > { %v4473_v37 = vpop.f32.mrf.mxu1  ;;  %5082 = vmatmul.mubr.f32.gmra.mxu1 %v4153_v62 }
 0x481   : > { %v4763_v19 = vpop.f32.mrf.mxu0  ;;  %5372 = vmatmul.mubr.f32.gmra.mxu0 %v13284_v57  ;;  %6177 = vmatprep.mubr.f32.mxu1 %v13285_v59  ;;  %v13290_v59 = vld [vmem:[#allocation39_spill] sm:$0xff] }
 0x482   : > { %v11631_v11 = vadd.f32 %v4763_v19, %v4459_v21  ;;  %v4475_v5 = vpop.f32.mrf.mxu1  ;;  %5376 = vmatprep.mubr.f32.mxu0 %v6487_v3  ;;  %v13289_v19 = vld [vmem:[#allocation29_spill] sm:$0xff] }
 0x483   : > { %v4765_v51 = vpop.f32.mrf.mxu0 }
 0x484   : > { %v4848_v43 = vpop.f32.mrf.mxu1  ;;  %6178 = vmatmul.mubr.f32.vlgmr.msra.gmra.mxu1 %v13286_v35  ;;  %v13291_v51 = vld [vmem:[#allocation37_spill] sm:$0xff] }
 0x485   : > { %v4768_v40 = vpop.f32.mrf.mxu0  ;;  %v4849_v44 = vadd.f32 %v4848_v43, %v13287_v47  ;;  %5377 = vmatmul.mubr.f32.gmra.mxu0 %v4157_v22  ;;  %6180 = vmatprep.mubr.f32.mxu1 %v13288_v6  ;;  %v4159_v22 = vld [vmem:[#allocation2 + $0x1af] sm:$0xff]  ;;  %v13292_v6 = vld [vmem:[#allocation36_spill] sm:$0xff] }
 0x486   : > { %v11637_v36 = vadd.f32 %v4768_v40, %v4464_v31  ;;  %v4850_v62 = vpop.f32.mrf.mxu1  ;;  %5381 = vmatprep.mubr.f32.mxu0 %v6487_v3  ;;  %v4474_v40 = vadd.f32 %v6488_v27, %v4473_v37  ;;  %v6490_v37 = vld [vmem:[#allocation2 + $0x79] sm:$0xff] }
 0x487   : > { %v4770_v54 = vpop.f32.mrf.mxu0  ;;  %v13293_v62 = vld [vmem:[#allocation70_spill] sm:$0xff] }
 0x488   : > { %v4853_v21 = vpop.f32.mrf.mxu1  ;;  %6181 = vmatmul.mubr.f32.gmra.mxu1 %v13289_v19 }
 0x489   : > { %v4773_v57 = vpop.f32.mrf.mxu0  ;;  %v4854_v5 = vadd.f32 %v4853_v21, %v13290_v59  ;;  %5382 = vmatmul.mubr.f32.gmra.mxu0 %v4158_v30  ;;  %6183 = vmatprep.mubr.f32.mxu1 %v13291_v51 }
 0x48a   : > { %v11645_v31 = vadd.f32 %v4773_v57, %v4469_v46  ;;  %v4855_v43 = vpop.f32.mrf.mxu1  ;;  %5386 = vmatprep.mubr.f32.mxu0 %v6487_v3  ;;  %v6489_v57 = vld [vmem:[#allocation2 + $0x71] sm:$0xff]  ;;  %v13294_v3 = vld [vmem:[#allocation41_spill] sm:$0xff] }
 0x48b   : > { %v4775_v35 = vpop.f32.mrf.mxu0 }
 0x48c   : > { %v4858_v47 = vpop.f32.mrf.mxu1  ;;  %6184 = vmatmul.mubr.f32.gmra.mxu1 %v13292_v6 }
 0x48d   : > { %v4778_v14 = vpop.f32.mrf.mxu0  ;;  %v4859_v54 = vadd.f32 %v4858_v47, %v13293_v62  ;;  %5387 = vmatmul.mubr.f32.gmra.mxu0 %v4159_v22  ;;  %6186 = vmatprep.mubr.f32.mxu1 %v11414_v1  ;;  %v6491_v22 = vld [vmem:[#allocation2 + $0x81] sm:$0xff]  ;;  %v13295_v1 = vld [vmem:[#allocation83_spill] sm:$0xff] }
 0x48e   : > { %v11650_v21 = vadd.f32 %v4778_v14, %v4474_v40  ;;  %v4860_v30 = vpop.f32.mrf.mxu1  ;;  %v6492_v14 = vld [vmem:[#allocation2 + $0x89] sm:$0xff] }
 0x48f   : > { %v4780_v19 = vpop.f32.mrf.mxu0 }
 0x490   : > { %v4863_v46 = vpop.f32.mrf.mxu1  ;;  %6187 = vmatmul.mubr.f32.gmra.mxu1 %v6489_v57  ;;  %v6493_v57 = vld [vmem:[#allocation2 + $0x91] sm:$0xff] }
 0x491   : > { %v4864_v59 = vadd.f32 %v4863_v46, %v13294_v3  ;;  %v5153_v51 = vpop.f32.mrf.mxu0  ;;  %6189 = vmatprep.mubr.f32.mxu1 %v6490_v37  ;;  %v13296_v3 = vld [vmem:[#allocation73_spill] sm:$0xff] }
 0x492   : > { %v11653_v27 = vadd.f32 %v5153_v51, %v4849_v44  ;;  %v4865_v43 = vpop.f32.mrf.mxu1  ;;  %v6494_v37 = vld [vmem:[#allocation2 + $0x99] sm:$0xff] }
 0x493   : > { %v5155_v35 = vpop.f32.mrf.mxu0 }
 0x494   : > { %v4868_v47 = vpop.f32.mrf.mxu1  ;;  %6190 = vmatmul.mubr.f32.gmra.mxu1 %v6491_v22 }
 0x495   : > { %v4869_v40 = vadd.f32 %v4868_v47, %v13295_v1  ;;  %v5158_v6 = vpop.f32.mrf.mxu0  ;;  %6192 = vmatprep.mubr.f32.mxu1 %v6492_v14  ;;  %v6495_v1 = vld [vmem:[#allocation2 + $0xa1] sm:$0xff]  ;;  %v6496_v14 = vld [vmem:[#allocation2 + $0xa9] sm:$0xff] }
 0x496   : > { %v11656_v62 = vadd.f32 %v5158_v6, %v4854_v5  ;;  %v4870_v30 = vpop.f32.mrf.mxu1 }
 0x497   : > { %v5160_v19 = vpop.f32.mrf.mxu0 }
 0x498   : > { %v4873_v46 = vpop.f32.mrf.mxu1  ;;  %6193 = vmatmul.mubr.f32.gmra.mxu1 %v6493_v57 }
 0x499   : > { %v4874_v44 = vadd.f32 %v4873_v46, %v13296_v3  ;;  %v5163_v51 = vpop.f32.mrf.mxu0  ;;  %6195 = vmatprep.mubr.f32.mxu1 %v6494_v37  ;;  %v6497_v3 = vld [vmem:[#allocation2 + $0xb1] sm:$0xff]  ;;  %v6498_v37 = vld [vmem:[#allocation2 + $0xb9] sm:$0xff] }
 0x49a   : > { %v11659_v43 = vadd.f32 %v5163_v51, %v4859_v54  ;;  %v4875_v35 = vpop.f32.mrf.mxu1 }
 0x49b   : > { %v5165_v22 = vpop.f32.mrf.mxu0 }
 0x49c   : > { %13297 = vst [vmem:[#allocation48_spill] sm:$0xff] %v11659_v43  ;;  %v4878_v47 = vpop.f32.mrf.mxu1  ;;  %6196 = vmatmul.mubr.f32.gmra.mxu1 %v6495_v1 }
 0x49d   : > { %v4879_v5 = vadd.f32 %v4878_v47, %v11421_v23  ;;  %v5168_v6 = vpop.f32.mrf.mxu0  ;;  %6198 = vmatprep.mubr.f32.mxu1 %v6496_v14  ;;  %v6499_v47 = vld [vmem:[#allocation2 + $0xc1] sm:$0xff]  ;;  %v13299_v14 = vld [vmem:[#allocation43_spill] sm:$0xff] }
 0x49e   : > { %v11662_v30 = vadd.f32 %v5168_v6, %v4864_v59  ;;  %v4880_v19 = vpop.f32.mrf.mxu1 }
 0x49f   : > { %v5170_v57 = vpop.f32.mrf.mxu0  ;;  %v6500_v19 = vld [vmem:[#allocation2 + $0xc9] sm:$0xff] }
 0x4a0   : > { %v4883_v46 = vpop.f32.mrf.mxu1  ;;  %6199 = vmatmul.mubr.f32.gmra.mxu1 %v6497_v3 }
 0x4a1   : > { %v4884_v54 = vadd.f32 %v4883_v46, %v11425_v41  ;;  %v5173_v51 = vpop.f32.mrf.mxu0  ;;  %6201 = vmatprep.mubr.f32.mxu1 %v6498_v37  ;;  %v6501_v46 = vld [vmem:[#allocation2 + $0xd1] sm:$0xff] }
 0x4a2   : > { %v11665_v35 = vadd.f32 %v5173_v51, %v4869_v40  ;;  %v4885_v22 = vpop.f32.mrf.mxu1  ;;  %v13300_v37 = vld [vmem:[#allocation40_spill] sm:$0xff] }
 0x4a3   : > { %v5175_v1 = vpop.f32.mrf.mxu0  ;;  %v6502_v22 = vld [vmem:[#allocation2 + $0xd9] sm:$0xff] }
 0x4a4   : > { %13298 = vst [vmem:[#allocation85_spill] sm:$0xff] %v11665_v35  ;;  %v4888_v23 = vpop.f32.mrf.mxu1  ;;  %6202 = vmatmul.mubr.f32.gmra.mxu1 %v6499_v47 }
 0x4a5   : > { %v4889_v59 = vadd.f32 %v4888_v23, %v13299_v14  ;;  %v5178_v6 = vpop.f32.mrf.mxu0  ;;  %6204 = vmatprep.mubr.f32.mxu1 %v6500_v19  ;;  %v6503_v14 = vld [vmem:[#allocation2 + $0xe1] sm:$0xff]  ;;  %v6504_v19 = vld [vmem:[#allocation2 + $0xe9] sm:$0xff] }
 0x4a6   : > { %v11668_v57 = vadd.f32 %v5178_v6, %v4874_v44  ;;  %v4890_v3 = vpop.f32.mrf.mxu1 }
 0x4a7   : > { %v5180_v43 = vpop.f32.mrf.mxu0 }
 0x4a8   : > { %v4893_v41 = vpop.f32.mrf.mxu1  ;;  %6205 = vmatmul.mubr.f32.gmra.mxu1 %v6501_v46 }
 0x4a9   : > { %v4894_v40 = vadd.f32 %v4893_v41, %v13300_v37  ;;  %v5183_v51 = vpop.f32.mrf.mxu0  ;;  %6207 = vmatprep.mubr.f32.mxu1 %v6502_v22  ;;  %v6505_v37 = vld [vmem:[#allocation2 + $0xf1] sm:$0xff]  ;;  %v6506_v22 = vld [vmem:[#allocation2 + $0xf9] sm:$0xff] }
 0x4aa   : > { %v11671_v1 = vadd.f32 %v5183_v51, %v4879_v5  ;;  %v4895_v47 = vpop.f32.mrf.mxu1 }
 0x4ab   : > { %v5185_v35 = vpop.f32.mrf.mxu0 }
 0x4ac   : > { %v4898_v23 = vpop.f32.mrf.mxu1  ;;  %6208 = vmatmul.mubr.f32.gmra.mxu1 %v6503_v14 }
 0x4ad   : > { %v4899_v44 = vadd.f32 %v4898_v23, %v11437_v61  ;;  %v5188_v6 = vpop.f32.mrf.mxu0  ;;  %6210 = vmatprep.mubr.f32.mxu1 %v6504_v19  ;;  %v6507_v23 = vld [vmem:[#allocation2 + $0x101] sm:$0xff]  ;;  %v6508_v19 = vld [vmem:[#allocation2 + $0x109] sm:$0xff] }
 0x4ae   : > { %v11674_v43 = vadd.f32 %v5188_v6, %v4884_v54  ;;  %v4900_v3 = vpop.f32.mrf.mxu1 }
 0x4af   : > { %v5190_v46 = vpop.f32.mrf.mxu0 }
 0x4b0   : > { %v4903_v41 = vpop.f32.mrf.mxu1  ;;  %6211 = vmatmul.mubr.f32.gmra.mxu1 %v6505_v37 }
 0x4b1   : > { %v4904_v5 = vadd.f32 %v4903_v41, %v11441_v39  ;;  %v5193_v51 = vpop.f32.mrf.mxu0  ;;  %6213 = vmatprep.mubr.f32.mxu1 %v6506_v22  ;;  %v6509_v41 = vld [vmem:[#allocation2 + $0x111] sm:$0xff]  ;;  %v6510_v22 = vld [vmem:[#allocation2 + $0x119] sm:$0xff] }
 0x4b2   : > { %v11677_v35 = vadd.f32 %v5193_v51, %v4889_v59  ;;  %v4905_v47 = vpop.f32.mrf.mxu1 }
 0x4b3   : > { %v5195_v14 = vpop.f32.mrf.mxu0 }
 0x4b4   : > { %v4908_v61 = vpop.f32.mrf.mxu1  ;;  %6214 = vmatmul.mubr.f32.gmra.mxu1 %v6507_v23 }
 0x4b5   : > { %v4909_v54 = vadd.f32 %v4908_v61, %v11445_v17  ;;  %v5198_v6 = vpop.f32.mrf.mxu0  ;;  %6216 = vmatprep.mubr.f32.mxu1 %v6508_v19  ;;  %v6511_v61 = vld [vmem:[#allocation2 + $0x121] sm:$0xff]  ;;  %v6512_v19 = vld [vmem:[#allocation2 + $0x129] sm:$0xff] }
 0x4b6   : > { %v11680_v3 = vadd.f32 %v5198_v6, %v4894_v40  ;;  %v4910_v46 = vpop.f32.mrf.mxu1 }
 0x4b7   : > { %v5200_v37 = vpop.f32.mrf.mxu0 }
 0x4b8   : > { %v4913_v39 = vpop.f32.mrf.mxu1  ;;  %6217 = vmatmul.mubr.f32.gmra.mxu1 %v6509_v41 }
 0x4b9   : > { %v4914_v59 = vadd.f32 %v4913_v39, %v11450_v16  ;;  %v5203_v51 = vpop.f32.mrf.mxu0  ;;  %6219 = vmatprep.mubr.f32.mxu1 %v6510_v22  ;;  %v6513_v39 = vld [vmem:[#allocation2 + $0x131] sm:$0xff]  ;;  %v6514_v22 = vld [vmem:[#allocation2 + $0x139] sm:$0xff] }
 0x4ba   : > { %v11683_v47 = vadd.f32 %v5203_v51, %v4899_v44  ;;  %v4915_v14 = vpop.f32.mrf.mxu1 }
 0x4bb   : > { %v5205_v23 = vpop.f32.mrf.mxu0 }
 0x4bc   : > { %v4918_v17 = vpop.f32.mrf.mxu1  ;;  %6220 = vmatmul.mubr.f32.gmra.mxu1 %v6511_v61 }
 0x4bd   : > { %v4919_v40 = vadd.f32 %v4918_v17, %v11457_v13  ;;  %v5208_v6 = vpop.f32.mrf.mxu0  ;;  %6222 = vmatprep.mubr.f32.mxu1 %v6512_v19  ;;  %v6515_v17 = vld [vmem:[#allocation2 + $0x141] sm:$0xff]  ;;  %v6516_v19 = vld [vmem:[#allocation2 + $0x149] sm:$0xff] }
 0x4be   : > { %v11686_v46 = vadd.f32 %v5208_v6, %v4904_v5  ;;  %v4920_v37 = vpop.f32.mrf.mxu1 }
 0x4bf   : > { %v5210_v41 = vpop.f32.mrf.mxu0 }
 0x4c0   : > { %v4923_v16 = vpop.f32.mrf.mxu1  ;;  %6223 = vmatmul.mubr.f32.gmra.mxu1 %v6513_v39 }
 0x4c1   : > { %v4924_v44 = vadd.f32 %v4923_v16, %v11464_v2  ;;  %v5213_v51 = vpop.f32.mrf.mxu0  ;;  %6225 = vmatprep.mubr.f32.mxu1 %v6514_v22  ;;  %v6517_v16 = vld [vmem:[#allocation2 + $0x151] sm:$0xff]  ;;  %v6518_v22 = vld [vmem:[#allocation2 + $0x159] sm:$0xff] }
 0x4c2   : > { %v11689_v14 = vadd.f32 %v5213_v51, %v4909_v54  ;;  %v4925_v23 = vpop.f32.mrf.mxu1 }
 0x4c3   : > { %v5215_v61 = vpop.f32.mrf.mxu0 }
 0x4c4   : > { %v4928_v13 = vpop.f32.mrf.mxu1  ;;  %6226 = vmatmul.mubr.f32.gmra.mxu1 %v6515_v17 }
 0x4c5   : > { %v4929_v5 = vadd.f32 %v4928_v13, %v11471_v25  ;;  %v5218_v6 = vpop.f32.mrf.mxu0  ;;  %6228 = vmatprep.mubr.f32.mxu1 %v6516_v19  ;;  %v6519_v13 = vld [vmem:[#allocation2 + $0x161] sm:$0xff]  ;;  %v6520_v19 = vld [vmem:[#allocation2 + $0x169] sm:$0xff] }
 0x4c6   : > { %v11692_v37 = vadd.f32 %v5218_v6, %v4914_v59  ;;  %v4930_v41 = vpop.f32.mrf.mxu1 }
 0x4c7   : > { %v5220_v39 = vpop.f32.mrf.mxu0 }
 0x4c8   : > { %v4933_v2 = vpop.f32.mrf.mxu1  ;;  %6229 = vmatmul.mubr.f32.gmra.mxu1 %v6517_v16 }
 0x4c9   : > { %v4934_v54 = vadd.f32 %v4933_v2, %v11478_v42  ;;  %v5223_v51 = vpop.f32.mrf.mxu0  ;;  %6231 = vmatprep.mubr.f32.mxu1 %v6518_v22  ;;  %v6521_v2 = vld [vmem:[#allocation2 + $0x171] sm:$0xff]  ;;  %v6522_v22 = vld [vmem:[#allocation2 + $0x179] sm:$0xff] }
 0x4ca   : > { %v11695_v23 = vadd.f32 %v5223_v51, %v4919_v40  ;;  %v4935_v61 = vpop.f32.mrf.mxu1 }
 0x4cb   : > { %v5225_v17 = vpop.f32.mrf.mxu0 }
 0x4cc   : > { %v4938_v25 = vpop.f32.mrf.mxu1  ;;  %6232 = vmatmul.mubr.f32.gmra.mxu1 %v6519_v13 }
 0x4cd   : > { %v4939_v59 = vadd.f32 %v4938_v25, %v11485_v26  ;;  %v5228_v6 = vpop.f32.mrf.mxu0  ;;  %6234 = vmatprep.mubr.f32.mxu1 %v6520_v19  ;;  %v6523_v25 = vld [vmem:[#allocation2 + $0x181] sm:$0xff] }
 0x4ce   : > { %v11698_v41 = vadd.f32 %v5228_v6, %v4924_v44  ;;  %v4940_v39 = vpop.f32.mrf.mxu1 }
 0x4cf   : > { %v5230_v16 = vpop.f32.mrf.mxu0 }
 0x4d0   : > { %v4943_v42 = vpop.f32.mrf.mxu1  ;;  %6235 = vmatmul.mubr.f32.gmra.mxu1 %v6521_v2  ;;  %v4163_v2 = vld [vmem:[#allocation2 + $0x1a1] sm:$0xff] }
 0x4d1   : > { %v4944_v40 = vadd.f32 %v4943_v42, %v11492_v55  ;;  %v5233_v51 = vpop.f32.mrf.mxu0  ;;  %6237 = vmatprep.mubr.f32.mxu1 %v6522_v22 }
 0x4d2   : > { %v11701_v61 = vadd.f32 %v5233_v51, %v4929_v5  ;;  %v4945_v17 = vpop.f32.mrf.mxu1 }
 0x4d3   : > { %v5235_v13 = vpop.f32.mrf.mxu0 }
 0x4d4   : > { %v4948_v26 = vpop.f32.mrf.mxu1  ;;  %6238 = vmatmul.mubr.f32.gmra.mxu1 %v6523_v25 }
 0x4d5   : > { %v4949_v44 = vadd.f32 %v4948_v26, %v11499_v56  ;;  %v5238_v6 = vpop.f32.mrf.mxu0  ;;  %6240 = vmatprep.mubr.f32.mxu1 %v11608_v60  ;;  %v4164_v56 = vld [vmem:[#allocation2 + $0x1a9] sm:$0xff]  ;;  %v4165_v26 = vld [vmem:[#allocation2 + $0x1b1] sm:$0xff] }
 0x4d6   : > { %v11705_v19 = vadd.f32 %v5238_v6, %v4934_v54  ;;  %v4950_v39 = vpop.f32.mrf.mxu1 }
 0x4d7   : > { %v5240_v16 = vpop.f32.mrf.mxu0 }
 0x4d8   : > { %v4953_v55 = vpop.f32.mrf.mxu1  ;;  %6241 = vmatmul.mubr.f32.gmra.mxu1 %v11615_v15 }
 0x4d9   : > { %v4954_v5 = vadd.f32 %v4953_v55, %v11506_v29  ;;  %v5243_v42 = vpop.f32.mrf.mxu0  ;;  %6243 = vmatprep.mubr.f32.mxu1 %v11622_v12 }
 0x4da   : > { %v11710_v51 = vadd.f32 %v5243_v42, %v4939_v59  ;;  %v4955_v22 = vpop.f32.mrf.mxu1 }
 0x4db   : > { %v5245_v17 = vpop.f32.mrf.mxu0 }
 0x4dc   : > { %v4958_v13 = vpop.f32.mrf.mxu1  ;;  %6244 = vmatmul.mubr.f32.gmra.mxu1 %v4163_v2 }
 0x4dd   : > { %v4959_v60 = vadd.f32 %v4958_v13, %v11513_v52  ;;  %v5248_v54 = vpop.f32.mrf.mxu0  ;;  %6246 = vmatprep.mubr.f32.mxu1 %v4164_v56 }
 0x4de   : > { %v11713_v25 = vadd.f32 %v5248_v54, %v4944_v40  ;;  %v4960_v15 = vpop.f32.mrf.mxu1 }
 0x4df   : > { %v5250_v29 = vpop.f32.mrf.mxu0 }
 0x4e0   : > { %v4963_v6 = vpop.f32.mrf.mxu1  ;;  %6247 = vmatmul.mubr.f32.gmra.mxu1 %v4165_v26 }
 0x4e1   : > { %v4964_v12 = vadd.f32 %v4963_v6, %v11518_v34  ;;  %v5253_v59 = vpop.f32.mrf.mxu0 }
 0x4e2   : > { %v11716_v39 = vadd.f32 %v5253_v59, %v4949_v44  ;;  %v4965_v16 = vpop.f32.mrf.mxu1 }
 0x4e3   : > { %v5255_v55 = vpop.f32.mrf.mxu0 }
 0x4e4   : > { %v4968_v42 = vpop.f32.mrf.mxu1 }
 0x4e5   : > { %v4969_v2 = vadd.f32 %v4968_v42, %v11525_v49  ;;  %v5258_v52 = vpop.f32.mrf.mxu0 }
 0x4e6   : > { %v11719_v22 = vadd.f32 %v5258_v52, %v4954_v5  ;;  %v4970_v56 = vpop.f32.mrf.mxu1 }
 0x4e7   : > { %v5260_v40 = vpop.f32.mrf.mxu0 }
 0x4e8   : > { %v4973_v17 = vpop.f32.mrf.mxu1 }
 0x4e9   : > { %v4974_v13 = vadd.f32 %v4973_v17, %v11530_v9  ;;  %v5263_v54 = vpop.f32.mrf.mxu0 }
 0x4ea   : > { %v11722_v26 = vadd.f32 %v5263_v54, %v4959_v60  ;;  %v4975_v34 = vpop.f32.mrf.mxu1 }
 0x4eb   : > { %v5265_v15 = vpop.f32.mrf.mxu0 }
 0x4ec   : > { %v4978_v44 = vpop.f32.mrf.mxu1 }
 0x4ed   : > { %v4979_v29 = vadd.f32 %v4978_v44, %v11535_v10  ;;  %v5268_v6 = vpop.f32.mrf.mxu0 }
 0x4ee   : > { %v11725_v59 = vadd.f32 %v5268_v6, %v4964_v12  ;;  %v4980_v49 = vpop.f32.mrf.mxu1 }
 0x4ef   : > { %v5270_v16 = vpop.f32.mrf.mxu0 }
 0x4f0   : > { %v4983_v5 = vpop.f32.mrf.mxu1 }
 0x4f1   : > { %v4984_v55 = vadd.f32 %v4983_v5, %v11540_v28  ;;  %v5273_v42 = vpop.f32.mrf.mxu0 }
 0x4f2   : > { %v11728_v52 = vadd.f32 %v5273_v42, %v4969_v2  ;;  %v4985_v9 = vpop.f32.mrf.mxu1 }
 0x4f3   : > { %v5275_v56 = vpop.f32.mrf.mxu0 }
 0x4f4   : > { %v4988_v60 = vpop.f32.mrf.mxu1 }
 0x4f5   : > { %v4989_v40 = vadd.f32 %v4988_v60, %v11545_v38  ;;  %v5278_v17 = vpop.f32.mrf.mxu0 }
 0x4f6   : > { %v11731_v54 = vadd.f32 %v5278_v17, %v4974_v13  ;;  %v4990_v10 = vpop.f32.mrf.mxu1 }
 0x4f7   : > { %v5280_v34 = vpop.f32.mrf.mxu0 }
 0x4f8   : > { %v4993_v12 = vpop.f32.mrf.mxu1 }
 0x4f9   : > { %v4994_v15 = vadd.f32 %v4993_v12, %v11550_v20  ;;  %v5283_v44 = vpop.f32.mrf.mxu0 }
 0x4fa   : > { %v11734_v6 = vadd.f32 %v5283_v44, %v4979_v29  ;;  %v4995_v28 = vpop.f32.mrf.mxu1 }
 0x4fb   : > { %v5285_v49 = vpop.f32.mrf.mxu0 }
 0x4fc   : > { %v4998_v2 = vpop.f32.mrf.mxu1 }
 0x4fd   : > { %v4999_v16 = vadd.f32 %v4998_v2, %v11555_v18  ;;  %v5288_v5 = vpop.f32.mrf.mxu0 }
 0x4fe   : > { %v11737_v42 = vadd.f32 %v5288_v5, %v4984_v55  ;;  %v5000_v38 = vpop.f32.mrf.mxu1 }
 0x4ff   : > { %v5290_v9 = vpop.f32.mrf.mxu0 }
 0x500   : > { %v5003_v13 = vpop.f32.mrf.mxu1 }
 0x501   : > { %v5004_v56 = vadd.f32 %v5003_v13, %v11560_v48  ;;  %v5293_v60 = vpop.f32.mrf.mxu0 }
 0x502   : > { %v11740_v17 = vadd.f32 %v5293_v60, %v4989_v40  ;;  %v5005_v20 = vpop.f32.mrf.mxu1 }
 0x503   : > { %v5295_v10 = vpop.f32.mrf.mxu0 }
 0x504   : > { %v5008_v29 = vpop.f32.mrf.mxu1 }
 0x505   : > { %v5009_v34 = vadd.f32 %v5008_v29, %v11565_v58  ;;  %v5298_v12 = vpop.f32.mrf.mxu0 }
 0x506   : > { %v11743_v44 = vadd.f32 %v5298_v12, %v4994_v15  ;;  %v5010_v18 = vpop.f32.mrf.mxu1 }
 0x507   : > { %v5300_v28 = vpop.f32.mrf.mxu0 }
 0x508   : > { %v5013_v55 = vpop.f32.mrf.mxu1 }
 0x509   : > { %v5014_v49 = vadd.f32 %v5013_v55, %v11570_v4  ;;  %v5303_v2 = vpop.f32.mrf.mxu0 }
 0x50a   : > { %v11746_v5 = vadd.f32 %v5303_v2, %v4999_v16  ;;  %v5015_v48 = vpop.f32.mrf.mxu1 }
 0x50b   : > { %v5305_v38 = vpop.f32.mrf.mxu0 }
 0x50c   : > { %v5018_v40 = vpop.f32.mrf.mxu1 }
 0x50d   : > { %v5019_v9 = vadd.f32 %v5018_v40, %v11575_v0  ;;  %v5308_v13 = vpop.f32.mrf.mxu0 }
 0x50e   : > { %v11749_v60 = vadd.f32 %v5308_v13, %v5004_v56  ;;  %v5020_v58 = vpop.f32.mrf.mxu1 }
 0x50f   : > { %v5310_v20 = vpop.f32.mrf.mxu0 }
 0x510   : > { %v5023_v15 = vpop.f32.mrf.mxu1 }
 0x511   : > { %v5024_v10 = vadd.f32 %v5023_v15, %v11580_v32  ;;  %v5313_v29 = vpop.f32.mrf.mxu0 }
 0x512   : > { %v11752_v12 = vadd.f32 %v5313_v29, %v5009_v34  ;;  %v5025_v4 = vpop.f32.mrf.mxu1 }
 0x513   : > { %v5315_v18 = vpop.f32.mrf.mxu0 }
 0x514   : > { %v5028_v16 = vpop.f32.mrf.mxu1 }
 0x515   : > { %v5029_v28 = vadd.f32 %v5028_v16, %v11585_v8  ;;  %v5318_v55 = vpop.f32.mrf.mxu0 }
 0x516   : > { %v11755_v2 = vadd.f32 %v5318_v55, %v5014_v49  ;;  %v5030_v0 = vpop.f32.mrf.mxu1 }
 0x517   : > { %v5320_v48 = vpop.f32.mrf.mxu0 }
 0x518   : > { %v5033_v56 = vpop.f32.mrf.mxu1 }
 0x519   : > { %v5034_v38 = vadd.f32 %v5033_v56, %v11590_v63  ;;  %v5323_v40 = vpop.f32.mrf.mxu0 }
 0x51a   : > { %v11758_v13 = vadd.f32 %v5323_v40, %v5019_v9  ;;  %v5035_v32 = vpop.f32.mrf.mxu1 }
 0x51b   : > { %v5325_v58 = vpop.f32.mrf.mxu0 }
 0x51c   : > { %v5038_v34 = vpop.f32.mrf.mxu1 }
 0x51d   : > { %v5039_v20 = vadd.f32 %v5038_v34, %v11595_v33  ;;  %v5328_v15 = vpop.f32.mrf.mxu0 }
 0x51e   : > { %v11761_v29 = vadd.f32 %v5328_v15, %v5024_v10  ;;  %v5040_v8 = vpop.f32.mrf.mxu1 }
 0x51f   : > { %v5330_v4 = vpop.f32.mrf.mxu0 }
 0x520   : > { %v5043_v49 = vpop.f32.mrf.mxu1 }
 0x521   : > { %v5044_v18 = vadd.f32 %v5043_v49, %v11600_v50  ;;  %v5333_v16 = vpop.f32.mrf.mxu0 }
 0x522   : > { %v11764_v55 = vadd.f32 %v5333_v16, %v5029_v28  ;;  %v5045_v63 = vpop.f32.mrf.mxu1 }
 0x523   : > { %v5335_v0 = vpop.f32.mrf.mxu0 }
 0x524   : > { %v5048_v9 = vpop.f32.mrf.mxu1 }
 0x525   : > { %v5049_v48 = vadd.f32 %v5048_v9, %v11605_v53  ;;  %v5338_v56 = vpop.f32.mrf.mxu0 }
 0x526   : > { %v11767_v40 = vadd.f32 %v5338_v56, %v5034_v38  ;;  %v5050_v33 = vpop.f32.mrf.mxu1 }
 0x527   : > { %v5340_v32 = vpop.f32.mrf.mxu0 }
 0x528   : > { %v5053_v10 = vpop.f32.mrf.mxu1 }
 0x529   : > { %v5054_v58 = vadd.f32 %v5053_v10, %v11612_v45  ;;  %v5343_v34 = vpop.f32.mrf.mxu0 }
 0x52a   : > { %v11770_v15 = vadd.f32 %v5343_v34, %v5039_v20  ;;  %v5055_v50 = vpop.f32.mrf.mxu1 }
 0x52b   : > { %v5345_v8 = vpop.f32.mrf.mxu0 }
 0x52c   : > { %v5058_v28 = vpop.f32.mrf.mxu1 }
 0x52d   : > { %v5059_v4 = vadd.f32 %v5058_v28, %v11619_v7  ;;  %v5348_v49 = vpop.f32.mrf.mxu0 }
 0x52e   : > { %v11773_v16 = vadd.f32 %v5348_v49, %v5044_v18  ;;  %v5060_v53 = vpop.f32.mrf.mxu1 }
 0x52f   : > { %v5350_v63 = vpop.f32.mrf.mxu0 }
 0x530   : > { %v5063_v38 = vpop.f32.mrf.mxu1 }
 0x531   : > { %v5064_v0 = vadd.f32 %v5063_v38, %v11626_v24  ;;  %v5353_v9 = vpop.f32.mrf.mxu0 }
 0x532   : > { %v11776_v56 = vadd.f32 %v5353_v9, %v5049_v48  ;;  %v5065_v45 = vpop.f32.mrf.mxu1 }
 0x533   : > { %v5355_v33 = vpop.f32.mrf.mxu0 }
 0x534   : > { %v5068_v20 = vpop.f32.mrf.mxu1 }
 0x535   : > { %v5069_v32 = vadd.f32 %v5068_v20, %v11631_v11  ;;  %v5358_v10 = vpop.f32.mrf.mxu0 }
 0x536   : > { %v11779_v34 = vadd.f32 %v5358_v10, %v5054_v58  ;;  %v5070_v7 = vpop.f32.mrf.mxu1 }
 0x537   : > { %v5360_v50 = vpop.f32.mrf.mxu0 }
 0x538   : > { %v5073_v18 = vpop.f32.mrf.mxu1 }
 0x539   : > { %v5074_v8 = vadd.f32 %v5073_v18, %v11637_v36  ;;  %v5363_v28 = vpop.f32.mrf.mxu0 }
 0x53a   : > { %v11782_v49 = vadd.f32 %v5363_v28, %v5059_v4  ;;  %v5075_v24 = vpop.f32.mrf.mxu1  ;;  %v6524_v28 = vld [vmem:[%s6936_s10 + $0x28] sm:$0xff] }
 0x53b   : > { %v5365_v48 = vpop.f32.mrf.mxu0 }
 0x53c   : > { %v5078_v53 = vpop.f32.mrf.mxu1 }
 0x53d   : > { %v5079_v63 = vadd.f32 %v5078_v53, %v11645_v31  ;;  %v5368_v38 = vpop.f32.mrf.mxu0 }
 0x53e   : > { %v11785_v11 = vadd.f32 %v5368_v38, %v5064_v0  ;;  %v5080_v58 = vpop.f32.mrf.mxu1 }
 0x53f   : > { %v5370_v9 = vpop.f32.mrf.mxu0 }
 0x540   : > { %v5083_v45 = vpop.f32.mrf.mxu1 }
 0x541   : > { %v5084_v33 = vadd.f32 %v5083_v45, %v11650_v21  ;;  %v5373_v20 = vpop.f32.mrf.mxu0 }
 0x542   : > { %v11788_v36 = vadd.f32 %v5373_v20, %v5069_v32  ;;  %v5085_v4 = vpop.f32.mrf.mxu1  ;;  %v6525_v32 = vld [vmem:[%s6936_s10 + $0x20] sm:$0xff] }
 0x543   : > { %v5375_v10 = vpop.f32.mrf.mxu0  ;;  %v13301_v4 = vld [vmem:[#allocation48_spill] sm:$0xff] }
 0x544   : > { %v6179_v7 = vpop.f32.mrf.mxu1 }
 0x545   : > { %v5378_v50 = vpop.f32.mrf.mxu0  ;;  %v5464_v31 = vadd.f32 %v6179_v7, %v11656_v62 }
 0x546   : > { %v11792_v18 = vadd.f32 %v5378_v50, %v5074_v8  ;;  %v5458_v0 = vpop.f32.mrf.mxu1  ;;  %v6527_v50 = vld [vmem:[%s6936_s10 + $0x30] sm:$0xff] }
 0x547   : > { %v5698_v24 = vadd.f32 %v6524_v28, %v5464_v31  ;;  %v5380_v48 = vpop.f32.mrf.mxu0  ;;  %v5459_v21 = vadd.f32 %v5458_v0, %v11653_v27  ;;  %v6526_v27 = vld [vmem:[%s6936_s10 + $0x38] sm:$0xff] }
 0x548   : > { %v6182_v53 = vpop.f32.mrf.mxu1 }
 0x549   : > { %5746 = vst [vmem:[%s11796_s12 + $0x8] sm:$0xff] %v5698_v24  ;;  %v5697_v38 = vadd.f32 %v6525_v32, %v5459_v21  ;;  %v5383_v62 = vpop.f32.mrf.mxu0  ;;  %v5474_v8 = vadd.f32 %v6182_v53, %v11662_v30  ;;  %v6528_v24 = vld [vmem:[%s6936_s10 + $0x48] sm:$0xff]  ;;  %v13302_v21 = vld [vmem:[#allocation85_spill] sm:$0xff] }
 0x54a   : > { %v11801_v58 = vadd.f32 %v5383_v62, %v5079_v63  ;;  %v5468_v9 = vpop.f32.mrf.mxu1  ;;  %v6529_v62 = vld [vmem:[%s6936_s10 + $0x40] sm:$0xff] }
 0x54b   : > { %5745 = vst [vmem:[%s11796_s12] sm:$0xff] %v5697_v38  ;;  %v5700_v45 = vadd.f32 %v6526_v27, %v5474_v8  ;;  %v5385_v20 = vpop.f32.mrf.mxu0  ;;  %v5469_v10 = vadd.f32 %v5468_v9, %v13301_v4  ;;  %v6531_v4 = vld [vmem:[%s6936_s10 + $0x50] sm:$0xff] }
 0x54c   : > { %v6185_v7 = vpop.f32.mrf.mxu1 }
 0x54d   : > { %5748 = vst [vmem:[%s11796_s12 + $0x18] sm:$0xff] %v5700_v45  ;;  %v5699_v31 = vadd.f32 %v6527_v50, %v5469_v10  ;;  %v5388_v0 = vpop.f32.mrf.mxu0  ;;  %v5484_v30 = vadd.f32 %v6185_v7, %v11668_v57 }
 0x54e   : > { %v11809_v63 = vadd.f32 %v5388_v0, %v5084_v33  ;;  %v5478_v28 = vpop.f32.mrf.mxu1  ;;  %v6530_v33 = vld [vmem:[%s6936_s10 + $0x58] sm:$0xff] }
 0x54f   : > { %5747 = vst [vmem:[%s11796_s12 + $0x10] sm:$0xff] %v5699_v31  ;;  %v5702_v48 = vadd.f32 %v6528_v24, %v5484_v30  ;;  %v5479_v53 = vadd.f32 %v5478_v28, %v13302_v21  ;;  %v5390_v32 = vpop.f32.mrf.mxu0 }
 0x550   : > { %v6188_v38 = vpop.f32.mrf.mxu1 }
 0x551   : > { %5750 = vst [vmem:[%s11796_s12 + $0x28] sm:$0xff] %v5702_v48  ;;  %v5701_v8 = vadd.f32 %v6529_v62, %v5479_v53  ;;  %v5494_v9 = vadd.f32 %v6188_v38, %v11674_v43  ;;  %v6532_v43 = vld [vmem:[%s6936_s10 + $0x68] sm:$0xff] }
 0x552   : > { %v5488_v57 = vpop.f32.mrf.mxu1 }
 0x553   : > { %5749 = vst [vmem:[%s11796_s12 + $0x20] sm:$0xff] %v5701_v8  ;;  %v5704_v27 = vadd.f32 %v6530_v33, %v5494_v9  ;;  %v5489_v45 = vadd.f32 %v5488_v57, %v11671_v1  ;;  %v6533_v1 = vld [vmem:[%s6936_s10 + $0x60] sm:$0xff] }
 0x554   : > { %v6191_v20 = vpop.f32.mrf.mxu1 }
 0x555   : > { %5752 = vst [vmem:[%s11796_s12 + $0x38] sm:$0xff] %v5704_v27  ;;  %v5703_v10 = vadd.f32 %v6531_v4, %v5489_v45  ;;  %v5504_v7 = vadd.f32 %v6191_v20, %v11680_v3  ;;  %v6534_v3 = vld [vmem:[%s6936_s10 + $0x78] sm:$0xff] }
 0x556   : > { %v5498_v50 = vpop.f32.mrf.mxu1 }
 0x557   : > { %5751 = vst [vmem:[%s11796_s12 + $0x30] sm:$0xff] %v5703_v10  ;;  %v5706_v31 = vadd.f32 %v6532_v43, %v5504_v7  ;;  %v5499_v0 = vadd.f32 %v5498_v50, %v11677_v35  ;;  %v6535_v35 = vld [vmem:[%s6936_s10 + $0x70] sm:$0xff] }
 0x558   : > { %v6194_v30 = vpop.f32.mrf.mxu1 }
 0x559   : > { %5754 = vst [vmem:[%s11796_s12 + $0x48] sm:$0xff] %v5706_v31  ;;  %v5705_v28 = vadd.f32 %v6533_v1, %v5499_v0  ;;  %v5514_v24 = vadd.f32 %v6194_v30, %v11686_v46  ;;  %v6536_v46 = vld [vmem:[%s6936_s10 + $0x88] sm:$0xff] }
 0x55a   : > { %v5508_v48 = vpop.f32.mrf.mxu1 }
 0x55b   : > { %5753 = vst [vmem:[%s11796_s12 + $0x40] sm:$0xff] %v5705_v28  ;;  %v5708_v21 = vadd.f32 %v6534_v3, %v5514_v24  ;;  %v5509_v53 = vadd.f32 %v5508_v48, %v11683_v47  ;;  %v6537_v47 = vld [vmem:[%s6936_s10 + $0x80] sm:$0xff] }
 0x55c   : > { %v6197_v32 = vpop.f32.mrf.mxu1 }
 0x55d   : > { %5756 = vst [vmem:[%s11796_s12 + $0x58] sm:$0xff] %v5708_v21  ;;  %v5707_v38 = vadd.f32 %v6535_v35, %v5509_v53  ;;  %v5524_v62 = vadd.f32 %v6197_v32, %v11692_v37  ;;  %v6538_v37 = vld [vmem:[%s6936_s10 + $0x98] sm:$0xff] }
 0x55e   : > { %v5518_v8 = vpop.f32.mrf.mxu1 }
 0x55f   : > { %5755 = vst [vmem:[%s11796_s12 + $0x50] sm:$0xff] %v5707_v38  ;;  %v5710_v9 = vadd.f32 %v6536_v46, %v5524_v62  ;;  %v5519_v57 = vadd.f32 %v5518_v8, %v11689_v14  ;;  %v6539_v14 = vld [vmem:[%s6936_s10 + $0x90] sm:$0xff] }
 0x560   : > { %v6200_v33 = vpop.f32.mrf.mxu1 }
 0x561   : > { %5758 = vst [vmem:[%s11796_s12 + $0x68] sm:$0xff] %v5710_v9  ;;  %v5709_v27 = vadd.f32 %v6537_v47, %v5519_v57  ;;  %v5534_v45 = vadd.f32 %v6200_v33, %v11698_v41  ;;  %v6540_v41 = vld [vmem:[%s6936_s10 + $0xa8] sm:$0xff] }
 0x562   : > { %v5528_v20 = vpop.f32.mrf.mxu1 }
 0x563   : > { %5757 = vst [vmem:[%s11796_s12 + $0x60] sm:$0xff] %v5709_v27  ;;  %v5712_v4 = vadd.f32 %v6538_v37, %v5534_v45  ;;  %v5529_v10 = vadd.f32 %v5528_v20, %v11695_v23  ;;  %v6541_v23 = vld [vmem:[%s6936_s10 + $0xa0] sm:$0xff] }
 0x564   : > { %v6203_v7 = vpop.f32.mrf.mxu1 }
 0x565   : > { %5760 = vst [vmem:[%s11796_s12 + $0x78] sm:$0xff] %v5712_v4  ;;  %v5711_v50 = vadd.f32 %v6539_v14, %v5529_v10  ;;  %v5544_v43 = vadd.f32 %v6203_v7, %v11705_v19  ;;  %v6542_v19 = vld [vmem:[%s6936_s10 + $0xb8] sm:$0xff] }
 0x566   : > { %v5538_v31 = vpop.f32.mrf.mxu1 }
 0x567   : > { %5759 = vst [vmem:[%s11796_s12 + $0x70] sm:$0xff] %v5711_v50  ;;  %v5714_v0 = vadd.f32 %v6540_v41, %v5544_v43  ;;  %v5539_v30 = vadd.f32 %v5538_v31, %v11701_v61  ;;  %v6543_v61 = vld [vmem:[%s6936_s10 + $0xb0] sm:$0xff] }
 0x568   : > { %v6206_v1 = vpop.f32.mrf.mxu1 }
 0x569   : > { %5762 = vst [vmem:[%s11796_s12 + $0x88] sm:$0xff] %v5714_v0  ;;  %v5713_v28 = vadd.f32 %v6541_v23, %v5539_v30  ;;  %v5554_v24 = vadd.f32 %v6206_v1, %v11713_v25  ;;  %v6544_v25 = vld [vmem:[%s6936_s10 + $0xc8] sm:$0xff] }
 0x56a   : > { %v5548_v48 = vpop.f32.mrf.mxu1 }
 0x56b   : > { %5761 = vst [vmem:[%s11796_s12 + $0x80] sm:$0xff] %v5713_v28  ;;  %v5716_v3 = vadd.f32 %v6542_v19, %v5554_v24  ;;  %v5549_v21 = vadd.f32 %v5548_v48, %v11710_v51  ;;  %v6545_v51 = vld [vmem:[%s6936_s10 + $0xc0] sm:$0xff] }
 0x56c   : > { %v6209_v53 = vpop.f32.mrf.mxu1 }
 0x56d   : > { %5764 = vst [vmem:[%s11796_s12 + $0x98] sm:$0xff] %v5716_v3  ;;  %v5715_v32 = vadd.f32 %v6543_v61, %v5549_v21  ;;  %v5564_v35 = vadd.f32 %v6209_v53, %v11719_v22  ;;  %v6546_v22 = vld [vmem:[%s6936_s10 + $0xd8] sm:$0xff] }
 0x56e   : > { %v5558_v38 = vpop.f32.mrf.mxu1 }
 0x56f   : > { %5763 = vst [vmem:[%s11796_s12 + $0x90] sm:$0xff] %v5715_v32  ;;  %v5718_v62 = vadd.f32 %v6544_v25, %v5564_v35  ;;  %v5559_v8 = vadd.f32 %v5558_v38, %v11716_v39  ;;  %v6547_v39 = vld [vmem:[%s6936_s10 + $0xd0] sm:$0xff] }
 0x570   : > { %v6212_v46 = vpop.f32.mrf.mxu1 }
 0x571   : > { %5766 = vst [vmem:[%s11796_s12 + $0xa8] sm:$0xff] %v5718_v62  ;;  %v5717_v9 = vadd.f32 %v6545_v51, %v5559_v8  ;;  %v5574_v57 = vadd.f32 %v6212_v46, %v11725_v59  ;;  %v6548_v59 = vld [vmem:[%s6936_s10 + $0xe8] sm:$0xff] }
 0x572   : > { %v5568_v33 = vpop.f32.mrf.mxu1 }
 0x573   : > { %5765 = vst [vmem:[%s11796_s12 + $0xa0] sm:$0xff] %v5717_v9  ;;  %v5720_v47 = vadd.f32 %v6546_v22, %v5574_v57  ;;  %v5569_v27 = vadd.f32 %v5568_v33, %v11722_v26  ;;  %v6549_v26 = vld [vmem:[%s6936_s10 + $0xe0] sm:$0xff] }
 0x574   : > { %v6215_v45 = vpop.f32.mrf.mxu1 }
 0x575   : > { %5768 = vst [vmem:[%s11796_s12 + $0xb8] sm:$0xff] %v5720_v47  ;;  %v5719_v20 = vadd.f32 %v6547_v39, %v5569_v27  ;;  %v5584_v37 = vadd.f32 %v6215_v45, %v11731_v54  ;;  %v6550_v54 = vld [vmem:[%s6936_s10 + $0xf8] sm:$0xff] }
 0x576   : > { %v5578_v4 = vpop.f32.mrf.mxu1 }
 0x577   : > { %5767 = vst [vmem:[%s11796_s12 + $0xb0] sm:$0xff] %v5719_v20  ;;  %v5722_v10 = vadd.f32 %v6548_v59, %v5584_v37  ;;  %v5579_v7 = vadd.f32 %v5578_v4, %v11728_v52  ;;  %v6551_v52 = vld [vmem:[%s6936_s10 + $0xf0] sm:$0xff] }
 0x578   : > { %v6218_v14 = vpop.f32.mrf.mxu1 }
 0x579   : > { %5770 = vst [vmem:[%s11796_s12 + $0xc8] sm:$0xff] %v5722_v10  ;;  %v5721_v50 = vadd.f32 %v6549_v26, %v5579_v7  ;;  %v5594_v43 = vadd.f32 %v6218_v14, %v11737_v42  ;;  %v6552_v42 = vld [vmem:[%s6936_s10 + $0x108] sm:$0xff] }
 0x57a   : > { %v5588_v31 = vpop.f32.mrf.mxu1 }
 0x57b   : > { %5769 = vst [vmem:[%s11796_s12 + $0xc0] sm:$0xff] %v5721_v50  ;;  %v5724_v41 = vadd.f32 %v6550_v54, %v5594_v43  ;;  %v5589_v0 = vadd.f32 %v5588_v31, %v11734_v6  ;;  %v6553_v6 = vld [vmem:[%s6936_s10 + $0x100] sm:$0xff] }
 0x57c   : > { %v6221_v30 = vpop.f32.mrf.mxu1 }
 0x57d   : > { %5772 = vst [vmem:[%s11796_s12 + $0xd8] sm:$0xff] %v5724_v41  ;;  %v5723_v1 = vadd.f32 %v6551_v52, %v5589_v0  ;;  %v5604_v23 = vadd.f32 %v6221_v30, %v11743_v44  ;;  %v6554_v44 = vld [vmem:[%s6936_s10 + $0x118] sm:$0xff] }
 0x57e   : > { %v5598_v28 = vpop.f32.mrf.mxu1 }
 0x57f   : > { %5771 = vst [vmem:[%s11796_s12 + $0xd0] sm:$0xff] %v5723_v1  ;;  %v5726_v24 = vadd.f32 %v6552_v42, %v5604_v23  ;;  %v5599_v48 = vadd.f32 %v5598_v28, %v11740_v17  ;;  %v6555_v17 = vld [vmem:[%s6936_s10 + $0x110] sm:$0xff] }
 0x580   : > { %v6224_v19 = vpop.f32.mrf.mxu1 }
 0x581   : > { %5774 = vst [vmem:[%s11796_s12 + $0xe8] sm:$0xff] %v5726_v24  ;;  %v5725_v3 = vadd.f32 %v6553_v6, %v5599_v48  ;;  %v5614_v21 = vadd.f32 %v6224_v19, %v11749_v60  ;;  %v6556_v60 = vld [vmem:[%s6936_s10 + $0x128] sm:$0xff] }
 0x582   : > { %v5608_v53 = vpop.f32.mrf.mxu1 }
 0x583   : > { %5773 = vst [vmem:[%s11796_s12 + $0xe0] sm:$0xff] %v5725_v3  ;;  %v5728_v61 = vadd.f32 %v6554_v44, %v5614_v21  ;;  %v5609_v32 = vadd.f32 %v5608_v53, %v11746_v5  ;;  %v6557_v5 = vld [vmem:[%s6936_s10 + $0x120] sm:$0xff] }
 0x584   : > { %v6227_v35 = vpop.f32.mrf.mxu1 }
 0x585   : > { %5776 = vst [vmem:[%s11796_s12 + $0xf8] sm:$0xff] %v5728_v61  ;;  %v5727_v38 = vadd.f32 %v6555_v17, %v5609_v32  ;;  %v5624_v25 = vadd.f32 %v6227_v35, %v11755_v2  ;;  %v6558_v2 = vld [vmem:[%s6936_s10 + $0x138] sm:$0xff] }
 0x586   : > { %v5618_v62 = vpop.f32.mrf.mxu1  ;;  %v6570_v35 = vld [vmem:[%s6936_s10 + $0x198] sm:$0xff] }
 0x587   : > { %5775 = vst [vmem:[%s11796_s12 + $0xf0] sm:$0xff] %v5727_v38  ;;  %v5730_v8 = vadd.f32 %v6556_v60, %v5624_v25  ;;  %v5619_v46 = vadd.f32 %v5618_v62, %v11752_v12  ;;  %v6559_v12 = vld [vmem:[%s6936_s10 + $0x130] sm:$0xff] }
 0x588   : > { %v6230_v51 = vpop.f32.mrf.mxu1 }
 0x589   : > { %5778 = vst [vmem:[%s11796_s12 + $0x108] sm:$0xff] %v5730_v8  ;;  %v5729_v9 = vadd.f32 %v6557_v5, %v5619_v46  ;;  %v5634_v57 = vadd.f32 %v6230_v51, %v11761_v29  ;;  %v6560_v29 = vld [vmem:[%s6936_s10 + $0x148] sm:$0xff] }
 0x58a   : > { %v5628_v33 = vpop.f32.mrf.mxu1 }
 0x58b   : > { %5777 = vst [vmem:[%s11796_s12 + $0x100] sm:$0xff] %v5729_v9  ;;  %v5732_v22 = vadd.f32 %v6558_v2, %v5634_v57  ;;  %v5629_v47 = vadd.f32 %v5628_v33, %v11758_v13  ;;  %v6561_v13 = vld [vmem:[%s6936_s10 + $0x140] sm:$0xff] }
 0x58c   : > { %v6233_v27 = vpop.f32.mrf.mxu1 }
 0x58d   : > { %5780 = vst [vmem:[%s11796_s12 + $0x118] sm:$0xff] %v5732_v22  ;;  %v5731_v45 = vadd.f32 %v6559_v12, %v5629_v47  ;;  %v5644_v39 = vadd.f32 %v6233_v27, %v11767_v40  ;;  %v6562_v40 = vld [vmem:[%s6936_s10 + $0x158] sm:$0xff] }
 0x58e   : > { %v5638_v20 = vpop.f32.mrf.mxu1 }
 0x58f   : > { %5779 = vst [vmem:[%s11796_s12 + $0x110] sm:$0xff] %v5731_v45  ;;  %v5734_v37 = vadd.f32 %v6560_v29, %v5644_v39  ;;  %v5639_v4 = vadd.f32 %v5638_v20, %v11764_v55  ;;  %v6563_v55 = vld [vmem:[%s6936_s10 + $0x150] sm:$0xff] }
 0x590   : > { %v6236_v59 = vpop.f32.mrf.mxu1 }
 0x591   : > { %5782 = vst [vmem:[%s11796_s12 + $0x128] sm:$0xff] %v5734_v37  ;;  %v5733_v10 = vadd.f32 %v6561_v13, %v5639_v4  ;;  %v5654_v7 = vadd.f32 %v6236_v59, %v11773_v16  ;;  %v6564_v16 = vld [vmem:[%s6936_s10 + $0x168] sm:$0xff] }
 0x592   : > { %v5648_v14 = vpop.f32.mrf.mxu1 }
 0x593   : > { %5781 = vst [vmem:[%s11796_s12 + $0x120] sm:$0xff] %v5733_v10  ;;  %v5736_v26 = vadd.f32 %v6562_v40, %v5654_v7  ;;  %v5649_v50 = vadd.f32 %v5648_v14, %v11770_v15  ;;  %v6565_v15 = vld [vmem:[%s6936_s10 + $0x160] sm:$0xff] }
 0x594   : > { %v6239_v43 = vpop.f32.mrf.mxu1 }
 0x595   : > { %5784 = vst [vmem:[%s11796_s12 + $0x138] sm:$0xff] %v5736_v26  ;;  %v5735_v31 = vadd.f32 %v6563_v55, %v5649_v50  ;;  %v5664_v54 = vadd.f32 %v6239_v43, %v11779_v34  ;;  %v6566_v34 = vld [vmem:[%s6936_s10 + $0x178] sm:$0xff] }
 0x596   : > { %v5658_v41 = vpop.f32.mrf.mxu1 }
 0x597   : > { %5783 = vst [vmem:[%s11796_s12 + $0x130] sm:$0xff] %v5735_v31  ;;  %v5738_v0 = vadd.f32 %v6564_v16, %v5664_v54  ;;  %v5659_v30 = vadd.f32 %v5658_v41, %v11776_v56  ;;  %v6567_v56 = vld [vmem:[%s6936_s10 + $0x170] sm:$0xff] }
 0x598   : > { %v6242_v52 = vpop.f32.mrf.mxu1 }
 0x599   : > { %5786 = vst [vmem:[%s11796_s12 + $0x148] sm:$0xff] %v5738_v0  ;;  %v5737_v1 = vadd.f32 %v6565_v15, %v5659_v30  ;;  %v5674_v23 = vadd.f32 %v6242_v52, %v11785_v11  ;;  %v6568_v11 = vld [vmem:[%s6936_s10 + $0x188] sm:$0xff] }
 0x59a   : > { %v5668_v28 = vpop.f32.mrf.mxu1 }
 0x59b   : > { %5785 = vst [vmem:[%s11796_s12 + $0x140] sm:$0xff] %v5737_v1  ;;  %v5740_v42 = vadd.f32 %v6566_v34, %v5674_v23  ;;  %v5669_v24 = vadd.f32 %v5668_v28, %v11782_v49  ;;  %v6569_v49 = vld [vmem:[%s6936_s10 + $0x180] sm:$0xff] }
 0x59c   : > { %v6245_v48 = vpop.f32.mrf.mxu1 }
 0x59d   : > { %5788 = vst [vmem:[%s11796_s12 + $0x158] sm:$0xff] %v5740_v42  ;;  %v5739_v19 = vadd.f32 %v6567_v56, %v5669_v24  ;;  %v5684_v6 = vadd.f32 %v6245_v48, %v11792_v18 }
 0x59e   : > { %v5678_v3 = vpop.f32.mrf.mxu1 }
 0x59f   : > { %5787 = vst [vmem:[%s11796_s12 + $0x150] sm:$0xff] %v5739_v19  ;;  %v5742_v21 = vadd.f32 %v6568_v11, %v5684_v6  ;;  %v5679_v53 = vadd.f32 %v5678_v3, %v11788_v36  ;;  %v6571_v36 = vld [vmem:[%s6936_s10 + $0x190] sm:$0xff] }
 0x5a0   : > { %v6248_v44 = vpop.f32.mrf.mxu1 }
 0x5a1   : > { %5790 = vst [vmem:[%s11796_s12 + $0x168] sm:$0xff] %v5742_v21  ;;  %v5741_v61 = vadd.f32 %v6569_v49, %v5679_v53  ;;  %v5694_v32 = vadd.f32 %v6248_v44, %v11809_v63 }
 0x5a2   : > { %v5688_v18 = vpop.f32.mrf.mxu1 }
 0x5a3   : > { %5789 = vst [vmem:[%s11796_s12 + $0x160] sm:$0xff] %v5741_v61  ;;  %v5744_v17 = vadd.f32 %v6570_v35, %v5694_v32  ;;  %v5689_v38 = vadd.f32 %v5688_v18, %v11801_v58 }
 0x5a5   : > { %5792 = vst [vmem:[%s11796_s12 + $0x178] sm:$0xff] %v5744_v17  ;;  %v5743_v63 = vadd.f32 %v6571_v36, %v5689_v38 }
 0x5a7   : > { %5791 = vst [vmem:[%s11796_s12 + $0x170] sm:$0xff] %v5743_v63 }
 0x5a8   : > { %6700 = shalt.err (!%p6697_p3)
}
 0x5a9   : > { %s6701_s10 = scalar_lea.hbm %s11945_s24, 6144  ;;  %s6705_s28 = scalar_lea.hbm %s11998_s5, 12288 }
 0x5aa   : > { %p6702_p2 = scmp.ne.s32.totalorder %s11945_s24, %s6701_s10  ;;  %p6706_p4 = scmp.lt.s32.totalorder %s11945_s24, %s11998_s5 }
 0x5ab   : > { %p6707_p6 = scmp.lt.s32.totalorder %s6705_s28, %s6701_s10 }
 0x5ac   : > { %p6703_p9 = pnand %p6702_p2, %p13303_p11 }
 0x5ad   : > { %p6708_p8 = por %p6707_p6, %p6706_p4 }
 0x5ae   : > { %p6704_p1 = pneg %p6703_p9 }
 0x5b0   : > { %p6709_p5 = pnand %p6708_p8, %p6704_p1 }
 0x5b2   : > { %6712 = shalt.err (!%p6709_p5)
}
 0x5b3   : > { %s6764_s17 = smov 128   ;;  %s6765_s7 = smov 8  }
 0x5b4   : > { %6360 = dma.vmem_to_hbm [thread:$0]  (%p13303_p11), %s11947_s8, 6144, %s11945_s24, %s5794_s22, %s6764_s17, %s6764_s17, %s6765_s7  }
 0x5b5 PF: > { %s5822_s30 = sand.u32 1, %s6743_s18   ;;  %p13304_p7 = scmp.ne.s32.totalorder %s12331_s25, 0 }
 0x5b6   : > { %p13305_p12 = scmp.ge.s32.totalorder %s6755_s21, 2  ;;  %s5823_s26 = scalar_lea.sflag [#allocation5], %s5822_s30 }
 0x5b8   : > { %p6374_p13 = pnand %p13305_p12, %p13304_p7 }
 0x5ba   : > { %p6375_p0 = pneg %p6374_p13 }
 0x5bc   : > { %6738 = dma.done.wait (%p6375_p0), %s5823_s26, 6144  }
 0x5bd   : > { %6740 = vsyncadd (%p6375_p0), %s5823_s26, 4294961152  ;;  %p19_p10 = scmp.ge.s32.totalorder %s6874_s15, 4   ;;  %s13306_s18 = smov %s6747_s19 }
 0x5be   : > { %s13307_s19 = smov %s6751_s20  ;;  %s13308_s20 = smov %s6890_s27 }
 0x5bf   : > { %s13309_s21 = smov %s6874_s15  ;;  %21 = sbr.rel (!%p19_p10) target bundleno = 6 (0x6), region = 93 }
 0x5c4   :  { %5828 = vsyncpa [#allocation4], 1 }
 0x5c5   :  { %5830 = vsyncpa [#allocation4 + $0x1], 1 }
 0x5c6   :  { %5831 = vsyncpa [#allocation7], 1 }
 0x5c7   :  { %5832 = vsyncpa [#allocation5], 1 }
 0x5c8   :  { %5834 = vsyncpa [#allocation5 + $0x1], 1 }

</bundles_post_ra>
